<compile_context>
chip_gen: v7x
topology: tpu7x:2x2x1
jax: 0.10.0
libtpu: 0.0.40
codegen_flags: <defaults>
</compile_context>

<pallas_src>
import math

import jax
import jax.numpy as jnp
from jax.experimental import pallas as pl
from jax.experimental.pallas import tpu as pltpu

IMAGE_SIZE = (1, 28, 28)
IMG_FLAT = 1 * 28 * 28          # 784
LABEL_EMB_DIM = 32
NUM_CLASSES = 10
LAYER_DIMS = [IMG_FLAT + LABEL_EMB_DIM, 512, 256, 128, 64, 32, 1]

_MAX_BATCH_TILE = 1024          # rows per grid step (multiple of 256)


def _round_up(x, m):
    return (x + m - 1) // m * m


def _choose_batch_tile(B):
    """Pick (batch_tile, padded_batch).

    * tile rows are a multiple of 128 (v5e MXU M) / 256 (v6e, v7x MXU M)
    * once the batch is big enough, guarantee >= 2 grid steps so the
      "parallel" grid axis can be split across v7x's two TensorCores.
    """
    if B <= 256:
        tb = _round_up(max(B, 1), 128)       # tiny batch: one full-MXU tile
        return tb, tb
    n_steps = max(2, -(-B // _MAX_BATCH_TILE))
    tb = _round_up(-(-B // n_steps), 256)
    return tb, _round_up(B, tb)


def _gelu_exact(x):
    # nn.GELU() default: exact erf-based GELU (computed in f32).
    return 0.5 * x * (1.0 + jax.lax.erf(x * (1.0 / math.sqrt(2.0))))


def _mlp_kernel(img_ref, lbl_ref,
                w1i, ew1, b1, w2, b2, w3, b3, w4, b4, w5, b5, w6, b6,
                o_ref):
    """One batch tile of the fused 6-layer MLP (bf16 MXU ops, f32 accum)."""
    tb = img_ref.shape[0]

    # Layer 1, split-K: the [tb, 816] concat never exists.  The f32->bf16
    # cast of the image happens here (VPU), not in a separate XLA pass.
    img = img_ref[...].astype(jnp.bfloat16)                       # (tb, 784)
    acc = jnp.dot(img, w1i[...], preferred_element_type=jnp.float32)

    # Embedding gather fused as one-hot @ (E @ W1_emb), table resident in VMEM.
    onehot = (lbl_ref[...] ==
              jax.lax.broadcasted_iota(jnp.int32, (tb, NUM_CLASSES), 1)
              ).astype(jnp.bfloat16)                              # (tb, 10)
    acc += jnp.dot(onehot, ew1[...], preferred_element_type=jnp.float32)

    h = _gelu_exact(acc + b1[...]).astype(jnp.bfloat16)

    h = _gelu_exact(jnp.dot(h, w2[...], preferred_element_type=jnp.float32)
                    + b2[...]).astype(jnp.bfloat16)
    h = _gelu_exact(jnp.dot(h, w3[...], preferred_element_type=jnp.float32)
                    + b3[...]).astype(jnp.bfloat16)
    h = _gelu_exact(jnp.dot(h, w4[...], preferred_element_type=jnp.float32)
                    + b4[...]).astype(jnp.bfloat16)
    h5 = _gelu_exact(jnp.dot(h, w5[...], preferred_element_type=jnp.float32)
                     + b5[...])                                   # (tb, 32) f32

    # Final 32->1 layer done lane-dense: transpose (XLU), multiply by the f32
    # weight column (VPU) and reduce over sublanes (XLU) -> a (1, tb) row, so
    # the store / writeback DMA is dense instead of a 1-lane-wide column.
    logits = jnp.sum(h5.T * w6[...], axis=0, keepdims=True) + b6[...]  # (1, tb)
    o_ref[...] = jax.nn.sigmoid(logits).astype(o_ref.dtype)


def init_params(key):
    """Deterministic parameter init (PyTorch-like uniform fan-in scaling)."""
    params = {}
    key, ek = jax.random.split(key)
    # nn.Embedding default init: N(0, 1).
    params["embedding"] = jax.random.normal(ek, (NUM_CLASSES, LABEL_EMB_DIM),
                                            jnp.float32)
    ws, bs = [], []
    for i in range(len(LAYER_DIMS) - 1):
        fan_in, fan_out = LAYER_DIMS[i], LAYER_DIMS[i + 1]
        key, wk, bk = jax.random.split(key, 3)
        bound = 1.0 / math.sqrt(fan_in)
        # Stored already transposed (in, out) so the kernel does x @ W.
        # Weights in bf16 (MXU-native); biases stay f32 (negligible size).
        ws.append(jax.random.uniform(wk, (fan_in, fan_out), jnp.float32,
                                     -bound, bound).astype(jnp.bfloat16))
        bs.append(jax.random.uniform(bk, (1, fan_out), jnp.float32,
                                     -bound, bound))
    params["weights"] = ws
    params["biases"] = bs
    return params


@jax.jit
def discriminator_forward(params, image, labels):
    B = image.shape[0]
    tb, b_pad = _choose_batch_tile(B)
    grid = b_pad // tb

    # Glue (outside the kernel): flatten NCHW row-major like torch.reshape.
    # No dtype cast here -- the kernel reads f32 directly (half the HBM
    # traffic vs. writing a bf16 copy first).  Padding only copies when the
    # batch is not tile-aligned; padded rows are sliced off at the end.
    img_flat = image.reshape(B, -1)                              # [B, 784] f32
    lbl = labels.astype(jnp.int32).reshape(B, 1)                 # [B, 1] i32
    if b_pad != B:
        img_flat = jnp.pad(img_flat, ((0, b_pad - B), (0, 0)))
        lbl = jnp.pad(lbl, ((0, b_pad - B), (0, 0)))

    # Split layer-1 weight; fold the embedding table into its slice so the
    # kernel's one-hot matmul covers both the gather and the emb @ W1 part.
    w1 = params["weights"][0]
    w1_img = w1[:IMG_FLAT]                                       # (784, 512) bf16
    emb_w1 = (params["embedding"]
              @ w1[IMG_FLAT:].astype(jnp.float32)).astype(jnp.bfloat16)  # (10, 512)

    weight_args = [w1_img, emb_w1, params["biases"][0]]
    for w, b in zip(params["weights"][1:5], params["biases"][1:5]):
        weight_args += [w, b]
    # Last layer (32 -> 1) is done as a broadcast-multiply + sublane reduce,
    # so its weight column is kept in f32.
    weight_args += [params["weights"][5].astype(jnp.float32), params["biases"][5]]

    def resident_spec(arr):
        # Full-array block, constant index map -> stays resident in VMEM
        # across grid steps.  (Small enough that default double-buffering is
        # irrelevant; pl.Buffered(1) would only shave ~1 MiB.)
        return pl.BlockSpec(arr.shape, lambda i: (0, 0))

    out = pl.pallas_call(
        _mlp_kernel,
        # Lane-dense output: one (1, tb) row of probabilities per grid step.
        out_shape=jax.ShapeDtypeStruct((1, b_pad), jnp.float32),
        grid=(grid,),
        in_specs=[pl.BlockSpec((tb, IMG_FLAT), lambda i: (i, 0)),   # image f32
                  pl.BlockSpec((tb, 1), lambda i: (i, 0))]          # labels i32
                 + [resident_spec(a) for a in weight_args],
        out_specs=pl.BlockSpec((1, tb), lambda i: (0, i)),
        compiler_params=pltpu.CompilerParams(
            dimension_semantics=("parallel",),    # megacore sharding on v7x
            vmem_limit_bytes=40 << 20,            # ~20 MiB used at tb=1024; fits v7x's 64 MiB
        ),
    )(img_flat, lbl, *weight_args)

    # (1, b_pad) row-major == batch order; back to the module's [B, 1] shape.
    return out.reshape(b_pad, 1)[:B]


def _reference_forward(params, image, labels):
    """Pure-JAX reference (same bf16 weights, f32 math) for correctness."""
    B = image.shape[0]
    img_flat = image.reshape(B, -1).astype(jnp.float32)
    label_emb = params["embedding"][labels].astype(jnp.float32)
    h = jnp.concatenate([img_flat, label_emb], axis=-1)
    n = len(params["weights"])
    for i, (w, b) in enumerate(zip(params["weights"], params["biases"])):
        h = h @ w.astype(jnp.float32) + b
        if i < n - 1:
            h = _gelu_exact(h)
    return jax.nn.sigmoid(h)


if __name__ == "__main__":
    key = jax.random.PRNGKey(0)
    pkey, ikey, lkey = jax.random.split(key, 3)

    params = init_params(pkey)

    # B=300 exercises batch padding (-> 512) and a 2-step grid (megacore path).
    B = 300
    image = jax.random.normal(ikey, (B,) + IMAGE_SIZE, jnp.float32)
    labels = jax.random.randint(lkey, (B,), 0, NUM_CLASSES, jnp.int32)

    out = jax.block_until_ready(discriminator_forward(params, image, labels))
    ref = _reference_forward(params, image, labels)

    assert out.shape == (B, 1), out.shape
    # bf16 image/activations/weights on the kernel path -> relaxed tolerance.
    assert jnp.allclose(out, ref, atol=2e-2, rtol=2e-2), (out, ref)

    print("KERNEL_OK")
</pallas_src>

<mosaic_0001>
module attributes {stable_mosaic.version = 11 : i64} {
  func.func @_mlp_kernel(%arg0: i32, %arg1: memref<256x784xf32, #tpu.memory_space<vmem>>, %arg2: memref<256x1xi32, #tpu.memory_space<vmem>>, %arg3: memref<784x512xbf16, #tpu.memory_space<vmem>>, %arg4: memref<10x512xbf16, #tpu.memory_space<vmem>>, %arg5: memref<1x512xf32, #tpu.memory_space<vmem>>, %arg6: memref<512x256xbf16, #tpu.memory_space<vmem>>, %arg7: memref<1x256xf32, #tpu.memory_space<vmem>>, %arg8: memref<256x128xbf16, #tpu.memory_space<vmem>>, %arg9: memref<1x128xf32, #tpu.memory_space<vmem>>, %arg10: memref<128x64xbf16, #tpu.memory_space<vmem>>, %arg11: memref<1x64xf32, #tpu.memory_space<vmem>>, %arg12: memref<64x32xbf16, #tpu.memory_space<vmem>>, %arg13: memref<1x32xf32, #tpu.memory_space<vmem>>, %arg14: memref<32x1xf32, #tpu.memory_space<vmem>>, %arg15: memref<1x1xf32, #tpu.memory_space<vmem>>, %arg16: memref<1x256xf32, #tpu.memory_space<vmem>>) attributes {dimension_semantics = [#tpu.dimension_semantics<parallel>], iteration_bounds = array<i64: 2>, scalar_prefetch = 0 : i64, scratch_operands = 0 : i64, tpu.core_type = #tpu.core_type<tc>, window_params = [{transform_indices = @transform_0, window_bounds = array<i64: 256, 784>}, {transform_indices = @transform_1, window_bounds = array<i64: 256, 1>}, {pipeline_mode = #tpu.pipeline_mode<synchronous>, transform_indices = @transform_2, window_bounds = array<i64: 784, 512>}, {pipeline_mode = #tpu.pipeline_mode<synchronous>, transform_indices = @transform_3, window_bounds = array<i64: 10, 512>}, {pipeline_mode = #tpu.pipeline_mode<synchronous>, transform_indices = @transform_4, window_bounds = array<i64: 1, 512>}, {pipeline_mode = #tpu.pipeline_mode<synchronous>, transform_indices = @transform_5, window_bounds = array<i64: 512, 256>}, {pipeline_mode = #tpu.pipeline_mode<synchronous>, transform_indices = @transform_6, window_bounds = array<i64: 1, 256>}, {pipeline_mode = #tpu.pipeline_mode<synchronous>, transform_indices = @transform_7, window_bounds = array<i64: 256, 128>}, {pipeline_mode = #tpu.pipeline_mode<synchronous>, transform_indices = @transform_8, window_bounds = array<i64: 1, 128>}, {pipeline_mode = #tpu.pipeline_mode<synchronous>, transform_indices = @transform_9, window_bounds = array<i64: 128, 64>}, {pipeline_mode = #tpu.pipeline_mode<synchronous>, transform_indices = @transform_10, window_bounds = array<i64: 1, 64>}, {pipeline_mode = #tpu.pipeline_mode<synchronous>, transform_indices = @transform_11, window_bounds = array<i64: 64, 32>}, {pipeline_mode = #tpu.pipeline_mode<synchronous>, transform_indices = @transform_12, window_bounds = array<i64: 1, 32>}, {pipeline_mode = #tpu.pipeline_mode<synchronous>, transform_indices = @transform_13, window_bounds = array<i64: 32, 1>}, {pipeline_mode = #tpu.pipeline_mode<synchronous>, transform_indices = @transform_14, window_bounds = array<i64: 1, 1>}, {transform_indices = @transform_15, window_bounds = array<i64: 1, 256>}]} {
    %c0 = arith.constant 0 : index
    %c0_0 = arith.constant 0 : index
    %0 = vector.load %arg1[%c0, %c0_0] : memref<256x784xf32, #tpu.memory_space<vmem>>, vector<256x784xf32>
    %1 = arith.truncf %0 : vector<256x784xf32> to vector<256x784xbf16>
    %c0_1 = arith.constant 0 : index
    %c0_2 = arith.constant 0 : index
    %2 = vector.load %arg3[%c0_1, %c0_2] : memref<784x512xbf16, #tpu.memory_space<vmem>>, vector<784x512xbf16>
    %cst = arith.constant dense<0.000000e+00> : vector<256x512xf32>
    %3 = tpu.matmul %1, %2, %cst {dimension_numbers = #tpu.dot_dimension_numbers<[1], [0], [0], [1], [0, 0, 1, 1], [], []>} : vector<256x784xbf16>, vector<784x512xbf16>, vector<256x512xf32> -> vector<256x512xf32>
    %c0_3 = arith.constant 0 : index
    %c0_4 = arith.constant 0 : index
    %4 = vector.load %arg2[%c0_3, %c0_4] : memref<256x1xi32, #tpu.memory_space<vmem>>, vector<256x1xi32>
    %5 = tpu.iota {dimensions = array<i32: 1>} : vector<256x10xi32>
    %6 = vector.broadcast %4 : vector<256x1xi32> to vector<256x10xi32>
    %7 = arith.cmpi eq, %6, %5 : vector<256x10xi32>
    %8 = arith.extui %7 : vector<256x10xi1> to vector<256x10xi32>
    %9 = arith.sitofp %8 : vector<256x10xi32> to vector<256x10xf32>
    %10 = arith.truncf %9 : vector<256x10xf32> to vector<256x10xbf16>
    %c0_5 = arith.constant 0 : index
    %c0_6 = arith.constant 0 : index
    %11 = vector.load %arg4[%c0_5, %c0_6] : memref<10x512xbf16, #tpu.memory_space<vmem>>, vector<10x512xbf16>
    %cst_7 = arith.constant dense<0.000000e+00> : vector<256x512xf32>
    %12 = tpu.matmul %10, %11, %cst_7 {dimension_numbers = #tpu.dot_dimension_numbers<[1], [0], [0], [1], [0, 0, 1, 1], [], []>} : vector<256x10xbf16>, vector<10x512xbf16>, vector<256x512xf32> -> vector<256x512xf32>
    %13 = arith.addf %3, %12 : vector<256x512xf32>
    %c0_8 = arith.constant 0 : index
    %c0_9 = arith.constant 0 : index
    %14 = vector.load %arg5[%c0_8, %c0_9] : memref<1x512xf32, #tpu.memory_space<vmem>>, vector<1x512xf32>
    %15 = vector.broadcast %14 : vector<1x512xf32> to vector<256x512xf32>
    %16 = arith.addf %13, %15 : vector<256x512xf32>
    %cst_10 = arith.constant 5.000000e-01 : f32
    %17 = vector.broadcast %cst_10 : f32 to vector<256x512xf32>
    %18 = arith.mulf %17, %16 : vector<256x512xf32>
    %cst_11 = arith.constant 0.707106769 : f32
    %19 = vector.broadcast %cst_11 : f32 to vector<256x512xf32>
    %20 = arith.mulf %16, %19 : vector<256x512xf32>
    %21 = math.erf %20 : vector<256x512xf32>
    %cst_12 = arith.constant 1.000000e+00 : f32
    %22 = vector.broadcast %cst_12 : f32 to vector<256x512xf32>
    %23 = arith.addf %22, %21 : vector<256x512xf32>
    %24 = arith.mulf %18, %23 : vector<256x512xf32>
    %25 = arith.truncf %24 : vector<256x512xf32> to vector<256x512xbf16>
    %c0_13 = arith.constant 0 : index
    %c0_14 = arith.constant 0 : index
    %26 = vector.load %arg6[%c0_13, %c0_14] : memref<512x256xbf16, #tpu.memory_space<vmem>>, vector<512x256xbf16>
    %cst_15 = arith.constant dense<0.000000e+00> : vector<256x256xf32>
    %27 = tpu.matmul %25, %26, %cst_15 {dimension_numbers = #tpu.dot_dimension_numbers<[1], [0], [0], [1], [0, 0, 1, 1], [], []>} : vector<256x512xbf16>, vector<512x256xbf16>, vector<256x256xf32> -> vector<256x256xf32>
    %c0_16 = arith.constant 0 : index
    %c0_17 = arith.constant 0 : index
    %28 = vector.load %arg7[%c0_16, %c0_17] : memref<1x256xf32, #tpu.memory_space<vmem>>, vector<1x256xf32>
    %29 = vector.broadcast %28 : vector<1x256xf32> to vector<256x256xf32>
    %30 = arith.addf %27, %29 : vector<256x256xf32>
    %cst_18 = arith.constant 5.000000e-01 : f32
    %31 = vector.broadcast %cst_18 : f32 to vector<256x256xf32>
    %32 = arith.mulf %31, %30 : vector<256x256xf32>
    %cst_19 = arith.constant 0.707106769 : f32
    %33 = vector.broadcast %cst_19 : f32 to vector<256x256xf32>
    %34 = arith.mulf %30, %33 : vector<256x256xf32>
    %35 = math.erf %34 : vector<256x256xf32>
    %cst_20 = arith.constant 1.000000e+00 : f32
    %36 = vector.broadcast %cst_20 : f32 to vector<256x256xf32>
    %37 = arith.addf %36, %35 : vector<256x256xf32>
    %38 = arith.mulf %32, %37 : vector<256x256xf32>
    %39 = arith.truncf %38 : vector<256x256xf32> to vector<256x256xbf16>
    %c0_21 = arith.constant 0 : index
    %c0_22 = arith.constant 0 : index
    %40 = vector.load %arg8[%c0_21, %c0_22] : memref<256x128xbf16, #tpu.memory_space<vmem>>, vector<256x128xbf16>
    %cst_23 = arith.constant dense<0.000000e+00> : vector<256x128xf32>
    %41 = tpu.matmul %39, %40, %cst_23 {dimension_numbers = #tpu.dot_dimension_numbers<[1], [0], [0], [1], [0, 0, 1, 1], [], []>} : vector<256x256xbf16>, vector<256x128xbf16>, vector<256x128xf32> -> vector<256x128xf32>
    %c0_24 = arith.constant 0 : index
    %c0_25 = arith.constant 0 : index
    %42 = vector.load %arg9[%c0_24, %c0_25] : memref<1x128xf32, #tpu.memory_space<vmem>>, vector<1x128xf32>
    %43 = vector.broadcast %42 : vector<1x128xf32> to vector<256x128xf32>
    %44 = arith.addf %41, %43 : vector<256x128xf32>
    %cst_26 = arith.constant 5.000000e-01 : f32
    %45 = vector.broadcast %cst_26 : f32 to vector<256x128xf32>
    %46 = arith.mulf %45, %44 : vector<256x128xf32>
    %cst_27 = arith.constant 0.707106769 : f32
    %47 = vector.broadcast %cst_27 : f32 to vector<256x128xf32>
    %48 = arith.mulf %44, %47 : vector<256x128xf32>
    %49 = math.erf %48 : vector<256x128xf32>
    %cst_28 = arith.constant 1.000000e+00 : f32
    %50 = vector.broadcast %cst_28 : f32 to vector<256x128xf32>
    %51 = arith.addf %50, %49 : vector<256x128xf32>
    %52 = arith.mulf %46, %51 : vector<256x128xf32>
    %53 = arith.truncf %52 : vector<256x128xf32> to vector<256x128xbf16>
    %c0_29 = arith.constant 0 : index
    %c0_30 = arith.constant 0 : index
    %54 = vector.load %arg10[%c0_29, %c0_30] : memref<128x64xbf16, #tpu.memory_space<vmem>>, vector<128x64xbf16>
    %cst_31 = arith.constant dense<0.000000e+00> : vector<256x64xf32>
    %55 = tpu.matmul %53, %54, %cst_31 {dimension_numbers = #tpu.dot_dimension_numbers<[1], [0], [0], [1], [0, 0, 1, 1], [], []>} : vector<256x128xbf16>, vector<128x64xbf16>, vector<256x64xf32> -> vector<256x64xf32>
    %c0_32 = arith.constant 0 : index
    %c0_33 = arith.constant 0 : index
    %56 = vector.load %arg11[%c0_32, %c0_33] : memref<1x64xf32, #tpu.memory_space<vmem>>, vector<1x64xf32>
    %57 = vector.broadcast %56 : vector<1x64xf32> to vector<256x64xf32>
    %58 = arith.addf %55, %57 : vector<256x64xf32>
    %cst_34 = arith.constant 5.000000e-01 : f32
    %59 = vector.broadcast %cst_34 : f32 to vector<256x64xf32>
    %60 = arith.mulf %59, %58 : vector<256x64xf32>
    %cst_35 = arith.constant 0.707106769 : f32
    %61 = vector.broadcast %cst_35 : f32 to vector<256x64xf32>
    %62 = arith.mulf %58, %61 : vector<256x64xf32>
    %63 = math.erf %62 : vector<256x64xf32>
    %cst_36 = arith.constant 1.000000e+00 : f32
    %64 = vector.broadcast %cst_36 : f32 to vector<256x64xf32>
    %65 = arith.addf %64, %63 : vector<256x64xf32>
    %66 = arith.mulf %60, %65 : vector<256x64xf32>
    %67 = arith.truncf %66 : vector<256x64xf32> to vector<256x64xbf16>
    %c0_37 = arith.constant 0 : index
    %c0_38 = arith.constant 0 : index
    %68 = vector.load %arg12[%c0_37, %c0_38] : memref<64x32xbf16, #tpu.memory_space<vmem>>, vector<64x32xbf16>
    %cst_39 = arith.constant dense<0.000000e+00> : vector<256x32xf32>
    %69 = tpu.matmul %67, %68, %cst_39 {dimension_numbers = #tpu.dot_dimension_numbers<[1], [0], [0], [1], [0, 0, 1, 1], [], []>} : vector<256x64xbf16>, vector<64x32xbf16>, vector<256x32xf32> -> vector<256x32xf32>
    %c0_40 = arith.constant 0 : index
    %c0_41 = arith.constant 0 : index
    %70 = vector.load %arg13[%c0_40, %c0_41] : memref<1x32xf32, #tpu.memory_space<vmem>>, vector<1x32xf32>
    %71 = vector.broadcast %70 : vector<1x32xf32> to vector<256x32xf32>
    %72 = arith.addf %69, %71 : vector<256x32xf32>
    %cst_42 = arith.constant 5.000000e-01 : f32
    %73 = vector.broadcast %cst_42 : f32 to vector<256x32xf32>
    %74 = arith.mulf %73, %72 : vector<256x32xf32>
    %cst_43 = arith.constant 0.707106769 : f32
    %75 = vector.broadcast %cst_43 : f32 to vector<256x32xf32>
    %76 = arith.mulf %72, %75 : vector<256x32xf32>
    %77 = math.erf %76 : vector<256x32xf32>
    %cst_44 = arith.constant 1.000000e+00 : f32
    %78 = vector.broadcast %cst_44 : f32 to vector<256x32xf32>
    %79 = arith.addf %78, %77 : vector<256x32xf32>
    %80 = arith.mulf %74, %79 : vector<256x32xf32>
    %81 = tpu.transpose %80, [1, 0] : vector<256x32xf32> -> vector<32x256xf32>
    %c0_45 = arith.constant 0 : index
    %c0_46 = arith.constant 0 : index
    %82 = vector.load %arg14[%c0_45, %c0_46] : memref<32x1xf32, #tpu.memory_space<vmem>>, vector<32x1xf32>
    %83 = vector.broadcast %82 : vector<32x1xf32> to vector<32x256xf32>
    %84 = arith.mulf %81, %83 : vector<32x256xf32>
    %cst_47 = arith.constant dense<0.000000e+00> : vector<256xf32>
    %85 = vector.multi_reduction <add>, %84, %cst_47 [0] : vector<32x256xf32> to vector<256xf32>
    %86 = vector.shape_cast %85 : vector<256xf32> to vector<1x256xf32>
    %c0_48 = arith.constant 0 : index
    %c0_49 = arith.constant 0 : index
    %87 = vector.load %arg15[%c0_48, %c0_49] : memref<1x1xf32, #tpu.memory_space<vmem>>, vector<1x1xf32>
    %88 = vector.broadcast %87 : vector<1x1xf32> to vector<1x256xf32>
    %89 = arith.addf %86, %88 : vector<1x256xf32>
    %90 = arith.negf %89 : vector<1x256xf32>
    %91 = math.exp %90 : vector<1x256xf32>
    %cst_50 = arith.constant 1.000000e+00 : f32
    %92 = vector.broadcast %cst_50 : f32 to vector<1x256xf32>
    %93 = arith.addf %92, %91 : vector<1x256xf32>
    %94 = arith.divf %92, %93 : vector<1x256xf32>
    %c0_51 = arith.constant 0 : index
    %c0_52 = arith.constant 0 : index
    %95 = vector.load %arg16[%c0_51, %c0_52] : memref<1x256xf32, #tpu.memory_space<vmem>>, vector<1x256xf32>
    tpu.vector_store %arg16[%c0_51, %c0_52], %94 {strides = array<i32>} : memref<1x256xf32, #tpu.memory_space<vmem>>, vector<1x256xf32>,
    return
  }
  func.func @transform_0(%arg0: i32) -> (i32, i32) {
    %c0_i32 = arith.constant 0 : i32
    %c0_i32_0 = arith.constant 0 : i32
    return %arg0, %c0_i32 : i32, i32
  }
  func.func @transform_1(%arg0: i32) -> (i32, i32) {
    %c0_i32 = arith.constant 0 : i32
    %c0_i32_0 = arith.constant 0 : i32
    return %arg0, %c0_i32 : i32, i32
  }
  func.func @transform_2(%arg0: i32) -> (i32, i32) {
    %c0_i32 = arith.constant 0 : i32
    %c0_i32_0 = arith.constant 0 : i32
    %c0_i32_1 = arith.constant 0 : i32
    return %c0_i32, %c0_i32_0 : i32, i32
  }
  func.func @transform_3(%arg0: i32) -> (i32, i32) {
    %c0_i32 = arith.constant 0 : i32
    %c0_i32_0 = arith.constant 0 : i32
    %c0_i32_1 = arith.constant 0 : i32
    return %c0_i32, %c0_i32_0 : i32, i32
  }
  func.func @transform_4(%arg0: i32) -> (i32, i32) {
    %c0_i32 = arith.constant 0 : i32
    %c0_i32_0 = arith.constant 0 : i32
    %c0_i32_1 = arith.constant 0 : i32
    return %c0_i32, %c0_i32_0 : i32, i32
  }
  func.func @transform_5(%arg0: i32) -> (i32, i32) {
    %c0_i32 = arith.constant 0 : i32
    %c0_i32_0 = arith.constant 0 : i32
    %c0_i32_1 = arith.constant 0 : i32
    return %c0_i32, %c0_i32_0 : i32, i32
  }
  func.func @transform_6(%arg0: i32) -> (i32, i32) {
    %c0_i32 = arith.constant 0 : i32
    %c0_i32_0 = arith.constant 0 : i32
    %c0_i32_1 = arith.constant 0 : i32
    return %c0_i32, %c0_i32_0 : i32, i32
  }
  func.func @transform_7(%arg0: i32) -> (i32, i32) {
    %c0_i32 = arith.constant 0 : i32
    %c0_i32_0 = arith.constant 0 : i32
    %c0_i32_1 = arith.constant 0 : i32
    return %c0_i32, %c0_i32_0 : i32, i32
  }
  func.func @transform_8(%arg0: i32) -> (i32, i32) {
    %c0_i32 = arith.constant 0 : i32
    %c0_i32_0 = arith.constant 0 : i32
    %c0_i32_1 = arith.constant 0 : i32
    return %c0_i32, %c0_i32_0 : i32, i32
  }
  func.func @transform_9(%arg0: i32) -> (i32, i32) {
    %c0_i32 = arith.constant 0 : i32
    %c0_i32_0 = arith.constant 0 : i32
    %c0_i32_1 = arith.constant 0 : i32
    return %c0_i32, %c0_i32_0 : i32, i32
  }
  func.func @transform_10(%arg0: i32) -> (i32, i32) {
    %c0_i32 = arith.constant 0 : i32
    %c0_i32_0 = arith.constant 0 : i32
    %c0_i32_1 = arith.constant 0 : i32
    return %c0_i32, %c0_i32_0 : i32, i32
  }
  func.func @transform_11(%arg0: i32) -> (i32, i32) {
    %c0_i32 = arith.constant 0 : i32
    %c0_i32_0 = arith.constant 0 : i32
    %c0_i32_1 = arith.constant 0 : i32
    return %c0_i32, %c0_i32_0 : i32, i32
  }
  func.func @transform_12(%arg0: i32) -> (i32, i32) {
    %c0_i32 = arith.constant 0 : i32
    %c0_i32_0 = arith.constant 0 : i32
    %c0_i32_1 = arith.constant 0 : i32
    return %c0_i32, %c0_i32_0 : i32, i32
  }
  func.func @transform_13(%arg0: i32) -> (i32, i32) {
    %c0_i32 = arith.constant 0 : i32
    %c0_i32_0 = arith.constant 0 : i32
    %c0_i32_1 = arith.constant 0 : i32
    return %c0_i32, %c0_i32_0 : i32, i32
  }
  func.func @transform_14(%arg0: i32) -> (i32, i32) {
    %c0_i32 = arith.constant 0 : i32
    %c0_i32_0 = arith.constant 0 : i32
    %c0_i32_1 = arith.constant 0 : i32
    return %c0_i32, %c0_i32_0 : i32, i32
  }
  func.func @transform_15(%arg0: i32) -> (i32, i32) {
    %c0_i32 = arith.constant 0 : i32
    %c0_i32_0 = arith.constant 0 : i32
    return %c0_i32, %arg0 : i32, i32
  }
}

</mosaic_0001>

<bundles_post_ra>
// kernel: discriminator_forward.1
= control target key start
LH: loop header
LB: loop body
LE: loop exit
PB: predicated region body
PF: predicated region fallthrough
CT: control target
= control target key end

     0   :  { %s10262_s20 = smov 0   ;;  %s13395_s0 = inlined_call_operand.vmem [shape: f32[512,784], index: 0, kind: input, shape index: {}]   ;;  %s13396_s1 = inlined_call_operand.vmem [shape: s32[512,1], index: 1, kind: input, shape index: {}]   ;;  %s13397_s2 = inlined_call_operand.vmem [shape: bf16[784,512], index: 2, kind: input, shape index: {}]   ;;  %s13398_s3 = inlined_call_operand.vmem [shape: bf16[10,512], index: 3, kind: input, shape index: {}]   ;;  %s13399_s4 = inlined_call_operand.vmem [shape: f32[1,512], index: 4, kind: input, shape index: {}]   ;;  %s13400_s5 = inlined_call_operand.vmem [shape: bf16[512,256], index: 5, kind: input, shape index: {}]   ;;  %s13401_s6 = inlined_call_operand.vmem [shape: f32[1,256], index: 6, kind: input, shape index: {}]   ;;  %s13402_s7 = inlined_call_operand.vmem [shape: bf16[256,128], index: 7, kind: input, shape index: {}]   ;;  %s13403_s8 = inlined_call_operand.vmem [shape: f32[1,128], index: 8, kind: input, shape index: {}]   ;;  %s13404_s9 = inlined_call_operand.vmem [shape: bf16[128,64], index: 9, kind: input, shape index: {}]   ;;  %s13405_s10 = inlined_call_operand.vmem [shape: f32[1,64], index: 10, kind: input, shape index: {}]   ;;  %s13406_s11 = inlined_call_operand.vmem [shape: bf16[64,32], index: 11, kind: input, shape index: {}]   ;;  %s13407_s12 = inlined_call_operand.vmem [shape: f32[1,32], index: 12, kind: input, shape index: {}]   ;;  %s13408_s13 = inlined_call_operand.vmem [shape: f32[32,1], index: 13, kind: input, shape index: {}]   ;;  %s13409_s14 = inlined_call_operand.<no memory space> [shape: f32[1,1], index: 14, kind: input, shape index: {}]   ;;  %s13410_s15 = inlined_call_operand.vmem [shape: f32[1,512], index: 15, kind: output, shape index: {}]  }
   0x1   :  { %v20_v0 = vstv %s13409_s14 }
   0x2   :  { %21 = vst [vmem:[#allocation2] sm:$0x1] %v20_v0 }
   0x3 LB: > { %s7839_s21 = sadd.s32 4294967295, %s10174_s20   ;;  %p7843_p0 = scmp.ge.s32.totalorder %s10174_s20, 1  ;;  %s10174_s20 = sphi %s10262_s20, %s27_s20  }
   0x4   : > { %p452_p1 = scmp.lt.s32.totalorder %s10174_s20, 3 }
   0x6   : > { %p453_p2 = pnand %p7843_p0, %p452_p1 }
   0x8   : > { %456 = sbr.rel (%p453_p2) target bundleno = 2313 (0x909), region = 80 }
   0xf   : > { %s7844_s22 = sshll.u32 %s7839_s21, 5  ;;  %v10176_v1 = vmov 0   ;;  %vm1367_vm0 = vcmask 1044480   ;;  %v9160_v10 = vld [vmem:[%s13398_s3 + $0x4] ss:$16 sps:$4 sm:$0x1f]   ;;  %v13411_v47 = vlaneseq }
  0x10   : > { %9159 = vset.pattern.permute.xlu1 %v10176_v1  ;;  %9158 = vset.pattern.permute.xlu0 %v10176_v1  ;;  %p506_p3 = scmp.lt.s32.totalorder %s7844_s22, 63  ;;  %v9162_v11 = vld [vmem:[%s13398_s3] ss:$16 sps:$4 sm:$0x1f]   ;;  %v9168_v17 = vld [vmem:[%s13397_s2 + $0x4] ss:$16 sps:$4 sm:$0xff]  }
  0x11   : > { %1412 = vmatprep.mubr.bf16.mxu0 %v10176_v1  ;;  %1605 = vmatprep.mubr.bf16.mxu1 %v10176_v1  ;;  %v9163_v12 = vld [vmem:[%s13398_s3 + $0xc] ss:$16 sps:$4 sm:$0x1f]   ;;  %v9165_v15 = vld [vmem:[%s13398_s3 + $0x8] ss:$16 sps:$4 sm:$0x1f]  }
  0x12   : > { %s13631_s22 = smov (!%p506_p3, %s7844_s22), 63  ;;  %7885 = vmatprep.subr.msk.bf16.mxu0 %vm1367_vm0, %v9160_v10  ;;  %v1369_v16 = vsel %vm1367_vm0, %v9162_v11, 0  ;;  %7902 = vmatprep.subr.msk.bf16.mxu1 %vm1367_vm0, %v9163_v12  ;;  %v1375_v18 = vsel %vm1367_vm0, %v9165_v15, 0  ;;  %v7681_v41 = vld [vmem:[%s13408_s13 + $0x8] sm:$0xff]  ;;  %v7680_v42 = vld [vmem:[%s13408_s13] sm:$0xff]  ;;  %v7683_v43 = vld [vmem:[%s13408_s13 + $0x18] sm:$0xff] }
  0x13   : > { %s7847_s14 = sshll.u32 %s13631_s22, 3  ;;  %1381 = vmatpush1.bf16.msra.mxu0 %v1369_v16  ;;  %1574 = vmatpush1.bf16.msra.mxu1 %v1375_v18  ;;  %v7682_v44 = vld [vmem:[%s13408_s13 + $0x10] sm:$0xff]  ;;  %v7730_v45 = vld [vmem:[#allocation2] sm:$0x1]  ;;  %v9195_v46 = vld [vmem:[%s13397_s2 + $0xc] ss:$16 sps:$4 sm:$0xff]  }
  0x14   : > { %s10282_s25 = scalar_lea.vmem %s13396_s1, %s7847_s14  ;;  %2795 = vmatprep.subr.bf16.mxu0 %v9168_v17  ;;  %3567 = vmatprep.subr.bf16.mxu1 %v9195_v46  ;;  %v10351_v48 = vand.u32 127, %v13411_v47  ;;  %vm1318_vm2 = vcmask 80896   ;;  %v9166_v53 = vld [vmem:[%s13397_s2] ss:$16 sps:$4 sm:$0xff]   ;;  %v9171_v54 = vld [vmem:[%s13397_s2 + $0x24] ss:$16 sps:$4 sm:$0xff]  }
  0x15   : > { %v1058_v2 = vld [vmem:[%s10282_s25 + $0x10] sm:$0xff]  ;;  %v1056_v3 = vld [vmem:[%s10282_s25] sm:$0xff]  ;;  %v1059_v4 = vld [vmem:[%s10282_s25 + $0x18] sm:$0xff]  ;;  %v10177_v55 = vmov 0.0   ;;  %s7848_s23 = sshll.u32 %s7839_s21, 1 }
  0x16   : > { %1097 = vperm.xlu1 %9159, %v1058_v2   ;;  %1091 = vperm.xlu0 %9158, %v1056_v3   ;;  %v1057_v5 = vld [vmem:[%s10282_s25 + $0x8] sm:$0xff]  ;;  %v1060_v7 = vld [vmem:[%s10282_s25 + $0x20] sm:$0xff]  ;;  %v1063_v8 = vld [vmem:[%s10282_s25 + $0x38] sm:$0xff]  ;;  %p519_p4 = scmp.lt.s32.totalorder %s7848_s23, 3 }
  0x17   : > { %v1061_v6 = vld [vmem:[%s10282_s25 + $0x28] sm:$0xff]  ;;  %v1062_v9 = vld [vmem:[%s10282_s25 + $0x30] sm:$0xff]  ;;  %v1064_v14 = vld [vmem:[%s10282_s25 + $0x40] sm:$0xff] }
  0x18   : > { %v1065_v13 = vld [vmem:[%s10282_s25 + $0x48] sm:$0xff]  ;;  %v1067_v19 = vld [vmem:[%s10282_s25 + $0x58] sm:$0xff]  ;;  %v1066_v20 = vld [vmem:[%s10282_s25 + $0x50] sm:$0xff]  ;;  %s13633_s23 = smov (!%p519_p4, %s7848_s23), 3 }
  0x19   : > { %v1069_v21 = vld [vmem:[%s10282_s25 + $0x68] sm:$0xff]  ;;  %v1068_v22 = vld [vmem:[%s10282_s25 + $0x60] sm:$0xff]  ;;  %v1071_v23 = vld [vmem:[%s10282_s25 + $0x78] sm:$0xff]  ;;  %s521_s27 = scalar_lea.vmem %s13410_s15, %s13633_s23 }
  0x1a   : > { %1100 = vperm.xlu1 %9159, %v1059_v4   ;;  %1094 = vperm.xlu0 %9158, %v1057_v5   ;;  %v1070_v24 = vld [vmem:[%s10282_s25 + $0x70] sm:$0xff]  ;;  %v1073_v25 = vld [vmem:[%s10282_s25 + $0x88] sm:$0xff]  ;;  %v1072_v26 = vld [vmem:[%s10282_s25 + $0x80] sm:$0xff] }
  0x1b   : > { %v1075_v27 = vld [vmem:[%s10282_s25 + $0x98] sm:$0xff]  ;;  %v1074_v28 = vld [vmem:[%s10282_s25 + $0x90] sm:$0xff]  ;;  %v1077_v29 = vld [vmem:[%s10282_s25 + $0xa8] sm:$0xff] }
  0x1c   : > { %v1076_v30 = vld [vmem:[%s10282_s25 + $0xa0] sm:$0xff]  ;;  %v1079_v31 = vld [vmem:[%s10282_s25 + $0xb8] sm:$0xff]  ;;  %v1078_v32 = vld [vmem:[%s10282_s25 + $0xb0] sm:$0xff] }
  0x1d   : > { %v1081_v33 = vld [vmem:[%s10282_s25 + $0xc8] sm:$0xff]  ;;  %v1080_v34 = vld [vmem:[%s10282_s25 + $0xc0] sm:$0xff]  ;;  %v1083_v35 = vld [vmem:[%s10282_s25 + $0xd8] sm:$0xff] }
  0x1e   : > { %1106 = vperm.xlu1 %9159, %v1061_v6   ;;  %1103 = vperm.xlu0 %9158, %v1060_v7   ;;  %v1082_v36 = vld [vmem:[%s10282_s25 + $0xd0] sm:$0xff]  ;;  %v1085_v37 = vld [vmem:[%s10282_s25 + $0xe8] sm:$0xff]  ;;  %v1084_v38 = vld [vmem:[%s10282_s25 + $0xe0] sm:$0xff] }
  0x1f   : > { %v1087_v39 = vld [vmem:[%s10282_s25 + $0xf8] sm:$0xff]  ;;  %v1086_v40 = vld [vmem:[%s10282_s25 + $0xf0] sm:$0xff]  ;;  %s9146_s25 = smul.u32 56, %s13631_s22 }
  0x20   : > { %v9193_v58 = vld [vmem:[%s13397_s2 + $0x8] ss:$16 sps:$4 sm:$0xff]   ;;  %v9198_v60 = vld [vmem:[%s13397_s2 + $0x2c] ss:$16 sps:$4 sm:$0xff]   ;;  %v9169_v63 = vld [vmem:[%s13397_s2 + $0x20] ss:$16 sps:$4 sm:$0xff]  }
  0x21   : > { %v9174_v0 = vld [vmem:[%s13397_s2 + $0x44] ss:$16 sps:$4 sm:$0xff]   ;;  %v9196_v2 = vld [vmem:[%s13397_s2 + $0x28] ss:$16 sps:$4 sm:$0xff]   ;;  %v9175_v15 = vld [vmem:[%s13397_s2 + $0x60] ss:$16 sps:$4 sm:$0xff]   ;;  %s10731_s19 = scalar_lea.vmem %s13395_s0, %s9146_s25 }
  0x22   : > { %1112 = vperm.xlu1 %9159, %v1063_v8   ;;  %1109 = vperm.xlu0 %9158, %v1062_v9   ;;  %v9172_v8 = vld [vmem:[%s13397_s2 + $0x40] ss:$16 sps:$4 sm:$0xff]   ;;  %v9204_v9 = vld [vmem:[%s13397_s2 + $0x4c] ss:$16 sps:$4 sm:$0xff]   ;;  %v9177_v12 = vld [vmem:[%s13397_s2 + $0x64] ss:$16 sps:$4 sm:$0xff]  }
  0x26   : > { %1118 = vperm.xlu1 %9159, %v1065_v13   ;;  %1115 = vperm.xlu0 %9158, %v1064_v14   ;;  %v9202_v13 = vld [vmem:[%s13397_s2 + $0x48] ss:$16 sps:$4 sm:$0xff]   ;;  %v9207_v14 = vld [vmem:[%s13397_s2 + $0x6c] ss:$16 sps:$4 sm:$0xff]  }
  0x2a   : > { %1124 = vperm.xlu1 %9159, %v1067_v19   ;;  %1121 = vperm.xlu0 %9158, %v1066_v20   ;;  %v9180_v20 = vld [vmem:[%s13397_s2 + $0x84] ss:$16 sps:$4 sm:$0xff]  }
  0x2e   : > { %1130 = vperm.xlu1 %9159, %v1069_v21   ;;  %1127 = vperm.xlu0 %9158, %v1068_v22   ;;  %v9205_v21 = vld [vmem:[%s13397_s2 + $0x68] ss:$16 sps:$4 sm:$0xff]  }
  0x32   : > { %1136 = vperm.xlu1 %9159, %v1071_v23   ;;  %1133 = vperm.xlu0 %9158, %v1070_v24   ;;  %v9178_v23 = vld [vmem:[%s13397_s2 + $0x80] ss:$16 sps:$4 sm:$0xff]   ;;  %v9213_v24 = vld [vmem:[%s13397_s2 + $0x8c] ss:$16 sps:$4 sm:$0xff]  }
  0x36   : > { %1142 = vperm.xlu1 %9159, %v1073_v25   ;;  %1139 = vperm.xlu0 %9158, %v1072_v26  }
  0x3a   : > { %1148 = vperm.xlu1 %9159, %v1075_v27   ;;  %1145 = vperm.xlu0 %9158, %v1074_v28   ;;  %v9183_v27 = vld [vmem:[%s13397_s2 + $0xa4] ss:$16 sps:$4 sm:$0xff]   ;;  %v9211_v28 = vld [vmem:[%s13397_s2 + $0x88] ss:$16 sps:$4 sm:$0xff]  }
  0x3e   : > { %1154 = vperm.xlu1 %9159, %v1077_v29   ;;  %1151 = vperm.xlu0 %9158, %v1076_v30   ;;  %v9216_v29 = vld [vmem:[%s13397_s2 + $0xac] ss:$16 sps:$4 sm:$0xff]   ;;  %v9181_v30 = vld [vmem:[%s13397_s2 + $0xa0] ss:$16 sps:$4 sm:$0xff]  }
  0x42   : > { %1160 = vperm.xlu1 %9159, %v1079_v31   ;;  %1157 = vperm.xlu0 %9158, %v1078_v32  }
  0x46   : > { %1166 = vperm.xlu1 %9159, %v1081_v33   ;;  %1163 = vperm.xlu0 %9158, %v1080_v34  }
  0x4a   : > { %1172 = vperm.xlu1 %9159, %v1083_v35   ;;  %1169 = vperm.xlu0 %9158, %v1082_v36   ;;  %v9186_v35 = vld [vmem:[%s13397_s2 + $0xc4] ss:$16 sps:$4 sm:$0xff]   ;;  %v9214_v36 = vld [vmem:[%s13397_s2 + $0xa8] ss:$16 sps:$4 sm:$0xff]  }
  0x4e   : > { %1178 = vperm.xlu1 %9159, %v1085_v37   ;;  %1175 = vperm.xlu0 %9158, %v1084_v38   ;;  %v9184_v38 = vld [vmem:[%s13397_s2 + $0xc0] ss:$16 sps:$4 sm:$0xff]  }
  0x52   : > { %1184 = vperm.xlu1 %9159, %v1087_v39   ;;  %1181 = vperm.xlu0 %9158, %v1086_v40   ;;  %v9222_v39 = vld [vmem:[%s13397_s2 + $0xcc] ss:$16 sps:$4 sm:$0xff]  }
  0x56   : > { %7691 = vperm.xlu1 %9159, %v7681_v41   ;;  %7686 = vperm.xlu0 %9158, %v7680_v42   ;;  %v9189_v42 = vld [vmem:[%s13397_s2 + $0xe4] ss:$16 sps:$4 sm:$0xff]  }
  0x5a   : > { %7701 = vperm.xlu1 %9159, %v7683_v43   ;;  %7696 = vperm.xlu0 %9158, %v7682_v44   ;;  %v9220_v43 = vld [vmem:[%s13397_s2 + $0xc8] ss:$16 sps:$4 sm:$0xff]   ;;  %v9225_v44 = vld [vmem:[%s13397_s2 + $0xec] ss:$16 sps:$4 sm:$0xff]  }
  0x5e   : > { %7733 = vperm.xlu0 %9158, %v7730_v45  }
  0x95   : > { %v1098_v49 = vpop.permute.xlu1 %1097  ;;  %v1092_v50 = vpop.permute.xlu0 %1091 }
  0x96   : > { %vm1186_vm1 = vcmp.eq.s32.totalorder %v1092_v50, %v10351_v48  ;;  %vm1188_vm4 = vcmp.eq.s32.totalorder %v1098_v49, %v10351_v48  ;;  %v9187_v50 = vld [vmem:[%s13397_s2 + $0xe0] ss:$16 sps:$4 sm:$0xff]  }
  0x97   : > { %v7849_v56 = vsel %vm1186_vm1, 1.0, %v10177_v55  ;;  %v7851_v3 = vsel %vm1188_vm4, 1.0, %v10177_v55 }
  0x99   : > { %v1101_v51 = vpop.permute.xlu1 %1100  ;;  %v1095_v52 = vpop.permute.xlu0 %1094 }
  0x9a   : > { %vm1187_vm3 = vcmp.eq.s32.totalorder %v1095_v52, %v10351_v48  ;;  %vm1189_vm5 = vcmp.eq.s32.totalorder %v1101_v51, %v10351_v48 }
  0x9b   : > { %v7850_v57 = vsel %vm1187_vm3, 1.0, %v10177_v55  ;;  %v7852_v4 = vsel %vm1189_vm5, 1.0, %v10177_v55 }
  0x9c   : > { %v1282_v59 = vpack.c.bf16 %v7850_v57, %v7849_v56  ;;  %v1283_v7 = vpack.c.bf16 %v7852_v4, %v7851_v3  ;;  %v9192_v56 = vld [vmem:[%s13397_s2 + $0x104] ss:$16 sps:$4 sm:$0xff]   ;;  %v9223_v57 = vld [vmem:[%s13397_s2 + $0xe8] ss:$16 sps:$4 sm:$0xff]  }
  0x9d   : > { %v1107_v61 = vpop.permute.xlu1 %1106  ;;  %v1104_v62 = vpop.permute.xlu0 %1103  ;;  %v9201_v3 = vld [vmem:[%s13397_s2 + $0x124] ss:$16 sps:$4 sm:$0xff]   ;;  %v9229_v4 = vld [vmem:[%s13397_s2 + $0x108] ss:$16 sps:$4 sm:$0xff]  }
  0x9e   : > { %7886 = vmatmul.mubr.msk.bf16.vlgmr.msra.gmra.mrb[0].mxu0 %vm1318_vm2, %v1282_v59  ;;  %7903 = vmatmul.mubr.msk.bf16.vlgmr.msra.gmra.mrb[0].mxu1 %vm1318_vm2, %v1282_v59  ;;  %vm1191_vm6 = vcmp.eq.s32.totalorder %v1107_v61, %v10351_v48  ;;  %vm1190_vm7 = vcmp.eq.s32.totalorder %v1104_v62, %v10351_v48  ;;  %v9190_v62 = vld [vmem:[%s13397_s2 + $0x100] ss:$16 sps:$4 sm:$0xff]  }
  0x9f   : > { %2796 = vmatpush1.bf16.msra.mxu0 %v9166_v53  ;;  %1422 = vmatprep.mubr.bf16.mxu0 %v10176_v1  ;;  %v7854_v16 = vsel %vm1191_vm6, 1.0, %v10177_v55  ;;  %v7853_v17 = vsel %vm1190_vm7, 1.0, %v10177_v55 }
  0xa0   : > { %1615 = vmatprep.mubr.bf16.mxu1 %v10176_v1  ;;  %2797 = vmatprep.subr.bf16.mxu0 %v9171_v54  ;;  %v1284_v22 = vpack.c.bf16 %v7854_v16, %v7853_v17 }
  0xa1   : > { %v1113_v5 = vpop.permute.xlu1 %1112  ;;  %v1110_v6 = vpop.permute.xlu0 %1109  ;;  %3568 = vmatpush1.bf16.msra.mxu1 %v9193_v58 }
  0xa2   : > { %3569 = vmatprep.subr.bf16.mxu1 %v9198_v60  ;;  %vm1193_vm8 = vcmp.eq.s32.totalorder %v1113_v5, %v10351_v48  ;;  %vm1192_vm9 = vcmp.eq.s32.totalorder %v1110_v6, %v10351_v48  ;;  %v9234_v5 = vld [vmem:[%s13397_s2 + $0x12c] ss:$16 sps:$4 sm:$0xff]  }
  0xa3   : > { %2798 = vmatpush1.bf16.msra.mxu0 %v9169_v63  ;;  %v7856_v31 = vsel %vm1193_vm8, 1.0, %v10177_v55  ;;  %v7855_v32 = vsel %vm1192_vm9, 1.0, %v10177_v55  ;;  %v9231_v63 = vld [vmem:[%s13397_s2 + $0x10c] ss:$16 sps:$4 sm:$0xff]  }
  0xa4   : > { %2799 = vmatprep.subr.bf16.mxu0 %v9174_v0  ;;  %v1285_v37 = vpack.c.bf16 %v7856_v31, %v7855_v32  ;;  %v9217_v31 = vld [vmem:[%s13397_s2 + $0x160] ss:$16 sps:$4 sm:$0xff]  }
  0xa5   : > { %v10392_v10 = vpop.permute.xlu1 %1118  ;;  %v10394_v11 = vpop.permute.xlu0 %1115  ;;  %3570 = vmatpush1.bf16.msra.mxu1 %v9196_v2 }
  0xa6   : > { %7887 = vmatmul.mubr.msk.bf16.gmra.mrb[4].mxu0 %vm1318_vm2, %v1283_v7  ;;  %7904 = vmatmul.mubr.msk.bf16.gmra.mrb[4].mxu1 %vm1318_vm2, %v1283_v7  ;;  %vm1195_vm10 = vcmp.eq.s32.totalorder %v10392_v10, %v10351_v48  ;;  %vm1194_vm11 = vcmp.eq.s32.totalorder %v10394_v11, %v10351_v48 }
  0xa7   : > { %1432 = vmatprep.mubr.bf16.mxu0 %v10176_v1  ;;  %1625 = vmatprep.mubr.bf16.mxu1 %v10176_v1  ;;  %v7858_v51 = vsel %vm1195_vm10, 1.0, %v10177_v55  ;;  %v7857_v52 = vsel %vm1194_vm11, 1.0, %v10177_v55 }
  0xa8   : > { %2800 = vmatpush1.bf16.msra.mxu0 %v9172_v8  ;;  %3571 = vmatprep.subr.bf16.mxu1 %v9204_v9  ;;  %v1286_v60 = vpack.c.bf16 %v7858_v51, %v7857_v52  ;;  %v9199_v9 = vld [vmem:[%s13397_s2 + $0x120] ss:$16 sps:$4 sm:$0xff]   ;;  %v9247_v51 = vld [vmem:[%s13397_s2 + $0x188] ss:$16 sps:$4 sm:$0xff]   ;;  %v9252_v52 = vld [vmem:[%s13397_s2 + $0x1ac] ss:$16 sps:$4 sm:$0xff]  }
  0xa9   : > { %v10416_v18 = vpop.permute.xlu1 %1124  ;;  %v10418_v19 = vpop.permute.xlu0 %1121  ;;  %2801 = vmatprep.subr.bf16.mxu0 %v9177_v12  ;;  %3572 = vmatpush1.bf16.msra.mxu1 %v9202_v13 }
  0xaa   : > { %3573 = vmatprep.subr.bf16.mxu1 %v9207_v14  ;;  %vm1197_vm0 = vcmp.eq.s32.totalorder %v10416_v18, %v10351_v48  ;;  %vm1196_vm1 = vcmp.eq.s32.totalorder %v10418_v19, %v10351_v48  ;;  %v9210_v14 = vld [vmem:[%s13397_s2 + $0x144] ss:$16 sps:$4 sm:$0xff]  }
  0xab   : > { %v7860_v10 = vsel %vm1197_vm0, 1.0, %v10177_v55  ;;  %v7859_v11 = vsel %vm1196_vm1, 1.0, %v10177_v55 }
  0xac   : > { %2802 = vmatpush1.bf16.msra.mxu0 %v9175_v15  ;;  %v9232_v15 = vld [vmem:[%s13397_s2 + $0x128] ss:$16 sps:$4 sm:$0xff]   ;;  %v1287_v18 = vpack.c.bf16 %v7860_v10, %v7859_v11  ;;  %v9264_v10 = vld [vmem:[%s13397_s2 + $0x204] ss:$16 sps:$4 sm:$0xff]   ;;  %v9291_v11 = vld [vmem:[%s13397_s2 + $0x20c] ss:$16 sps:$4 sm:$0xff]  }
  0xad   : > { %v10432_v25 = vpop.permute.xlu1 %1130  ;;  %v10434_v26 = vpop.permute.xlu0 %1127  ;;  %2803 = vmatprep.subr.bf16.mxu0 %v9180_v20  ;;  %3574 = vmatpush1.bf16.msra.mxu1 %v9205_v21  ;;  %v9208_v20 = vld [vmem:[%s13397_s2 + $0x140] ss:$16 sps:$4 sm:$0xff]   ;;  %v9240_v21 = vld [vmem:[%s13397_s2 + $0x14c] ss:$16 sps:$4 sm:$0xff]  }
  0xae   : > { %7888 = vmatmul.mubr.msk.bf16.gmra.mrb[8].mxu0 %vm1318_vm2, %v1284_v22  ;;  %7905 = vmatmul.mubr.msk.bf16.gmra.mrb[8].mxu1 %vm1318_vm2, %v1284_v22  ;;  %vm1199_vm7 = vcmp.eq.s32.totalorder %v10432_v25, %v10351_v48  ;;  %vm1198_vm8 = vcmp.eq.s32.totalorder %v10434_v26, %v10351_v48 }
  0xaf   : > { %1442 = vmatprep.mubr.bf16.mxu0 %v10176_v1  ;;  %1635 = vmatprep.mubr.bf16.mxu1 %v10176_v1  ;;  %v7862_v32 = vsel %vm1199_vm7, 1.0, %v10177_v55 }
  0xb0   : > { %2804 = vmatpush1.bf16.msra.mxu0 %v9178_v23  ;;  %3575 = vmatprep.subr.bf16.mxu1 %v9213_v24  ;;  %v9219_v24 = vld [vmem:[%s13397_s2 + $0x164] ss:$16 sps:$4 sm:$0xff]  }
  0xb1   : > { %v10456_v33 = vpop.permute.xlu1 %1136  ;;  %v10458_v34 = vpop.permute.xlu0 %1133  ;;  %2805 = vmatprep.subr.bf16.mxu0 %v9183_v27  ;;  %3576 = vmatpush1.bf16.msra.mxu1 %v9211_v28  ;;  %v9238_v27 = vld [vmem:[%s13397_s2 + $0x148] ss:$16 sps:$4 sm:$0xff]   ;;  %v9243_v28 = vld [vmem:[%s13397_s2 + $0x16c] ss:$16 sps:$4 sm:$0xff]  }
  0xb2   : > { %3577 = vmatprep.subr.bf16.mxu1 %v9216_v29 }
  0xb4   : > { %2806 = vmatpush1.bf16.msra.mxu0 %v9181_v30 }
  0xb5   : > { %v1143_v40 = vpop.permute.xlu1 %1142  ;;  %v1140_v41 = vpop.permute.xlu0 %1139  ;;  %2807 = vmatprep.subr.bf16.mxu0 %v9186_v35  ;;  %3578 = vmatpush1.bf16.msra.mxu1 %v9214_v36  ;;  %v7861_v35 = vsel %vm1198_vm8, 1.0, %v10177_v55 }
  0xb6   : > { %vm1203_vm12 = vcmp.eq.s32.totalorder %v1143_v40, %v10351_v48  ;;  %vm1202_vm13 = vcmp.eq.s32.totalorder %v1140_v41, %v10351_v48  ;;  %7889 = vmatmul.mubr.msk.bf16.gmra.mrb[12].mxu0 %vm1318_vm2, %v1285_v37  ;;  %7906 = vmatmul.mubr.msk.bf16.gmra.mrb[12].mxu1 %vm1318_vm2, %v1285_v37  ;;  %v1288_v41 = vpack.c.bf16 %v7862_v32, %v7861_v35  ;;  %v9268_v32 = vld [vmem:[%s13397_s2 + $0x240] ss:$16 sps:$4 sm:$0xff]   ;;  %v9300_v35 = vld [vmem:[%s13397_s2 + $0x24c] ss:$16 sps:$4 sm:$0xff]  }
  0xb7   : > { %v7866_v45 = vsel %vm1203_vm12, 1.0, %v10177_v55  ;;  %v7865_v46 = vsel %vm1202_vm13, 1.0, %v10177_v55  ;;  %1452 = vmatprep.mubr.bf16.mxu0 %v10176_v1  ;;  %1645 = vmatprep.mubr.bf16.mxu1 %v10176_v1  ;;  %vm1201_vm13 = vcmp.eq.s32.totalorder %v10456_v33, %v10351_v48 }
  0xb8   : > { %v10493_v49 = vpack.c.bf16 %v7866_v45, %v7865_v46  ;;  %2808 = vmatpush1.bf16.msra.mxu0 %v9184_v38  ;;  %3579 = vmatprep.subr.bf16.mxu1 %v9222_v39  ;;  %v9228_v38 = vld [vmem:[%s13397_s2 + $0x184] ss:$16 sps:$4 sm:$0xff]   ;;  %v9241_v39 = vld [vmem:[%s13397_s2 + $0x168] ss:$16 sps:$4 sm:$0xff]  }
  0xb9   : > { %v1149_v53 = vpop.permute.xlu1 %1148  ;;  %v1146_v54 = vpop.permute.xlu0 %1145  ;;  %2809 = vmatprep.subr.bf16.mxu0 %v9189_v42  ;;  %3580 = vmatpush1.bf16.msra.mxu1 %v9220_v43  ;;  %v9226_v43 = vld [vmem:[%s13397_s2 + $0x180] ss:$16 sps:$4 sm:$0xff]  }
  0xba   : > { %vm1205_vm14 = vcmp.eq.s32.totalorder %v1149_v53, %v10351_v48  ;;  %vm1204_vm15 = vcmp.eq.s32.totalorder %v1146_v54, %v10351_v48  ;;  %3581 = vmatprep.subr.bf16.mxu1 %v9225_v44  ;;  %v9249_v44 = vld [vmem:[%s13397_s2 + $0x18c] ss:$16 sps:$4 sm:$0xff]  }
  0xbb   : > { %v7868_v58 = vsel %vm1205_vm14, 1.0, %v10177_v55  ;;  %v7867_v59 = vsel %vm1204_vm15, 1.0, %v10177_v55  ;;  %vm1200_vm14 = vcmp.eq.s32.totalorder %v10458_v34, %v10351_v48 }
  0xbc   : > { %v10513_v61 = vpack.c.bf16 %v7868_v58, %v7867_v59  ;;  %2810 = vmatpush1.bf16.msra.mxu0 %v9187_v50  ;;  %v9237_v50 = vld [vmem:[%s13397_s2 + $0x1a4] ss:$16 sps:$4 sm:$0xff]   ;;  %v7863_v58 = vsel %vm1200_vm14, 1.0, %v10177_v55 }
  0xbd   : > { %v1155_v0 = vpop.permute.xlu1 %1154  ;;  %v1152_v2 = vpop.permute.xlu0 %1151  ;;  %2811 = vmatprep.subr.bf16.mxu0 %v9192_v56  ;;  %3582 = vmatpush1.bf16.msra.mxu1 %v9223_v57  ;;  %v9235_v56 = vld [vmem:[%s13397_s2 + $0x1a0] ss:$16 sps:$4 sm:$0xff]   ;;  %v7864_v57 = vsel %vm1201_vm13, 1.0, %v10177_v55 }
  0xbe   : > { %vm1207_vm3 = vcmp.eq.s32.totalorder %v1155_v0, %v10351_v48  ;;  %vm1206_vm4 = vcmp.eq.s32.totalorder %v1152_v2, %v10351_v48  ;;  %7890 = vmatmul.mubr.msk.bf16.gmra.mrb[16].mxu0 %vm1318_vm2, %v1286_v60  ;;  %7907 = vmatmul.mubr.msk.bf16.gmra.mrb[16].mxu1 %vm1318_vm2, %v1286_v60  ;;  %v1289_v2 = vpack.c.bf16 %v7864_v57, %v7863_v58  ;;  %v581_v57 = vld [vmem:[%s10731_s19 + $0x1c8] sm:$0xff]  ;;  %v588_v58 = vld [vmem:[%s10731_s19 + $0x200] sm:$0xff] }
  0xbf   : > { %v7870_v6 = vsel %vm1207_vm3, 1.0, %v10177_v55  ;;  %v7869_v7 = vsel %vm1206_vm4, 1.0, %v10177_v55  ;;  %1462 = vmatprep.mubr.bf16.mxu0 %v10176_v1  ;;  %1655 = vmatprep.mubr.bf16.mxu1 %v10176_v1  ;;  %vm7246_vm4 = vcmask 523264  }
  0xc0   : > { %v10542_v8 = vpack.c.bf16 %v7870_v6, %v7869_v7  ;;  %2812 = vmatpush1.bf16.msra.mxu0 %v9190_v62  ;;  %3583 = vmatprep.subr.bf16.mxu1 %v9231_v63  ;;  %v9246_v62 = vld [vmem:[%s13397_s2 + $0x1c4] ss:$16 sps:$4 sm:$0xff]   ;;  %v9250_v63 = vld [vmem:[%s13397_s2 + $0x1a8] ss:$16 sps:$4 sm:$0xff]   ;;  %v9261_v6 = vld [vmem:[%s13397_s2 + $0x1ec] ss:$16 sps:$4 sm:$0xff]  }
  0xc1   : > { %v1161_v12 = vpop.permute.xlu1 %1160  ;;  %v1158_v13 = vpop.permute.xlu0 %1157  ;;  %2813 = vmatprep.subr.bf16.mxu0 %v9201_v3  ;;  %3584 = vmatpush1.bf16.msra.mxu1 %v9229_v4  ;;  %v9244_v4 = vld [vmem:[%s13397_s2 + $0x1c0] ss:$16 sps:$4 sm:$0xff]  }
  0xc2   : > { %vm1209_vm5 = vcmp.eq.s32.totalorder %v1161_v12, %v10351_v48  ;;  %vm1208_vm6 = vcmp.eq.s32.totalorder %v1158_v13, %v10351_v48  ;;  %3585 = vmatprep.subr.bf16.mxu1 %v9234_v5  ;;  %v9258_v5 = vld [vmem:[%s13397_s2 + $0x1cc] ss:$16 sps:$4 sm:$0xff]   ;;  %v9253_v7 = vld [vmem:[%s13397_s2 + $0x1e0] ss:$16 sps:$4 sm:$0xff]  }
  0xc3   : > { %v7872_v16 = vsel %vm1209_vm5, 1.0, %v10177_v55  ;;  %v7871_v17 = vsel %vm1208_vm6, 1.0, %v10177_v55  ;;  %v524_v12 = vld [vmem:[%s10731_s19] sm:$0xff]  ;;  %v531_v13 = vld [vmem:[%s10731_s19 + $0x38] sm:$0xff] }
  0xc4   : > { %v10562_v19 = vpack.c.bf16 %v7872_v16, %v7871_v17  ;;  %2814 = vmatpush1.bf16.msra.mxu0 %v9199_v9  ;;  %v9259_v9 = vld [vmem:[%s13397_s2 + $0x1e8] ss:$16 sps:$4 sm:$0xff]   ;;  %v748_v16 = vpack.c.bf16 %v531_v13, %v524_v12  ;;  %v9262_v17 = vld [vmem:[%s13397_s2 + $0x200] ss:$16 sps:$4 sm:$0xff]   ;;  %v9327_v12 = vld [vmem:[%s13397_s2 + $0x30c] ss:$16 sps:$4 sm:$0xff]  }
  0xc5   : > { %v1167_v22 = vpop.permute.xlu1 %1166  ;;  %v1164_v23 = vpop.permute.xlu0 %1163  ;;  %2815 = vmatprep.subr.bf16.mxu0 %v9210_v14  ;;  %3586 = vmatpush1.bf16.msra.mxu1 %v9232_v15  ;;  %v539_v14 = vld [vmem:[%s10731_s19 + $0x78] sm:$0xff]  ;;  %v546_v15 = vld [vmem:[%s10731_s19 + $0xb0] sm:$0xff] }
  0xc6   : > { %vm1211_vm9 = vcmp.eq.s32.totalorder %v1167_v22, %v10351_v48  ;;  %vm1210_vm10 = vcmp.eq.s32.totalorder %v1164_v23, %v10351_v48  ;;  %7891 = vmatmul.mubr.msk.bf16.gmra.mrb[20].mxu0 %vm1318_vm2, %v1287_v18  ;;  %7908 = vmatmul.mubr.msk.bf16.gmra.mrb[20].mxu1 %vm1318_vm2, %v1287_v18  ;;  %v756_v18 = vpack.c.bf16 %v546_v15, %v539_v14  ;;  %v9265_v22 = vld [vmem:[%s13397_s2 + $0x220] ss:$16 sps:$4 sm:$0xff]   ;;  %v9297_v13 = vld [vmem:[%s13397_s2 + $0x324] ss:$16 sps:$4 sm:$0xff]   ;;  %v9325_v14 = vld [vmem:[%s13397_s2 + $0x308] ss:$16 sps:$4 sm:$0xff]  }
  0xc7   : > { %v7874_v29 = vsel %vm1211_vm9, 1.0, %v10177_v55  ;;  %v7873_v30 = vsel %vm1210_vm10, 1.0, %v10177_v55  ;;  %1472 = vmatprep.mubr.bf16.mxu0 %v10176_v1  ;;  %1665 = vmatprep.mubr.bf16.mxu1 %v10176_v1  ;;  %v538_v23 = vld [vmem:[%s10731_s19 + $0x70] sm:$0xff]  ;;  %v9330_v15 = vld [vmem:[%s13397_s2 + $0x32c] ss:$16 sps:$4 sm:$0xff]  }
  0xc8   : > { %v10591_v26 = vpack.c.bf16 %v7874_v29, %v7873_v30  ;;  %2816 = vmatpush1.bf16.msra.mxu0 %v9208_v20  ;;  %3587 = vmatprep.subr.bf16.mxu1 %v9240_v21  ;;  %v9289_v20 = vld [vmem:[%s13397_s2 + $0x208] ss:$16 sps:$4 sm:$0xff]   ;;  %v9294_v21 = vld [vmem:[%s13397_s2 + $0x22c] ss:$16 sps:$4 sm:$0xff]   ;;  %v9270_v29 = vld [vmem:[%s13397_s2 + $0x244] ss:$16 sps:$4 sm:$0xff]  }
  0xc9   : > { %v1173_v36 = vpop.permute.xlu1 %1172  ;;  %v1170_v37 = vpop.permute.xlu0 %1169  ;;  %2817 = vmatprep.subr.bf16.mxu0 %v9219_v24  ;;  %3588 = vmatpush1.bf16.msra.mxu1 %v9238_v27  ;;  %v545_v24 = vld [vmem:[%s10731_s19 + $0xa8] sm:$0xff] }
  0xca   : > { %vm1213_vm11 = vcmp.eq.s32.totalorder %v1173_v36, %v10351_v48  ;;  %vm1212_vm12 = vcmp.eq.s32.totalorder %v1170_v37, %v10351_v48  ;;  %3589 = vmatprep.subr.bf16.mxu1 %v9243_v28  ;;  %v553_v27 = vld [vmem:[%s10731_s19 + $0xe8] sm:$0xff]  ;;  %v560_v28 = vld [vmem:[%s10731_s19 + $0x120] sm:$0xff] }
  0xcb   : > { %v7876_v25 = vsel %vm1213_vm11, 1.0, %v10177_v55  ;;  %v7875_v40 = vsel %vm1212_vm12, 1.0, %v10177_v55  ;;  %v9292_v30 = vld [vmem:[%s13397_s2 + $0x228] ss:$16 sps:$4 sm:$0xff]   ;;  %v9273_v36 = vld [vmem:[%s13397_s2 + $0x264] ss:$16 sps:$4 sm:$0xff]  }
  0xcc   : > { %v10611_v42 = vpack.c.bf16 %v7876_v25, %v7875_v40  ;;  %2818 = vmatpush1.bf16.msra.mxu0 %v9217_v31  ;;  %v763_v31 = vpack.c.bf16 %v560_v28, %v553_v27  ;;  %v9298_v37 = vld [vmem:[%s13397_s2 + $0x248] ss:$16 sps:$4 sm:$0xff]   ;;  %v9304_v27 = vld [vmem:[%s13397_s2 + $0x340] ss:$16 sps:$4 sm:$0xff]   ;;  %v9336_v28 = vld [vmem:[%s13397_s2 + $0x34c] ss:$16 sps:$4 sm:$0xff]  }
  0xcd   : > { %v1179_v45 = vpop.permute.xlu1 %1178  ;;  %v1176_v46 = vpop.permute.xlu0 %1175  ;;  %2819 = vmatprep.subr.bf16.mxu0 %v9228_v38  ;;  %3590 = vmatpush1.bf16.msra.mxu1 %v9241_v39  ;;  %v9303_v38 = vld [vmem:[%s13397_s2 + $0x26c] ss:$16 sps:$4 sm:$0xff]   ;;  %v552_v39 = vld [vmem:[%s10731_s19 + $0xe0] sm:$0xff] }
  0xce   : > { %vm1215_vm15 = vcmp.eq.s32.totalorder %v1179_v45, %v10351_v48  ;;  %vm1214_vm0 = vcmp.eq.s32.totalorder %v1176_v46, %v10351_v48  ;;  %7892 = vmatmul.mubr.msk.bf16.gmra.mrb[24].mxu0 %vm1318_vm2, %v1288_v41  ;;  %7909 = vmatmul.mubr.msk.bf16.gmra.mrb[24].mxu1 %vm1318_vm2, %v1288_v41  ;;  %v559_v25 = vld [vmem:[%s10731_s19 + $0x118] sm:$0xff]  ;;  %v574_v41 = vld [vmem:[%s10731_s19 + $0x190] sm:$0xff] }
  0xcf   : > { %v7878_v53 = vsel %vm1215_vm15, 1.0, %v10177_v55  ;;  %v7877_v54 = vsel %vm1214_vm0, 1.0, %v10177_v55  ;;  %1482 = vmatprep.mubr.bf16.mxu0 %v10176_v1  ;;  %1675 = vmatprep.mubr.bf16.mxu1 %v10176_v1  ;;  %v567_v40 = vld [vmem:[%s10731_s19 + $0x158] sm:$0xff]  ;;  %v762_v45 = vpack.c.bf16 %v559_v25, %v552_v39 }
  0xd0   : > { %v10640_v34 = vpack.c.bf16 %v7878_v53, %v7877_v54  ;;  %2820 = vmatpush1.bf16.msra.mxu0 %v9226_v43  ;;  %3591 = vmatprep.subr.bf16.mxu1 %v9249_v44  ;;  %v9276_v43 = vld [vmem:[%s13397_s2 + $0x284] ss:$16 sps:$4 sm:$0xff]   ;;  %v9301_v44 = vld [vmem:[%s13397_s2 + $0x268] ss:$16 sps:$4 sm:$0xff]   ;;  %v770_v46 = vpack.c.bf16 %v574_v41, %v567_v40  ;;  %v9312_v54 = vld [vmem:[%s13397_s2 + $0x2ac] ss:$16 sps:$4 sm:$0xff]  }
  0xd1   : > { %v1185_v59 = vpop.permute.xlu1 %1184  ;;  %v1182_v60 = vpop.permute.xlu0 %1181  ;;  %2821 = vmatprep.subr.bf16.mxu0 %v9237_v50  ;;  %3592 = vmatpush1.bf16.msra.mxu1 %v9247_v51  ;;  %v9274_v50 = vld [vmem:[%s13397_s2 + $0x280] ss:$16 sps:$4 sm:$0xff]   ;;  %v9309_v51 = vld [vmem:[%s13397_s2 + $0x28c] ss:$16 sps:$4 sm:$0xff]   ;;  %v9307_v53 = vld [vmem:[%s13397_s2 + $0x288] ss:$16 sps:$4 sm:$0xff]  }
  0xd2   : > { %vm1217_vm1 = vcmp.eq.s32.totalorder %v1185_v59, %v10351_v48  ;;  %vm1216_vm3 = vcmp.eq.s32.totalorder %v1182_v60, %v10351_v48  ;;  %3593 = vmatprep.subr.bf16.mxu1 %v9252_v52  ;;  %v9255_v48 = vld [vmem:[%s13397_s2 + $0x1e4] ss:$16 sps:$4 sm:$0xff]   ;;  %v9277_v59 = vld [vmem:[%s13397_s2 + $0x2a0] ss:$16 sps:$4 sm:$0xff]   ;;  %v9337_v39 = vld [vmem:[%s13397_s2 + $0x368] ss:$16 sps:$4 sm:$0xff]  }
  0xd3   : > { %v7880_v33 = vsel %vm1217_vm1, 1.0, %v10177_v55  ;;  %v7879_v0 = vsel %vm1216_vm3, 1.0, %v10177_v55  ;;  %v9256_v55 = vld [vmem:[%s13397_s2 + $0x1c8] ss:$16 sps:$4 sm:$0xff]   ;;  %v9279_v52 = vld [vmem:[%s13397_s2 + $0x2a4] ss:$16 sps:$4 sm:$0xff]  }
  0xd4   : > { %v1297_v3 = vpack.c.bf16 %v7880_v33, %v7879_v0  ;;  %2822 = vmatpush1.bf16.msra.mxu0 %v9235_v56  ;;  %v573_v56 = vld [vmem:[%s10731_s19 + $0x188] sm:$0xff]  ;;  %v9282_v60 = vld [vmem:[%s13397_s2 + $0x2c4] ss:$16 sps:$4 sm:$0xff]   ;;  %v777_v33 = vpack.c.bf16 %v588_v58, %v581_v57  ;;  %v9280_v0 = vld [vmem:[%s13397_s2 + $0x2c0] ss:$16 sps:$4 sm:$0xff]  }
  0xd5   : > { %2823 = vmatprep.subr.bf16.mxu0 %v9246_v62  ;;  %3594 = vmatpush1.bf16.msra.mxu1 %v9250_v63  ;;  %v9310_v62 = vld [vmem:[%s13397_s2 + $0x2a8] ss:$16 sps:$4 sm:$0xff]   ;;  %v9322_v41 = vld [vmem:[%s13397_s2 + $0x380] ss:$16 sps:$4 sm:$0xff]  }
  0xd6   : > { %7893 = vmatmul.mubr.msk.bf16.gmra.mrb[28].mxu0 %vm1318_vm2, %v1289_v2  ;;  %7910 = vmatmul.mubr.msk.bf16.gmra.mrb[28].mxu1 %vm1318_vm2, %v1289_v2  ;;  %v9318_v2 = vld [vmem:[%s13397_s2 + $0x2cc] ss:$16 sps:$4 sm:$0xff]   ;;  %v9340_v58 = vld [vmem:[%s13397_s2 + $0x3c0] ss:$16 sps:$4 sm:$0xff]  }
  0xd7   : > { %1492 = vmatprep.mubr.bf16.mxu0 %v10176_v1  ;;  %1685 = vmatprep.mubr.bf16.mxu1 %v10176_v1 }
  0xd8   : > { %2824 = vmatpush1.bf16.msra.mxu0 %v9244_v4  ;;  %3595 = vmatprep.subr.bf16.mxu1 %v9258_v5  ;;  %v9316_v4 = vld [vmem:[%s13397_s2 + $0x2c8] ss:$16 sps:$4 sm:$0xff]   ;;  %v9321_v5 = vld [vmem:[%s13397_s2 + $0x2ec] ss:$16 sps:$4 sm:$0xff]  }
  0xd9   : > { %2825 = vmatprep.subr.bf16.mxu0 %v9255_v48  ;;  %3596 = vmatpush1.bf16.msra.mxu1 %v9256_v55  ;;  %v580_v48 = vld [vmem:[%s10731_s19 + $0x1c0] sm:$0xff]  ;;  %v587_v55 = vld [vmem:[%s10731_s19 + $0x1f8] sm:$0xff] }
  0xda   : > { %3597 = vmatprep.subr.bf16.mxu1 %v9261_v6  ;;  %v595_v6 = vld [vmem:[%s10731_s19 + $0x238] sm:$0xff] }
  0xdc   : > { %2826 = vmatpush1.bf16.msra.mxu0 %v9253_v7  ;;  %v602_v7 = vld [vmem:[%s10731_s19 + $0x270] sm:$0xff] }
  0xdd   : > { %3598 = vmatpush1.bf16.msra.mxu1 %v9259_v9  ;;  %2988 = vmatprep.subr.bf16.mxu0 %v9264_v10  ;;  %v9283_v9 = vld [vmem:[%s13397_s2 + $0x2e0] ss:$16 sps:$4 sm:$0xff]   ;;  %v9288_v10 = vld [vmem:[%s13397_s2 + $0x304] ss:$16 sps:$4 sm:$0xff]  }
  0xde   : > { %7894 = vmatmul.mubr.msk.bf16.gmra.mrb[32].mxu0 %vm1318_vm2, %v10493_v49  ;;  %7911 = vmatmul.mubr.msk.bf16.gmra.mrb[32].mxu1 %vm1318_vm2, %v10493_v49  ;;  %v525_v49 = vld [vmem:[%s10731_s19 + $0x8] sm:$0xff] }
  0xdf   : > { %1502 = vmatprep.mubr.bf16.mxu0 %v10176_v1  ;;  %1695 = vmatprep.mubr.bf16.mxu1 %v10176_v1 }
  0xe0   : > { %3760 = vmatprep.subr.bf16.mxu1 %v9291_v11  ;;  %v9319_v11 = vld [vmem:[%s13397_s2 + $0x2e8] ss:$16 sps:$4 sm:$0xff]  }
  0xe6   : > { %7895 = vmatmul.mubr.msk.bf16.gmra.mrb[36].mxu0 %vm1318_vm2, %v10513_v61  ;;  %7912 = vmatmul.mubr.msk.bf16.gmra.mrb[36].mxu1 %vm1318_vm2, %v10513_v61  ;;  %v532_v61 = vld [vmem:[%s10731_s19 + $0x40] sm:$0xff] }
  0xe7   : > { %1512 = vmatprep.mubr.bf16.mxu0 %v10176_v1  ;;  %1705 = vmatprep.mubr.bf16.mxu1 %v10176_v1 }
  0xee   : > { %7896 = vmatmul.mubr.msk.bf16.gmra.mrb[40].mxu0 %vm1318_vm2, %v10542_v8  ;;  %7913 = vmatmul.mubr.msk.bf16.gmra.mrb[40].mxu1 %vm1318_vm2, %v10542_v8  ;;  %v749_v8 = vpack.c.bf16 %v532_v61, %v525_v49  ;;  %v776_v49 = vpack.c.bf16 %v587_v55, %v580_v48  ;;  %v784_v61 = vpack.c.bf16 %v602_v7, %v595_v6  ;;  %v9360_v48 = vld [vmem:[%s13397_s2 + $0x404] ss:$16 sps:$4 sm:$0xff]   ;;  %v9387_v7 = vld [vmem:[%s13397_s2 + $0x40c] ss:$16 sps:$4 sm:$0xff]  }
  0xef   : > { %1522 = vmatprep.mubr.bf16.mxu0 %v10176_v1  ;;  %1715 = vmatprep.mubr.bf16.mxu1 %v10176_v1 }
  0xf6   : > { %7897 = vmatmul.mubr.msk.bf16.gmra.mrb[44].mxu0 %vm1318_vm2, %v10562_v19  ;;  %7914 = vmatmul.mubr.msk.bf16.gmra.mrb[44].mxu1 %vm1318_vm2, %v10562_v19  ;;  %v9267_v19 = vld [vmem:[%s13397_s2 + $0x224] ss:$16 sps:$4 sm:$0xff]  }
  0xf7   : > { %1532 = vmatprep.mubr.bf16.mxu0 %v10176_v1  ;;  %1725 = vmatprep.mubr.bf16.mxu1 %v10176_v1 }
  0xfe   : > { %7898 = vmatmul.mubr.msk.bf16.gmra.mrb[48].mxu0 %vm1318_vm2, %v10591_v26  ;;  %7915 = vmatmul.mubr.msk.bf16.gmra.mrb[48].mxu1 %vm1318_vm2, %v10591_v26  ;;  %v755_v26 = vpack.c.bf16 %v545_v24, %v538_v23 }
  0xff   : > { %1542 = vmatprep.mubr.bf16.mxu0 %v10176_v1  ;;  %1735 = vmatprep.mubr.bf16.mxu1 %v10176_v1 }
 0x106   : > { %7899 = vmatmul.mubr.msk.bf16.gmra.mrb[52].mxu0 %vm1318_vm2, %v10611_v42  ;;  %7916 = vmatmul.mubr.msk.bf16.gmra.mrb[52].mxu1 %vm1318_vm2, %v10611_v42  ;;  %v9271_v42 = vld [vmem:[%s13397_s2 + $0x260] ss:$16 sps:$4 sm:$0xff]  }
 0x107   : > { %1552 = vmatprep.mubr.bf16.mxu0 %v10176_v1  ;;  %1745 = vmatprep.mubr.bf16.mxu1 %v10176_v1 }
 0x10e   : > { %7900 = vmatmul.mubr.msk.bf16.gmra.mrb[56].mxu0 %vm1318_vm2, %v10640_v34  ;;  %7917 = vmatmul.mubr.msk.bf16.gmra.mrb[56].mxu1 %vm1318_vm2, %v10640_v34  ;;  %v566_v34 = vld [vmem:[%s10731_s19 + $0x150] sm:$0xff] }
 0x10f   : > { %1562 = vmatprep.mubr.bf16.mxu0 %v10176_v1  ;;  %1755 = vmatprep.mubr.bf16.mxu1 %v10176_v1  ;;  %v769_v63 = vpack.c.bf16 %v573_v56, %v566_v34  ;;  %v9346_v34 = vld [vmem:[%s13397_s2 + $0x3a8] ss:$16 sps:$4 sm:$0xff]  }
 0x116   : > { %7901 = vmatmul.mubr.msk.bf16.gmra.mrb[60].mxu0 %vm1318_vm2, %v1297_v3  ;;  %7918 = vmatmul.mubr.msk.bf16.gmra.mrb[60].mxu1 %vm1318_vm2, %v1297_v3  ;;  %v9285_v3 = vld [vmem:[%s13397_s2 + $0x2e4] ss:$16 sps:$4 sm:$0xff]   ;;  %vm2746_vm2 = vcmask 130048  }
 0x117   : > { %2827 = vmatprep.mubr.bf16.mxu0 %v749_v8  ;;  %3599 = vmatprep.mubr.bf16.mxu1 %v749_v8  ;;  %v9286_v8 = vld [vmem:[%s13397_s2 + $0x300] ss:$16 sps:$4 sm:$0xff]  }
 0x11e   : > { %2828 = vmatmul.mubr.bf16.vlgmr.msra.gmra.mrb[0].mxu0 %v748_v16  ;;  %3600 = vmatmul.mubr.bf16.vlgmr.msra.gmra.mrb[0].mxu1 %v748_v16  ;;  %v594_v16 = vld [vmem:[%s10731_s19 + $0x230] sm:$0xff] }
 0x11f   : > { %2989 = vmatpush1.bf16.msra.mxu0 %v9262_v17  ;;  %2837 = vmatprep.mubr.bf16.mxu0 %v756_v18  ;;  %v601_v17 = vld [vmem:[%s10731_s19 + $0x268] sm:$0xff] }
 0x120   : > { %2990 = vmatprep.subr.bf16.mxu0 %v9267_v19  ;;  %3609 = vmatprep.mubr.bf16.mxu1 %v756_v18  ;;  %v609_v18 = vld [vmem:[%s10731_s19 + $0x2a8] sm:$0xff]  ;;  %v616_v19 = vld [vmem:[%s10731_s19 + $0x2e0] sm:$0xff]  ;;  %v783_v23 = vpack.c.bf16 %v601_v17, %v594_v16 }
 0x121   : > { %3761 = vmatpush1.bf16.msra.mxu1 %v9289_v20  ;;  %v9295_v20 = vld [vmem:[%s13397_s2 + $0x320] ss:$16 sps:$4 sm:$0xff]   ;;  %v791_v24 = vpack.c.bf16 %v616_v19, %v609_v18  ;;  %v685_v19 = vld [vmem:[%s10731_s19 + $0x508] sm:$0xff] }
 0x122   : > { %3762 = vmatprep.subr.bf16.mxu1 %v9294_v21  ;;  %v9306_v21 = vld [vmem:[%s13397_s2 + $0x344] ss:$16 sps:$4 sm:$0xff]  }
 0x123   : > { %2991 = vmatpush1.bf16.msra.mxu0 %v9265_v22  ;;  %v9328_v22 = vld [vmem:[%s13397_s2 + $0x328] ss:$16 sps:$4 sm:$0xff]   ;;  %v678_v18 = vld [vmem:[%s10731_s19 + $0x4d0] sm:$0xff] }
 0x124   : > { %2992 = vmatprep.subr.bf16.mxu0 %v9270_v29  ;;  %v9315_v29 = vld [vmem:[%s13397_s2 + $0x364] ss:$16 sps:$4 sm:$0xff]  }
 0x125   : > { %3763 = vmatpush1.bf16.msra.mxu1 %v9292_v30  ;;  %v9334_v30 = vld [vmem:[%s13397_s2 + $0x348] ss:$16 sps:$4 sm:$0xff]  }
 0x126   : > { %2838 = vmatmul.mubr.bf16.gmra.mrb[4].mxu0 %v755_v26  ;;  %3610 = vmatmul.mubr.bf16.gmra.mrb[4].mxu1 %v755_v26  ;;  %v9339_v26 = vld [vmem:[%s13397_s2 + $0x36c] ss:$16 sps:$4 sm:$0xff]  }
 0x127   : > { %2847 = vmatprep.mubr.bf16.mxu0 %v763_v31  ;;  %3619 = vmatprep.mubr.bf16.mxu1 %v763_v31  ;;  %v608_v31 = vld [vmem:[%s10731_s19 + $0x2a0] sm:$0xff] }
 0x128   : > { %2993 = vmatpush1.bf16.msra.mxu0 %v9268_v32  ;;  %3764 = vmatprep.subr.bf16.mxu1 %v9300_v35  ;;  %v615_v32 = vld [vmem:[%s10731_s19 + $0x2d8] sm:$0xff] }
 0x129   : > { %2994 = vmatprep.subr.bf16.mxu0 %v9273_v36  ;;  %3765 = vmatpush1.bf16.msra.mxu1 %v9298_v37  ;;  %v623_v35 = vld [vmem:[%s10731_s19 + $0x318] sm:$0xff]  ;;  %v630_v36 = vld [vmem:[%s10731_s19 + $0x350] sm:$0xff]  ;;  %v790_v25 = vpack.c.bf16 %v615_v32, %v608_v31  ;;  %v713_v32 = vld [vmem:[%s10731_s19 + $0x5e8] sm:$0xff] }
 0x12a   : > { %3766 = vmatprep.subr.bf16.mxu1 %v9303_v38  ;;  %v9313_v37 = vld [vmem:[%s13397_s2 + $0x360] ss:$16 sps:$4 sm:$0xff]   ;;  %v9324_v38 = vld [vmem:[%s13397_s2 + $0x384] ss:$16 sps:$4 sm:$0xff]   ;;  %v798_v40 = vpack.c.bf16 %v630_v36, %v623_v35  ;;  %v721_v35 = vld [vmem:[%s10731_s19 + $0x628] sm:$0xff] }
 0x12b   : > { %v706_v31 = vld [vmem:[%s10731_s19 + $0x5b0] sm:$0xff]  ;;  %v728_v36 = vld [vmem:[%s10731_s19 + $0x660] sm:$0xff] }
 0x12c   : > { %2995 = vmatpush1.bf16.msra.mxu0 %v9271_v42  ;;  %v9345_v42 = vld [vmem:[%s13397_s2 + $0x38c] ss:$16 sps:$4 sm:$0xff]  }
 0x12d   : > { %2996 = vmatprep.subr.bf16.mxu0 %v9276_v43  ;;  %3767 = vmatpush1.bf16.msra.mxu1 %v9301_v44  ;;  %v9333_v43 = vld [vmem:[%s13397_s2 + $0x3a4] ss:$16 sps:$4 sm:$0xff]   ;;  %v9343_v44 = vld [vmem:[%s13397_s2 + $0x388] ss:$16 sps:$4 sm:$0xff]  }
 0x12e   : > { %2848 = vmatmul.mubr.bf16.gmra.mrb[8].mxu0 %v762_v45  ;;  %3620 = vmatmul.mubr.bf16.gmra.mrb[8].mxu1 %v762_v45  ;;  %v9348_v45 = vld [vmem:[%s13397_s2 + $0x3ac] ss:$16 sps:$4 sm:$0xff]  }
 0x12f   : > { %2857 = vmatprep.mubr.bf16.mxu0 %v770_v46  ;;  %3629 = vmatprep.mubr.bf16.mxu1 %v770_v46  ;;  %v622_v46 = vld [vmem:[%s10731_s19 + $0x310] sm:$0xff] }
 0x130   : > { %2997 = vmatpush1.bf16.msra.mxu0 %v9274_v50  ;;  %3768 = vmatprep.subr.bf16.mxu1 %v9309_v51  ;;  %v629_v50 = vld [vmem:[%s10731_s19 + $0x348] sm:$0xff] }
 0x131   : > { %2998 = vmatprep.subr.bf16.mxu0 %v9279_v52  ;;  %3769 = vmatpush1.bf16.msra.mxu1 %v9307_v53  ;;  %v637_v51 = vld [vmem:[%s10731_s19 + $0x388] sm:$0xff]  ;;  %v644_v52 = vld [vmem:[%s10731_s19 + $0x3c0] sm:$0xff]  ;;  %v797_v56 = vpack.c.bf16 %v629_v50, %v622_v46  ;;  %v527_v46 = vld [vmem:[%s10731_s19 + $0x18] sm:$0xff] }
 0x132   : > { %3770 = vmatprep.subr.bf16.mxu1 %v9312_v54  ;;  %v9331_v53 = vld [vmem:[%s13397_s2 + $0x3a0] ss:$16 sps:$4 sm:$0xff]   ;;  %v9342_v54 = vld [vmem:[%s13397_s2 + $0x3c4] ss:$16 sps:$4 sm:$0xff]   ;;  %v805_v57 = vpack.c.bf16 %v644_v52, %v637_v51 }
 0x133   : > { %v534_v50 = vld [vmem:[%s10731_s19 + $0x50] sm:$0xff] }
 0x134   : > { %2999 = vmatpush1.bf16.msra.mxu0 %v9277_v59  ;;  %v9354_v59 = vld [vmem:[%s13397_s2 + $0x3cc] ss:$16 sps:$4 sm:$0xff]   ;;  %v751_v52 = vpack.c.bf16 %v534_v50, %v527_v46  ;;  %v9415_v46 = vld [vmem:[%s13397_s2 + $0x4e8] ss:$16 sps:$4 sm:$0xff]  }
 0x135   : > { %3000 = vmatprep.subr.bf16.mxu0 %v9282_v60  ;;  %3771 = vmatpush1.bf16.msra.mxu1 %v9310_v62  ;;  %v9351_v60 = vld [vmem:[%s13397_s2 + $0x3e4] ss:$16 sps:$4 sm:$0xff]   ;;  %v9352_v62 = vld [vmem:[%s13397_s2 + $0x3c8] ss:$16 sps:$4 sm:$0xff]  }
 0x136   : > { %2858 = vmatmul.mubr.bf16.gmra.mrb[12].mxu0 %v769_v63  ;;  %3630 = vmatmul.mubr.bf16.gmra.mrb[12].mxu1 %v769_v63  ;;  %v9357_v63 = vld [vmem:[%s13397_s2 + $0x3ec] ss:$16 sps:$4 sm:$0xff]  }
 0x137   : > { %2867 = vmatprep.mubr.bf16.mxu0 %v777_v33  ;;  %3639 = vmatprep.mubr.bf16.mxu1 %v777_v33  ;;  %v636_v33 = vld [vmem:[%s10731_s19 + $0x380] sm:$0xff] }
 0x138   : > { %3001 = vmatpush1.bf16.msra.mxu0 %v9280_v0  ;;  %3772 = vmatprep.subr.bf16.mxu1 %v9318_v2  ;;  %v643_v0 = vld [vmem:[%s10731_s19 + $0x3b8] sm:$0xff] }
 0x139   : > { %3002 = vmatprep.subr.bf16.mxu0 %v9285_v3  ;;  %3773 = vmatpush1.bf16.msra.mxu1 %v9316_v4  ;;  %v651_v2 = vld [vmem:[%s10731_s19 + $0x3f8] sm:$0xff]  ;;  %v658_v3 = vld [vmem:[%s10731_s19 + $0x430] sm:$0xff]  ;;  %v804_v55 = vpack.c.bf16 %v643_v0, %v636_v33  ;;  %v540_v0 = vld [vmem:[%s10731_s19 + $0x80] sm:$0xff] }
 0x13a   : > { %3774 = vmatprep.subr.bf16.mxu1 %v9321_v5  ;;  %v9349_v4 = vld [vmem:[%s13397_s2 + $0x3e0] ss:$16 sps:$4 sm:$0xff]   ;;  %v9355_v5 = vld [vmem:[%s13397_s2 + $0x3e8] ss:$16 sps:$4 sm:$0xff]   ;;  %v812_v6 = vpack.c.bf16 %v658_v3, %v651_v2 }
 0x13b   : > { %v9361_v33 = vld [vmem:[%s13397_s2 + $0x420] ss:$16 sps:$4 sm:$0xff]   ;;  %v547_v2 = vld [vmem:[%s10731_s19 + $0xb8] sm:$0xff] }
 0x13c   : > { %3003 = vmatpush1.bf16.msra.mxu0 %v9283_v9  ;;  %v650_v9 = vld [vmem:[%s10731_s19 + $0x3f0] sm:$0xff]  ;;  %v555_v3 = vld [vmem:[%s10731_s19 + $0xf8] sm:$0xff] }
 0x13d   : > { %3004 = vmatprep.subr.bf16.mxu0 %v9288_v10  ;;  %3775 = vmatpush1.bf16.msra.mxu1 %v9319_v11  ;;  %v657_v10 = vld [vmem:[%s10731_s19 + $0x428] sm:$0xff] }
 0x13e   : > { %2868 = vmatmul.mubr.bf16.gmra.mrb[16].mxu0 %v776_v49  ;;  %3640 = vmatmul.mubr.bf16.gmra.mrb[16].mxu1 %v776_v49  ;;  %v665_v11 = vld [vmem:[%s10731_s19 + $0x468] sm:$0xff]  ;;  %v672_v49 = vld [vmem:[%s10731_s19 + $0x4a0] sm:$0xff] }
 0x13f   : > { %2877 = vmatprep.mubr.bf16.mxu0 %v784_v61  ;;  %3649 = vmatprep.mubr.bf16.mxu1 %v784_v61  ;;  %v811_v61 = vpack.c.bf16 %v657_v10, %v650_v9  ;;  %v9396_v9 = vld [vmem:[%s13397_s2 + $0x44c] ss:$16 sps:$4 sm:$0xff]   ;;  %v9369_v10 = vld [vmem:[%s13397_s2 + $0x464] ss:$16 sps:$4 sm:$0xff]  }
 0x140   : > { %3005 = vmatpush1.bf16.msra.mxu0 %v9286_v8  ;;  %3776 = vmatprep.subr.bf16.mxu1 %v9327_v12  ;;  %v819_v8 = vpack.c.bf16 %v672_v49, %v665_v11  ;;  %v664_v12 = vld [vmem:[%s10731_s19 + $0x460] sm:$0xff]  ;;  %v9394_v11 = vld [vmem:[%s13397_s2 + $0x448] ss:$16 sps:$4 sm:$0xff]   ;;  %v9399_v49 = vld [vmem:[%s13397_s2 + $0x46c] ss:$16 sps:$4 sm:$0xff]  }
 0x141   : > { %3006 = vmatprep.subr.bf16.mxu0 %v9297_v13  ;;  %3777 = vmatpush1.bf16.msra.mxu1 %v9325_v14  ;;  %v671_v13 = vld [vmem:[%s10731_s19 + $0x498] sm:$0xff] }
 0x142   : > { %3778 = vmatprep.subr.bf16.mxu1 %v9330_v15  ;;  %v679_v14 = vld [vmem:[%s10731_s19 + $0x4d8] sm:$0xff]  ;;  %v686_v15 = vld [vmem:[%s10731_s19 + $0x510] sm:$0xff]  ;;  %v818_v16 = vpack.c.bf16 %v671_v13, %v664_v12  ;;  %v569_v12 = vld [vmem:[%s10731_s19 + $0x168] sm:$0xff] }
 0x143   : > { %v826_v17 = vpack.c.bf16 %v686_v15, %v679_v14  ;;  %v576_v13 = vld [vmem:[%s10731_s19 + $0x1a0] sm:$0xff] }
 0x144   : > { %3007 = vmatpush1.bf16.msra.mxu0 %v9295_v20  ;;  %v693_v20 = vld [vmem:[%s10731_s19 + $0x548] sm:$0xff]  ;;  %v9367_v14 = vld [vmem:[%s13397_s2 + $0x460] ss:$16 sps:$4 sm:$0xff]   ;;  %v9372_v15 = vld [vmem:[%s13397_s2 + $0x484] ss:$16 sps:$4 sm:$0xff]  }
 0x145   : > { %3008 = vmatprep.subr.bf16.mxu0 %v9306_v21  ;;  %3779 = vmatpush1.bf16.msra.mxu1 %v9328_v22  ;;  %v700_v21 = vld [vmem:[%s10731_s19 + $0x580] sm:$0xff]  ;;  %v825_v22 = vpack.c.bf16 %v685_v19, %v678_v18  ;;  %v772_v18 = vpack.c.bf16 %v576_v13, %v569_v12 }
 0x146   : > { %2878 = vmatmul.mubr.bf16.gmra.mrb[20].mxu0 %v783_v23  ;;  %3650 = vmatmul.mubr.bf16.gmra.mrb[20].mxu1 %v783_v23  ;;  %v833_v23 = vpack.c.bf16 %v700_v21, %v693_v20  ;;  %v9370_v19 = vld [vmem:[%s13397_s2 + $0x480] ss:$16 sps:$4 sm:$0xff]   ;;  %v9405_v20 = vld [vmem:[%s13397_s2 + $0x48c] ss:$16 sps:$4 sm:$0xff]   ;;  %v9375_v21 = vld [vmem:[%s13397_s2 + $0x4a4] ss:$16 sps:$4 sm:$0xff]  }
 0x147   : > { %2887 = vmatprep.mubr.bf16.mxu0 %v791_v24  ;;  %3659 = vmatprep.mubr.bf16.mxu1 %v791_v24  ;;  %v692_v24 = vld [vmem:[%s10731_s19 + $0x540] sm:$0xff] }
 0x148   : > { %3009 = vmatpush1.bf16.msra.mxu0 %v9304_v27  ;;  %3780 = vmatprep.subr.bf16.mxu1 %v9336_v28  ;;  %v699_v27 = vld [vmem:[%s10731_s19 + $0x578] sm:$0xff]  ;;  %v9418_v13 = vld [vmem:[%s13397_s2 + $0x580] ss:$16 sps:$4 sm:$0xff]  }
 0x149   : > { %3010 = vmatprep.subr.bf16.mxu0 %v9315_v29  ;;  %3781 = vmatpush1.bf16.msra.mxu1 %v9334_v30  ;;  %v707_v28 = vld [vmem:[%s10731_s19 + $0x5b8] sm:$0xff]  ;;  %v714_v29 = vld [vmem:[%s10731_s19 + $0x5f0] sm:$0xff]  ;;  %v832_v30 = vpack.c.bf16 %v699_v27, %v692_v24  ;;  %v568_v24 = vld [vmem:[%s10731_s19 + $0x160] sm:$0xff] }
 0x14a   : > { %3782 = vmatprep.subr.bf16.mxu1 %v9339_v26  ;;  %v840_v26 = vpack.c.bf16 %v714_v29, %v707_v28  ;;  %v575_v27 = vld [vmem:[%s10731_s19 + $0x198] sm:$0xff]  ;;  %v590_v29 = vld [vmem:[%s10731_s19 + $0x210] sm:$0xff] }
 0x14b   : > { %v583_v28 = vld [vmem:[%s10731_s19 + $0x1d8] sm:$0xff] }
 0x14c   : > { %3011 = vmatpush1.bf16.msra.mxu0 %v9313_v37  ;;  %v839_v37 = vpack.c.bf16 %v713_v32, %v706_v31  ;;  %v9406_v31 = vld [vmem:[%s13397_s2 + $0x4a8] ss:$16 sps:$4 sm:$0xff]   ;;  %v771_v32 = vpack.c.bf16 %v575_v27, %v568_v24 }
 0x14d   : > { %3012 = vmatprep.subr.bf16.mxu0 %v9324_v38  ;;  %3783 = vmatpush1.bf16.msra.mxu1 %v9337_v39  ;;  %v847_v38 = vpack.c.bf16 %v728_v36, %v721_v35  ;;  %v720_v39 = vld [vmem:[%s10731_s19 + $0x620] sm:$0xff]  ;;  %v779_v35 = vpack.c.bf16 %v590_v29, %v583_v28  ;;  %v9442_v24 = vld [vmem:[%s13397_s2 + $0x5a8] ss:$16 sps:$4 sm:$0xff]  }
 0x14e   : > { %2888 = vmatmul.mubr.bf16.gmra.mrb[24].mxu0 %v790_v25  ;;  %3660 = vmatmul.mubr.bf16.gmra.mrb[24].mxu1 %v790_v25  ;;  %v727_v25 = vld [vmem:[%s10731_s19 + $0x658] sm:$0xff]  ;;  %v9376_v36 = vld [vmem:[%s13397_s2 + $0x4c0] ss:$16 sps:$4 sm:$0xff]  }
 0x14f   : > { %2897 = vmatprep.mubr.bf16.mxu0 %v798_v40  ;;  %3669 = vmatprep.mubr.bf16.mxu1 %v798_v40  ;;  %v735_v40 = vld [vmem:[%s10731_s19 + $0x698] sm:$0xff]  ;;  %v9436_v29 = vld [vmem:[%s13397_s2 + $0x5c0] ss:$16 sps:$4 sm:$0xff]  }
 0x150   : > { %3013 = vmatpush1.bf16.msra.mxu0 %v9322_v41  ;;  %3784 = vmatprep.subr.bf16.mxu1 %v9345_v42  ;;  %v742_v41 = vld [vmem:[%s10731_s19 + $0x6d0] sm:$0xff]  ;;  %v846_v42 = vpack.c.bf16 %v727_v25, %v720_v39  ;;  %v9412_v39 = vld [vmem:[%s13397_s2 + $0x4c8] ss:$16 sps:$4 sm:$0xff]   ;;  %v9417_v25 = vld [vmem:[%s13397_s2 + $0x4ec] ss:$16 sps:$4 sm:$0xff]  }
 0x151   : > { %3014 = vmatprep.subr.bf16.mxu0 %v9333_v43  ;;  %3785 = vmatpush1.bf16.msra.mxu1 %v9343_v44  ;;  %v854_v43 = vpack.c.bf16 %v742_v41, %v735_v40  ;;  %v734_v44 = vld [vmem:[%s10731_s19 + $0x690] sm:$0xff]  ;;  %v589_v41 = vld [vmem:[%s10731_s19 + $0x208] sm:$0xff] }
 0x152   : > { %3786 = vmatprep.subr.bf16.mxu1 %v9348_v45  ;;  %v741_v45 = vld [vmem:[%s10731_s19 + $0x6c8] sm:$0xff]  ;;  %v582_v40 = vld [vmem:[%s10731_s19 + $0x1d0] sm:$0xff] }
 0x153   : > { %v853_v51 = vpack.c.bf16 %v741_v45, %v734_v44  ;;  %v9379_v44 = vld [vmem:[%s13397_s2 + $0x4e0] ss:$16 sps:$4 sm:$0xff]   ;;  %v9384_v45 = vld [vmem:[%s13397_s2 + $0x504] ss:$16 sps:$4 sm:$0xff]   ;;  %v778_v50 = vpack.c.bf16 %v589_v41, %v582_v40 }
 0x154   : > { %3015 = vmatpush1.bf16.msra.mxu0 %v9331_v53  ;;  %v526_v53 = vld [vmem:[%s10731_s19 + $0x10] sm:$0xff] }
 0x155   : > { %3016 = vmatprep.subr.bf16.mxu0 %v9342_v54  ;;  %3787 = vmatpush1.bf16.msra.mxu1 %v9346_v34  ;;  %v533_v54 = vld [vmem:[%s10731_s19 + $0x48] sm:$0xff]  ;;  %v9456_v40 = vld [vmem:[%s13397_s2 + $0x604] ss:$16 sps:$4 sm:$0xff]  }
 0x156   : > { %2898 = vmatmul.mubr.bf16.gmra.mrb[28].mxu0 %v797_v56  ;;  %3670 = vmatmul.mubr.bf16.gmra.mrb[28].mxu1 %v797_v56  ;;  %v541_v34 = vld [vmem:[%s10731_s19 + $0x88] sm:$0xff]  ;;  %v548_v56 = vld [vmem:[%s10731_s19 + $0xc0] sm:$0xff] }
 0x157   : > { %2907 = vmatprep.mubr.bf16.mxu0 %v805_v57  ;;  %3679 = vmatprep.mubr.bf16.mxu1 %v805_v57  ;;  %v750_v57 = vpack.c.bf16 %v533_v54, %v526_v53  ;;  %v9423_v53 = vld [vmem:[%s13397_s2 + $0x50c] ss:$16 sps:$4 sm:$0xff]   ;;  %v9393_v54 = vld [vmem:[%s13397_s2 + $0x524] ss:$16 sps:$4 sm:$0xff]  }
 0x158   : > { %3017 = vmatpush1.bf16.msra.mxu0 %v9340_v58  ;;  %3788 = vmatprep.subr.bf16.mxu1 %v9354_v59  ;;  %v9358_v58 = vld [vmem:[%s13397_s2 + $0x400] ss:$16 sps:$4 sm:$0xff]   ;;  %v758_v59 = vpack.c.bf16 %v548_v56, %v541_v34  ;;  %v9421_v34 = vld [vmem:[%s13397_s2 + $0x508] ss:$16 sps:$4 sm:$0xff]   ;;  %v9426_v56 = vld [vmem:[%s13397_s2 + $0x52c] ss:$16 sps:$4 sm:$0xff]  }
 0x159   : > { %3018 = vmatprep.subr.bf16.mxu0 %v9351_v60  ;;  %3789 = vmatpush1.bf16.msra.mxu1 %v9352_v62  ;;  %v9363_v60 = vld [vmem:[%s13397_s2 + $0x424] ss:$16 sps:$4 sm:$0xff]   ;;  %v9385_v62 = vld [vmem:[%s13397_s2 + $0x408] ss:$16 sps:$4 sm:$0xff]  }
 0x15a   : > { %3790 = vmatprep.subr.bf16.mxu1 %v9357_v63  ;;  %v9390_v63 = vld [vmem:[%s13397_s2 + $0x42c] ss:$16 sps:$4 sm:$0xff]  }
 0x15c   : > { %3019 = vmatpush1.bf16.msra.mxu0 %v9349_v4  ;;  %v562_v4 = vld [vmem:[%s10731_s19 + $0x130] sm:$0xff] }
 0x15d   : > { %3791 = vmatpush1.bf16.msra.mxu1 %v9355_v5  ;;  %3181 = vmatprep.subr.bf16.mxu0 %v9360_v48  ;;  %v9366_v5 = vld [vmem:[%s13397_s2 + $0x444] ss:$16 sps:$4 sm:$0xff]   ;;  %v9388_v48 = vld [vmem:[%s13397_s2 + $0x428] ss:$16 sps:$4 sm:$0xff]  }
 0x15e   : > { %2908 = vmatmul.mubr.bf16.gmra.mrb[32].mxu0 %v804_v55  ;;  %3680 = vmatmul.mubr.bf16.gmra.mrb[32].mxu1 %v804_v55  ;;  %v757_v55 = vpack.c.bf16 %v547_v2, %v540_v0 }
 0x15f   : > { %2917 = vmatprep.mubr.bf16.mxu0 %v812_v6  ;;  %3689 = vmatprep.mubr.bf16.mxu1 %v812_v6  ;;  %v765_v6 = vpack.c.bf16 %v562_v4, %v555_v3  ;;  %v9400_v3 = vld [vmem:[%s13397_s2 + $0x540] ss:$16 sps:$4 sm:$0xff]   ;;  %v9432_v4 = vld [vmem:[%s13397_s2 + $0x54c] ss:$16 sps:$4 sm:$0xff]  }
 0x160   : > { %3953 = vmatprep.subr.bf16.mxu1 %v9387_v7  ;;  %v9364_v7 = vld [vmem:[%s13397_s2 + $0x440] ss:$16 sps:$4 sm:$0xff]  }
 0x166   : > { %2918 = vmatmul.mubr.bf16.gmra.mrb[36].mxu0 %v811_v61  ;;  %3690 = vmatmul.mubr.bf16.gmra.mrb[36].mxu1 %v811_v61  ;;  %v554_v61 = vld [vmem:[%s10731_s19 + $0xf0] sm:$0xff] }
 0x167   : > { %2927 = vmatprep.mubr.bf16.mxu0 %v819_v8  ;;  %3699 = vmatprep.mubr.bf16.mxu1 %v819_v8  ;;  %v561_v8 = vld [vmem:[%s10731_s19 + $0x128] sm:$0xff] }
 0x16e   : > { %2928 = vmatmul.mubr.bf16.gmra.mrb[40].mxu0 %v818_v16  ;;  %3700 = vmatmul.mubr.bf16.gmra.mrb[40].mxu1 %v818_v16  ;;  %v9397_v16 = vld [vmem:[%s13397_s2 + $0x468] ss:$16 sps:$4 sm:$0xff]  }
 0x16f   : > { %2937 = vmatprep.mubr.bf16.mxu0 %v826_v17  ;;  %3709 = vmatprep.mubr.bf16.mxu1 %v826_v17  ;;  %v764_v17 = vpack.c.bf16 %v561_v8, %v554_v61  ;;  %v9433_v61 = vld [vmem:[%s13397_s2 + $0x568] ss:$16 sps:$4 sm:$0xff]  }
 0x176   : > { %2938 = vmatmul.mubr.bf16.gmra.mrb[44].mxu0 %v825_v22  ;;  %3710 = vmatmul.mubr.bf16.gmra.mrb[44].mxu1 %v825_v22  ;;  %v9403_v22 = vld [vmem:[%s13397_s2 + $0x488] ss:$16 sps:$4 sm:$0xff]  }
 0x177   : > { %2947 = vmatprep.mubr.bf16.mxu0 %v833_v23  ;;  %3719 = vmatprep.mubr.bf16.mxu1 %v833_v23  ;;  %v9408_v23 = vld [vmem:[%s13397_s2 + $0x4ac] ss:$16 sps:$4 sm:$0xff]  }
 0x17e   : > { %2948 = vmatmul.mubr.bf16.gmra.mrb[48].mxu0 %v832_v30  ;;  %3720 = vmatmul.mubr.bf16.gmra.mrb[48].mxu1 %v832_v30  ;;  %v9373_v30 = vld [vmem:[%s13397_s2 + $0x4a0] ss:$16 sps:$4 sm:$0xff]  }
 0x17f   : > { %2957 = vmatprep.mubr.bf16.mxu0 %v840_v26  ;;  %3729 = vmatprep.mubr.bf16.mxu1 %v840_v26  ;;  %v9378_v26 = vld [vmem:[%s13397_s2 + $0x4c4] ss:$16 sps:$4 sm:$0xff]  }
 0x186   : > { %2958 = vmatmul.mubr.bf16.gmra.mrb[52].mxu0 %v839_v37  ;;  %3730 = vmatmul.mubr.bf16.gmra.mrb[52].mxu1 %v839_v37  ;;  %v9414_v37 = vld [vmem:[%s13397_s2 + $0x4cc] ss:$16 sps:$4 sm:$0xff]  }
 0x187   : > { %2967 = vmatprep.mubr.bf16.mxu0 %v847_v38  ;;  %3739 = vmatprep.mubr.bf16.mxu1 %v847_v38  ;;  %v9381_v38 = vld [vmem:[%s13397_s2 + $0x4e4] ss:$16 sps:$4 sm:$0xff]  }
 0x18e   : > { %2968 = vmatmul.mubr.bf16.gmra.mrb[56].mxu0 %v846_v42  ;;  %3740 = vmatmul.mubr.bf16.gmra.mrb[56].mxu1 %v846_v42  ;;  %v597_v42 = vld [vmem:[%s10731_s19 + $0x248] sm:$0xff] }
 0x18f   : > { %2977 = vmatprep.mubr.bf16.mxu0 %v854_v43  ;;  %3749 = vmatprep.mubr.bf16.mxu1 %v854_v43  ;;  %v604_v43 = vld [vmem:[%s10731_s19 + $0x280] sm:$0xff] }
 0x196   : > { %2978 = vmatmul.mubr.bf16.gmra.mrb[60].mxu0 %v853_v51  ;;  %3750 = vmatmul.mubr.bf16.gmra.mrb[60].mxu1 %v853_v51  ;;  %v786_v51 = vpack.c.bf16 %v604_v43, %v597_v42  ;;  %v652_v43 = vld [vmem:[%s10731_s19 + $0x400] sm:$0xff] }
 0x197   : > { %3020 = vmatprep.mubr.bf16.mxu0 %v751_v52  ;;  %3792 = vmatprep.mubr.bf16.mxu1 %v751_v52  ;;  %v9382_v52 = vld [vmem:[%s13397_s2 + $0x500] ss:$16 sps:$4 sm:$0xff]  }
 0x19e   : > { %3021 = vmatmul.mubr.bf16.vlgmr.msra.gmra.mrb[0].mxu0 %v750_v57  ;;  %3793 = vmatmul.mubr.bf16.vlgmr.msra.gmra.mrb[0].mxu1 %v750_v57  ;;  %v596_v57 = vld [vmem:[%s10731_s19 + $0x240] sm:$0xff] }
 0x19f   : > { %3182 = vmatpush1.bf16.msra.mxu0 %v9358_v58  ;;  %3030 = vmatprep.mubr.bf16.mxu0 %v758_v59  ;;  %v603_v58 = vld [vmem:[%s10731_s19 + $0x278] sm:$0xff] }
 0x1a0   : > { %3183 = vmatprep.subr.bf16.mxu0 %v9363_v60  ;;  %3802 = vmatprep.mubr.bf16.mxu1 %v758_v59  ;;  %v611_v59 = vld [vmem:[%s10731_s19 + $0x2b8] sm:$0xff]  ;;  %v618_v60 = vld [vmem:[%s10731_s19 + $0x2f0] sm:$0xff]  ;;  %v785_v0 = vpack.c.bf16 %v603_v58, %v596_v57  ;;  %v680_v58 = vld [vmem:[%s10731_s19 + $0x4e0] sm:$0xff] }
 0x1a1   : > { %3954 = vmatpush1.bf16.msra.mxu1 %v9385_v62  ;;  %v9391_v62 = vld [vmem:[%s13397_s2 + $0x520] ss:$16 sps:$4 sm:$0xff]   ;;  %v793_v2 = vpack.c.bf16 %v618_v60, %v611_v59  ;;  %v687_v59 = vld [vmem:[%s10731_s19 + $0x518] sm:$0xff] }
 0x1a2   : > { %3955 = vmatprep.subr.bf16.mxu1 %v9390_v63  ;;  %v9402_v63 = vld [vmem:[%s13397_s2 + $0x544] ss:$16 sps:$4 sm:$0xff]   ;;  %v695_v60 = vld [vmem:[%s10731_s19 + $0x558] sm:$0xff] }
 0x1a3   : > { %3184 = vmatpush1.bf16.msra.mxu0 %v9361_v33  ;;  %v9424_v33 = vld [vmem:[%s13397_s2 + $0x528] ss:$16 sps:$4 sm:$0xff]  }
 0x1a4   : > { %3185 = vmatprep.subr.bf16.mxu0 %v9366_v5  ;;  %v9411_v5 = vld [vmem:[%s13397_s2 + $0x564] ss:$16 sps:$4 sm:$0xff]  }
 0x1a5   : > { %3956 = vmatpush1.bf16.msra.mxu1 %v9388_v48  ;;  %v9430_v48 = vld [vmem:[%s13397_s2 + $0x548] ss:$16 sps:$4 sm:$0xff]  }
 0x1a6   : > { %3031 = vmatmul.mubr.bf16.gmra.mrb[4].mxu0 %v757_v55  ;;  %3803 = vmatmul.mubr.bf16.gmra.mrb[4].mxu1 %v757_v55  ;;  %v9435_v55 = vld [vmem:[%s13397_s2 + $0x56c] ss:$16 sps:$4 sm:$0xff]  }
 0x1a7   : > { %3040 = vmatprep.mubr.bf16.mxu0 %v765_v6  ;;  %3812 = vmatprep.mubr.bf16.mxu1 %v765_v6  ;;  %v610_v6 = vld [vmem:[%s10731_s19 + $0x2b0] sm:$0xff] }
 0x1a8   : > { %3186 = vmatpush1.bf16.msra.mxu0 %v9364_v7  ;;  %3957 = vmatprep.subr.bf16.mxu1 %v9396_v9  ;;  %v617_v7 = vld [vmem:[%s10731_s19 + $0x2e8] sm:$0xff] }
 0x1a9   : > { %3187 = vmatprep.subr.bf16.mxu0 %v9369_v10  ;;  %3958 = vmatpush1.bf16.msra.mxu1 %v9394_v11  ;;  %v625_v9 = vld [vmem:[%s10731_s19 + $0x328] sm:$0xff]  ;;  %v632_v10 = vld [vmem:[%s10731_s19 + $0x360] sm:$0xff]  ;;  %v792_v8 = vpack.c.bf16 %v617_v7, %v610_v6  ;;  %v715_v6 = vld [vmem:[%s10731_s19 + $0x5f8] sm:$0xff] }
 0x1aa   : > { %3959 = vmatprep.subr.bf16.mxu1 %v9399_v49  ;;  %v9409_v11 = vld [vmem:[%s13397_s2 + $0x560] ss:$16 sps:$4 sm:$0xff]   ;;  %v9420_v49 = vld [vmem:[%s13397_s2 + $0x584] ss:$16 sps:$4 sm:$0xff]   ;;  %v800_v12 = vpack.c.bf16 %v632_v10, %v625_v9  ;;  %v723_v7 = vld [vmem:[%s10731_s19 + $0x638] sm:$0xff] }
 0x1ab   : > { %v730_v9 = vld [vmem:[%s10731_s19 + $0x670] sm:$0xff] }
 0x1ac   : > { %3188 = vmatpush1.bf16.msra.mxu0 %v9367_v14  ;;  %v9441_v14 = vld [vmem:[%s13397_s2 + $0x58c] ss:$16 sps:$4 sm:$0xff]  }
 0x1ad   : > { %3189 = vmatprep.subr.bf16.mxu0 %v9372_v15  ;;  %3960 = vmatpush1.bf16.msra.mxu1 %v9397_v16  ;;  %v9429_v15 = vld [vmem:[%s13397_s2 + $0x5a4] ss:$16 sps:$4 sm:$0xff]   ;;  %v9439_v16 = vld [vmem:[%s13397_s2 + $0x588] ss:$16 sps:$4 sm:$0xff]  }
 0x1ae   : > { %3041 = vmatmul.mubr.bf16.gmra.mrb[8].mxu0 %v764_v17  ;;  %3813 = vmatmul.mubr.bf16.gmra.mrb[8].mxu1 %v764_v17  ;;  %v9444_v17 = vld [vmem:[%s13397_s2 + $0x5ac] ss:$16 sps:$4 sm:$0xff]  }
 0x1af   : > { %3050 = vmatprep.mubr.bf16.mxu0 %v772_v18  ;;  %3822 = vmatprep.mubr.bf16.mxu1 %v772_v18  ;;  %v624_v18 = vld [vmem:[%s10731_s19 + $0x320] sm:$0xff] }
 0x1b0   : > { %3190 = vmatpush1.bf16.msra.mxu0 %v9370_v19  ;;  %3961 = vmatprep.subr.bf16.mxu1 %v9405_v20  ;;  %v631_v19 = vld [vmem:[%s10731_s19 + $0x358] sm:$0xff] }
 0x1b1   : > { %3191 = vmatprep.subr.bf16.mxu0 %v9375_v21  ;;  %3962 = vmatpush1.bf16.msra.mxu1 %v9403_v22  ;;  %v639_v20 = vld [vmem:[%s10731_s19 + $0x398] sm:$0xff]  ;;  %v646_v21 = vld [vmem:[%s10731_s19 + $0x3d0] sm:$0xff]  ;;  %v799_v27 = vpack.c.bf16 %v631_v19, %v624_v18  ;;  %v536_v18 = vld [vmem:[%s10731_s19 + $0x60] sm:$0xff] }
 0x1b2   : > { %3963 = vmatprep.subr.bf16.mxu1 %v9408_v23  ;;  %v9427_v22 = vld [vmem:[%s13397_s2 + $0x5a0] ss:$16 sps:$4 sm:$0xff]   ;;  %v9438_v23 = vld [vmem:[%s13397_s2 + $0x5c4] ss:$16 sps:$4 sm:$0xff]   ;;  %v807_v28 = vpack.c.bf16 %v646_v21, %v639_v20  ;;  %v9459_v21 = vld [vmem:[%s13397_s2 + $0x60c] ss:$16 sps:$4 sm:$0xff]  }
 0x1b4   : > { %3192 = vmatpush1.bf16.msra.mxu0 %v9373_v30  ;;  %v9450_v30 = vld [vmem:[%s13397_s2 + $0x5cc] ss:$16 sps:$4 sm:$0xff]  }
 0x1b5   : > { %3193 = vmatprep.subr.bf16.mxu0 %v9378_v26  ;;  %3964 = vmatpush1.bf16.msra.mxu1 %v9406_v31  ;;  %v9447_v26 = vld [vmem:[%s13397_s2 + $0x5e4] ss:$16 sps:$4 sm:$0xff]   ;;  %v9448_v31 = vld [vmem:[%s13397_s2 + $0x5c8] ss:$16 sps:$4 sm:$0xff]  }
 0x1b6   : > { %3051 = vmatmul.mubr.bf16.gmra.mrb[12].mxu0 %v771_v32  ;;  %3823 = vmatmul.mubr.bf16.gmra.mrb[12].mxu1 %v771_v32  ;;  %v9453_v32 = vld [vmem:[%s13397_s2 + $0x5ec] ss:$16 sps:$4 sm:$0xff]  }
 0x1b7   : > { %3060 = vmatprep.mubr.bf16.mxu0 %v779_v35  ;;  %3832 = vmatprep.mubr.bf16.mxu1 %v779_v35  ;;  %v638_v35 = vld [vmem:[%s10731_s19 + $0x390] sm:$0xff] }
 0x1b8   : > { %3194 = vmatpush1.bf16.msra.mxu0 %v9376_v36  ;;  %3965 = vmatprep.subr.bf16.mxu1 %v9414_v37  ;;  %v645_v36 = vld [vmem:[%s10731_s19 + $0x3c8] sm:$0xff] }
 0x1b9   : > { %3195 = vmatprep.subr.bf16.mxu0 %v9381_v38  ;;  %3966 = vmatpush1.bf16.msra.mxu1 %v9412_v39  ;;  %v653_v37 = vld [vmem:[%s10731_s19 + $0x408] sm:$0xff]  ;;  %v660_v38 = vld [vmem:[%s10731_s19 + $0x440] sm:$0xff]  ;;  %v806_v41 = vpack.c.bf16 %v645_v36, %v638_v35 }
 0x1ba   : > { %3967 = vmatprep.subr.bf16.mxu1 %v9417_v25  ;;  %v9445_v39 = vld [vmem:[%s13397_s2 + $0x5e0] ss:$16 sps:$4 sm:$0xff]   ;;  %v9451_v25 = vld [vmem:[%s13397_s2 + $0x5e8] ss:$16 sps:$4 sm:$0xff]   ;;  %v814_v42 = vpack.c.bf16 %v660_v38, %v653_v37 }
 0x1bb   : > { %v557_v35 = vld [vmem:[%s10731_s19 + $0x108] sm:$0xff]  ;;  %v564_v36 = vld [vmem:[%s10731_s19 + $0x140] sm:$0xff] }
 0x1bc   : > { %3196 = vmatpush1.bf16.msra.mxu0 %v9379_v44  ;;  %v659_v44 = vld [vmem:[%s10731_s19 + $0x438] sm:$0xff]  ;;  %v767_v38 = vpack.c.bf16 %v564_v36, %v557_v35 }
 0x1bd   : > { %3197 = vmatprep.subr.bf16.mxu0 %v9384_v45  ;;  %3968 = vmatpush1.bf16.msra.mxu1 %v9415_v46  ;;  %v667_v45 = vld [vmem:[%s10731_s19 + $0x478] sm:$0xff]  ;;  %v674_v46 = vld [vmem:[%s10731_s19 + $0x4b0] sm:$0xff] }
 0x1be   : > { %3061 = vmatmul.mubr.bf16.gmra.mrb[16].mxu0 %v778_v50  ;;  %3833 = vmatmul.mubr.bf16.gmra.mrb[16].mxu1 %v778_v50  ;;  %v813_v50 = vpack.c.bf16 %v659_v44, %v652_v43  ;;  %v570_v44 = vld [vmem:[%s10731_s19 + $0x170] sm:$0xff] }
 0x1bf   : > { %3070 = vmatprep.mubr.bf16.mxu0 %v786_v51  ;;  %3842 = vmatprep.mubr.bf16.mxu1 %v786_v51  ;;  %v821_v51 = vpack.c.bf16 %v674_v46, %v667_v45  ;;  %v577_v45 = vld [vmem:[%s10731_s19 + $0x1a8] sm:$0xff] }
 0x1c0   : > { %3198 = vmatpush1.bf16.msra.mxu0 %v9382_v52  ;;  %3969 = vmatprep.subr.bf16.mxu1 %v9423_v53  ;;  %v666_v52 = vld [vmem:[%s10731_s19 + $0x470] sm:$0xff]  ;;  %v673_v53 = vld [vmem:[%s10731_s19 + $0x4a8] sm:$0xff] }
 0x1c1   : > { %3199 = vmatprep.subr.bf16.mxu0 %v9393_v54  ;;  %3970 = vmatpush1.bf16.msra.mxu1 %v9421_v34  ;;  %v681_v54 = vld [vmem:[%s10731_s19 + $0x4e8] sm:$0xff]  ;;  %v688_v34 = vld [vmem:[%s10731_s19 + $0x520] sm:$0xff] }
 0x1c2   : > { %3971 = vmatprep.subr.bf16.mxu1 %v9426_v56  ;;  %v820_v56 = vpack.c.bf16 %v673_v53, %v666_v52  ;;  %v828_v57 = vpack.c.bf16 %v688_v34, %v681_v54  ;;  %v585_v46 = vld [vmem:[%s10731_s19 + $0x1e8] sm:$0xff]  ;;  %v584_v53 = vld [vmem:[%s10731_s19 + $0x1e0] sm:$0xff]  ;;  %v591_v54 = vld [vmem:[%s10731_s19 + $0x218] sm:$0xff] }
 0x1c3   : > { %v599_v34 = vld [vmem:[%s10731_s19 + $0x258] sm:$0xff] }
 0x1c4   : > { %3200 = vmatpush1.bf16.msra.mxu0 %v9391_v62  ;;  %v702_v62 = vld [vmem:[%s10731_s19 + $0x590] sm:$0xff] }
 0x1c5   : > { %3201 = vmatprep.subr.bf16.mxu0 %v9402_v63  ;;  %3972 = vmatpush1.bf16.msra.mxu1 %v9424_v33  ;;  %v827_v63 = vpack.c.bf16 %v687_v59, %v680_v58  ;;  %v835_v33 = vpack.c.bf16 %v702_v62, %v695_v60  ;;  %v598_v59 = vld [vmem:[%s10731_s19 + $0x250] sm:$0xff]  ;;  %v605_v60 = vld [vmem:[%s10731_s19 + $0x288] sm:$0xff] }
 0x1c6   : > { %3071 = vmatmul.mubr.bf16.gmra.mrb[20].mxu0 %v785_v0  ;;  %3843 = vmatmul.mubr.bf16.gmra.mrb[20].mxu1 %v785_v0  ;;  %v694_v0 = vld [vmem:[%s10731_s19 + $0x550] sm:$0xff]  ;;  %v613_v62 = vld [vmem:[%s10731_s19 + $0x2c8] sm:$0xff] }
 0x1c7   : > { %3080 = vmatprep.mubr.bf16.mxu0 %v793_v2  ;;  %3852 = vmatprep.mubr.bf16.mxu1 %v793_v2  ;;  %v701_v2 = vld [vmem:[%s10731_s19 + $0x588] sm:$0xff] }
 0x1c8   : > { %3202 = vmatpush1.bf16.msra.mxu0 %v9400_v3  ;;  %3973 = vmatprep.subr.bf16.mxu1 %v9432_v4  ;;  %v709_v3 = vld [vmem:[%s10731_s19 + $0x5c8] sm:$0xff]  ;;  %v716_v4 = vld [vmem:[%s10731_s19 + $0x600] sm:$0xff] }
 0x1c9   : > { %3203 = vmatprep.subr.bf16.mxu0 %v9411_v5  ;;  %3974 = vmatpush1.bf16.msra.mxu1 %v9430_v48  ;;  %v834_v5 = vpack.c.bf16 %v701_v2, %v694_v0  ;;  %v842_v48 = vpack.c.bf16 %v716_v4, %v709_v3  ;;  %v612_v2 = vld [vmem:[%s10731_s19 + $0x2c0] sm:$0xff]  ;;  %v619_v3 = vld [vmem:[%s10731_s19 + $0x2f8] sm:$0xff] }
 0x1ca   : > { %3975 = vmatprep.subr.bf16.mxu1 %v9435_v55  ;;  %v708_v55 = vld [vmem:[%s10731_s19 + $0x5c0] sm:$0xff]  ;;  %v627_v4 = vld [vmem:[%s10731_s19 + $0x338] sm:$0xff] }
 0x1cb   : > { %v841_v10 = vpack.c.bf16 %v715_v6, %v708_v55  ;;  %v626_v6 = vld [vmem:[%s10731_s19 + $0x330] sm:$0xff] }
 0x1cc   : > { %3204 = vmatpush1.bf16.msra.mxu0 %v9409_v11  ;;  %v849_v11 = vpack.c.bf16 %v730_v9, %v723_v7  ;;  %v633_v7 = vld [vmem:[%s10731_s19 + $0x368] sm:$0xff] }
 0x1cd   : > { %3205 = vmatprep.subr.bf16.mxu0 %v9420_v49  ;;  %3976 = vmatpush1.bf16.msra.mxu1 %v9433_v61  ;;  %v722_v49 = vld [vmem:[%s10731_s19 + $0x630] sm:$0xff]  ;;  %v729_v61 = vld [vmem:[%s10731_s19 + $0x668] sm:$0xff] }
 0x1ce   : > { %3081 = vmatmul.mubr.bf16.gmra.mrb[24].mxu0 %v792_v8  ;;  %3853 = vmatmul.mubr.bf16.gmra.mrb[24].mxu1 %v792_v8  ;;  %v737_v8 = vld [vmem:[%s10731_s19 + $0x6a8] sm:$0xff] }
 0x1cf   : > { %3090 = vmatprep.mubr.bf16.mxu0 %v800_v12  ;;  %3862 = vmatprep.mubr.bf16.mxu1 %v800_v12  ;;  %v744_v12 = vld [vmem:[%s10731_s19 + $0x6e0] sm:$0xff]  ;;  %v641_v9 = vld [vmem:[%s10731_s19 + $0x3a8] sm:$0xff] }
 0x1d0   : > { %3206 = vmatpush1.bf16.msra.mxu0 %v9418_v13  ;;  %3977 = vmatprep.subr.bf16.mxu1 %v9441_v14  ;;  %v848_v13 = vpack.c.bf16 %v729_v61, %v722_v49  ;;  %v856_v14 = vpack.c.bf16 %v744_v12, %v737_v8  ;;  %v640_v61 = vld [vmem:[%s10731_s19 + $0x3a0] sm:$0xff]  ;;  %v647_v8 = vld [vmem:[%s10731_s19 + $0x3d8] sm:$0xff] }
 0x1d1   : > { %3207 = vmatprep.subr.bf16.mxu0 %v9429_v15  ;;  %3978 = vmatpush1.bf16.msra.mxu1 %v9439_v16  ;;  %v736_v15 = vld [vmem:[%s10731_s19 + $0x6a0] sm:$0xff]  ;;  %v743_v16 = vld [vmem:[%s10731_s19 + $0x6d8] sm:$0xff] }
 0x1d2   : > { %3979 = vmatprep.subr.bf16.mxu1 %v9444_v17  ;;  %v529_v17 = vld [vmem:[%s10731_s19 + $0x28] sm:$0xff]  ;;  %v855_v19 = vpack.c.bf16 %v743_v16, %v736_v15  ;;  %v655_v12 = vld [vmem:[%s10731_s19 + $0x418] sm:$0xff]  ;;  %v654_v16 = vld [vmem:[%s10731_s19 + $0x410] sm:$0xff] }
 0x1d3   : > { %v753_v20 = vpack.c.bf16 %v536_v18, %v529_v17  ;;  %v661_v17 = vld [vmem:[%s10731_s19 + $0x448] sm:$0xff] }
 0x1d4   : > { %3208 = vmatpush1.bf16.msra.mxu0 %v9427_v22  ;;  %v528_v22 = vld [vmem:[%s10731_s19 + $0x20] sm:$0xff]  ;;  %v669_v18 = vld [vmem:[%s10731_s19 + $0x488] sm:$0xff] }
 0x1d5   : > { %3209 = vmatprep.subr.bf16.mxu0 %v9438_v23  ;;  %3980 = vmatpush1.bf16.msra.mxu1 %v9442_v24  ;;  %v535_v23 = vld [vmem:[%s10731_s19 + $0x58] sm:$0xff] }
 0x1d6   : > { %3091 = vmatmul.mubr.bf16.gmra.mrb[28].mxu0 %v799_v27  ;;  %3863 = vmatmul.mubr.bf16.gmra.mrb[28].mxu1 %v799_v27  ;;  %v543_v24 = vld [vmem:[%s10731_s19 + $0x98] sm:$0xff]  ;;  %v550_v27 = vld [vmem:[%s10731_s19 + $0xd0] sm:$0xff] }
 0x1d7   : > { %3100 = vmatprep.mubr.bf16.mxu0 %v807_v28  ;;  %3872 = vmatprep.mubr.bf16.mxu1 %v807_v28  ;;  %v752_v28 = vpack.c.bf16 %v535_v23, %v528_v22  ;;  %v668_v22 = vld [vmem:[%s10731_s19 + $0x480] sm:$0xff]  ;;  %v675_v23 = vld [vmem:[%s10731_s19 + $0x4b8] sm:$0xff] }
 0x1d8   : > { %3210 = vmatpush1.bf16.msra.mxu0 %v9436_v29  ;;  %3981 = vmatprep.subr.bf16.mxu1 %v9450_v30  ;;  %v9454_v29 = vld [vmem:[%s13397_s2 + $0x600] ss:$16 sps:$4 sm:$0xff]   ;;  %v760_v30 = vpack.c.bf16 %v550_v27, %v543_v24  ;;  %v683_v24 = vld [vmem:[%s10731_s19 + $0x4f8] sm:$0xff] }
 0x1d9   : > { %3211 = vmatprep.subr.bf16.mxu0 %v9447_v26  ;;  %3982 = vmatpush1.bf16.msra.mxu1 %v9448_v31  ;;  %v9457_v26 = vld [vmem:[%s13397_s2 + $0x608] ss:$16 sps:$4 sm:$0xff]   ;;  %v542_v31 = vld [vmem:[%s10731_s19 + $0x90] sm:$0xff] }
 0x1da   : > { %3983 = vmatprep.subr.bf16.mxu1 %v9453_v32  ;;  %v549_v32 = vld [vmem:[%s10731_s19 + $0xc8] sm:$0xff]  ;;  %v690_v27 = vld [vmem:[%s10731_s19 + $0x530] sm:$0xff] }
 0x1db   : > { %v759_v37 = vpack.c.bf16 %v549_v32, %v542_v31  ;;  %v697_v31 = vld [vmem:[%s10731_s19 + $0x568] sm:$0xff]  ;;  %v704_v32 = vld [vmem:[%s10731_s19 + $0x5a0] sm:$0xff] }
 0x1dc   : > { %3212 = vmatpush1.bf16.msra.mxu0 %v9445_v39  ;;  %v556_v39 = vld [vmem:[%s10731_s19 + $0x100] sm:$0xff]  ;;  %v837_v36 = vpack.c.bf16 %v704_v32, %v697_v31 }
 0x1dd   : > { %3984 = vmatpush1.bf16.msra.mxu1 %v9451_v25  ;;  %3374 = vmatprep.subr.bf16.mxu0 %v9456_v40  ;;  %v563_v25 = vld [vmem:[%s10731_s19 + $0x138] sm:$0xff]  ;;  %v9492_v31 = vld [vmem:[%s13400_s5 + $0xa4] ss:$8 sps:$4 sm:$0xff]  }
 0x1de   : > { %3101 = vmatmul.mubr.bf16.gmra.mrb[32].mxu0 %v806_v41  ;;  %3873 = vmatmul.mubr.bf16.gmra.mrb[32].mxu1 %v806_v41  ;;  %v571_v40 = vld [vmem:[%s10731_s19 + $0x178] sm:$0xff]  ;;  %v578_v41 = vld [vmem:[%s10731_s19 + $0x1b0] sm:$0xff] }
 0x1df   : > { %3110 = vmatprep.mubr.bf16.mxu0 %v814_v42  ;;  %3882 = vmatprep.mubr.bf16.mxu1 %v814_v42  ;;  %v766_v42 = vpack.c.bf16 %v563_v25, %v556_v39  ;;  %v774_v43 = vpack.c.bf16 %v578_v41, %v571_v40  ;;  %v711_v39 = vld [vmem:[%s10731_s19 + $0x5d8] sm:$0xff]  ;;  %v718_v25 = vld [vmem:[%s10731_s19 + $0x610] sm:$0xff] }
 0x1e0   : > { %4146 = vmatprep.subr.bf16.mxu1 %v9459_v21  ;;  %v844_v41 = vpack.c.bf16 %v718_v25, %v711_v39  ;;  %v9493_v39 = vld [vmem:[%s13400_s5 + $0xb0] ss:$8 sps:$4 sm:$0xff]   ;;  %v9498_v25 = vld [vmem:[%s13400_s5 + $0xc4] ss:$8 sps:$4 sm:$0xff]  }
 0x1e6   : > { %3111 = vmatmul.mubr.bf16.gmra.mrb[36].mxu0 %v813_v50  ;;  %3883 = vmatmul.mubr.bf16.gmra.mrb[36].mxu1 %v813_v50  ;;  %v592_v50 = vld [vmem:[%s10731_s19 + $0x220] sm:$0xff] }
 0x1e7   : > { %3120 = vmatprep.mubr.bf16.mxu0 %v821_v51  ;;  %3892 = vmatprep.mubr.bf16.mxu1 %v821_v51  ;;  %v773_v51 = vpack.c.bf16 %v577_v45, %v570_v44  ;;  %v781_v52 = vpack.c.bf16 %v592_v50, %v585_v46  ;;  %v725_v44 = vld [vmem:[%s10731_s19 + $0x648] sm:$0xff]  ;;  %v732_v45 = vld [vmem:[%s10731_s19 + $0x680] sm:$0xff] }
 0x1e8   : > { %v851_v50 = vpack.c.bf16 %v732_v45, %v725_v44  ;;  %v642_v45 = vld [vmem:[%s10731_s19 + $0x3b0] sm:$0xff] }
 0x1ee   : > { %3121 = vmatmul.mubr.bf16.gmra.mrb[40].mxu0 %v820_v56  ;;  %3893 = vmatmul.mubr.bf16.gmra.mrb[40].mxu1 %v820_v56  ;;  %v606_v56 = vld [vmem:[%s10731_s19 + $0x290] sm:$0xff] }
 0x1ef   : > { %3130 = vmatprep.mubr.bf16.mxu0 %v828_v57  ;;  %3902 = vmatprep.mubr.bf16.mxu1 %v828_v57  ;;  %v780_v57 = vpack.c.bf16 %v591_v54, %v584_v53  ;;  %v788_v58 = vpack.c.bf16 %v606_v56, %v599_v34  ;;  %v731_v53 = vld [vmem:[%s10731_s19 + $0x678] sm:$0xff]  ;;  %v746_v34 = vld [vmem:[%s10731_s19 + $0x6f0] sm:$0xff] }
 0x1f0   : > { %v739_v54 = vld [vmem:[%s10731_s19 + $0x6b8] sm:$0xff] }
 0x1f6   : > { %3131 = vmatmul.mubr.bf16.gmra.mrb[44].mxu0 %v827_v63  ;;  %3903 = vmatmul.mubr.bf16.gmra.mrb[44].mxu1 %v827_v63  ;;  %v620_v63 = vld [vmem:[%s10731_s19 + $0x300] sm:$0xff] }
 0x1f7   : > { %3140 = vmatprep.mubr.bf16.mxu0 %v835_v33  ;;  %3912 = vmatprep.mubr.bf16.mxu1 %v835_v33  ;;  %v787_v33 = vpack.c.bf16 %v605_v60, %v598_v59  ;;  %v795_v0 = vpack.c.bf16 %v620_v63, %v613_v62  ;;  %v745_v59 = vld [vmem:[%s10731_s19 + $0x6e8] sm:$0xff]  ;;  %v530_v62 = vld [vmem:[%s10731_s19 + $0x30] sm:$0xff] }
 0x1f8   : > { %v537_v63 = vld [vmem:[%s10731_s19 + $0x68] sm:$0xff] }
 0x1fe   : > { %3141 = vmatmul.mubr.bf16.gmra.mrb[48].mxu0 %v834_v5  ;;  %3913 = vmatmul.mubr.bf16.gmra.mrb[48].mxu1 %v834_v5  ;;  %v634_v5 = vld [vmem:[%s10731_s19 + $0x370] sm:$0xff] }
 0x1ff   : > { %3150 = vmatprep.mubr.bf16.mxu0 %v842_v48  ;;  %3922 = vmatprep.mubr.bf16.mxu1 %v842_v48  ;;  %v794_v48 = vpack.c.bf16 %v619_v3, %v612_v2  ;;  %v802_v55 = vpack.c.bf16 %v634_v5, %v627_v4  ;;  %v9465_v2 = vld [vmem:[%s13400_s5 + $0x14] ss:$8 sps:$4 sm:$0xff]   ;;  %v544_v3 = vld [vmem:[%s10731_s19 + $0xa0] sm:$0xff]  ;;  %v9463_v5 = vld [vmem:[%s13400_s5 + $0x10] ss:$8 sps:$4 sm:$0xff]  }
 0x200   : > { %v551_v4 = vld [vmem:[%s10731_s19 + $0xd8] sm:$0xff] }
 0x206   : > { %3151 = vmatmul.mubr.bf16.gmra.mrb[52].mxu0 %v841_v10  ;;  %3923 = vmatmul.mubr.bf16.gmra.mrb[52].mxu1 %v841_v10  ;;  %v648_v10 = vld [vmem:[%s10731_s19 + $0x3e0] sm:$0xff] }
 0x207   : > { %3160 = vmatprep.mubr.bf16.mxu0 %v849_v11  ;;  %3932 = vmatprep.mubr.bf16.mxu1 %v849_v11  ;;  %v801_v11 = vpack.c.bf16 %v633_v7, %v626_v6  ;;  %v809_v49 = vpack.c.bf16 %v648_v10, %v641_v9  ;;  %v9466_v6 = vld [vmem:[%s13400_s5 + $0x20] ss:$8 sps:$4 sm:$0xff]   ;;  %v9471_v7 = vld [vmem:[%s13400_s5 + $0x34] ss:$8 sps:$4 sm:$0xff]  }
 0x208   : > { %v558_v9 = vld [vmem:[%s10731_s19 + $0x110] sm:$0xff]  ;;  %v565_v10 = vld [vmem:[%s10731_s19 + $0x148] sm:$0xff] }
 0x20e   : > { %3161 = vmatmul.mubr.bf16.gmra.mrb[56].mxu0 %v848_v13  ;;  %3933 = vmatmul.mubr.bf16.gmra.mrb[56].mxu1 %v848_v13  ;;  %v662_v13 = vld [vmem:[%s10731_s19 + $0x450] sm:$0xff] }
 0x20f   : > { %3170 = vmatprep.mubr.bf16.mxu0 %v856_v14  ;;  %3942 = vmatprep.mubr.bf16.mxu1 %v856_v14  ;;  %v808_v14 = vpack.c.bf16 %v647_v8, %v640_v61  ;;  %v816_v15 = vpack.c.bf16 %v662_v13, %v655_v12  ;;  %v768_v61 = vpack.c.bf16 %v565_v10, %v558_v9  ;;  %v9472_v8 = vld [vmem:[%s13400_s5 + $0x40] ss:$8 sps:$4 sm:$0xff]   ;;  %v9477_v12 = vld [vmem:[%s13400_s5 + $0x54] ss:$8 sps:$4 sm:$0xff]  }
 0x210   : > { %v572_v13 = vld [vmem:[%s10731_s19 + $0x180] sm:$0xff]  ;;  %v747_v10 = vld [vmem:[%s10731_s19 + $0x6f8] sm:$0xff] }
 0x211   : > { %v740_v9 = vld [vmem:[%s10731_s19 + $0x6c0] sm:$0xff] }
 0x216   : > { %3171 = vmatmul.mubr.bf16.gmra.mrb[60].mxu0 %v855_v19  ;;  %3943 = vmatmul.mubr.bf16.gmra.mrb[60].mxu1 %v855_v19  ;;  %v676_v19 = vld [vmem:[%s10731_s19 + $0x4c0] sm:$0xff] }
 0x217   : > { %3213 = vmatprep.mubr.bf16.mxu0 %v753_v20  ;;  %3985 = vmatprep.mubr.bf16.mxu1 %v753_v20  ;;  %v815_v20 = vpack.c.bf16 %v661_v17, %v654_v16  ;;  %v823_v21 = vpack.c.bf16 %v676_v19, %v669_v18  ;;  %v9480_v16 = vld [vmem:[%s13400_s5 + $0x64] ss:$8 sps:$4 sm:$0xff]   ;;  %v9478_v18 = vld [vmem:[%s13400_s5 + $0x60] ss:$8 sps:$4 sm:$0xff]   ;;  %v9483_v19 = vld [vmem:[%s13400_s5 + $0x74] ss:$8 sps:$4 sm:$0xff]  }
 0x21e   : > { %3214 = vmatmul.mubr.bf16.vlgmr.msra.gmra.mrb[0].mxu0 %v752_v28  ;;  %3986 = vmatmul.mubr.bf16.vlgmr.msra.gmra.mrb[0].mxu1 %v752_v28  ;;  %v822_v28 = vpack.c.bf16 %v675_v23, %v668_v22  ;;  %v9481_v22 = vld [vmem:[%s13400_s5 + $0x70] ss:$8 sps:$4 sm:$0xff]   ;;  %v9486_v23 = vld [vmem:[%s13400_s5 + $0x84] ss:$8 sps:$4 sm:$0xff]  }
 0x21f   : > { %3375 = vmatpush1.bf16.msra.mxu0 %v9454_v29  ;;  %3223 = vmatprep.mubr.bf16.mxu0 %v760_v30  ;;  %v830_v29 = vpack.c.bf16 %v690_v27, %v683_v24  ;;  %v9484_v27 = vld [vmem:[%s13400_s5 + $0x80] ss:$8 sps:$4 sm:$0xff]  }
 0x220   : > { %3995 = vmatprep.mubr.bf16.mxu1 %v760_v30  ;;  %4147 = vmatpush1.bf16.msra.mxu1 %v9457_v26  ;;  %v682_v30 = vld [vmem:[%s10731_s19 + $0x4f0] sm:$0xff]  ;;  %v689_v26 = vld [vmem:[%s10731_s19 + $0x528] sm:$0xff] }
 0x221   : > { %v829_v35 = vpack.c.bf16 %v689_v26, %v682_v30  ;;  %v607_v30 = vld [vmem:[%s10731_s19 + $0x298] sm:$0xff] }
 0x222   : > { %v9487_v26 = vld [vmem:[%s13400_s5 + $0x90] ss:$8 sps:$4 sm:$0xff]  }
 0x226   : > { %3224 = vmatmul.mubr.bf16.gmra.mrb[4].mxu0 %v759_v37  ;;  %3996 = vmatmul.mubr.bf16.gmra.mrb[4].mxu1 %v759_v37  ;;  %v696_v37 = vld [vmem:[%s10731_s19 + $0x560] sm:$0xff] }
 0x227   : > { %3233 = vmatprep.mubr.bf16.mxu0 %v767_v38  ;;  %4005 = vmatprep.mubr.bf16.mxu1 %v767_v38  ;;  %v703_v38 = vld [vmem:[%s10731_s19 + $0x598] sm:$0xff] }
 0x228   : > { %v836_v40 = vpack.c.bf16 %v703_v38, %v696_v37  ;;  %v614_v37 = vld [vmem:[%s10731_s19 + $0x2d0] sm:$0xff]  ;;  %v621_v38 = vld [vmem:[%s10731_s19 + $0x308] sm:$0xff] }
 0x22e   : > { %3234 = vmatmul.mubr.bf16.gmra.mrb[8].mxu0 %v766_v42  ;;  %4006 = vmatmul.mubr.bf16.gmra.mrb[8].mxu1 %v766_v42  ;;  %v710_v42 = vld [vmem:[%s10731_s19 + $0x5d0] sm:$0xff] }
 0x22f   : > { %3243 = vmatprep.mubr.bf16.mxu0 %v774_v43  ;;  %4015 = vmatprep.mubr.bf16.mxu1 %v774_v43  ;;  %v717_v43 = vld [vmem:[%s10731_s19 + $0x608] sm:$0xff] }
 0x230   : > { %v843_v46 = vpack.c.bf16 %v717_v43, %v710_v42  ;;  %v628_v42 = vld [vmem:[%s10731_s19 + $0x340] sm:$0xff]  ;;  %v635_v43 = vld [vmem:[%s10731_s19 + $0x378] sm:$0xff] }
 0x231   : > { %v803_v44 = vpack.c.bf16 %v635_v43, %v628_v42 }
 0x236   : > { %3244 = vmatmul.mubr.bf16.gmra.mrb[12].mxu0 %v773_v51  ;;  %4016 = vmatmul.mubr.bf16.gmra.mrb[12].mxu1 %v773_v51  ;;  %v9462_v51 = vld [vmem:[%s13400_s5 + $0x4] ss:$8 sps:$4 sm:$0xff]  }
 0x237   : > { %3253 = vmatprep.mubr.bf16.mxu0 %v781_v52  ;;  %4025 = vmatprep.mubr.bf16.mxu1 %v781_v52  ;;  %v724_v52 = vld [vmem:[%s10731_s19 + $0x640] sm:$0xff] }
 0x238   : > { %5589 = vmatprep.subr.bf16.mxu0 %v9462_v51  ;;  %v850_v56 = vpack.c.bf16 %v731_v53, %v724_v52  ;;  %v656_v51 = vld [vmem:[%s10731_s19 + $0x420] sm:$0xff]  ;;  %v663_v52 = vld [vmem:[%s10731_s19 + $0x458] sm:$0xff] }
 0x239   : > { %v817_v53 = vpack.c.bf16 %v663_v52, %v656_v51 }
 0x23e   : > { %3254 = vmatmul.mubr.bf16.gmra.mrb[16].mxu0 %v780_v57  ;;  %4026 = vmatmul.mubr.bf16.gmra.mrb[16].mxu1 %v780_v57  ;;  %v858_v57 = vpack.c.bf16 %v746_v34, %v739_v54  ;;  %v670_v54 = vld [vmem:[%s10731_s19 + $0x490] sm:$0xff]  ;;  %v677_v34 = vld [vmem:[%s10731_s19 + $0x4c8] sm:$0xff] }
 0x23f   : > { %3263 = vmatprep.mubr.bf16.mxu0 %v788_v58  ;;  %4035 = vmatprep.mubr.bf16.mxu1 %v788_v58  ;;  %v738_v58 = vld [vmem:[%s10731_s19 + $0x6b0] sm:$0xff] }
 0x240   : > { %v857_v60 = vpack.c.bf16 %v745_v59, %v738_v58  ;;  %v691_v58 = vld [vmem:[%s10731_s19 + $0x538] sm:$0xff] }
 0x246   : > { %3264 = vmatmul.mubr.bf16.gmra.mrb[20].mxu0 %v787_v33  ;;  %4036 = vmatmul.mubr.bf16.gmra.mrb[20].mxu1 %v787_v33  ;;  %v754_v33 = vpack.c.bf16 %v537_v63, %v530_v62  ;;  %v705_v62 = vld [vmem:[%s10731_s19 + $0x5a8] sm:$0xff] }
 0x247   : > { %3273 = vmatprep.mubr.bf16.mxu0 %v795_v0  ;;  %4045 = vmatprep.mubr.bf16.mxu1 %v795_v0  ;;  %v9460_v0 = vld [vmem:[%s13400_s5] ss:$8 sps:$4 sm:$0xff]  }
 0x24e   : > { %3274 = vmatmul.mubr.bf16.gmra.mrb[24].mxu0 %v794_v48  ;;  %4046 = vmatmul.mubr.bf16.gmra.mrb[24].mxu1 %v794_v48  ;;  %v9468_v48 = vld [vmem:[%s13400_s5 + $0x24] ss:$8 sps:$4 sm:$0xff]  }
 0x24f   : > { %3283 = vmatprep.mubr.bf16.mxu0 %v802_v55  ;;  %4055 = vmatprep.mubr.bf16.mxu1 %v802_v55  ;;  %v761_v55 = vpack.c.bf16 %v551_v4, %v544_v3  ;;  %v9499_v3 = vld [vmem:[%s13400_s5 + $0xd0] ss:$8 sps:$4 sm:$0xff]  }
 0x256   : > { %3284 = vmatmul.mubr.bf16.gmra.mrb[28].mxu0 %v801_v11  ;;  %4056 = vmatmul.mubr.bf16.gmra.mrb[28].mxu1 %v801_v11  ;;  %v9469_v11 = vld [vmem:[%s13400_s5 + $0x30] ss:$8 sps:$4 sm:$0xff]  }
 0x257   : > { %3293 = vmatprep.mubr.bf16.mxu0 %v809_v49  ;;  %4065 = vmatprep.mubr.bf16.mxu1 %v809_v49  ;;  %v9474_v49 = vld [vmem:[%s13400_s5 + $0x44] ss:$8 sps:$4 sm:$0xff]  }
 0x25e   : > { %3294 = vmatmul.mubr.bf16.gmra.mrb[32].mxu0 %v808_v14  ;;  %4066 = vmatmul.mubr.bf16.gmra.mrb[32].mxu1 %v808_v14  ;;  %v579_v14 = vld [vmem:[%s10731_s19 + $0x1b8] sm:$0xff] }
 0x25f   : > { %3303 = vmatprep.mubr.bf16.mxu0 %v816_v15  ;;  %4075 = vmatprep.mubr.bf16.mxu1 %v816_v15  ;;  %v9475_v15 = vld [vmem:[%s13400_s5 + $0x50] ss:$8 sps:$4 sm:$0xff]   ;;  %v775_v17 = vpack.c.bf16 %v579_v14, %v572_v13  ;;  %v4339_v13 = vld [vmem:[%s13399_s4] sm:$0xf] }
 0x266   : > { %3304 = vmatmul.mubr.bf16.gmra.mrb[36].mxu0 %v815_v20  ;;  %4076 = vmatmul.mubr.bf16.gmra.mrb[36].mxu1 %v815_v20  ;;  %v586_v20 = vld [vmem:[%s10731_s19 + $0x1f0] sm:$0xff] }
 0x267   : > { %3313 = vmatprep.mubr.bf16.mxu0 %v823_v21  ;;  %4085 = vmatprep.mubr.bf16.mxu1 %v823_v21  ;;  %v593_v21 = vld [vmem:[%s10731_s19 + $0x228] sm:$0xff] }
 0x268   : > { %v782_v24 = vpack.c.bf16 %v593_v21, %v586_v20 }
 0x26e   : > { %3314 = vmatmul.mubr.bf16.gmra.mrb[40].mxu0 %v822_v28  ;;  %4086 = vmatmul.mubr.bf16.gmra.mrb[40].mxu1 %v822_v28  ;;  %v9489_v28 = vld [vmem:[%s13400_s5 + $0x94] ss:$8 sps:$4 sm:$0xff]  }
 0x26f   : > { %3323 = vmatprep.mubr.bf16.mxu0 %v830_v29  ;;  %4095 = vmatprep.mubr.bf16.mxu1 %v830_v29  ;;  %v600_v29 = vld [vmem:[%s10731_s19 + $0x260] sm:$0xff] }
 0x270   : > { %v789_v32 = vpack.c.bf16 %v607_v30, %v600_v29 }
 0x276   : > { %3324 = vmatmul.mubr.bf16.gmra.mrb[44].mxu0 %v829_v35  ;;  %4096 = vmatmul.mubr.bf16.gmra.mrb[44].mxu1 %v829_v35  ;;  %v9490_v35 = vld [vmem:[%s13400_s5 + $0xa0] ss:$8 sps:$4 sm:$0xff]  }
 0x277   : > { %3333 = vmatprep.mubr.bf16.mxu0 %v837_v36  ;;  %4105 = vmatprep.mubr.bf16.mxu1 %v837_v36  ;;  %v9495_v36 = vld [vmem:[%s13400_s5 + $0xb4] ss:$8 sps:$4 sm:$0xff]  }
 0x27e   : > { %3334 = vmatmul.mubr.bf16.gmra.mrb[48].mxu0 %v836_v40  ;;  %4106 = vmatmul.mubr.bf16.gmra.mrb[48].mxu1 %v836_v40  ;;  %v796_v40 = vpack.c.bf16 %v621_v38, %v614_v37 }
 0x27f   : > { %3343 = vmatprep.mubr.bf16.mxu0 %v844_v41  ;;  %4115 = vmatprep.mubr.bf16.mxu1 %v844_v41  ;;  %v9496_v41 = vld [vmem:[%s13400_s5 + $0xc0] ss:$8 sps:$4 sm:$0xff]  }
 0x286   : > { %3344 = vmatmul.mubr.bf16.gmra.mrb[52].mxu0 %v843_v46  ;;  %4116 = vmatmul.mubr.bf16.gmra.mrb[52].mxu1 %v843_v46  ;;  %v649_v46 = vld [vmem:[%s10731_s19 + $0x3e8] sm:$0xff] }
 0x287   : > { %3353 = vmatprep.mubr.bf16.mxu0 %v851_v50  ;;  %4125 = vmatprep.mubr.bf16.mxu1 %v851_v50  ;;  %v810_v50 = vpack.c.bf16 %v649_v46, %v642_v45 }
 0x28e   : > { %3354 = vmatmul.mubr.bf16.gmra.mrb[56].mxu0 %v850_v56  ;;  %4126 = vmatmul.mubr.bf16.gmra.mrb[56].mxu1 %v850_v56  ;;  %v824_v56 = vpack.c.bf16 %v677_v34, %v670_v54 }
 0x28f   : > { %3363 = vmatprep.mubr.bf16.mxu0 %v858_v57  ;;  %4135 = vmatprep.mubr.bf16.mxu1 %v858_v57  ;;  %v684_v57 = vld [vmem:[%s10731_s19 + $0x500] sm:$0xff] }
 0x290   : > { %v831_v59 = vpack.c.bf16 %v691_v58, %v684_v57 }
 0x296   : > { %3364 = vmatmul.mubr.bf16.gmra.mrb[60].mxu0 %v857_v60  ;;  %4136 = vmatmul.mubr.bf16.gmra.mrb[60].mxu1 %v857_v60  ;;  %v698_v60 = vld [vmem:[%s10731_s19 + $0x570] sm:$0xff] }
 0x297   : > { %3406 = vmatprep.mubr.bf16.mxu0 %v10176_v1  ;;  %4178 = vmatprep.mubr.bf16.mxu1 %v10176_v1  ;;  %v838_v63 = vpack.c.bf16 %v705_v62, %v698_v60 }
 0x29e   : > { %8115 = vmatmul.mubr.msk.bf16.vlgmr.msra.gmra.mrb[0].mxu0 %vm2746_vm2, %v754_v33  ;;  %8131 = vmatmul.mubr.msk.bf16.vlgmr.msra.gmra.mrb[0].mxu1 %vm2746_vm2, %v754_v33  ;;  %v712_v33 = vld [vmem:[%s10731_s19 + $0x5e0] sm:$0xff] }
 0x29f   : > { %3416 = vmatprep.mubr.bf16.mxu0 %v10176_v1  ;;  %4188 = vmatprep.mubr.bf16.mxu1 %v10176_v1 }
 0x2a0   : > { %5590 = vmatpush1.bf16.msra.mxu0 %v9460_v0  ;;  %v719_v0 = vld [vmem:[%s10731_s19 + $0x618] sm:$0xff] }
 0x2a1   : > { %5591 = vmatprep.subr.bf16.mxu0 %v9465_v2  ;;  %v9501_v2 = vld [vmem:[%s13400_s5 + $0xd4] ss:$8 sps:$4 sm:$0xff]   ;;  %v845_v4 = vpack.c.bf16 %v719_v0, %v712_v33 }
 0x2a4   : > { %5592 = vmatpush1.bf16.msra.mxu0 %v9463_v5  ;;  %v9504_v5 = vld [vmem:[%s13400_s5 + $0xe4] ss:$8 sps:$4 sm:$0xff]  }
 0x2a5   : > { %5593 = vmatprep.subr.bf16.mxu0 %v9468_v48  ;;  %v9502_v48 = vld [vmem:[%s13400_s5 + $0xe0] ss:$8 sps:$4 sm:$0xff]  }
 0x2a6   : > { %8116 = vmatmul.mubr.msk.bf16.gmra.mrb[4].mxu0 %vm2746_vm2, %v761_v55  ;;  %8132 = vmatmul.mubr.msk.bf16.gmra.mrb[4].mxu1 %vm2746_vm2, %v761_v55  ;;  %v726_v55 = vld [vmem:[%s10731_s19 + $0x650] sm:$0xff] }
 0x2a7   : > { %3426 = vmatprep.mubr.bf16.mxu0 %v10176_v1  ;;  %4198 = vmatprep.mubr.bf16.mxu1 %v10176_v1 }
 0x2a8   : > { %5594 = vmatpush1.bf16.msra.mxu0 %v9466_v6  ;;  %v733_v6 = vld [vmem:[%s10731_s19 + $0x688] sm:$0xff] }
 0x2a9   : > { %5595 = vmatprep.subr.bf16.mxu0 %v9471_v7  ;;  %v852_v7 = vpack.c.bf16 %v733_v6, %v726_v55 }
 0x2ac   : > { %5596 = vmatpush1.bf16.msra.mxu0 %v9469_v11  ;;  %v9507_v11 = vld [vmem:[%s13400_s5 + $0xf4] ss:$8 sps:$4 sm:$0xff]  }
 0x2ad   : > { %5597 = vmatprep.subr.bf16.mxu0 %v9474_v49  ;;  %v9505_v49 = vld [vmem:[%s13400_s5 + $0xf0] ss:$8 sps:$4 sm:$0xff]  }
 0x2ae   : > { %8117 = vmatmul.mubr.msk.bf16.gmra.mrb[8].mxu0 %vm2746_vm2, %v768_v61  ;;  %8133 = vmatmul.mubr.msk.bf16.gmra.mrb[8].mxu1 %vm2746_vm2, %v768_v61  ;;  %v859_v61 = vpack.c.bf16 %v747_v10, %v740_v9 }
 0x2af   : > { %3436 = vmatprep.mubr.bf16.mxu0 %v10176_v1  ;;  %4208 = vmatprep.mubr.bf16.mxu1 %v10176_v1 }
 0x2b0   : > { %5598 = vmatpush1.bf16.msra.mxu0 %v9472_v8  ;;  %v11519_v8 = vshrl.u32 %v13411_v47, 7 }
 0x2b1   : > { %5599 = vmatprep.subr.bf16.mxu0 %v9477_v12 }
 0x2b2   : > { %13453 = vst [vmem:[#allocation3_spill] sm:$0xff] %v11519_v8  ;;  %v4351_v12 = vsub.s32 2, %v11519_v8  ;;  %v13412_v14 = vsub.s32 1, %v11519_v8 }
 0x2b4   : > { %5600 = vmatpush1.bf16.msra.mxu0 %v9475_v15  ;;  %v4355_v15 = vsub.s32 3, %v11519_v8 }
 0x2b5   : > { %5601 = vmatprep.subr.bf16.mxu0 %v9480_v16  ;;  %v11528_v16 = vsub.s32 0, %v11519_v8 }
 0x2b6   : > { %8118 = vmatmul.mubr.msk.bf16.gmra.mrb[12].mxu0 %vm2746_vm2, %v775_v17  ;;  %8134 = vmatmul.mubr.msk.bf16.gmra.mrb[12].mxu1 %vm2746_vm2, %v775_v17  ;;  %v11539_v20 = vrot.slane %v4339_v13, %v4355_v15 }
 0x2b7   : > { %3446 = vmatprep.mubr.bf16.mxu0 %v10176_v1  ;;  %4218 = vmatprep.mubr.bf16.mxu1 %v10176_v1  ;;  %13454 = vst [vmem:[#allocation4_spill] sm:$0xff] %v11528_v16  ;;  %v11531_v17 = vrot.slane %v4339_v13, %v11528_v16 }
 0x2b8   : > { %5602 = vmatpush1.bf16.msra.mxu0 %v9478_v18  ;;  %v11533_v18 = vrot.slane %v4339_v13, %v4351_v12 }
 0x2b9   : > { %5603 = vmatprep.subr.bf16.mxu0 %v9483_v19  ;;  %v11537_v19 = vrot.slane %v4339_v13, %v13412_v14 }
 0x2bc   : > { %5604 = vmatpush1.bf16.msra.mxu0 %v9481_v22 }
 0x2bd   : > { %5605 = vmatprep.subr.bf16.mxu0 %v9486_v23 }
 0x2be   : > { %8119 = vmatmul.mubr.msk.bf16.gmra.mrb[16].mxu0 %vm2746_vm2, %v782_v24  ;;  %8135 = vmatmul.mubr.msk.bf16.gmra.mrb[16].mxu1 %vm2746_vm2, %v782_v24 }
 0x2bf   : > { %3456 = vmatprep.mubr.bf16.mxu0 %v10176_v1  ;;  %4228 = vmatprep.mubr.bf16.mxu1 %v10176_v1 }
 0x2c0   : > { %5606 = vmatpush1.bf16.msra.mxu0 %v9484_v27 }
 0x2c1   : > { %5607 = vmatprep.subr.bf16.mxu0 %v9489_v28 }
 0x2c4   : > { %5608 = vmatpush1.bf16.msra.mxu0 %v9487_v26 }
 0x2c5   : > { %5609 = vmatprep.subr.bf16.mxu0 %v9492_v31 }
 0x2c6   : > { %8120 = vmatmul.mubr.msk.bf16.gmra.mrb[20].mxu0 %vm2746_vm2, %v789_v32  ;;  %8136 = vmatmul.mubr.msk.bf16.gmra.mrb[20].mxu1 %vm2746_vm2, %v789_v32 }
 0x2c7   : > { %3466 = vmatprep.mubr.bf16.mxu0 %v10176_v1  ;;  %4238 = vmatprep.mubr.bf16.mxu1 %v10176_v1 }
 0x2c8   : > { %5610 = vmatpush1.bf16.msra.mxu0 %v9490_v35 }
 0x2c9   : > { %5611 = vmatprep.subr.bf16.mxu0 %v9495_v36 }
 0x2cc   : > { %5612 = vmatpush1.bf16.msra.mxu0 %v9493_v39 }
 0x2cd   : > { %5613 = vmatprep.subr.bf16.mxu0 %v9498_v25 }
 0x2ce   : > { %8121 = vmatmul.mubr.msk.bf16.gmra.mrb[24].mxu0 %vm2746_vm2, %v796_v40  ;;  %8137 = vmatmul.mubr.msk.bf16.gmra.mrb[24].mxu1 %vm2746_vm2, %v796_v40 }
 0x2cf   : > { %3476 = vmatprep.mubr.bf16.mxu0 %v10176_v1  ;;  %4248 = vmatprep.mubr.bf16.mxu1 %v10176_v1 }
 0x2d0   : > { %5614 = vmatpush1.bf16.msra.mxu0 %v9496_v41 }
 0x2d1   : > { %5615 = vmatprep.subr.bf16.mxu0 %v9501_v2 }
 0x2d4   : > { %5616 = vmatpush1.bf16.msra.mxu0 %v9499_v3 }
 0x2d5   : > { %5617 = vmatprep.subr.bf16.mxu0 %v9504_v5 }
 0x2d6   : > { %8122 = vmatmul.mubr.msk.bf16.gmra.mrb[28].mxu0 %vm2746_vm2, %v803_v44  ;;  %8138 = vmatmul.mubr.msk.bf16.gmra.mrb[28].mxu1 %vm2746_vm2, %v803_v44 }
 0x2d7   : > { %3486 = vmatprep.mubr.bf16.mxu0 %v10176_v1  ;;  %4258 = vmatprep.mubr.bf16.mxu1 %v10176_v1 }
 0x2d8   : > { %5618 = vmatpush1.bf16.msra.mxu0 %v9502_v48 }
 0x2d9   : > { %5619 = vmatprep.subr.bf16.mxu0 %v9507_v11 }
 0x2dc   : > { %5620 = vmatpush1.bf16.msra.mxu0 %v9505_v49 }
 0x2de   : > { %8123 = vmatmul.mubr.msk.bf16.gmra.mrb[32].mxu0 %vm2746_vm2, %v810_v50  ;;  %8139 = vmatmul.mubr.msk.bf16.gmra.mrb[32].mxu1 %vm2746_vm2, %v810_v50 }
 0x2df   : > { %3496 = vmatprep.mubr.bf16.mxu0 %v10176_v1  ;;  %4268 = vmatprep.mubr.bf16.mxu1 %v10176_v1 }
 0x2e6   : > { %8124 = vmatmul.mubr.msk.bf16.gmra.mrb[36].mxu0 %vm2746_vm2, %v817_v53  ;;  %8140 = vmatmul.mubr.msk.bf16.gmra.mrb[36].mxu1 %vm2746_vm2, %v817_v53 }
 0x2e7   : > { %3506 = vmatprep.mubr.bf16.mxu0 %v10176_v1  ;;  %4278 = vmatprep.mubr.bf16.mxu1 %v10176_v1 }
 0x2ee   : > { %8125 = vmatmul.mubr.msk.bf16.gmra.mrb[40].mxu0 %vm2746_vm2, %v824_v56  ;;  %8141 = vmatmul.mubr.msk.bf16.gmra.mrb[40].mxu1 %vm2746_vm2, %v824_v56 }
 0x2ef   : > { %3516 = vmatprep.mubr.bf16.mxu0 %v10176_v1  ;;  %4288 = vmatprep.mubr.bf16.mxu1 %v10176_v1 }
 0x2f6   : > { %8126 = vmatmul.mubr.msk.bf16.gmra.mrb[44].mxu0 %vm2746_vm2, %v831_v59  ;;  %8142 = vmatmul.mubr.msk.bf16.gmra.mrb[44].mxu1 %vm2746_vm2, %v831_v59 }
 0x2f7   : > { %3526 = vmatprep.mubr.bf16.mxu0 %v10176_v1  ;;  %4298 = vmatprep.mubr.bf16.mxu1 %v10176_v1 }
 0x2fe   : > { %8127 = vmatmul.mubr.msk.bf16.gmra.mrb[48].mxu0 %vm2746_vm2, %v838_v63  ;;  %8143 = vmatmul.mubr.msk.bf16.gmra.mrb[48].mxu1 %vm2746_vm2, %v838_v63 }
 0x2ff   : > { %3536 = vmatprep.mubr.bf16.mxu0 %v10176_v1  ;;  %4308 = vmatprep.mubr.bf16.mxu1 %v10176_v1 }
 0x306   : > { %8128 = vmatmul.mubr.msk.bf16.gmra.mrb[52].mxu0 %vm2746_vm2, %v845_v4  ;;  %8144 = vmatmul.mubr.msk.bf16.gmra.mrb[52].mxu1 %vm2746_vm2, %v845_v4 }
 0x307   : > { %3546 = vmatprep.mubr.bf16.mxu0 %v10176_v1  ;;  %4318 = vmatprep.mubr.bf16.mxu1 %v10176_v1 }
 0x30e   : > { %8129 = vmatmul.mubr.msk.bf16.gmra.mrb[56].mxu0 %vm2746_vm2, %v852_v7  ;;  %8145 = vmatmul.mubr.msk.bf16.gmra.mrb[56].mxu1 %vm2746_vm2, %v852_v7 }
 0x30f   : > { %3556 = vmatprep.mubr.bf16.mxu0 %v10176_v1  ;;  %4328 = vmatprep.mubr.bf16.mxu1 %v10176_v1  ;;  %v9510_v1 = vld [vmem:[%s13400_s5 + $0x104] ss:$8 sps:$4 sm:$0xff]  }
 0x310   : > { %5782 = vmatprep.subr.bf16.mxu0 %v9510_v1 }
 0x316   : > { %8130 = vmatmul.mubr.msk.bf16.gmra.mrb[60].mxu0 %vm2746_vm2, %v859_v61  ;;  %8146 = vmatmul.mubr.msk.bf16.gmra.mrb[60].mxu1 %vm2746_vm2, %v859_v61 }
 0x371   : > { %v3408_v21 = vpop.f32.mrb[0].mxu0  ;;  %v4180_v22 = vpop.f32.mrb[0].mxu1 }
 0x372   : > { %v4361_v23 = vadd.f32 %v11531_v17, %v3408_v21  ;;  %v4363_v24 = vadd.f32 %v11533_v18, %v4180_v22  ;;  %v3410_v27 = vpop.f32.mrb[1].mxu0  ;;  %v4182_v28 = vpop.f32.mrb[1].mxu1 }
 0x373   : > { %v4362_v29 = vadd.f32 %v11537_v19, %v3410_v27  ;;  %v4364_v30 = vadd.f32 %v11539_v20, %v4182_v28  ;;  %v3412_v26 = vpop.f32.mrb[2].mxu0  ;;  %v4184_v31 = vpop.f32.mrb[2].mxu1 }
 0x374   : > { %v4617_v32 = vmul.f32 0.70710677, %v4361_v23  ;;  %v4619_v35 = vmul.f32 0.70710677, %v4363_v24  ;;  %v4365_v38 = vadd.f32 %v11531_v17, %v3412_v26  ;;  %v4367_v39 = vadd.f32 %v11533_v18, %v4184_v31  ;;  %v3414_v25 = vpop.f32.mrb[3].mxu0  ;;  %v4186_v40 = vpop.f32.mrb[3].mxu1 }
 0x375   : > { %v4618_v36 = vmul.f32 0.70710677, %v4362_v29  ;;  %v4620_v37 = vmul.f32 0.70710677, %v4364_v30  ;;  %v4366_v41 = vadd.f32 %v11537_v19, %v3414_v25  ;;  %v4368_v42 = vadd.f32 %v11539_v20, %v4186_v40 }
 0x376   : > { %9584 = verf.f32 %v4617_v32  ;;  %v4621_v43 = vmul.f32 0.70710677, %v4365_v38  ;;  %v4489_v44 = vmul.f32 0.5, %v4361_v23  ;;  %v4623_v45 = vmul.f32 0.70710677, %v4367_v39 }
 0x377   : > { %9586 = verf.f32 %v4619_v35  ;;  %v4622_v46 = vmul.f32 0.70710677, %v4366_v41  ;;  %v11549_v51 = vmul.f32 0.5, %v4363_v24  ;;  %v4624_v52 = vmul.f32 0.70710677, %v4368_v42 }
 0x378   : > { %9588 = verf.f32 %v4618_v36  ;;  %v11552_v56 = vmul.f32 0.5, %v4362_v29  ;;  %v11556_v62 = vmul.f32 0.5, %v4364_v30  ;;  %v4493_v3 = vmul.f32 0.5, %v4365_v38 }
 0x379   : > { %9590 = verf.f32 %v4620_v37  ;;  %v3418_v50 = vpop.f32.mrb[4].mxu0  ;;  %v4190_v54 = vpop.f32.mrb[4].mxu1  ;;  %v4495_v4 = vmul.f32 0.5, %v4367_v39  ;;  %v11559_v55 = vmul.f32 0.5, %v4366_v41  ;;  %v11564_v61 = vmul.f32 0.5, %v4368_v42 }
 0x37a   : > { %9592 = verf.f32 %v4621_v43  ;;  %v4369_v53 = vadd.f32 %v11531_v17, %v3418_v50  ;;  %v3420_v34 = vpop.f32.mrb[5].mxu0  ;;  %v4371_v57 = vadd.f32 %v11533_v18, %v4190_v54  ;;  %v4192_v59 = vpop.f32.mrb[5].mxu1 }
 0x37b   : > { %9594 = verf.f32 %v4623_v45  ;;  %v4370_v58 = vadd.f32 %v11537_v19, %v3420_v34  ;;  %v3422_v60 = vpop.f32.mrb[6].mxu0  ;;  %v4372_v33 = vadd.f32 %v11539_v20, %v4192_v59  ;;  %v4194_v0 = vpop.f32.mrb[6].mxu1 }
 0x37c   : > { %9596 = verf.f32 %v4622_v46  ;;  %v4625_v63 = vmul.f32 0.70710677, %v4369_v53  ;;  %v3424_v2 = vpop.f32.mrb[7].mxu0  ;;  %v4627_v5 = vmul.f32 0.70710677, %v4371_v57  ;;  %v4196_v48 = vpop.f32.mrb[7].mxu1  ;;  %v4373_v9 = vadd.f32 %v11531_v17, %v3422_v60 }
 0x37d   : > { %9598 = verf.f32 %v4624_v52  ;;  %v4626_v6 = vmul.f32 0.70710677, %v4370_v58  ;;  %v4628_v7 = vmul.f32 0.70710677, %v4372_v33  ;;  %v4375_v10 = vadd.f32 %v11533_v18, %v4194_v0 }
 0x37e   : > { %9600 = verf.f32 %v4625_v63  ;;  %v4374_v11 = vadd.f32 %v11537_v19, %v3424_v2  ;;  %v11566_v1 = vmul.f32 0.5, %v4369_v53  ;;  %v11568_v12 = vmul.f32 0.5, %v4371_v57 }
 0x37f   : > { %9602 = verf.f32 %v4627_v5  ;;  %v4629_v21 = vmul.f32 0.70710677, %v4373_v9  ;;  %v4376_v22 = vadd.f32 %v11539_v20, %v4196_v48  ;;  %v11571_v29 = vmul.f32 0.5, %v4370_v58 }
 0x380   : > { %v9585_v49 = vpop.eup %9584  ;;  %9604 = verf.f32 %v4626_v6  ;;  %v11573_v30 = vmul.f32 0.5, %v4372_v33  ;;  %v4631_v26 = vmul.f32 0.70710677, %v4375_v10  ;;  %v11575_v35 = vmul.f32 0.5, %v4373_v9 }
 0x381   : > { %v9587_v13 = vpop.eup %9586  ;;  %v4873_v15 = vadd.f32 1.0, %v9585_v49  ;;  %9606 = verf.f32 %v4628_v7  ;;  %v3428_v23 = vpop.f32.mrb[8].mxu0  ;;  %v11577_v36 = vmul.f32 0.5, %v4375_v10  ;;  %v4630_v37 = vmul.f32 0.70710677, %v4374_v11 }
 0x382   : > { %v4200_v24 = vpop.f32.mrb[8].mxu1  ;;  %v9589_v27 = vpop.eup %9588  ;;  %v4875_v28 = vadd.f32 1.0, %v9587_v13  ;;  %9608 = verf.f32 %v4629_v21  ;;  %v11581_v42 = vmul.f32 0.5, %v4374_v11  ;;  %v4632_v53 = vmul.f32 0.70710677, %v4376_v22 }
 0x383   : > { %v3430_v31 = vpop.f32.mrb[9].mxu0  ;;  %v9591_v32 = vpop.eup %9590  ;;  %v11579_v40 = vmul.f32 %v4873_v15, %v4489_v44  ;;  %v4874_v41 = vadd.f32 1.0, %v9589_v27  ;;  %9610 = verf.f32 %v4631_v26  ;;  %v11590_v58 = vmul.f32 0.5, %v4376_v22 }
 0x384   : > { %v4202_v38 = vpop.f32.mrb[9].mxu1  ;;  %v3432_v39 = vpop.f32.mrb[10].mxu0  ;;  %v4876_v50 = vadd.f32 1.0, %v9591_v32  ;;  %9612 = verf.f32 %v4630_v37  ;;  %v11588_v57 = vmul.f32 %v4875_v28, %v11549_v51  ;;  %v4377_v59 = vadd.f32 %v11531_v17, %v3428_v23 }
 0x385   : > { %v9593_v25 = vpop.eup %9592  ;;  %v4204_v43 = vpop.f32.mrb[10].mxu1  ;;  %9614 = verf.f32 %v4632_v53  ;;  %v4379_v0 = vadd.f32 %v11533_v18, %v4200_v24  ;;  %v4378_v51 = vadd.f32 %v11537_v19, %v3430_v31  ;;  %v11600_v9 = vmul.f32 %v4874_v41, %v11552_v56 }
 0x386   : > { %v11583_v45 = vpop.f32.mrb[11].mxu0  ;;  %v9595_v46 = vpop.eup %9594  ;;  %v4877_v52 = vadd.f32 1.0, %v9593_v25  ;;  %13455 = vst [vmem:[#allocation5_spill] sm:$0xff] %v11588_v57  ;;  %v4633_v6 = vmul.f32 0.70710677, %v4377_v59  ;;  %v11603_v10 = vmul.f32 %v4876_v50, %v11556_v62  ;;  %v11611_v22 = vmul.f32 0.5, %v4377_v59 }
 0x387   : > { %v11585_v54 = vpop.f32.mrb[11].mxu1  ;;  %v9597_v34 = vpop.eup %9596  ;;  %v4879_v44 = vadd.f32 1.0, %v9595_v46  ;;  %v11618_v28 = vmul.f32 0.5, %v4379_v0  ;;  %v4635_v26 = vmul.f32 0.70710677, %v4379_v0  ;;  %v4380_v46 = vadd.f32 %v11539_v20, %v4202_v38 }
 0x388   : > { %v9599_v60 = vpop.eup %9598  ;;  %v11593_v63 = vmul.f32 %v4877_v52, %v4493_v3  ;;  %v4878_v33 = vadd.f32 1.0, %v9597_v34  ;;  %13457 = vst [vmem:[#allocation7_spill] sm:$0xff] %v11603_v10  ;;  %9616 = verf.f32 %v4633_v6  ;;  %v4634_v41 = vmul.f32 0.70710677, %v4378_v51 }
 0x389   : > { %v9601_v2 = vpop.eup %9600  ;;  %v11596_v5 = vmul.f32 %v4879_v44, %v4495_v4  ;;  %v4880_v48 = vadd.f32 1.0, %v9599_v60  ;;  %v3438_v49 = vpop.f32.mrb[12].mxu0  ;;  %9618 = verf.f32 %v4635_v26  ;;  %v4381_v34 = vadd.f32 %v11531_v17, %v3432_v39 }
 0x38a   : > { %v9603_v7 = vpop.eup %9602  ;;  %v5129_v3 = vpack.c.bf16 %v11593_v63, %v11579_v40  ;;  %v4881_v11 = vadd.f32 1.0, %v9601_v2  ;;  %v11607_v13 = vpop.f32.mrb[12].mxu1  ;;  %v11616_v24 = vmul.f32 %v4878_v33, %v11559_v55  ;;  %v4383_v44 = vadd.f32 %v11533_v18, %v4204_v43 }
 0x38b   : > { %13456 = vst [vmem:[#allocation6_spill] sm:$0xff] %v11596_v5  ;;  %v9605_v4 = vpop.eup %9604  ;;  %v4883_v21 = vadd.f32 1.0, %v9603_v7  ;;  %v3440_v56 = vpop.f32.mrb[13].mxu0  ;;  %v11623_v37 = vmul.f32 %v4880_v48, %v11564_v61  ;;  %v11638_v33 = vmul.f32 0.5, %v4378_v51  ;;  %9620 = verf.f32 %v4634_v41 }
 0x38c   : > { %v11613_v23 = vpop.f32.mrb[13].mxu1  ;;  %v9607_v62 = vpop.eup %9606  ;;  %v4882_v27 = vadd.f32 1.0, %v9605_v4  ;;  %v11631_v53 = vmul.f32 %v4881_v11, %v11566_v1  ;;  %v4636_v1 = vmul.f32 0.70710677, %v4380_v46  ;;  %v4637_v48 = vmul.f32 0.70710677, %v4381_v34 }
 0x38d   : > { %v3442_v31 = vpop.f32.mrb[14].mxu0  ;;  %v11620_v32 = vpop.f32.mrb[14].mxu1  ;;  %13458 = vst [vmem:[#allocation8_spill] sm:$0xff] %v11623_v37  ;;  %v4884_v25 = vadd.f32 1.0, %v9607_v62  ;;  %v11636_v61 = vmul.f32 %v4883_v21, %v11568_v12  ;;  %v11646_v43 = vmul.f32 0.5, %v4380_v46  ;;  %v11648_v11 = vmul.f32 0.5, %v4381_v34 }
 0x38e   : > { %v11626_v50 = vpop.f32.mrb[15].mxu0  ;;  %v11628_v52 = vpop.f32.mrb[15].mxu1  ;;  %v11641_v0 = vmul.f32 %v4882_v27, %v11571_v29  ;;  %v4639_v7 = vmul.f32 0.70710677, %v4383_v44  ;;  %9622 = verf.f32 %v4636_v1  ;;  %v4382_v51 = vadd.f32 %v11537_v19, %v11583_v45 }
 0x38f   : > { %v9609_v55 = vpop.eup %9608  ;;  %13459 = vst [vmem:[#allocation9_spill] sm:$0xff] %v11636_v61  ;;  %v11644_v6 = vmul.f32 %v4884_v25, %v11573_v30  ;;  %v4384_v29 = vadd.f32 %v11539_v20, %v11585_v54  ;;  %9624 = verf.f32 %v4637_v48  ;;  %v11661_v62 = vmul.f32 0.5, %v4383_v44 }
 0x390   : > { %v9611_v59 = vpop.eup %9610  ;;  %v4885_v60 = vadd.f32 1.0, %v9609_v55  ;;  %v4385_v27 = vadd.f32 %v11531_v17, %v3438_v49  ;;  %9626 = verf.f32 %v4639_v7  ;;  %v4638_v41 = vmul.f32 0.70710677, %v4382_v51 }
 0x391   : > { %v9613_v38 = vpop.eup %9612  ;;  %v4887_v2 = vadd.f32 1.0, %v9611_v59  ;;  %13460 = vst [vmem:[#allocation10_spill] sm:$0xff] %v11644_v6  ;;  %v11654_v4 = vpop.f32.mrb[16].mxu0  ;;  %v11678_v44 = vmul.f32 0.5, %v4382_v51  ;;  %v4640_v49 = vmul.f32 0.70710677, %v4384_v29  ;;  %v5130_v48 = vpack.c.bf16 %v11616_v24, %v11600_v9 }
 0x392   : > { %v4886_v39 = vadd.f32 1.0, %v9613_v38  ;;  %v9615_v12 = vpop.eup %9614  ;;  %v11656_v21 = vpop.f32.mrb[16].mxu1  ;;  %v11659_v30 = vmul.f32 %v4885_v60, %v11575_v35  ;;  %v4641_v59 = vmul.f32 0.70710677, %v4385_v27  ;;  %9628 = verf.f32 %v4638_v41 }
 0x393   : > { %v11664_v26 = vpop.f32.mrb[17].mxu0  ;;  %v11666_v25 = vpop.f32.mrb[17].mxu1  ;;  %v11669_v45 = vmul.f32 %v4887_v2, %v11577_v36  ;;  %v4888_v54 = vadd.f32 1.0, %v9615_v12  ;;  %v4387_v36 = vadd.f32 %v11533_v18, %v11607_v13  ;;  %v4386_v2 = vadd.f32 %v11537_v19, %v3440_v56  ;;  %5621 = vmatprep.mubr.bf16.mxu0 %v5130_v48 }
 0x394   : > { %v11671_v46 = vpop.f32.mrb[18].mxu0  ;;  %v11673_v55 = vpop.f32.mrb[18].mxu1  ;;  %v11676_v34 = vmul.f32 %v4886_v39, %v11581_v42  ;;  %9630 = verf.f32 %v4640_v49  ;;  %v4388_v42 = vadd.f32 %v11539_v20, %v11613_v23  ;;  %v9508_v39 = vld [vmem:[%s13400_s5 + $0x100] ss:$8 sps:$4 sm:$0xff]   ;;  %v4389_v7 = vadd.f32 %v11531_v17, %v3442_v31  ;;  %v9513_v23 = vld [vmem:[%s13400_s5 + $0x114] ss:$8 sps:$4 sm:$0xff]   ;;  %5622 = vmatmul.mubr.bf16.vlgmr.msra.gmra.mrb[64].mxu0 %v5129_v3 }
 0x395   : > { %13461 = vst [vmem:[#allocation11_spill] sm:$0xff] %v11669_v45  ;;  %v9617_v35 = vpop.eup %9616  ;;  %v11680_v60 = vpop.f32.mrb[19].mxu0  ;;  %v11696_v13 = vmul.f32 %v4888_v54, %v11590_v58  ;;  %v11698_v56 = vmul.f32 0.5, %v4384_v29  ;;  %9632 = verf.f32 %v4641_v59  ;;  %v4643_v51 = vmul.f32 0.70710677, %v4387_v36  ;;  %5783 = vmatpush1.bf16.msra.mxu0 %v9508_v39 }
 0x396   : > { %v4889_v38 = vadd.f32 1.0, %v9617_v35  ;;  %v11685_v1 = vpop.f32.mrb[19].mxu1  ;;  %v9619_v12 = vpop.eup %9618  ;;  %v11706_v35 = vmul.f32 0.5, %v4385_v27  ;;  %v4642_v31 = vmul.f32 0.70710677, %v4386_v2  ;;  %v11711_v54 = vmul.f32 0.5, %v4387_v36  ;;  %5784 = vmatprep.subr.bf16.mxu0 %v9513_v23 }
 0x397   : > { %13462 = vst [vmem:[#allocation12_spill] sm:$0xff] %v11696_v13  ;;  %v9621_v41 = vpop.eup %9620  ;;  %v4891_v24 = vadd.f32 1.0, %v9619_v12  ;;  %v9511_v58 = vld [vmem:[%s13400_s5 + $0x110] ss:$8 sps:$4 sm:$0xff]   ;;  %9634 = verf.f32 %v4643_v51  ;;  %v4644_v49 = vmul.f32 0.70710677, %v4388_v42  ;;  %v4391_v48 = vadd.f32 %v11533_v18, %v11620_v32 }
 0x398   : > { %v11704_v9 = vmul.f32 %v4889_v38, %v11611_v22  ;;  %v4890_v29 = vadd.f32 1.0, %v9621_v41  ;;  %v11720_v27 = vmul.f32 0.5, %v4386_v2  ;;  %9636 = verf.f32 %v4642_v31  ;;  %v9623_v51 = vpop.eup %9622  ;;  %v9516_v3 = vld [vmem:[%s13400_s5 + $0x124] ss:$8 sps:$4 sm:$0xff]  }
 0x399   : > { %v11716_v22 = vpop.f32.mrb[20].mxu0  ;;  %v11718_v59 = vpop.f32.mrb[20].mxu1  ;;  %v4645_v38 = vmul.f32 0.70710677, %v4389_v7  ;;  %v11728_v41 = vmul.f32 0.5, %v4388_v42  ;;  %9638 = verf.f32 %v4644_v49  ;;  %v4390_v40 = vadd.f32 %v11537_v19, %v11626_v50  ;;  %5785 = vmatpush1.bf16.msra.mxu0 %v9511_v58 }
 0x39a   : > { %v11724_v36 = vpop.f32.mrb[21].mxu0  ;;  %v11726_v12 = vpop.f32.mrb[21].mxu1  ;;  %v4392_v63 = vadd.f32 %v11539_v20, %v11628_v52  ;;  %v11742_v42 = vmul.f32 %v4891_v24, %v11618_v28  ;;  %v11744_v31 = vmul.f32 0.5, %v4389_v7  ;;  %v4647_v50 = vmul.f32 0.70710677, %v4391_v48  ;;  %5786 = vmatprep.subr.bf16.mxu0 %v9516_v3 }
 0x39b   : > { %v11737_v32 = vpop.f32.mrb[22].mxu0  ;;  %v11739_v2 = vpop.f32.mrb[22].mxu1  ;;  %9640 = verf.f32 %v4645_v38  ;;  %v11751_v47 = vmul.f32 %v4890_v29, %v11638_v33  ;;  %v4892_v14 = vadd.f32 1.0, %v9623_v51  ;;  %v4646_v8 = vmul.f32 0.70710677, %v4390_v40 }
 0x39c   : > { %v9625_v39 = vpop.eup %9624  ;;  %13463 = vst [vmem:[#allocation13_spill] sm:$0xff] %v11742_v42  ;;  %v11746_v49 = vpop.f32.mrb[23].mxu0  ;;  %v11753_v57 = vmul.f32 0.5, %v4391_v48  ;;  %9642 = verf.f32 %v4647_v50  ;;  %v4648_v28 = vmul.f32 0.70710677, %v4392_v63  ;;  %v11758_v38 = vmul.f32 0.5, %v4390_v40 }
 0x39d   : > { %v11748_v52 = vpop.f32.mrb[23].mxu1  ;;  %v9627_v23 = vpop.eup %9626  ;;  %v4893_v15 = vadd.f32 1.0, %v9625_v39  ;;  %v9514_v7 = vld [vmem:[%s13400_s5 + $0x120] ss:$8 sps:$4 sm:$0xff]   ;;  %9644 = verf.f32 %v4646_v8  ;;  %v4393_v33 = vadd.f32 %v11531_v17, %v11654_v4  ;;  %v4395_v29 = vadd.f32 %v11533_v18, %v11656_v21  ;;  %v9519_v48 = vld [vmem:[%s13400_s5 + $0x134] ss:$8 sps:$4 sm:$0xff]  }
 0x39e   : > { %v4895_v16 = vadd.f32 1.0, %v9627_v23  ;;  %v9629_v24 = vpop.eup %9628  ;;  %v11767_v39 = vmul.f32 0.5, %v4392_v63  ;;  %9646 = verf.f32 %v4648_v28  ;;  %v4394_v40 = vadd.f32 %v11537_v19, %v11664_v26  ;;  %v9517_v8 = vld [vmem:[%s13400_s5 + $0x130] ss:$8 sps:$4 sm:$0xff]   ;;  %v9522_v63 = vld [vmem:[%s13400_s5 + $0x144] ss:$8 sps:$4 sm:$0xff]   ;;  %5787 = vmatpush1.bf16.msra.mxu0 %v9514_v7 }
 0x39f   : > { %v9631_v58 = vpop.eup %9630  ;;  %v4894_v51 = vadd.f32 1.0, %v9629_v24  ;;  %v11775_v21 = vmul.f32 %v4892_v14, %v11646_v43  ;;  %v11778_v3 = vmul.f32 %v4893_v15, %v11648_v11  ;;  %v4649_v23 = vmul.f32 0.70710677, %v4393_v33  ;;  %5788 = vmatprep.subr.bf16.mxu0 %v9519_v48 }
 0x3a0   : > { %v9633_v4 = vpop.eup %9632  ;;  %v4896_v50 = vadd.f32 1.0, %v9631_v58  ;;  %v11786_v26 = vmul.f32 %v4895_v16, %v11661_v62  ;;  %v11788_v28 = vmul.f32 0.5, %v4393_v33  ;;  %v11790_v5 = vmul.f32 0.5, %v4395_v29 }
 0x3a1   : > { %13464 = vst [vmem:[#allocation14_spill] sm:$0xff] %v11775_v21  ;;  %v11780_v24 = vpop.f32.mrb[24].mxu0  ;;  %v4651_v14 = vmul.f32 0.70710677, %v4395_v29  ;;  %v11792_v43 = vpop.f32.mrb[24].mxu1  ;;  %v4897_v58 = vadd.f32 1.0, %v9633_v4  ;;  %9648 = verf.f32 %v4649_v23  ;;  %v4396_v21 = vadd.f32 %v11539_v20, %v11666_v25 }
 0x3a2   : > { %13465 = vst [vmem:[#allocation15_spill] sm:$0xff] %v11786_v26  ;;  %v11794_v15 = vpop.f32.mrb[25].mxu0  ;;  %v9635_v11 = vpop.eup %9634  ;;  %v4650_v42 = vmul.f32 0.70710677, %v4394_v40  ;;  %v11803_v33 = vmul.f32 %v4894_v51, %v11678_v44  ;;  %v5134_v29 = vpack.c.bf16 %v11676_v34, %v11641_v0  ;;  %v11811_v61 = vmul.f32 0.5, %v4394_v40  ;;  %5789 = vmatpush1.bf16.msra.mxu0 %v9517_v8 }
 0x3a3   : > { %v11798_v45 = vpop.f32.mrb[25].mxu1  ;;  %v11800_v16 = vpop.f32.mrb[26].mxu0  ;;  %v4899_v7 = vadd.f32 1.0, %v9635_v11  ;;  %9650 = verf.f32 %v4651_v14  ;;  %v4652_v48 = vmul.f32 0.70710677, %v4396_v21  ;;  %v11816_v44 = vmul.f32 %v4896_v50, %v11698_v56  ;;  %5790 = vmatprep.subr.bf16.mxu0 %v9522_v63 }
 0x3a4   : > { %v9637_v62 = vpop.eup %9636  ;;  %v11807_v4 = vpop.f32.mrb[26].mxu1  ;;  %9652 = verf.f32 %v4650_v42  ;;  %5631 = vmatprep.mubr.bf16.mxu0 %v5134_v29  ;;  %v4397_v0 = vadd.f32 %v11531_v17, %v11671_v46  ;;  %v4399_v34 = vadd.f32 %v11533_v18, %v11673_v55  ;;  %v9520_v42 = vld [vmem:[%s13400_s5 + $0x140] ss:$8 sps:$4 sm:$0xff]   ;;  %v11826_v40 = vmul.f32 %v4897_v58, %v11706_v35  ;;  %v9525_v46 = vld [vmem:[%s13400_s5 + $0x154] ss:$8 sps:$4 sm:$0xff]  }
 0x3a5   : > { %v11809_v23 = vpop.f32.mrb[27].mxu0  ;;  %v9639_v26 = vpop.eup %9638  ;;  %v4898_v25 = vadd.f32 1.0, %v9637_v62  ;;  %13466 = vst [vmem:[#allocation16_spill] sm:$0xff] %v11816_v44  ;;  %v11828_v14 = vmul.f32 0.5, %v4396_v21  ;;  %9654 = verf.f32 %v4652_v48  ;;  %v5133_v56 = vpack.c.bf16 %v11659_v30, %v11631_v53  ;;  %v9523_v21 = vld [vmem:[%s13400_s5 + $0x150] ss:$8 sps:$4 sm:$0xff]  }
 0x3a6   : > { %v11813_v13 = vpop.f32.mrb[27].mxu1  ;;  %v9641_v6 = vpop.eup %9640  ;;  %v4900_v51 = vadd.f32 1.0, %v9639_v26  ;;  %v11836_v8 = vmul.f32 %v4899_v7, %v11711_v54  ;;  %v4653_v26 = vmul.f32 0.70710677, %v4397_v0  ;;  %v4655_v63 = vmul.f32 0.70710677, %v4399_v34  ;;  %5791 = vmatpush1.bf16.msra.mxu0 %v9520_v42 }
 0x3a7   : > { %v9643_v55 = vpop.eup %9642  ;;  %v11839_v50 = vmul.f32 %v4898_v25, %v11720_v27  ;;  %v4901_v35 = vadd.f32 1.0, %v9641_v6  ;;  %5632 = vmatmul.mubr.bf16.gmra.mrb[68].mxu0 %v5133_v56  ;;  %v4398_v54 = vadd.f32 %v11537_v19, %v11680_v60  ;;  %v4400_v7 = vadd.f32 %v11539_v20, %v11685_v1  ;;  %v9528_v60 = vld [vmem:[%s13400_s5 + $0x164] ss:$8 sps:$4 sm:$0xff]   ;;  %5792 = vmatprep.subr.bf16.mxu0 %v9525_v46 }
 0x3a8   : > { %13467 = vst [vmem:[#allocation17_spill] sm:$0xff] %v11836_v8  ;;  %v9645_v11 = vpop.eup %9644  ;;  %v11845_v53 = vmul.f32 %v4900_v51, %v11728_v41  ;;  %v4903_v30 = vadd.f32 1.0, %v9643_v55  ;;  %9656 = verf.f32 %v4653_v26  ;;  %v4401_v41 = vadd.f32 %v11531_v17, %v11716_v22 }
 0x3a9   : > { %v11849_v58 = vpop.f32.mrb[28].mxu0  ;;  %v11851_v27 = vpop.f32.mrb[28].mxu1  ;;  %v4902_v62 = vadd.f32 1.0, %v9645_v11  ;;  %v11864_v51 = vmul.f32 0.5, %v4397_v0  ;;  %v11866_v56 = vmul.f32 0.5, %v4399_v34  ;;  %9658 = verf.f32 %v4655_v63 }
 0x3aa   : > { %13468 = vst [vmem:[#allocation18_spill] sm:$0xff] %v11845_v53  ;;  %v9647_v6 = vpop.eup %9646  ;;  %v11857_v29 = vpop.f32.mrb[29].mxu0  ;;  %v11873_v22 = vmul.f32 %v4901_v35, %v11744_v31  ;;  %v11876_v42 = vmul.f32 %v4903_v30, %v11753_v57  ;;  %v4654_v26 = vmul.f32 0.70710677, %v4398_v54  ;;  %v4656_v11 = vmul.f32 0.70710677, %v4400_v7  ;;  %5793 = vmatpush1.bf16.msra.mxu0 %v9523_v21 }
 0x3ab   : > { %v11859_v25 = vpop.f32.mrb[29].mxu1  ;;  %v4904_v48 = vadd.f32 1.0, %v9647_v6  ;;  %v11868_v55 = vpop.f32.mrb[30].mxu0  ;;  %v11881_v34 = vmul.f32 %v4902_v62, %v11758_v38  ;;  %v11883_v63 = vmul.f32 0.5, %v4398_v54  ;;  %v4657_v6 = vmul.f32 0.70710677, %v4401_v41  ;;  %5794 = vmatprep.subr.bf16.mxu0 %v9528_v60 }
 0x3ac   : > { %v11870_v1 = vpop.f32.mrb[30].mxu1  ;;  %13469 = vst [vmem:[#allocation19_spill] sm:$0xff] %v11876_v42  ;;  %v11878_v8 = vpop.f32.mrb[31].mxu0  ;;  %v4403_v46 = vadd.f32 %v11533_v18, %v11718_v59  ;;  %9660 = verf.f32 %v4654_v26  ;;  %v4402_v57 = vadd.f32 %v11537_v19, %v11724_v36  ;;  %v4404_v30 = vadd.f32 %v11539_v20, %v11726_v12  ;;  %v9526_v38 = vld [vmem:[%s13400_s5 + $0x160] ss:$8 sps:$4 sm:$0xff]  }
 0x3ad   : > { %v9649_v0 = vpop.eup %9648  ;;  %v11887_v53 = vpop.f32.mrb[31].mxu1  ;;  %v11897_v62 = vmul.f32 %v4904_v48, %v11767_v39  ;;  %v11899_v59 = vmul.f32 0.5, %v4400_v7  ;;  %9662 = verf.f32 %v4656_v11  ;;  %v9531_v36 = vld [vmem:[%s13400_s5 + $0x174] ss:$8 sps:$4 sm:$0xff]   ;;  %v11904_v12 = vmul.f32 0.5, %v4401_v41 }
 0x3ae   : > { %v9651_v31 = vpop.eup %9650  ;;  %v4905_v35 = vadd.f32 1.0, %v9649_v0  ;;  %v4659_v0 = vmul.f32 0.70710677, %v4403_v46  ;;  %9664 = verf.f32 %v4657_v6  ;;  %v11906_v21 = vmul.f32 0.5, %v4403_v46  ;;  %v9529_v39 = vld [vmem:[%s13400_s5 + $0x170] ss:$8 sps:$4 sm:$0xff]   ;;  %5795 = vmatpush1.bf16.msra.mxu0 %v9526_v38 }
 0x3af   : > { %v9653_v54 = vpop.eup %9652  ;;  %13470 = vst [vmem:[#allocation20_spill] sm:$0xff] %v11897_v62  ;;  %v4907_v26 = vadd.f32 1.0, %v9651_v31  ;;  %v4658_v60 = vmul.f32 0.70710677, %v4402_v57  ;;  %v11918_v31 = vmul.f32 0.5, %v4402_v57  ;;  %v5138_v46 = vpack.c.bf16 %v11803_v33, %v11751_v47  ;;  %5796 = vmatprep.subr.bf16.mxu0 %v9531_v36 }
 0x3b0   : > { %v9655_v48 = vpop.eup %9654  ;;  %v11912_v7 = vmul.f32 %v4905_v35, %v11788_v28  ;;  %v4906_v11 = vadd.f32 1.0, %v9653_v54  ;;  %9666 = verf.f32 %v4659_v0  ;;  %v4660_v6 = vmul.f32 0.70710677, %v4404_v30  ;;  %v9534_v47 = vld [vmem:[%s13400_s5 + $0x184] ss:$8 sps:$4 sm:$0xff]  }
 0x3b1   : > { %v11914_v42 = vpop.f32.mrb[32].mxu0  ;;  %v11916_v62 = vpop.f32.mrb[32].mxu1  ;;  %v4908_v41 = vadd.f32 1.0, %v9655_v48  ;;  %9668 = verf.f32 %v4658_v60  ;;  %v4405_v28 = vadd.f32 %v11531_v17, %v11737_v32  ;;  %v4407_v35 = vadd.f32 %v11533_v18, %v11739_v2  ;;  %5641 = vmatprep.mubr.bf16.mxu0 %v5138_v46 }
 0x3b2   : > { %v11922_v44 = vpop.f32.mrb[33].mxu0  ;;  %v11924_v37 = vpop.f32.mrb[33].mxu1  ;;  %v5137_v57 = vpack.c.bf16 %v11778_v3, %v11704_v9  ;;  %v11940_v38 = vmul.f32 %v4907_v26, %v11790_v5  ;;  %9670 = verf.f32 %v4660_v6  ;;  %v4406_v32 = vadd.f32 %v11537_v19, %v11746_v49  ;;  %v9532_v49 = vld [vmem:[%s13400_s5 + $0x180] ss:$8 sps:$4 sm:$0xff]   ;;  %5797 = vmatpush1.bf16.msra.mxu0 %v9529_v39 }
 0x3b3   : > { %v11932_v54 = vpop.f32.mrb[34].mxu0  ;;  %v11934_v0 = vpop.f32.mrb[34].mxu1  ;;  %v4408_v9 = vadd.f32 %v11539_v20, %v11748_v52  ;;  %v11951_v48 = vmul.f32 %v4906_v11, %v11811_v61  ;;  %v11953_v10 = vmul.f32 0.5, %v4404_v30  ;;  %v4661_v5 = vmul.f32 0.70710677, %v4405_v28  ;;  %5798 = vmatprep.subr.bf16.mxu0 %v9534_v47 }
 0x3b4   : > { %v9657_v33 = vpop.eup %9656  ;;  %13471 = vst [vmem:[#allocation21_spill] sm:$0xff] %v11940_v38  ;;  %v11946_v2 = vpop.f32.mrb[35].mxu0  ;;  %5642 = vmatmul.mubr.bf16.gmra.mrb[72].mxu0 %v5137_v57  ;;  %v11959_v26 = vmul.f32 %v4908_v41, %v11828_v14  ;;  %v11961_v52 = vmul.f32 0.5, %v4405_v28  ;;  %v4663_v6 = vmul.f32 0.70710677, %v4407_v35  ;;  %v11963_v61 = vmul.f32 0.5, %v4407_v35 }
 0x3b5   : > { %v11948_v3 = vpop.f32.mrb[35].mxu1  ;;  %v9659_v36 = vpop.eup %9658  ;;  %v4909_v60 = vadd.f32 1.0, %v9657_v33  ;;  %v4662_v46 = vmul.f32 0.70710677, %v4406_v32  ;;  %9672 = verf.f32 %v4661_v5  ;;  %v4664_v30 = vmul.f32 0.70710677, %v4408_v9 }
 0x3b6   : > { %13472 = vst [vmem:[#allocation22_spill] sm:$0xff] %v11948_v3  ;;  %13473 = vst [vmem:[#allocation23_spill] sm:$0xff] %v11959_v26  ;;  %v4911_v38 = vadd.f32 1.0, %v9659_v36  ;;  %v9537_v11 = vld [vmem:[%s13400_s5 + $0x194] ss:$8 sps:$4 sm:$0xff]   ;;  %v9661_v57 = vpop.eup %9660  ;;  %9674 = verf.f32 %v4663_v6  ;;  %v11968_v33 = vmul.f32 0.5, %v4406_v32  ;;  %v4409_v14 = vadd.f32 %v11531_v17, %v11780_v24  ;;  %5799 = vmatpush1.bf16.msra.mxu0 %v9532_v49 }
 0x3b7   : > { %v4411_v39 = vadd.f32 %v11533_v18, %v11792_v43  ;;  %v9535_v41 = vld [vmem:[%s13400_s5 + $0x190] ss:$8 sps:$4 sm:$0xff]   ;;  %v9663_v28 = vpop.eup %9662  ;;  %v11978_v35 = vmul.f32 %v4909_v60, %v11864_v51  ;;  %v4910_v47 = vadd.f32 1.0, %v9661_v57  ;;  %9676 = verf.f32 %v4662_v46  ;;  %v9540_v24 = vld [vmem:[%s13400_s5 + $0x1a4] ss:$8 sps:$4 sm:$0xff]   ;;  %5800 = vmatprep.subr.bf16.mxu0 %v9537_v11 }
 0x3b8   : > { %v4410_v32 = vadd.f32 %v11537_v19, %v11794_v15  ;;  %v9665_v43 = vpop.eup %9664  ;;  %v4912_v6 = vadd.f32 1.0, %v9663_v28  ;;  %9678 = verf.f32 %v4664_v30  ;;  %v4665_v26 = vmul.f32 0.70710677, %v4409_v14 }
 0x3b9   : > { %v11982_v36 = vpop.f32.mrb[36].mxu0  ;;  %v11984_v5 = vpop.f32.mrb[36].mxu1  ;;  %v4412_v51 = vadd.f32 %v11539_v20, %v11798_v45  ;;  %v11996_v57 = vmul.f32 %v4911_v38, %v11866_v56  ;;  %v4667_v3 = vmul.f32 0.70710677, %v4411_v39  ;;  %v12007_v45 = vmul.f32 %v4910_v47, %v11883_v63 }
 0x3ba   : > { %13474 = vst [vmem:[#allocation24_spill] sm:$0xff] %v11982_v36  ;;  %13475 = vst [vmem:[#allocation25_spill] sm:$0xff] %v11984_v5  ;;  %v11991_v60 = vpop.f32.mrb[37].mxu0  ;;  %v11993_v46 = vpop.f32.mrb[37].mxu1  ;;  %v11998_v5 = vmul.f32 0.5, %v4408_v9  ;;  %v12000_v36 = vmul.f32 0.5, %v4409_v14  ;;  %9680 = verf.f32 %v4665_v26  ;;  %v12016_v9 = vmul.f32 %v4912_v6, %v11899_v59  ;;  %5801 = vmatpush1.bf16.msra.mxu0 %v9535_v41 }
 0x3bb   : > { %13476 = vst [vmem:[#allocation26_spill] sm:$0xff] %v11991_v60  ;;  %13477 = vst [vmem:[#allocation27_spill] sm:$0xff] %v11993_v46  ;;  %v9667_v15 = vpop.eup %9666  ;;  %v12002_v28 = vpop.f32.mrb[38].mxu0  ;;  %v4913_v60 = vadd.f32 1.0, %v9665_v43  ;;  %v12009_v49 = vmul.f32 0.5, %v4411_v39  ;;  %9682 = verf.f32 %v4667_v3  ;;  %v5142_v26 = vpack.c.bf16 %v11881_v34, %v11839_v50  ;;  %5802 = vmatprep.subr.bf16.mxu0 %v9540_v24 }
 0x3bc   : > { %13478 = vst [vmem:[#allocation28_spill] sm:$0xff] %v11996_v57  ;;  %13479 = vst [vmem:[#allocation29_spill] sm:$0xff] %v12002_v28  ;;  %v12004_v30 = vpop.f32.mrb[38].mxu1  ;;  %v12011_v46 = vpop.f32.mrb[39].mxu0  ;;  %v4915_v14 = vadd.f32 1.0, %v9667_v15  ;;  %v12018_v28 = vmul.f32 0.5, %v4410_v32  ;;  %v4413_v47 = vadd.f32 %v11531_v17, %v11800_v16  ;;  %v4415_v59 = vadd.f32 %v11533_v18, %v11807_v4 }
 0x3bd   : > { %13480 = vst [vmem:[#allocation30_spill] sm:$0xff] %v12004_v30  ;;  %v12013_v56 = vpop.f32.mrb[39].mxu1  ;;  %v9669_v38 = vpop.eup %9668  ;;  %13481 = vst [vmem:[#allocation31_spill] sm:$0xff] %v12016_v9  ;;  %v4666_v57 = vmul.f32 0.70710677, %v4410_v32  ;;  %v12030_v32 = vmul.f32 %v4913_v60, %v11904_v12  ;;  %5651 = vmatprep.mubr.bf16.mxu0 %v5142_v26  ;;  %v5141_v50 = vpack.c.bf16 %v11873_v22, %v11826_v40  ;;  %v12045_v12 = vmul.f32 0.5, %v4412_v51 }
 0x3be   : > { %v9671_v30 = vpop.eup %9670  ;;  %v4914_v11 = vadd.f32 1.0, %v9669_v38  ;;  %v4668_v63 = vmul.f32 0.70710677, %v4412_v51  ;;  %v9538_v3 = vld [vmem:[%s13400_s5 + $0x1a0] ss:$8 sps:$4 sm:$0xff]   ;;  %v4414_v34 = vadd.f32 %v11537_v19, %v11809_v23  ;;  %v12040_v41 = vmul.f32 %v4915_v14, %v11906_v21 }
 0x3bf   : > { %v4916_v39 = vadd.f32 1.0, %v9671_v30  ;;  %9684 = verf.f32 %v4666_v57  ;;  %v9543_v16 = vld [vmem:[%s13400_s5 + $0x1b4] ss:$8 sps:$4 sm:$0xff]   ;;  %v9673_v4 = vpop.eup %9672  ;;  %v4669_v43 = vmul.f32 0.70710677, %v4413_v47  ;;  %5652 = vmatmul.mubr.bf16.gmra.mrb[76].mxu0 %v5141_v50  ;;  %v4417_v51 = vadd.f32 %v11531_v17, %v11849_v58 }
 0x3c0   : > { %9686 = verf.f32 %v4668_v63  ;;  %13482 = vst [vmem:[#allocation32_spill] sm:$0xff] %v12040_v41  ;;  %v12043_v24 = vmul.f32 %v4914_v11, %v11918_v31  ;;  %v9675_v22 = vpop.eup %9674  ;;  %v4917_v60 = vadd.f32 1.0, %v9673_v4  ;;  %v4671_v15 = vmul.f32 0.70710677, %v4415_v59  ;;  %5803 = vmatpush1.bf16.msra.mxu0 %v9538_v3  ;;  %v9546_v3 = vld [vmem:[%s13400_s5 + $0x1c4] ss:$8 sps:$4 sm:$0xff]  }
 0x3c1   : > { %v12047_v6 = vpop.f32.mrb[40].mxu0  ;;  %v12049_v40 = vpop.f32.mrb[40].mxu1  ;;  %v12052_v23 = vmul.f32 %v4916_v39, %v11953_v10  ;;  %v4670_v57 = vmul.f32 0.70710677, %v4414_v34  ;;  %v4919_v30 = vadd.f32 1.0, %v9675_v22  ;;  %9688 = verf.f32 %v4669_v43  ;;  %5804 = vmatprep.subr.bf16.mxu0 %v9543_v16 }
 0x3c2   : > { %v9677_v21 = vpop.eup %9676  ;;  %v4416_v31 = vadd.f32 %v11539_v20, %v11813_v13  ;;  %v12058_v38 = vpop.f32.mrb[41].mxu0  ;;  %v9541_v10 = vld [vmem:[%s13400_s5 + $0x1b0] ss:$8 sps:$4 sm:$0xff]   ;;  %v12065_v26 = vmul.f32 0.5, %v4413_v47  ;;  %9690 = verf.f32 %v4671_v15  ;;  %v4419_v13 = vadd.f32 %v11533_v18, %v11851_v27 }
 0x3c3   : > { %13483 = vst [vmem:[#allocation33_spill] sm:$0xff] %v12052_v23  ;;  %v12060_v14 = vpop.f32.mrb[41].mxu1  ;;  %v9679_v11 = vpop.eup %9678  ;;  %v4918_v63 = vadd.f32 1.0, %v9677_v21  ;;  %v12077_v50 = vmul.f32 %v4917_v60, %v11961_v52  ;;  %v12079_v4 = vmul.f32 0.5, %v4415_v59  ;;  %v12081_v47 = vmul.f32 0.5, %v4414_v34 }
 0x3c4   : > { %v12069_v39 = vpop.f32.mrb[42].mxu0  ;;  %v12071_v58 = vpop.f32.mrb[42].mxu1  ;;  %9692 = verf.f32 %v4670_v57  ;;  %v12088_v15 = vmul.f32 %v4919_v30, %v11963_v61  ;;  %v4920_v16 = vadd.f32 1.0, %v9679_v11  ;;  %v4672_v21 = vmul.f32 0.70710677, %v4416_v31  ;;  %5805 = vmatpush1.bf16.msra.mxu0 %v9541_v10 }
 0x3c5   : > { %v12083_v43 = vpop.f32.mrb[43].mxu0  ;;  %v12085_v27 = vpop.f32.mrb[43].mxu1  ;;  %v4673_v41 = vmul.f32 0.70710677, %v4417_v51  ;;  %v12091_v52 = vmul.f32 %v4918_v63, %v11968_v33  ;;  %v12093_v60 = vmul.f32 0.5, %v4416_v31  ;;  %v4418_v61 = vadd.f32 %v11537_v19, %v11857_v29  ;;  %5806 = vmatprep.subr.bf16.mxu0 %v9546_v3 }
 0x3c6   : > { %v9681_v22 = vpop.eup %9680  ;;  %13484 = vst [vmem:[#allocation34_spill] sm:$0xff] %v12088_v15  ;;  %v4675_v34 = vmul.f32 0.70710677, %v4419_v13  ;;  %v9544_v57 = vld [vmem:[%s13400_s5 + $0x1c0] ss:$8 sps:$4 sm:$0xff]   ;;  %9694 = verf.f32 %v4672_v21  ;;  %v4420_v30 = vadd.f32 %v11539_v20, %v11859_v25  ;;  %v12105_v11 = vmul.f32 0.5, %v4417_v51 }
 0x3c7   : > { %v9683_v23 = vpop.eup %9682  ;;  %v4921_v59 = vadd.f32 1.0, %v9681_v22  ;;  %v9549_v33 = vld [vmem:[%s13400_s5 + $0x1d4] ss:$8 sps:$4 sm:$0xff]   ;;  %9696 = verf.f32 %v4673_v41  ;;  %v5146_v10 = vpack.c.bf16 %v12007_v45, %v11951_v48  ;;  %v12116_v3 = vmul.f32 %v4920_v16, %v11998_v5  ;;  %v9547_v5 = vld [vmem:[%s13400_s5 + $0x1d0] ss:$8 sps:$4 sm:$0xff]  }
 0x3c8   : > { %v4923_v9 = vadd.f32 1.0, %v9683_v23  ;;  %v4421_v23 = vadd.f32 %v11531_v17, %v11868_v55  ;;  %v12118_v21 = vmul.f32 0.5, %v4419_v13  ;;  %9698 = verf.f32 %v4675_v34  ;;  %5807 = vmatpush1.bf16.msra.mxu0 %v9544_v57 }
 0x3c9   : > { %v9685_v31 = vpop.eup %9684  ;;  %v12111_v63 = vpop.f32.mrb[44].mxu0  ;;  %13485 = vst [vmem:[#allocation35_spill] sm:$0xff] %v12116_v3  ;;  %v12125_v48 = vmul.f32 %v4921_v59, %v12000_v36  ;;  %v4674_v45 = vmul.f32 0.70710677, %v4418_v61  ;;  %v4676_v15 = vmul.f32 0.70710677, %v4420_v30  ;;  %5661 = vmatprep.mubr.bf16.mxu0 %v5146_v10  ;;  %5808 = vmatprep.subr.bf16.mxu0 %v9549_v33  ;;  %v5145_v57 = vpack.c.bf16 %v11978_v35, %v11912_v7 }
 0x3ca   : > { %v12113_v29 = vpop.f32.mrb[44].mxu1  ;;  %v9687_v25 = vpop.eup %9686  ;;  %v4922_v22 = vadd.f32 1.0, %v9685_v31  ;;  %v12128_v55 = vmul.f32 %v4923_v9, %v12009_v49  ;;  %v12133_v16 = vmul.f32 0.5, %v4418_v61  ;;  %v4677_v34 = vmul.f32 0.70710677, %v4421_v23 }
 0x3cb   : > { %v12120_v51 = vpop.f32.mrb[45].mxu0  ;;  %v12122_v41 = vpop.f32.mrb[45].mxu1  ;;  %v4924_v13 = vadd.f32 1.0, %v9687_v25  ;;  %v4423_v31 = vadd.f32 %v11533_v18, %v11870_v1  ;;  %9700 = verf.f32 %v4674_v45  ;;  %v12141_v9 = vmul.f32 0.5, %v4420_v30  ;;  %v9552_v1 = vld [vmem:[%s13400_s5 + $0x1e4] ss:$8 sps:$4 sm:$0xff]   ;;  %5662 = vmatmul.mubr.bf16.gmra.mrb[80].mxu0 %v5145_v57 }
 0x3cc   : > { %13486 = vst [vmem:[#allocation36_spill] sm:$0xff] %v12128_v55  ;;  %v12137_v36 = vpop.f32.mrb[46].mxu0  ;;  %v12139_v59 = vpop.f32.mrb[46].mxu1  ;;  %v4422_v61 = vadd.f32 %v11537_v19, %v11878_v8  ;;  %v12155_v33 = vmul.f32 %v4922_v22, %v12018_v28  ;;  %9702 = verf.f32 %v4676_v15  ;;  %v12157_v35 = vmul.f32 0.5, %v4421_v23  ;;  %5809 = vmatpush1.bf16.msra.mxu0 %v9547_v5  ;;  %v9550_v28 = vld [vmem:[%s13400_s5 + $0x1e0] ss:$8 sps:$4 sm:$0xff]  }
 0x3cd   : > { %13487 = vst [vmem:[#allocation37_spill] sm:$0xff] %v12139_v59  ;;  %v9689_v49 = vpop.eup %9688  ;;  %v12147_v10 = vpop.f32.mrb[47].mxu0  ;;  %v4679_v45 = vmul.f32 0.70710677, %v4423_v31  ;;  %9704 = verf.f32 %v4677_v34  ;;  %v4424_v59 = vadd.f32 %v11539_v20, %v11887_v53  ;;  %v12167_v15 = vmul.f32 0.5, %v4423_v31  ;;  %5810 = vmatprep.subr.bf16.mxu0 %v9552_v1 }
 0x3ce   : > { %13488 = vst [vmem:[#allocation38_spill] sm:$0xff] %v12147_v10  ;;  %v12149_v25 = vpop.f32.mrb[47].mxu1  ;;  %v9691_v55 = vpop.eup %9690  ;;  %v4925_v30 = vadd.f32 1.0, %v9689_v49  ;;  %v4678_v8 = vmul.f32 0.70710677, %v4422_v61  ;;  %v4425_v23 = vadd.f32 %v11531_v17, %v11914_v42  ;;  %v4426_v42 = vadd.f32 %v11537_v19, %v11922_v44 }
 0x3cf   : > { %13489 = vst [vmem:[#allocation39_spill] sm:$0xff] %v12149_v25  ;;  %v9693_v3 = vpop.eup %9692  ;;  %v4927_v7 = vadd.f32 1.0, %v9691_v55  ;;  %v12160_v25 = vmul.f32 %v4924_v13, %v12045_v12  ;;  %9706 = verf.f32 %v4679_v45  ;;  %v4427_v12 = vadd.f32 %v11533_v18, %v11916_v62  ;;  %v9555_v53 = vld [vmem:[%s13400_s5 + $0x1f4] ss:$8 sps:$4 sm:$0xff]   ;;  %v9553_v44 = vld [vmem:[%s13400_s5 + $0x1f0] ss:$8 sps:$4 sm:$0xff]  }
 0x3d0   : > { %v4926_v10 = vadd.f32 1.0, %v9693_v3  ;;  %9708 = verf.f32 %v4678_v8  ;;  %v9695_v55 = vpop.eup %9694  ;;  %v12181_v5 = vmul.f32 %v4925_v30, %v12065_v26  ;;  %v12183_v13 = vmul.f32 0.5, %v4422_v61  ;;  %5811 = vmatpush1.bf16.msra.mxu0 %v9550_v28 }
 0x3d1   : > { %13490 = vst [vmem:[#allocation40_spill] sm:$0xff] %v12160_v25  ;;  %v12173_v22 = vpop.f32.mrb[48].mxu0  ;;  %v12175_v3 = vpop.f32.mrb[48].mxu1  ;;  %v4680_v34 = vmul.f32 0.70710677, %v4424_v59  ;;  %v12192_v57 = vmul.f32 %v4927_v7, %v12079_v4  ;;  %v12197_v45 = vmul.f32 0.5, %v4424_v59  ;;  %5812 = vmatprep.subr.bf16.mxu0 %v9555_v53  ;;  %v4429_v28 = vadd.f32 %v11531_v17, %v11932_v54 }
 0x3d2   : > { %v12187_v62 = vpop.f32.mrb[49].mxu0  ;;  %v12189_v31 = vpop.f32.mrb[49].mxu1  ;;  %v12195_v1 = vmul.f32 %v4926_v10, %v12081_v47  ;;  %v4681_v26 = vmul.f32 0.70710677, %v4425_v23  ;;  %v4928_v8 = vadd.f32 1.0, %v9695_v55  ;;  %v12208_v59 = vmul.f32 0.5, %v4425_v23 }
 0x3d3   : > { %13491 = vst [vmem:[#allocation41_spill] sm:$0xff] %v12187_v62  ;;  %13492 = vst [vmem:[#allocation42_spill] sm:$0xff] %v12189_v31  ;;  %v9697_v49 = vpop.eup %9696  ;;  %v12199_v61 = vpop.f32.mrb[50].mxu0  ;;  %9710 = verf.f32 %v4680_v34  ;;  %v4683_v31 = vmul.f32 0.70710677, %v4427_v12  ;;  %v4428_v55 = vadd.f32 %v11539_v20, %v11924_v37  ;;  %v5150_v34 = vpack.c.bf16 %v12091_v52, %v12043_v24 }
 0x3d4   : > { %13493 = vst [vmem:[#allocation43_spill] sm:$0xff] %v12192_v57  ;;  %v9699_v30 = vpop.eup %9698  ;;  %v4929_v25 = vadd.f32 1.0, %v9697_v49  ;;  %v12204_v62 = vpop.f32.mrb[50].mxu1  ;;  %9712 = verf.f32 %v4681_v26  ;;  %v4682_v10 = vmul.f32 0.70710677, %v4426_v42  ;;  %v12212_v57 = vmul.f32 0.5, %v4427_v12  ;;  %5813 = vmatpush1.bf16.msra.mxu0 %v9553_v44 }
 0x3d5   : > { %v12206_v4 = vpop.f32.mrb[51].mxu0  ;;  %v4931_v47 = vadd.f32 1.0, %v9699_v30  ;;  %v12210_v7 = vpop.f32.mrb[51].mxu1  ;;  %9714 = verf.f32 %v4683_v31  ;;  %v4431_v23 = vadd.f32 %v11533_v18, %v11934_v0  ;;  %v12225_v12 = vmul.f32 %v4928_v8, %v12093_v60  ;;  %5671 = vmatprep.mubr.bf16.mxu0 %v5150_v34 }
 0x3d6   : > { %13494 = vst [vmem:[#allocation44_spill] sm:$0xff] %v12206_v4  ;;  %v9701_v49 = vpop.eup %9700  ;;  %v12218_v4 = vmul.f32 0.5, %v4426_v42  ;;  %9716 = verf.f32 %v4682_v10  ;;  %v12228_v31 = vmul.f32 %v4929_v25, %v12105_v11  ;;  %v4684_v37 = vmul.f32 0.70710677, %v4428_v55 }
 0x3d7   : > { %v9703_v53 = vpop.eup %9702  ;;  %13495 = vst [vmem:[#allocation45_spill] sm:$0xff] %v12225_v12  ;;  %v5149_v24 = vpack.c.bf16 %v12077_v50, %v12030_v32  ;;  %v12233_v42 = vmul.f32 %v4931_v47, %v12118_v21  ;;  %v4930_v54 = vadd.f32 1.0, %v9701_v49  ;;  %v4685_v0 = vmul.f32 0.70710677, %v4429_v28 }
 0x3d8   : > { %v9705_v52 = vpop.eup %9704  ;;  %v4932_v26 = vadd.f32 1.0, %v9703_v53  ;;  %v12237_v10 = vmul.f32 0.5, %v4428_v55  ;;  %9718 = verf.f32 %v4684_v37  ;;  %v4687_v11 = vmul.f32 0.70710677, %v4431_v23  ;;  %v13499_v37 = vld [vmem:[#allocation22_spill] sm:$0xff] }
 0x3d9   : > { %13496 = vst [vmem:[#allocation46_spill] sm:$0xff] %v12233_v42  ;;  %v12235_v30 = vpop.f32.mrb[52].mxu0  ;;  %v9707_v60 = vpop.eup %9706  ;;  %v4933_v8 = vadd.f32 1.0, %v9705_v52  ;;  %5672 = vmatmul.mubr.bf16.gmra.mrb[84].mxu0 %v5149_v24  ;;  %v12243_v21 = vmul.f32 0.5, %v4429_v28  ;;  %9720 = verf.f32 %v4685_v0  ;;  %v4430_v47 = vadd.f32 %v11537_v19, %v11946_v2  ;;  %v13503_v42 = vld [vmem:[#allocation24_spill] sm:$0xff] }
 0x3da   : > { %v12239_v25 = vpop.f32.mrb[52].mxu1  ;;  %v12241_v32 = vpop.f32.mrb[53].mxu0  ;;  %v4935_v44 = vadd.f32 1.0, %v9707_v60  ;;  %v12251_v53 = vmul.f32 0.5, %v4431_v23  ;;  %9722 = verf.f32 %v4687_v11  ;;  %v4432_v24 = vadd.f32 %v11539_v20, %v13499_v37 }
 0x3db   : > { %v9709_v50 = vpop.eup %9708  ;;  %v12247_v34 = vpop.f32.mrb[53].mxu1  ;;  %v12260_v28 = vmul.f32 %v4930_v54, %v12133_v16  ;;  %v12263_v2 = vmul.f32 %v4932_v26, %v12141_v9  ;;  %v4686_v0 = vmul.f32 0.70710677, %v4430_v47  ;;  %v12270_v12 = vmul.f32 %v4933_v8, %v12157_v35 }
 0x3dc   : > { %13497 = vst [vmem:[#allocation47_spill] sm:$0xff] %v12247_v34  ;;  %v12249_v49 = vpop.f32.mrb[54].mxu0  ;;  %v4934_v55 = vadd.f32 1.0, %v9709_v50  ;;  %v12255_v52 = vpop.f32.mrb[54].mxu1  ;;  %v4433_v50 = vadd.f32 %v11531_v17, %v13503_v42  ;;  %v12273_v37 = vmul.f32 %v4935_v44, %v12167_v15  ;;  %v12277_v26 = vmul.f32 0.5, %v4430_v47 }
 0x3dd   : > { %13498 = vst [vmem:[#allocation48_spill] sm:$0xff] %v12249_v49  ;;  %13500 = vst [vmem:[#allocation22_spill] sm:$0xff] %v12255_v52  ;;  %v12257_v60 = vpop.f32.mrb[55].mxu0  ;;  %v12267_v23 = vpop.f32.mrb[55].mxu1  ;;  %v13506_v52 = vld [vmem:[#allocation25_spill] sm:$0xff]  ;;  %9724 = verf.f32 %v4686_v0  ;;  %v12282_v44 = vmul.f32 0.5, %v4432_v24 }
 0x3de   : > { %13501 = vst [vmem:[#allocation49_spill] sm:$0xff] %v12257_v60  ;;  %13502 = vst [vmem:[#allocation50_spill] sm:$0xff] %v12263_v2  ;;  %v9711_v11 = vpop.eup %9710  ;;  %v4688_v60 = vmul.f32 0.70710677, %v4432_v24  ;;  %v4435_v16 = vadd.f32 %v11533_v18, %v13506_v52  ;;  %v4689_v2 = vmul.f32 0.70710677, %v4433_v50 }
 0x3df   : > { %13504 = vst [vmem:[#allocation24_spill] sm:$0xff] %v12267_v23  ;;  %13505 = vst [vmem:[#allocation51_spill] sm:$0xff] %v12273_v37  ;;  %v9713_v54 = vpop.eup %9712  ;;  %v4936_v9 = vadd.f32 1.0, %v9711_v11  ;;  %v12280_v23 = vmul.f32 %v4934_v55, %v12183_v13  ;;  %v13507_v37 = vld [vmem:[#allocation26_spill] sm:$0xff]  ;;  %v12290_v0 = vmul.f32 0.5, %v4433_v50  ;;  %v13509_v13 = vld [vmem:[#allocation27_spill] sm:$0xff] }
 0x3e0   : > { %v9715_v42 = vpop.eup %9714  ;;  %v4937_v49 = vadd.f32 1.0, %v9713_v54  ;;  %9726 = verf.f32 %v4688_v60  ;;  %v4691_v35 = vmul.f32 0.70710677, %v4435_v16  ;;  %v4434_v52 = vadd.f32 %v11537_v19, %v13507_v37 }
 0x3e1   : > { %v9717_v8 = vpop.eup %9716  ;;  %v4939_v15 = vadd.f32 1.0, %v9715_v42  ;;  %9728 = verf.f32 %v4689_v2  ;;  %v12286_v11 = vpop.f32.mrb[56].mxu0  ;;  %v12292_v34 = vmul.f32 0.5, %v4435_v16  ;;  %v4436_v55 = vadd.f32 %v11539_v20, %v13509_v13 }
 0x3e2   : > { %v12288_v47 = vpop.f32.mrb[56].mxu1  ;;  %9730 = verf.f32 %v4691_v35  ;;  %v12296_v60 = vpop.f32.mrb[57].mxu0  ;;  %v12301_v2 = vmul.f32 %v4936_v9, %v12197_v45  ;;  %v4938_v37 = vadd.f32 1.0, %v9717_v8  ;;  %v4690_v54 = vmul.f32 0.70710677, %v4434_v52 }
 0x3e3   : > { %13508 = vst [vmem:[#allocation25_spill] sm:$0xff] %v12288_v47  ;;  %13510 = vst [vmem:[#allocation26_spill] sm:$0xff] %v12296_v60  ;;  %v12298_v24 = vpop.f32.mrb[57].mxu1  ;;  %v5154_v42 = vpack.c.bf16 %v12195_v1, %v12155_v33  ;;  %v12305_v50 = vpop.f32.mrb[58].mxu0  ;;  %v12310_v47 = vmul.f32 %v4937_v49, %v12208_v59  ;;  %v12313_v13 = vmul.f32 %v4939_v15, %v12212_v57  ;;  %v13515_v60 = vld [vmem:[#allocation29_spill] sm:$0xff]  ;;  %v12325_v15 = vmul.f32 0.5, %v4434_v52 }
 0x3e4   : > { %13511 = vst [vmem:[#allocation27_spill] sm:$0xff] %v12298_v24  ;;  %13512 = vst [vmem:[#allocation52_spill] sm:$0xff] %v12301_v2  ;;  %v12307_v16 = vpop.f32.mrb[58].mxu1  ;;  %v9719_v35 = vpop.eup %9718  ;;  %v4692_v24 = vmul.f32 0.70710677, %v4436_v55  ;;  %v4437_v45 = vadd.f32 %v11531_v17, %v13515_v60  ;;  %9732 = verf.f32 %v4690_v54  ;;  %v13518_v2 = vld [vmem:[#allocation30_spill] sm:$0xff]  ;;  %v5153_v59 = vpack.c.bf16 %v12181_v5, %v12125_v48 }
 0x3e5   : > { %13513 = vst [vmem:[#allocation53_spill] sm:$0xff] %v12307_v16  ;;  %13514 = vst [vmem:[#allocation54_spill] sm:$0xff] %v12313_v13  ;;  %v12317_v9 = vpop.f32.mrb[59].mxu0  ;;  %v12319_v8 = vpop.f32.mrb[59].mxu1  ;;  %v4940_v1 = vadd.f32 1.0, %v9719_v35  ;;  %5681 = vmatprep.mubr.bf16.mxu0 %v5154_v42  ;;  %v4439_v16 = vadd.f32 %v11533_v18, %v13518_v2  ;;  %v12328_v13 = vmul.f32 %v4938_v37, %v12218_v4 }
 0x3e6   : > { %13516 = vst [vmem:[#allocation29_spill] sm:$0xff] %v12317_v9  ;;  %13517 = vst [vmem:[#allocation55_spill] sm:$0xff] %v12319_v8  ;;  %v9721_v33 = vpop.eup %9720  ;;  %9734 = verf.f32 %v4692_v24  ;;  %v4693_v60 = vmul.f32 0.70710677, %v4437_v45  ;;  %v12330_v9 = vmul.f32 0.5, %v4436_v55  ;;  %5682 = vmatmul.mubr.bf16.gmra.mrb[88].mxu0 %v5153_v59  ;;  %v12332_v42 = vmul.f32 0.5, %v4437_v45 }
 0x3e7   : > { %v9723_v57 = vpop.eup %9722  ;;  %v4941_v49 = vadd.f32 1.0, %v9721_v33  ;;  %v4695_v54 = vmul.f32 0.70710677, %v4439_v16  ;;  %v4438_v48 = vadd.f32 %v11537_v19, %v12011_v46  ;;  %v4440_v5 = vadd.f32 %v11539_v20, %v12013_v56 }
 0x3e8   : > { %v4943_v8 = vadd.f32 1.0, %v9723_v57  ;;  %9736 = verf.f32 %v4693_v60  ;;  %v9725_v52 = vpop.eup %9724  ;;  %v12339_v24 = vmul.f32 %v4940_v1, %v12237_v10  ;;  %v4441_v4 = vadd.f32 %v11531_v17, %v12047_v6 }
 0x3e9   : > { %9738 = verf.f32 %v4695_v54  ;;  %v4443_v55 = vadd.f32 %v11533_v18, %v12049_v40  ;;  %v12345_v2 = vpop.f32.mrb[60].mxu0  ;;  %v12347_v37 = vpop.f32.mrb[60].mxu1  ;;  %v12350_v46 = vmul.f32 %v4941_v49, %v12243_v21  ;;  %v4942_v56 = vadd.f32 1.0, %v9725_v52 }
 0x3ea   : > { %13519 = vst [vmem:[#allocation30_spill] sm:$0xff] %v12339_v24  ;;  %v9727_v35 = vpop.eup %9726  ;;  %v12352_v45 = vmul.f32 0.5, %v4439_v16  ;;  %v4694_v10 = vmul.f32 0.70710677, %v4438_v48  ;;  %v12354_v33 = vpop.f32.mrb[61].mxu0  ;;  %v12357_v6 = vmul.f32 %v4943_v8, %v12251_v53  ;;  %v12359_v59 = vmul.f32 0.5, %v4438_v48 }
 0x3eb   : > { %13520 = vst [vmem:[#allocation56_spill] sm:$0xff] %v12354_v33  ;;  %v9729_v1 = vpop.eup %9728  ;;  %v4696_v40 = vmul.f32 0.70710677, %v4440_v5  ;;  %v4697_v57 = vmul.f32 0.70710677, %v4441_v4  ;;  %v4944_v54 = vadd.f32 1.0, %v9727_v35  ;;  %v4444_v35 = vadd.f32 %v11539_v20, %v12060_v14 }
 0x3ec   : > { %13521 = vst [vmem:[#allocation57_spill] sm:$0xff] %v12357_v6  ;;  %v9731_v60 = vpop.eup %9730  ;;  %v4945_v24 = vadd.f32 1.0, %v9729_v1  ;;  %9740 = verf.f32 %v4694_v10  ;;  %v12361_v21 = vmul.f32 0.5, %v4440_v5  ;;  %v12363_v49 = vpop.f32.mrb[61].mxu1  ;;  %v12367_v33 = vmul.f32 0.5, %v4441_v4 }
 0x3ed   : > { %v12365_v16 = vpop.f32.mrb[62].mxu0  ;;  %v4947_v52 = vadd.f32 1.0, %v9731_v60  ;;  %9742 = verf.f32 %v4696_v40  ;;  %v4699_v53 = vmul.f32 0.70710677, %v4443_v55  ;;  %v12369_v8 = vpop.f32.mrb[62].mxu1  ;;  %v12374_v6 = vmul.f32 %v4942_v56, %v12277_v26 }
 0x3ee   : > { %v12371_v48 = vpop.f32.mrb[63].mxu0  ;;  %9744 = verf.f32 %v4697_v57  ;;  %v4442_v5 = vadd.f32 %v11537_v19, %v12058_v38  ;;  %v12380_v10 = vpop.f32.mrb[63].mxu1  ;;  %v12382_v4 = vmul.f32 0.5, %v4443_v55  ;;  %v5158_v40 = vpack.c.bf16 %v12280_v23, %v12260_v28 }
 0x3ef   : > { %13522 = vst [vmem:[#allocation58_spill] sm:$0xff] %v12371_v48  ;;  %13523 = vst [vmem:[#allocation59_spill] sm:$0xff] %v12380_v10  ;;  %v9733_v1 = vpop.eup %9732  ;;  %9746 = verf.f32 %v4699_v53  ;;  %v4445_v26 = vadd.f32 %v11531_v17, %v12069_v39  ;;  %v12389_v57 = vmul.f32 %v4944_v54, %v12282_v44  ;;  %v12392_v38 = vmul.f32 %v4945_v24, %v12290_v0 }
 0x3f0   : > { %v9735_v56 = vpop.eup %9734  ;;  %v12395_v14 = vmul.f32 %v4947_v52, %v12292_v34  ;;  %v4698_v60 = vmul.f32 0.70710677, %v4442_v5  ;;  %v4946_v55 = vadd.f32 1.0, %v9733_v1  ;;  %v4700_v53 = vmul.f32 0.70710677, %v4444_v35  ;;  %5691 = vmatprep.mubr.bf16.mxu0 %v5158_v40 }
 0x3f1   : > { %v4948_v10 = vadd.f32 1.0, %v9735_v56  ;;  %v4701_v48 = vmul.f32 0.70710677, %v4445_v26  ;;  %v12397_v23 = vmul.f32 0.5, %v4442_v5  ;;  %v4447_v39 = vadd.f32 %v11533_v18, %v12071_v58 }
 0x3f2   : > { %v9737_v28 = vpop.eup %9736  ;;  %9748 = verf.f32 %v4698_v60  ;;  %v5157_v44 = vpack.c.bf16 %v12270_v12, %v12228_v31  ;;  %v12403_v34 = vmul.f32 0.5, %v4444_v35  ;;  %v4446_v54 = vadd.f32 %v11537_v19, %v12083_v43 }
 0x3f3   : > { %v9739_v0 = vpop.eup %9738  ;;  %v4949_v24 = vadd.f32 1.0, %v9737_v28  ;;  %9750 = verf.f32 %v4700_v53  ;;  %v12407_v1 = vmul.f32 0.5, %v4445_v26  ;;  %v4703_v5 = vmul.f32 0.70710677, %v4447_v39 }
 0x3f4   : > { %v4951_v52 = vadd.f32 1.0, %v9739_v0  ;;  %9752 = verf.f32 %v4701_v48  ;;  %5692 = vmatmul.mubr.bf16.gmra.mrb[92].mxu0 %v5157_v44  ;;  %v12410_v40 = vmul.f32 %v4946_v55, %v12325_v15  ;;  %v12413_v58 = vmul.f32 %v4948_v10, %v12330_v9 }
 0x3f5   : > { %v4702_v12 = vmul.f32 0.70710677, %v4446_v54  ;;  %v4448_v31 = vadd.f32 %v11539_v20, %v12085_v27  ;;  %v12417_v56 = vmul.f32 0.5, %v4447_v39  ;;  %9754 = verf.f32 %v4703_v5 }
 0x3f6   : > { %v9741_v35 = vpop.eup %9740  ;;  %v4449_v43 = vadd.f32 %v11531_v17, %v12111_v63  ;;  %v4451_v48 = vadd.f32 %v11533_v18, %v12113_v29  ;;  %v12424_v15 = vmul.f32 %v4949_v24, %v12332_v42  ;;  %v12426_v9 = vmul.f32 0.5, %v4446_v54 }
 0x3f7   : > { %v9743_v26 = vpop.eup %9742  ;;  %9756 = verf.f32 %v4702_v12  ;;  %v4704_v10 = vmul.f32 0.70710677, %v4448_v31  ;;  %v12429_v27 = vmul.f32 %v4951_v52, %v12352_v45  ;;  %v4950_v55 = vadd.f32 1.0, %v9741_v35 }
 0x3f8   : > { %v9745_v60 = vpop.eup %9744  ;;  %v4952_v53 = vadd.f32 1.0, %v9743_v26  ;;  %v4705_v28 = vmul.f32 0.70710677, %v4449_v43  ;;  %v12431_v44 = vmul.f32 0.5, %v4448_v31  ;;  %v4707_v29 = vmul.f32 0.70710677, %v4451_v48 }
 0x3f9   : > { %v9747_v39 = vpop.eup %9746  ;;  %v4953_v63 = vadd.f32 1.0, %v9745_v60  ;;  %9758 = verf.f32 %v4704_v10  ;;  %v12433_v42 = vmul.f32 0.5, %v4449_v43  ;;  %v4450_v24 = vadd.f32 %v11537_v19, %v12120_v51  ;;  %v13524_v10 = vld [vmem:[#allocation37_spill] sm:$0xff] }
 0x3fa   : > { %v4955_v0 = vadd.f32 1.0, %v9747_v39  ;;  %9760 = verf.f32 %v4705_v28  ;;  %v12437_v54 = vmul.f32 0.5, %v4451_v48  ;;  %v4452_v45 = vadd.f32 %v11539_v20, %v12122_v41 }
 0x3fb   : > { %9762 = verf.f32 %v4707_v29  ;;  %v5162_v52 = vpack.c.bf16 %v12374_v6, %v12328_v13  ;;  %v12444_v12 = vmul.f32 %v4950_v55, %v12359_v59  ;;  %v12447_v31 = vmul.f32 %v4952_v53, %v12361_v21 }
 0x3fc   : > { %v9749_v5 = vpop.eup %9748  ;;  %v4706_v35 = vmul.f32 0.70710677, %v4450_v24  ;;  %v4453_v51 = vadd.f32 %v11531_v17, %v12137_v36  ;;  %v12452_v48 = vmul.f32 %v4953_v63, %v12367_v33  ;;  %v4708_v41 = vmul.f32 0.70710677, %v4452_v45 }
 0x3fd   : > { %v9751_v43 = vpop.eup %9750  ;;  %v4954_v26 = vadd.f32 1.0, %v9749_v5  ;;  %5701 = vmatprep.mubr.bf16.mxu0 %v5162_v52  ;;  %v4455_v13 = vadd.f32 %v11533_v18, %v13524_v10  ;;  %v12457_v59 = vmul.f32 %v4955_v0, %v12382_v4  ;;  %v12459_v21 = vmul.f32 0.5, %v4450_v24  ;;  %v13525_v24 = vld [vmem:[#allocation38_spill] sm:$0xff]  ;;  %v13526_v5 = vld [vmem:[#allocation39_spill] sm:$0xff] }
 0x3fe   : > { %v9753_v6 = vpop.eup %9752  ;;  %9764 = verf.f32 %v4706_v35  ;;  %v4709_v60 = vmul.f32 0.70710677, %v4453_v51  ;;  %v4956_v55 = vadd.f32 1.0, %v9751_v43  ;;  %v12461_v53 = vmul.f32 0.5, %v4452_v45 }
 0x3ff   : > { %v4957_v36 = vadd.f32 1.0, %v9753_v6  ;;  %9766 = verf.f32 %v4708_v41  ;;  %v9755_v33 = vpop.eup %9754  ;;  %v12463_v28 = vmul.f32 0.5, %v4453_v51  ;;  %v4711_v39 = vmul.f32 0.70710677, %v4455_v13 }
 0x400   : > { %9768 = verf.f32 %v4709_v60  ;;  %v5161_v63 = vpack.c.bf16 %v12350_v46, %v12310_v47  ;;  %v12468_v4 = vmul.f32 %v4954_v26, %v12397_v23  ;;  %v4959_v0 = vadd.f32 1.0, %v9755_v33 }
 0x401   : > { %v9757_v29 = vpop.eup %9756  ;;  %v4454_v52 = vadd.f32 %v11537_v19, %v13525_v24  ;;  %v4456_v45 = vadd.f32 %v11539_v20, %v13526_v5  ;;  %9770 = verf.f32 %v4711_v39  ;;  %v4457_v51 = vadd.f32 %v11531_v17, %v12173_v22 }
 0x402   : > { %v4958_v35 = vadd.f32 1.0, %v9757_v29  ;;  %5702 = vmatmul.mubr.bf16.gmra.mrb[96].mxu0 %v5161_v63  ;;  %v4459_v47 = vadd.f32 %v11533_v18, %v12175_v3  ;;  %v12479_v23 = vmul.f32 %v4956_v55, %v12403_v34  ;;  %v12482_v43 = vmul.f32 %v4957_v36, %v12407_v1 }
 0x403   : > { %v9759_v46 = vpop.eup %9758  ;;  %v12484_v26 = vmul.f32 0.5, %v4455_v13  ;;  %v4710_v41 = vmul.f32 0.70710677, %v4454_v52  ;;  %v12487_v6 = vmul.f32 %v4959_v0, %v12417_v56  ;;  %v12489_v60 = vmul.f32 0.5, %v4454_v52  ;;  %v13527_v56 = vld [vmem:[#allocation41_spill] sm:$0xff]  ;;  %v13528_v0 = vld [vmem:[#allocation42_spill] sm:$0xff] }
 0x404   : > { %v9761_v10 = vpop.eup %9760  ;;  %v12491_v22 = vmul.f32 0.5, %v4456_v45  ;;  %v4712_v33 = vmul.f32 0.70710677, %v4456_v45  ;;  %v4960_v39 = vadd.f32 1.0, %v9759_v46  ;;  %v4713_v34 = vmul.f32 0.70710677, %v4457_v51 }
 0x405   : > { %v9763_v3 = vpop.eup %9762  ;;  %v4961_v63 = vadd.f32 1.0, %v9761_v10  ;;  %9772 = verf.f32 %v4710_v41  ;;  %v12494_v1 = vmul.f32 %v4958_v35, %v12426_v9  ;;  %v4715_v55 = vmul.f32 0.70710677, %v4459_v47 }
 0x406   : > { %v4963_v13 = vadd.f32 1.0, %v9763_v3  ;;  %9774 = verf.f32 %v4712_v33  ;;  %v12496_v36 = vmul.f32 0.5, %v4457_v51  ;;  %v4458_v29 = vadd.f32 %v11537_v19, %v13527_v56 }
 0x407   : > { %9776 = verf.f32 %v4713_v34  ;;  %v4460_v24 = vadd.f32 %v11539_v20, %v13528_v0  ;;  %v12502_v5 = vmul.f32 0.5, %v4459_v47  ;;  %v5166_v9 = vpack.c.bf16 %v12444_v12, %v12410_v40 }
 0x408   : > { %v9765_v52 = vpop.eup %9764  ;;  %9778 = verf.f32 %v4715_v55  ;;  %v4461_v45 = vadd.f32 %v11531_v17, %v12199_v61  ;;  %v12509_v51 = vmul.f32 %v4960_v39, %v12431_v44  ;;  %v12512_v46 = vmul.f32 %v4961_v63, %v12433_v42 }
 0x409   : > { %v9767_v35 = vpop.eup %9766  ;;  %v4962_v41 = vadd.f32 1.0, %v9765_v52  ;;  %v4714_v10 = vmul.f32 0.70710677, %v4458_v29  ;;  %v12515_v47 = vmul.f32 %v4963_v13, %v12437_v54  ;;  %v4716_v34 = vmul.f32 0.70710677, %v4460_v24  ;;  %5711 = vmatprep.mubr.bf16.mxu0 %v5166_v9  ;;  %v13529_v54 = vld [vmem:[#allocation44_spill] sm:$0xff] }
 0x40a   : > { %v9769_v33 = vpop.eup %9768  ;;  %v4964_v3 = vadd.f32 1.0, %v9767_v35  ;;  %v4717_v40 = vmul.f32 0.70710677, %v4461_v45  ;;  %v12517_v55 = vmul.f32 0.5, %v4458_v29  ;;  %v4463_v61 = vadd.f32 %v11533_v18, %v12204_v62 }
 0x40b   : > { %v4965_v12 = vadd.f32 1.0, %v9769_v33  ;;  %9780 = verf.f32 %v4714_v10  ;;  %v9771_v44 = vpop.eup %9770  ;;  %v12521_v42 = vmul.f32 0.5, %v4460_v24  ;;  %v5165_v39 = vpack.c.bf16 %v12424_v15, %v12392_v38 }
 0x40c   : > { %9782 = verf.f32 %v4716_v34  ;;  %v4462_v63 = vadd.f32 %v11537_v19, %v13529_v54  ;;  %v12528_v13 = vmul.f32 %v4962_v41, %v12459_v21  ;;  %v12531_v56 = vmul.f32 %v4964_v3, %v12461_v53 }
 0x40d   : > { %v12533_v29 = vmul.f32 0.5, %v4461_v45  ;;  %9784 = verf.f32 %v4717_v40  ;;  %v4967_v62 = vadd.f32 1.0, %v9771_v44  ;;  %v4719_v0 = vmul.f32 0.70710677, %v4463_v61  ;;  %5712 = vmatmul.mubr.bf16.gmra.mrb[100].mxu0 %v5165_v39 }
 0x40e   : > { %v4718_v24 = vmul.f32 0.70710677, %v4462_v63  ;;  %v4464_v52 = vadd.f32 %v11539_v20, %v12210_v7  ;;  %v12538_v15 = vmul.f32 %v4965_v12, %v12463_v28  ;;  %v12540_v9 = vmul.f32 0.5, %v4463_v61 }
 0x40f   : > { %v9773_v38 = vpop.eup %9772  ;;  %v4465_v21 = vadd.f32 %v11531_v17, %v12235_v30  ;;  %v4467_v53 = vadd.f32 %v11533_v18, %v12239_v25  ;;  %9786 = verf.f32 %v4719_v0  ;;  %v4466_v10 = vadd.f32 %v11537_v19, %v12241_v32 }
 0x410   : > { %v9775_v45 = vpop.eup %9774  ;;  %v4966_v35 = vadd.f32 1.0, %v9773_v38  ;;  %v4720_v41 = vmul.f32 0.70710677, %v4464_v52  ;;  %v12548_v3 = vmul.f32 0.5, %v4462_v63  ;;  %9788 = verf.f32 %v4718_v24  ;;  %v13530_v63 = vld [vmem:[#allocation47_spill] sm:$0xff]  ;;  %v13531_v24 = vld [vmem:[#allocation48_spill] sm:$0xff] }
 0x411   : > { %v9777_v7 = vpop.eup %9776  ;;  %v4968_v33 = vadd.f32 1.0, %v9775_v45  ;;  %v4721_v28 = vmul.f32 0.70710677, %v4465_v21  ;;  %v12551_v40 = vmul.f32 %v4967_v62, %v12484_v26  ;;  %v12553_v12 = vmul.f32 0.5, %v4464_v52 }
 0x412   : > { %v9779_v34 = vpop.eup %9778  ;;  %v4969_v30 = vadd.f32 1.0, %v9777_v7  ;;  %9790 = verf.f32 %v4720_v41  ;;  %v12556_v25 = vmul.f32 %v4966_v35, %v12489_v60  ;;  %v12558_v61 = vmul.f32 0.5, %v4465_v21 }
 0x413   : > { %9792 = verf.f32 %v4721_v28  ;;  %v4723_v32 = vmul.f32 0.70710677, %v4467_v53  ;;  %v4971_v44 = vadd.f32 1.0, %v9779_v34  ;;  %v12560_v39 = vmul.f32 0.5, %v4467_v53 }
 0x414   : > { %v4722_v54 = vmul.f32 0.70710677, %v4466_v10  ;;  %v4468_v0 = vadd.f32 %v11539_v20, %v13530_v63  ;;  %v12565_v62 = vmul.f32 %v4968_v33, %v12491_v22  ;;  %v5170_v60 = vpack.c.bf16 %v12494_v1, %v12468_v4  ;;  %v13532_v33 = vld [vmem:[#allocation22_spill] sm:$0xff]  ;;  %v13533_v63 = vld [vmem:[#allocation49_spill] sm:$0xff] }
 0x415   : > { %v9781_v26 = vpop.eup %9780  ;;  %9794 = verf.f32 %v4723_v32  ;;  %v4469_v52 = vadd.f32 %v11531_v17, %v13531_v24  ;;  %v12572_v21 = vmul.f32 %v4969_v30, %v12496_v36  ;;  %v4594_v7 = vmul.f32 0.5, %v4466_v10  ;;  %v13535_v24 = vld [vmem:[#allocation25_spill] sm:$0xff] }
 0x416   : > { %v9783_v38 = vpop.eup %9782  ;;  %v4970_v53 = vadd.f32 1.0, %v9781_v26  ;;  %9796 = verf.f32 %v4722_v54  ;;  %v4724_v45 = vmul.f32 0.70710677, %v4468_v0  ;;  %5721 = vmatprep.mubr.bf16.mxu0 %v5170_v60  ;;  %v4471_v28 = vadd.f32 %v11533_v18, %v13532_v33 }
 0x417   : > { %v9785_v35 = vpop.eup %9784  ;;  %v4972_v41 = vadd.f32 1.0, %v9783_v38  ;;  %v4725_v22 = vmul.f32 0.70710677, %v4469_v52  ;;  %v12577_v4 = vmul.f32 %v4971_v44, %v12502_v5  ;;  %v5169_v36 = vpack.c.bf16 %v12482_v43, %v12452_v48  ;;  %v13534_v44 = vld [vmem:[#allocation24_spill] sm:$0xff] }
 0x418   : > { %v4973_v1 = vadd.f32 1.0, %v9785_v35  ;;  %9798 = verf.f32 %v4724_v45  ;;  %v12581_v34 = vmul.f32 0.5, %v4468_v0  ;;  %v12583_v30 = vmul.f32 0.5, %v4469_v52 }
 0x419   : > { %9800 = verf.f32 %v4725_v22  ;;  %v4727_v32 = vmul.f32 0.70710677, %v4471_v28  ;;  %v9787_v10 = vpop.eup %9786  ;;  %v12586_v54 = vmul.f32 %v4970_v53, %v12517_v55  ;;  %5722 = vmatmul.mubr.bf16.gmra.mrb[104].mxu0 %v5169_v36  ;;  %v4470_v5 = vadd.f32 %v11537_v19, %v13533_v63  ;;  %v13536_v63 = vld [vmem:[#allocation26_spill] sm:$0xff] }
 0x41a   : > { %v4472_v26 = vadd.f32 %v11539_v20, %v13534_v44  ;;  %v4473_v48 = vadd.f32 %v11531_v17, %v12286_v11  ;;  %v9789_v43 = vpop.eup %9788  ;;  %v12595_v0 = vmul.f32 %v4972_v41, %v12521_v42  ;;  %v4975_v60 = vadd.f32 1.0, %v9787_v10 }
 0x41b   : > { %9802 = verf.f32 %v4727_v32  ;;  %v4475_v55 = vadd.f32 %v11533_v18, %v13535_v24  ;;  %v12600_v38 = vmul.f32 %v4973_v1, %v12533_v29  ;;  %v4974_v53 = vadd.f32 1.0, %v9789_v43 }
 0x41c   : > { %v9791_v52 = vpop.eup %9790  ;;  %v4599_v45 = vmul.f32 0.5, %v4471_v28  ;;  %v4726_v35 = vmul.f32 0.70710677, %v4470_v5  ;;  %v12602_v36 = vmul.f32 0.5, %v4470_v5  ;;  %v4728_v11 = vmul.f32 0.70710677, %v4472_v26 }
 0x41d   : > { %v9793_v22 = vpop.eup %9792  ;;  %v4976_v33 = vadd.f32 1.0, %v9791_v52  ;;  %v4474_v42 = vadd.f32 %v11537_v19, %v13536_v63  ;;  %v12607_v41 = vmul.f32 %v4975_v60, %v12540_v9  ;;  %v12609_v32 = vmul.f32 0.5, %v4472_v26  ;;  %v13537_v60 = vld [vmem:[#allocation27_spill] sm:$0xff] }
 0x41e   : > { %9804 = verf.f32 %v4726_v35  ;;  %v4729_v10 = vmul.f32 0.70710677, %v4473_v48  ;;  %v4977_v1 = vadd.f32 1.0, %v9793_v22  ;;  %v12611_v28 = vmul.f32 0.5, %v4473_v48 }
 0x41f   : > { %v9795_v29 = vpop.eup %9794  ;;  %9806 = verf.f32 %v4728_v11  ;;  %v4731_v44 = vmul.f32 0.70710677, %v4475_v55  ;;  %v12614_v5 = vmul.f32 %v4974_v53, %v12548_v3  ;;  %v12617_v24 = vmul.f32 %v4976_v33, %v12553_v12  ;;  %v13538_v53 = vld [vmem:[#allocation53_spill] sm:$0xff] }
 0x420   : > { %v9797_v43 = vpop.eup %9796  ;;  %v4979_v52 = vadd.f32 1.0, %v9795_v29  ;;  %9808 = verf.f32 %v4729_v10  ;;  %v4730_v26 = vmul.f32 0.70710677, %v4474_v42  ;;  %v4476_v35 = vadd.f32 %v11539_v20, %v13537_v60 }
 0x421   : > { %v4978_v9 = vadd.f32 1.0, %v9797_v43  ;;  %9810 = verf.f32 %v4731_v44  ;;  %v12621_v11 = vmul.f32 0.5, %v4475_v55  ;;  %v5174_v48 = vpack.c.bf16 %v12556_v25, %v12528_v13 }
 0x422   : > { %v9799_v22 = vpop.eup %9798  ;;  %v4477_v3 = vadd.f32 %v11531_v17, %v12305_v50  ;;  %v4479_v12 = vadd.f32 %v11533_v18, %v13538_v53  ;;  %v12630_v63 = vmul.f32 %v4977_v1, %v12558_v61  ;;  %v12633_v10 = vmul.f32 %v4979_v52, %v12560_v39  ;;  %v13541_v52 = vld [vmem:[#allocation55_spill] sm:$0xff] }
 0x423   : > { %v9801_v33 = vpop.eup %9800  ;;  %v12635_v29 = vmul.f32 0.5, %v4474_v42  ;;  %9812 = verf.f32 %v4730_v26  ;;  %v12637_v55 = vmul.f32 %v4978_v9, %v4594_v7  ;;  %v4980_v44 = vadd.f32 1.0, %v9799_v22  ;;  %5731 = vmatprep.mubr.bf16.mxu0 %v5174_v48  ;;  %v13540_v42 = vld [vmem:[#allocation29_spill] sm:$0xff] }
 0x424   : > { %13539 = vst [vmem:[#allocation37_spill] sm:$0xff] %v12633_v10  ;;  %v4732_v13 = vmul.f32 0.70710677, %v4476_v35  ;;  %v4733_v25 = vmul.f32 0.70710677, %v4477_v3  ;;  %v4981_v43 = vadd.f32 1.0, %v9801_v33  ;;  %v5173_v61 = vpack.c.bf16 %v12538_v15, %v12512_v46 }
 0x425   : > { %v9803_v50 = vpop.eup %9802  ;;  %v12639_v60 = vmul.f32 0.5, %v4476_v35  ;;  %v4735_v53 = vmul.f32 0.70710677, %v4479_v12  ;;  %v12643_v39 = vmul.f32 0.5, %v4477_v3  ;;  %v4478_v7 = vadd.f32 %v11537_v19, %v13540_v42 }
 0x426   : > { %v4983_v1 = vadd.f32 1.0, %v9803_v50  ;;  %9814 = verf.f32 %v4732_v13  ;;  %5732 = vmatmul.mubr.bf16.gmra.mrb[108].mxu0 %v5173_v61  ;;  %v4480_v9 = vadd.f32 %v11539_v20, %v13541_v52  ;;  %v4481_v26 = vadd.f32 %v11531_v17, %v12345_v2 }
 0x427   : > { %9816 = verf.f32 %v4733_v25  ;;  %v4483_v35 = vadd.f32 %v11533_v18, %v12347_v37  ;;  %v12654_v46 = vmul.f32 %v4980_v44, %v12581_v34  ;;  %v12656_v15 = vmul.f32 0.5, %v4479_v12 }
 0x428   : > { %v9805_v22 = vpop.eup %9804  ;;  %9818 = verf.f32 %v4735_v53  ;;  %v4734_v48 = vmul.f32 0.70710677, %v4478_v7  ;;  %v12659_v33 = vmul.f32 %v4981_v43, %v12583_v30  ;;  %v12661_v13 = vmul.f32 %v4983_v1, %v4599_v45  ;;  %v13542_v30 = vld [vmem:[#allocation56_spill] sm:$0xff] }
 0x429   : > { %v9807_v3 = vpop.eup %9806  ;;  %v12663_v25 = vmul.f32 0.5, %v4478_v7  ;;  %v4736_v2 = vmul.f32 0.70710677, %v4480_v9  ;;  %v4982_v61 = vadd.f32 1.0, %v9805_v22  ;;  %v4737_v42 = vmul.f32 0.70710677, %v4481_v26 }
 0x42a   : > { %v9809_v50 = vpop.eup %9808  ;;  %v4984_v37 = vadd.f32 1.0, %v9807_v3  ;;  %9820 = verf.f32 %v4734_v48  ;;  %v12665_v12 = vmul.f32 0.5, %v4480_v9  ;;  %v4739_v53 = vmul.f32 0.70710677, %v4483_v35 }
 0x42b   : > { %v9811_v34 = vpop.eup %9810  ;;  %v4985_v44 = vadd.f32 1.0, %v9809_v50  ;;  %9822 = verf.f32 %v4736_v2  ;;  %v12667_v10 = vmul.f32 0.5, %v4481_v26  ;;  %v4482_v45 = vadd.f32 %v11537_v19, %v13542_v30 }
 0x42c   : > { %v4987_v52 = vadd.f32 1.0, %v9811_v34  ;;  %9824 = verf.f32 %v4737_v42  ;;  %v12671_v1 = vmul.f32 0.5, %v4483_v35  ;;  %v12675_v7 = vadd.f32 %v11539_v20, %v12363_v49 }
 0x42d   : > { %v9813_v43 = vpop.eup %9812  ;;  %9826 = verf.f32 %v4739_v53  ;;  %v5178_v9 = vpack.c.bf16 %v12614_v5, %v12586_v54  ;;  %v5110_v22 = vmul.f32 %v4982_v61, %v12602_v36  ;;  %v12681_v26 = vmul.f32 %v4984_v37, %v12609_v32  ;;  %v13543_v5 = vld [vmem:[#allocation58_spill] sm:$0xff] }
 0x42e   : > { %v4986_v48 = vadd.f32 1.0, %v9813_v43  ;;  %v4738_v3 = vmul.f32 0.70710677, %v4482_v45  ;;  %v12684_v2 = vmul.f32 %v4985_v44, %v12611_v28  ;;  %v4740_v35 = vmul.f32 0.70710677, %v12675_v7 }
 0x42f   : > { %5741 = vmatprep.mubr.bf16.mxu0 %v5178_v9  ;;  %v4485_v49 = vadd.f32 %v11531_v17, %v12365_v16  ;;  %v4487_v50 = vadd.f32 %v11533_v18, %v12369_v8  ;;  %v12692_v36 = vmul.f32 %v4987_v52, %v12621_v11  ;;  %v5177_v32 = vpack.c.bf16 %v12600_v38, %v12572_v21 }
 0x430   : > { %v9815_v54 = vpop.eup %9814  ;;  %9828 = verf.f32 %v4738_v3  ;;  %v4486_v28 = vadd.f32 %v11537_v19, %v13543_v5  ;;  %v5114_v37 = vmul.f32 %v4986_v48, %v12635_v29  ;;  %v12699_v42 = vmul.f32 0.5, %v4482_v45  ;;  %v13544_v29 = vld [vmem:[#allocation59_spill] sm:$0xff] }
 0x431   : > { %v9817_v61 = vpop.eup %9816  ;;  %9830 = verf.f32 %v4740_v35  ;;  %v4741_v17 = vmul.f32 0.70710677, %v4485_v49  ;;  %v4988_v18 = vadd.f32 1.0, %v9815_v54  ;;  %v12701_v34 = vmul.f32 0.5, %v4485_v49  ;;  %5742 = vmatmul.mubr.bf16.gmra.mrb[112].mxu0 %v5177_v32  ;;  %v13545_v54 = vld [vmem:[#allocation7_spill] sm:$0xff]  ;;  %v13546_v32 = vld [vmem:[#allocation8_spill] sm:$0xff] }
 0x432   : > { %v9819_v16 = vpop.eup %9818  ;;  %v4989_v8 = vadd.f32 1.0, %v9817_v61  ;;  %v4743_v11 = vmul.f32 0.70710677, %v4487_v50  ;;  %v12703_v21 = vmul.f32 0.5, %v4487_v50  ;;  %v4742_v38 = vmul.f32 0.70710677, %v4486_v28 }
 0x433   : > { %v4991_v44 = vadd.f32 1.0, %v9819_v16  ;;  %9832 = verf.f32 %v4741_v17  ;;  %v12710_v52 = vadd.f32 %v11539_v20, %v13544_v29  ;;  %v5182_v30 = vpack.c.bf16 %v5110_v22, %v12637_v55  ;;  %v13549_v17 = vld [vmem:[#allocation9_spill] sm:$0xff]  ;;  %v13550_v16 = vld [vmem:[#allocation11_spill] sm:$0xff]  ;;  %v13571_v29 = vld [vmem:[#allocation50_spill] sm:$0xff] }
 0x434   : > { %v9821_v19 = vpop.eup %9820  ;;  %v12706_v53 = vmul.f32 %v4989_v8, %v12643_v39  ;;  %9834 = verf.f32 %v4743_v11  ;;  %v12713_v9 = vmul.f32 0.5, %v4486_v28  ;;  %v5181_v48 = vpack.c.bf16 %v12659_v33, %v12630_v63  ;;  %v13547_v28 = vld [vmem:[#allocation10_spill] sm:$0xff]  ;;  %v13548_v63 = vld [vmem:[#allocation12_spill] sm:$0xff]  ;;  %v13570_v33 = vld [vmem:[#allocation43_spill] sm:$0xff] }
 0x435   : > { %v9823_v45 = vpop.eup %9822  ;;  %v4990_v43 = vadd.f32 1.0, %v9821_v19  ;;  %9836 = verf.f32 %v4742_v38  ;;  %v12718_v35 = vmul.f32 %v4988_v18, %v12639_v60  ;;  %v4744_v49 = vmul.f32 0.70710677, %v12710_v52  ;;  %5751 = vmatprep.mubr.bf16.mxu0 %v5182_v30  ;;  %v13552_v11 = vld [vmem:[#allocation16_spill] sm:$0xff]  ;;  %v13573_v18 = vld [vmem:[#allocation46_spill] sm:$0xff] }
 0x436   : > { %v9825_v3 = vpop.eup %9824  ;;  %v4992_v39 = vadd.f32 1.0, %v9823_v45  ;;  %v5185_v20 = vpack.c.bf16 %v12706_v53, %v12684_v2  ;;  %v12729_v60 = vmul.f32 %v4991_v44, %v12656_v15  ;;  %v13569_v38 = vld [vmem:[#allocation36_spill] sm:$0xff]  ;;  %v13576_v44 = vld [vmem:[#allocation54_spill] sm:$0xff]  ;;  %v4616_v15 = vmul.f32 0.5, %v12710_v52 }
 0x437   : > { %v9827_v55 = vpop.eup %9826  ;;  %v5118_v22 = vmul.f32 %v4990_v43, %v12663_v25  ;;  %v4993_v50 = vadd.f32 1.0, %v9825_v3  ;;  %9838 = verf.f32 %v4744_v49  ;;  %v9556_v43 = vld [vmem:[%s13402_s7 + $0x40] sm:$0xff]   ;;  %v13572_v19 = vld [vmem:[#allocation52_spill] sm:$0xff] }
 0x438   : > { %v4995_v61 = vadd.f32 1.0, %v9827_v55  ;;  %v12734_v2 = vmul.f32 %v4992_v39, %v12665_v12  ;;  %v9557_v39 = vld [vmem:[%s13402_s7] sm:$0xff]   ;;  %v13568_v55 = vld [vmem:[#allocation45_spill] sm:$0xff]  ;;  %8262 = vmatprep.subr.bf16.mxu1 %v9556_v43 }
 0x439   : > { %v5186_v8 = vpack.c.bf16 %v5118_v22, %v5114_v37  ;;  %v5121_v45 = vmul.f32 %v4993_v50, %v12667_v10  ;;  %5752 = vmatmul.mubr.bf16.gmra.mrb[116].mxu0 %v5181_v48  ;;  %v13574_v12 = vld [vmem:[#allocation51_spill] sm:$0xff]  ;;  %v13575_v49 = vld [vmem:[#allocation30_spill] sm:$0xff]  ;;  %8263 = vmatpush3.bf16.msra.mxu1 %v9557_v39  ;;  %v9560_v52 = vld [vmem:[%s13402_s7 + $0x50] sm:$0xff]  }
 0x43a   : > { %v9829_v30 = vpop.eup %9828  ;;  %v5188_v39 = vpack.c.bf16 %v12734_v2, %v12718_v35 }
 0x43b   : > { %v9831_v37 = vpop.eup %9830  ;;  %v4994_v22 = vadd.f32 1.0, %v9829_v30  ;;  %5761 = vmatprep.mubr.bf16.mxu0 %v5186_v8  ;;  %v12760_v30 = vmul.f32 %v4995_v61, %v12671_v1  ;;  %v13577_v1 = vld [vmem:[#allocation57_spill] sm:$0xff] }
 0x43c   : > { %v4996_v48 = vadd.f32 1.0, %v9831_v37 }
 0x43d   : > { %v9833_v10 = vpop.eup %9832  ;;  %v5122_v5 = vmul.f32 %v4994_v22, %v12699_v42 }
 0x43e   : > { %v9835_v25 = vpop.eup %9834  ;;  %v4997_v8 = vadd.f32 1.0, %v9833_v10 }
 0x43f   : > { %v9837_v50 = vpop.eup %9836  ;;  %v4999_v3 = vadd.f32 1.0, %v9835_v25 }
 0x440   : > { %v5125_v42 = vmul.f32 %v4997_v8, %v12701_v34  ;;  %v4998_v22 = vadd.f32 1.0, %v9837_v50 }
 0x441   : > { %v12791_v25 = vmul.f32 %v4999_v3, %v12703_v21  ;;  %v9839_v34 = vpop.eup %9838  ;;  %5762 = vmatmul.mubr.bf16.gmra.mrb[120].mxu0 %v5185_v20  ;;  %v5187_v21 = vpack.c.bf16 %v12729_v60, %v12692_v36  ;;  %v4612_v3 = vmul.f32 0.5, %v12675_v7  ;;  %v9558_v20 = vld [vmem:[%s13402_s7 + $0x48] sm:$0xff]  }
 0x442   : > { %v5126_v50 = vmul.f32 %v4998_v22, %v12713_v9  ;;  %v5189_v8 = vpack.c.bf16 %v5125_v42, %v5121_v45  ;;  %v5000_v10 = vadd.f32 1.0, %v9839_v34  ;;  %v9559_v7 = vld [vmem:[%s13402_s7 + $0x8] sm:$0xff]   ;;  %8264 = vmatprep.subr.bf16.mxu1 %v9558_v20  ;;  %v9562_v45 = vld [vmem:[%s13402_s7 + $0x58] sm:$0xff]   ;;  %v9565_v42 = vld [vmem:[%s13402_s7 + $0x20] sm:$0xff]   ;;  %v13584_v34 = vpack.c.bf16 %v13550_v16, %v13549_v17 }
 0x443   : > { %v5191_v61 = vpack.c.bf16 %v12791_v25, %v12760_v30  ;;  %v5124_v53 = vmul.f32 %v4996_v48, %v4612_v3  ;;  %8265 = vmatpush3.bf16.msra.mxu1 %v9559_v7  ;;  %v13580_v48 = vld [vmem:[#allocation6_spill] sm:$0xff]  ;;  %v9566_v22 = vld [vmem:[%s13402_s7 + $0x68] sm:$0xff]   ;;  %v13588_v20 = vld [vmem:[#allocation13_spill] sm:$0xff] }
 0x444   : > { %v5190_v43 = vpack.c.bf16 %v5126_v50, %v5122_v5  ;;  %v5128_v37 = vmul.f32 %v5000_v10, %v4616_v15  ;;  %v13579_v5 = vpack.c.bf16 %v13546_v32, %v13545_v54  ;;  %8266 = vmatprep.subr.bf16.mxu1 %v9560_v52  ;;  %v9563_v15 = vld [vmem:[%s13402_s7 + $0x18] sm:$0xff]   ;;  %v9564_v32 = vld [vmem:[%s13402_s7 + $0x60] sm:$0xff]   ;;  %v9567_v10 = vld [vmem:[%s13402_s7 + $0x28] sm:$0xff]  }
 0x445   : > { %v13587_v3 = vld [vmem:[#allocation15_spill] sm:$0xff]  ;;  %v13590_v16 = vld [vmem:[#allocation20_spill] sm:$0xff]  ;;  %v13591_v7 = vld [vmem:[#allocation18_spill] sm:$0xff] }
 0x446   : > { %5771 = vmatprep.mubr.bf16.mxu0 %v5190_v43  ;;  %v5192_v9 = vpack.c.bf16 %v5128_v37, %v5124_v53  ;;  %v9561_v53 = vld [vmem:[%s13402_s7 + $0x10] sm:$0xff]   ;;  %v13583_v43 = vpack.c.bf16 %v13548_v63, %v13547_v28  ;;  %v13585_v63 = vld [vmem:[#allocation14_spill] sm:$0xff]  ;;  %v13589_v17 = vpack.c.bf16 %v13587_v3, %v13588_v20  ;;  %v13592_v52 = vpack.c.bf16 %v13590_v16, %v13591_v7 }
 0x447   : > { %8267 = vmatpush3.bf16.msra.mxu1 %v9561_v53  ;;  %v13581_v37 = vld [vmem:[#allocation5_spill] sm:$0xff]  ;;  %v13586_v50 = vpack.c.bf16 %v13552_v11, %v13585_v63  ;;  %v13596_v11 = vld [vmem:[#allocation31_spill] sm:$0xff]  ;;  %v13608_v63 = vld [vmem:[#allocation40_spill] sm:$0xff]  ;;  %v13611_v3 = vpack.c.bf16 %v13572_v19, %v13571_v29  ;;  %v13612_v20 = vpack.c.bf16 %v13574_v12, %v13573_v18  ;;  %v13617_v18 = vpack.c.bf16 %v12509_v51, %v12479_v23 }
 0x448   : > { %v13582_v54 = vpack.c.bf16 %v13580_v48, %v13581_v37  ;;  %8268 = vmatprep.subr.bf16.mxu1 %v9562_v45  ;;  %v9568_v28 = vld [vmem:[%s13402_s7 + $0x70] sm:$0xff]   ;;  %v13619_v19 = vpack.c.bf16 %v12565_v62, %v12531_v56  ;;  %v9571_v51 = vld [vmem:[%s13402_s7 + $0x38] sm:$0xff]   ;;  %v13627_v62 = vld [vmem:[#allocation3_spill] sm:$0xff] }
 0x449   : > { %5772 = vmatmul.mubr.bf16.gmra.mrb[124].mxu0 %v5189_v8  ;;  %v9569_v8 = vld [vmem:[%s13402_s7 + $0x30] sm:$0xff]  }
 0x44a   : > { %5814 = vmatprep.mubr.bf16.mxu0 %v13579_v5  ;;  %v13593_v5 = vld [vmem:[#allocation19_spill] sm:$0xff]  ;;  %v13594_v53 = vld [vmem:[#allocation17_spill] sm:$0xff]  ;;  %v13599_v37 = vld [vmem:[#allocation28_spill] sm:$0xff] }
 0x44b   : > { %8269 = vmatpush3.bf16.msra.mxu1 %v9563_v15  ;;  %v13595_v45 = vpack.c.bf16 %v13593_v5, %v13594_v53  ;;  %v13597_v15 = vld [vmem:[#allocation23_spill] sm:$0xff]  ;;  %v13626_v56 = vld [vmem:[#allocation4_spill] sm:$0xff] }
 0x44c   : > { %8270 = vmatprep.subr.bf16.mxu1 %v9564_v32  ;;  %v13598_v48 = vpack.c.bf16 %v13596_v11, %v13597_v15 }
 0x44f   : > { %8271 = vmatpush3.bf16.msra.mxu1 %v9565_v42  ;;  %v13603_v42 = vld [vmem:[#allocation33_spill] sm:$0xff] }
 0x450   : > { %8272 = vmatprep.subr.bf16.mxu1 %v9566_v22 }
 0x451   : > { %5815 = vmatmul.mubr.bf16.vlgmr.msra.gmra.mrb[64].mxu0 %v13582_v54  ;;  %v13600_v54 = vld [vmem:[#allocation21_spill] sm:$0xff] }
 0x452   : > { %5824 = vmatprep.mubr.bf16.mxu0 %v13583_v43  ;;  %v13601_v32 = vpack.c.bf16 %v13599_v37, %v13600_v54  ;;  %v13602_v43 = vld [vmem:[#allocation35_spill] sm:$0xff] }
 0x453   : > { %8273 = vmatpush3.bf16.msra.mxu1 %v9567_v10  ;;  %v13604_v22 = vpack.c.bf16 %v13602_v43, %v13603_v42  ;;  %v13605_v10 = vld [vmem:[#allocation34_spill] sm:$0xff] }
 0x454   : > { %8274 = vmatprep.subr.bf16.mxu1 %v9568_v28 }
 0x457   : > { %8275 = vmatpush3.bf16.msra.mxu1 %v9569_v8  ;;  %v13610_v8 = vpack.c.bf16 %v13570_v33, %v13569_v38  ;;  %v13615_v33 = vpack.c.bf16 %v12447_v31, %v12413_v58  ;;  %v13616_v38 = vpack.c.bf16 %v12429_v27, %v12395_v14  ;;  %v13620_v58 = vpack.c.bf16 %v12551_v40, %v12515_v47  ;;  %v5257_v47 = vld [vmem:[%s13401_s6] sm:$0x3] }
 0x458   : > { %v13621_v14 = vpack.c.bf16 %v12617_v24, %v12595_v0  ;;  %v13622_v27 = vpack.c.bf16 %v12607_v41, %v12577_v4  ;;  %v13623_v31 = vpack.c.bf16 %v12681_v26, %v12654_v46  ;;  %v12947_v40 = vrot.slane %v5257_v47, %v13626_v56 }
 0x459   : > { %5825 = vmatmul.mubr.bf16.gmra.mrb[68].mxu0 %v13584_v34  ;;  %v13606_v34 = vld [vmem:[#allocation32_spill] sm:$0xff]  ;;  %v13628_v4 = vsub.s32 1, %v13627_v62 }
 0x45a   : > { %5834 = vmatprep.mubr.bf16.mxu0 %v13586_v50  ;;  %v13607_v28 = vpack.c.bf16 %v13605_v10, %v13606_v34  ;;  %v13609_v50 = vpack.c.bf16 %v13568_v55, %v13608_v63  ;;  %v13614_v55 = vpack.c.bf16 %v13577_v1, %v13576_v44 }
 0x45b   : > { %v12951_v0 = vrot.slane %v5257_v47, %v13628_v4  ;;  %v9573_v4 = vld [vmem:[%s13404_s9 + $0x8] sm:$0xff]  }
 0x461   : > { %5835 = vmatmul.mubr.bf16.gmra.mrb[72].mxu0 %v13589_v17  ;;  %v13613_v17 = vpack.c.bf16 %v12389_v57, %v13575_v49  ;;  %v13618_v57 = vpack.c.bf16 %v12487_v6, %v12457_v59  ;;  %v13624_v59 = vld [vmem:[#allocation37_spill] sm:$0xff] }
 0x462   : > { %5844 = vmatprep.mubr.bf16.mxu0 %v13592_v52  ;;  %v13625_v23 = vpack.c.bf16 %v12661_v13, %v13624_v59  ;;  %v9570_v6 = vld [vmem:[%s13402_s7 + $0x78] sm:$0xff]  }
 0x463   : > { %8276 = vmatprep.subr.bf16.mxu1 %v9570_v6 }
 0x464   : > { %8277 = vmatpush3.bf16.msra.mxu1 %v9571_v51 }
 0x469   : > { %5845 = vmatmul.mubr.bf16.gmra.mrb[76].mxu0 %v13595_v45 }
 0x46a   : > { %5854 = vmatprep.mubr.bf16.mxu0 %v13598_v48 }
 0x471   : > { %5855 = vmatmul.mubr.bf16.gmra.mrb[80].mxu0 %v13601_v32 }
 0x472   : > { %5864 = vmatprep.mubr.bf16.mxu0 %v13604_v22 }
 0x479   : > { %5865 = vmatmul.mubr.bf16.gmra.mrb[84].mxu0 %v13607_v28 }
 0x47a   : > { %5874 = vmatprep.mubr.bf16.mxu0 %v13609_v50 }
 0x481   : > { %5875 = vmatmul.mubr.bf16.gmra.mrb[88].mxu0 %v13610_v8 }
 0x482   : > { %5884 = vmatprep.mubr.bf16.mxu0 %v13611_v3 }
 0x489   : > { %5885 = vmatmul.mubr.bf16.gmra.mrb[92].mxu0 %v13612_v20 }
 0x48a   : > { %5894 = vmatprep.mubr.bf16.mxu0 %v13613_v17  ;;  %v9572_v17 = vld [vmem:[%s13404_s9] sm:$0xff]  }
 0x48b   : > { %8418 = vmatprep.subr.bf16.mxu1 %v9572_v17 }
 0x491   : > { %5895 = vmatmul.mubr.bf16.gmra.mrb[96].mxu0 %v13614_v55 }
 0x492   : > { %5904 = vmatprep.mubr.bf16.mxu0 %v13615_v33 }
 0x499   : > { %5905 = vmatmul.mubr.bf16.gmra.mrb[100].mxu0 %v13616_v38 }
 0x49a   : > { %5914 = vmatprep.mubr.bf16.mxu0 %v13617_v18 }
 0x4a1   : > { %5915 = vmatmul.mubr.bf16.gmra.mrb[104].mxu0 %v13618_v57 }
 0x4a2   : > { %5924 = vmatprep.mubr.bf16.mxu0 %v13619_v19 }
 0x4a9   : > { %5925 = vmatmul.mubr.bf16.gmra.mrb[108].mxu0 %v13620_v58 }
 0x4aa   : > { %5934 = vmatprep.mubr.bf16.mxu0 %v13621_v14 }
 0x4b1   : > { %5935 = vmatmul.mubr.bf16.gmra.mrb[112].mxu0 %v13622_v27 }
 0x4b2   : > { %5944 = vmatprep.mubr.bf16.mxu0 %v13623_v31 }
 0x4b9   : > { %5945 = vmatmul.mubr.bf16.gmra.mrb[116].mxu0 %v13625_v23 }
 0x4ba   : > { %5954 = vmatprep.mubr.bf16.mxu0 %v5188_v39 }
 0x4c1   : > { %5955 = vmatmul.mubr.bf16.gmra.mrb[120].mxu0 %v5187_v21 }
 0x4c2   : > { %5964 = vmatprep.mubr.bf16.mxu0 %v5192_v9 }
 0x4c9   : > { %5965 = vmatmul.mubr.bf16.gmra.mrb[124].mxu0 %v5191_v61 }
 0x524   : > { %v5816_v41 = vpop.f32.mrb[64].mxu0 }
 0x525   : > { %v8506_v24 = vadd.f32 %v5816_v41, %v12947_v40  ;;  %v5818_v46 = vpop.f32.mrb[65].mxu0 }
 0x526   : > { %v8507_v13 = vadd.f32 %v5818_v46, %v12951_v0  ;;  %v5820_v26 = vpop.f32.mrb[66].mxu0 }
 0x527   : > { %v6039_v36 = vmul.f32 0.70710677, %v8506_v24  ;;  %v8508_v35 = vadd.f32 %v5820_v26, %v12947_v40  ;;  %v5822_v60 = vpop.f32.mrb[67].mxu0  ;;  %v5975_v37 = vmul.f32 0.5, %v8506_v24 }
 0x528   : > { %v6040_v2 = vmul.f32 0.70710677, %v8507_v13  ;;  %v8509_v29 = vadd.f32 %v5822_v60, %v12951_v0  ;;  %v5976_v22 = vmul.f32 0.5, %v8507_v13 }
 0x529   : > { %9840 = verf.f32 %v6039_v36  ;;  %v6041_v44 = vmul.f32 0.70710677, %v8508_v35  ;;  %v5977_v10 = vmul.f32 0.5, %v8508_v35 }
 0x52a   : > { %9842 = verf.f32 %v6040_v2  ;;  %v6042_v49 = vmul.f32 0.70710677, %v8509_v29  ;;  %v5978_v50 = vmul.f32 0.5, %v8509_v29 }
 0x52b   : > { %9844 = verf.f32 %v6041_v44 }
 0x52c   : > { %9846 = verf.f32 %v6042_v49  ;;  %v5826_v12 = vpop.f32.mrb[68].mxu0 }
 0x52d   : > { %v8510_v30 = vadd.f32 %v5826_v12, %v12947_v40  ;;  %v5828_v1 = vpop.f32.mrb[69].mxu0 }
 0x52e   : > { %v12959_v61 = vadd.f32 %v5828_v1, %v12951_v0  ;;  %v5830_v39 = vpop.f32.mrb[70].mxu0 }
 0x52f   : > { %v6043_v25 = vmul.f32 0.70710677, %v8510_v30  ;;  %v8512_v21 = vadd.f32 %v5830_v39, %v12947_v40  ;;  %v5832_v9 = vpop.f32.mrb[71].mxu0  ;;  %v5979_v36 = vmul.f32 0.5, %v8510_v30 }
 0x530   : > { %v6044_v16 = vmul.f32 0.70710677, %v12959_v61  ;;  %v8513_v7 = vadd.f32 %v5832_v9, %v12951_v0  ;;  %v5980_v44 = vmul.f32 0.5, %v12959_v61 }
 0x531   : > { %9848 = verf.f32 %v6043_v25  ;;  %v6045_v52 = vmul.f32 0.70710677, %v8512_v21  ;;  %v5981_v35 = vmul.f32 0.5, %v8512_v21  ;;  %v9574_v21 = vld [vmem:[%s13404_s9 + $0x10] sm:$0xff]  }
 0x532   : > { %9850 = verf.f32 %v6044_v16  ;;  %v6046_v5 = vmul.f32 0.70710677, %v8513_v7  ;;  %v5982_v49 = vmul.f32 0.5, %v8513_v7 }
 0x533   : > { %v9841_v53 = vpop.eup %9840  ;;  %9852 = verf.f32 %v6045_v52 }
 0x534   : > { %v9843_v45 = vpop.eup %9842  ;;  %v6167_v11 = vadd.f32 1.0, %v9841_v53  ;;  %9854 = verf.f32 %v6046_v5  ;;  %v5836_v15 = vpop.f32.mrb[72].mxu0 }
 0x535   : > { %v9845_v48 = vpop.eup %9844  ;;  %v6168_v54 = vadd.f32 1.0, %v9843_v45  ;;  %v12965_v32 = vadd.f32 %v5836_v15, %v12947_v40  ;;  %v5838_v43 = vpop.f32.mrb[73].mxu0 }
 0x536   : > { %v9847_v42 = vpop.eup %9846  ;;  %v6169_v34 = vadd.f32 1.0, %v9845_v48  ;;  %v12968_v28 = vadd.f32 %v5838_v43, %v12951_v0  ;;  %v5840_v63 = vpop.f32.mrb[74].mxu0  ;;  %v6231_v55 = vmul.f32 %v6167_v11, %v5975_v37 }
 0x537   : > { %v6170_v8 = vadd.f32 1.0, %v9847_v42  ;;  %v6047_v3 = vmul.f32 0.70710677, %v12965_v32  ;;  %v5842_v20 = vpop.f32.mrb[75].mxu0  ;;  %v12976_v18 = vadd.f32 %v5840_v63, %v12947_v40  ;;  %v6232_v57 = vmul.f32 %v6168_v54, %v5976_v22  ;;  %v9575_v54 = vld [vmem:[%s13404_s9 + $0x18] sm:$0xff]  }
 0x538   : > { %v6233_v33 = vmul.f32 %v6169_v34, %v5977_v10  ;;  %v6048_v38 = vmul.f32 0.70710677, %v12968_v28  ;;  %v12979_v58 = vadd.f32 %v5842_v20, %v12951_v0  ;;  %v5983_v34 = vmul.f32 0.5, %v12965_v32 }
 0x539   : > { %v6234_v19 = vmul.f32 %v6170_v8, %v5978_v50  ;;  %9856 = verf.f32 %v6047_v3  ;;  %v6049_v27 = vmul.f32 0.70710677, %v12976_v18  ;;  %v5984_v20 = vmul.f32 0.5, %v12968_v28 }
 0x53a   : > { %v6295_v14 = vpack.c.bf16 %v6233_v33, %v6231_v55  ;;  %9858 = verf.f32 %v6048_v38  ;;  %v6050_v59 = vmul.f32 0.70710677, %v12979_v58 }
 0x53b   : > { %v9849_v31 = vpop.eup %9848  ;;  %v6296_v23 = vpack.c.bf16 %v6234_v19, %v6232_v57  ;;  %9860 = verf.f32 %v6049_v27  ;;  %v5986_v57 = vmul.f32 0.5, %v12979_v58 }
 0x53c   : > { %v9851_v6 = vpop.eup %9850  ;;  %v6171_v51 = vadd.f32 1.0, %v9849_v31  ;;  %v5846_v47 = vpop.f32.mrb[76].mxu0  ;;  %9862 = verf.f32 %v6050_v59 }
 0x53d   : > { %v9853_v41 = vpop.eup %9852  ;;  %v6172_v24 = vadd.f32 1.0, %v9851_v6  ;;  %v12987_v46 = vadd.f32 %v5846_v47, %v12947_v40  ;;  %v5848_v13 = vpop.f32.mrb[77].mxu0  ;;  %6494 = vmatprep.mubr.bf16.mxu1 %v6296_v23 }
 0x53e   : > { %v9855_v26 = vpop.eup %9854  ;;  %v6173_v60 = vadd.f32 1.0, %v9853_v41  ;;  %v12990_v2 = vadd.f32 %v5848_v13, %v12951_v0  ;;  %v5850_v29 = vpop.f32.mrb[78].mxu0  ;;  %6495 = vmatmul.mubr.bf16.vlgmr.msra.gmra.mrb[64].mxu1 %v6295_v14  ;;  %v6235_v25 = vmul.f32 %v6171_v51, %v5979_v36 }
 0x53f   : > { %v6174_v12 = vadd.f32 1.0, %v9855_v26  ;;  %v6051_v1 = vmul.f32 0.70710677, %v12987_v46  ;;  %v5852_v39 = vpop.f32.mrb[79].mxu0  ;;  %8419 = vmatpush3.bf16.msra.mxu1 %v9572_v17  ;;  %v12996_v30 = vadd.f32 %v5850_v29, %v12947_v40  ;;  %v6236_v52 = vmul.f32 %v6172_v24, %v5980_v44 }
 0x540   : > { %v6237_v9 = vmul.f32 %v6173_v60, %v5981_v35  ;;  %v6052_v16 = vmul.f32 0.70710677, %v12990_v2  ;;  %8420 = vmatprep.subr.bf16.mxu1 %v9573_v4  ;;  %v13002_v7 = vadd.f32 %v5852_v39, %v12951_v0  ;;  %v5985_v17 = vmul.f32 0.5, %v12976_v18 }
 0x541   : > { %v6238_v61 = vmul.f32 %v6174_v12, %v5982_v49  ;;  %9864 = verf.f32 %v6051_v1  ;;  %v6053_v5 = vmul.f32 0.70710677, %v12996_v30  ;;  %v5987_v35 = vmul.f32 0.5, %v12987_v46 }
 0x542   : > { %9866 = verf.f32 %v6052_v16  ;;  %v6297_v53 = vpack.c.bf16 %v6237_v9, %v6235_v25  ;;  %v6054_v11 = vmul.f32 0.70710677, %v13002_v7  ;;  %v5988_v12 = vmul.f32 0.5, %v12990_v2 }
 0x543   : > { %v9857_v45 = vpop.eup %9856  ;;  %v6298_v15 = vpack.c.bf16 %v6238_v61, %v6236_v52  ;;  %8421 = vmatpush3.bf16.msra.mxu1 %v9573_v4  ;;  %9868 = verf.f32 %v6053_v5  ;;  %v5989_v1 = vmul.f32 0.5, %v12996_v30  ;;  %v5990_v16 = vmul.f32 0.5, %v13002_v7 }
 0x544   : > { %v9859_v48 = vpop.eup %9858  ;;  %v5856_v37 = vpop.f32.mrb[80].mxu0  ;;  %8422 = vmatprep.subr.bf16.mxu1 %v9574_v21  ;;  %v6175_v43 = vadd.f32 1.0, %v9857_v45  ;;  %9870 = verf.f32 %v6054_v11 }
 0x545   : > { %v13010_v42 = vadd.f32 %v5856_v37, %v12947_v40  ;;  %v5858_v22 = vpop.f32.mrb[81].mxu0  ;;  %6502 = vmatprep.mubr.bf16.mxu1 %v6298_v15  ;;  %v9861_v10 = vpop.eup %9860  ;;  %v6176_v63 = vadd.f32 1.0, %v9859_v48 }
 0x546   : > { %v13014_v50 = vadd.f32 %v5858_v22, %v12951_v0  ;;  %v5860_v8 = vpop.f32.mrb[82].mxu0  ;;  %6503 = vmatmul.mubr.bf16.gmra.mrb[68].mxu1 %v6297_v53  ;;  %v9863_v3 = vpop.eup %9862  ;;  %v6177_v55 = vadd.f32 1.0, %v9861_v10  ;;  %v6239_v27 = vmul.f32 %v6175_v43, %v5983_v34 }
 0x547   : > { %v6055_v33 = vmul.f32 0.70710677, %v13010_v42  ;;  %v5862_v38 = vpop.f32.mrb[83].mxu0  ;;  %8423 = vmatpush3.bf16.msra.mxu1 %v9574_v21  ;;  %v6178_v19 = vadd.f32 1.0, %v9863_v3  ;;  %v13022_v14 = vadd.f32 %v5860_v8, %v12947_v40  ;;  %v6240_v18 = vmul.f32 %v6176_v63, %v5984_v20 }
 0x548   : > { %v6056_v32 = vmul.f32 0.70710677, %v13014_v50  ;;  %8424 = vmatprep.subr.bf16.mxu1 %v9575_v54  ;;  %v6241_v31 = vmul.f32 %v6177_v55, %v5985_v17  ;;  %v13025_v28 = vadd.f32 %v5862_v38, %v12951_v0  ;;  %v5991_v63 = vmul.f32 0.5, %v13010_v42 }
 0x549   : > { %9872 = verf.f32 %v6055_v33  ;;  %v6242_v59 = vmul.f32 %v6178_v19, %v5986_v57  ;;  %v6057_v23 = vmul.f32 0.70710677, %v13022_v14  ;;  %v5992_v55 = vmul.f32 0.5, %v13014_v50 }
 0x54a   : > { %9874 = verf.f32 %v6056_v32  ;;  %v6058_v58 = vmul.f32 0.70710677, %v13025_v28  ;;  %v6299_v51 = vpack.c.bf16 %v6241_v31, %v6239_v27  ;;  %v5993_v33 = vmul.f32 0.5, %v13022_v14 }
 0x54b   : > { %v9865_v6 = vpop.eup %9864  ;;  %8425 = vmatpush3.bf16.msra.mxu1 %v9575_v54  ;;  %9876 = verf.f32 %v6057_v23  ;;  %v6300_v41 = vpack.c.bf16 %v6242_v59, %v6240_v18  ;;  %v5994_v32 = vmul.f32 0.5, %v13025_v28 }
 0x54c   : > { %v9867_v47 = vpop.eup %9866  ;;  %v5866_v4 = vpop.f32.mrb[84].mxu0  ;;  %v6179_v24 = vadd.f32 1.0, %v9865_v6  ;;  %9878 = verf.f32 %v6058_v58 }
 0x54d   : > { %v13030_v13 = vadd.f32 %v5866_v4, %v12947_v40  ;;  %v5868_v26 = vpop.f32.mrb[85].mxu0  ;;  %v9869_v36 = vpop.eup %9868  ;;  %v6180_v60 = vadd.f32 1.0, %v9867_v47  ;;  %6510 = vmatprep.mubr.bf16.mxu1 %v6300_v41 }
 0x54e   : > { %v13034_v29 = vadd.f32 %v5868_v26, %v12951_v0  ;;  %v5870_v44 = vpop.f32.mrb[86].mxu0  ;;  %v9871_v49 = vpop.eup %9870  ;;  %v6181_v39 = vadd.f32 1.0, %v9869_v36  ;;  %6511 = vmatmul.mubr.bf16.gmra.mrb[72].mxu1 %v6299_v51  ;;  %v6243_v61 = vmul.f32 %v6179_v24, %v5987_v35 }
 0x54f   : > { %v6059_v25 = vmul.f32 0.70710677, %v13030_v13  ;;  %v5872_v9 = vpop.f32.mrb[87].mxu0  ;;  %v6182_v21 = vadd.f32 1.0, %v9871_v49  ;;  %v13042_v52 = vadd.f32 %v5870_v44, %v12947_v40  ;;  %v6244_v30 = vmul.f32 %v6180_v60, %v5988_v12 }
 0x550   : > { %v6060_v46 = vmul.f32 0.70710677, %v13034_v29  ;;  %v6245_v5 = vmul.f32 %v6181_v39, %v5989_v1  ;;  %v13045_v2 = vadd.f32 %v5872_v9, %v12951_v0  ;;  %v5995_v60 = vmul.f32 0.5, %v13030_v13 }
 0x551   : > { %9880 = verf.f32 %v6059_v25  ;;  %v6246_v53 = vmul.f32 %v6182_v21, %v5990_v16  ;;  %v6061_v45 = vmul.f32 0.70710677, %v13042_v52  ;;  %v5996_v39 = vmul.f32 0.5, %v13034_v29 }
 0x552   : > { %9882 = verf.f32 %v6060_v46  ;;  %v6062_v7 = vmul.f32 0.70710677, %v13045_v2  ;;  %v6301_v15 = vpack.c.bf16 %v6245_v5, %v6243_v61  ;;  %v5997_v25 = vmul.f32 0.5, %v13042_v52 }
 0x553   : > { %v9873_v11 = vpop.eup %9872  ;;  %9884 = verf.f32 %v6061_v45  ;;  %v6302_v54 = vpack.c.bf16 %v6246_v53, %v6244_v30  ;;  %v5998_v46 = vmul.f32 0.5, %v13045_v2 }
 0x554   : > { %v9875_v48 = vpop.eup %9874  ;;  %v5876_v37 = vpop.f32.mrb[88].mxu0  ;;  %v6183_v43 = vadd.f32 1.0, %v9873_v11  ;;  %9886 = verf.f32 %v6062_v7 }
 0x555   : > { %v13050_v22 = vadd.f32 %v5876_v37, %v12947_v40  ;;  %v5878_v10 = vpop.f32.mrb[89].mxu0  ;;  %v9877_v34 = vpop.eup %9876  ;;  %v6184_v8 = vadd.f32 1.0, %v9875_v48  ;;  %6518 = vmatprep.mubr.bf16.mxu1 %v6302_v54 }
 0x556   : > { %v13054_v3 = vadd.f32 %v5878_v10, %v12951_v0  ;;  %v5880_v20 = vpop.f32.mrb[90].mxu0  ;;  %v9879_v17 = vpop.eup %9878  ;;  %v6185_v38 = vadd.f32 1.0, %v9877_v34  ;;  %6519 = vmatmul.mubr.bf16.gmra.mrb[76].mxu1 %v6301_v15  ;;  %v6247_v18 = vmul.f32 %v6183_v43, %v5991_v63 }
 0x557   : > { %v6063_v57 = vmul.f32 0.70710677, %v13050_v22  ;;  %v5882_v19 = vpop.f32.mrb[91].mxu0  ;;  %v6186_v27 = vadd.f32 1.0, %v9879_v17  ;;  %v13062_v31 = vadd.f32 %v5880_v20, %v12947_v40  ;;  %v6248_v14 = vmul.f32 %v6184_v8, %v5992_v55 }
 0x558   : > { %v6064_v42 = vmul.f32 0.70710677, %v13054_v3  ;;  %v6249_v59 = vmul.f32 %v6185_v38, %v5993_v33  ;;  %v13065_v50 = vadd.f32 %v5882_v19, %v12951_v0  ;;  %v5999_v8 = vmul.f32 0.5, %v13050_v22 }
 0x559   : > { %9888 = verf.f32 %v6063_v57  ;;  %v6250_v23 = vmul.f32 %v6186_v27, %v5994_v32  ;;  %v6065_v6 = vmul.f32 0.70710677, %v13062_v31  ;;  %v6000_v38 = vmul.f32 0.5, %v13054_v3 }
 0x55a   : > { %9890 = verf.f32 %v6064_v42  ;;  %v6066_v28 = vmul.f32 0.70710677, %v13065_v50  ;;  %v6303_v51 = vpack.c.bf16 %v6249_v59, %v6247_v18  ;;  %v6001_v57 = vmul.f32 0.5, %v13062_v31 }
 0x55b   : > { %v9881_v58 = vpop.eup %9880  ;;  %9892 = verf.f32 %v6065_v6  ;;  %v6304_v41 = vpack.c.bf16 %v6250_v23, %v6248_v14  ;;  %v6002_v42 = vmul.f32 0.5, %v13065_v50 }
 0x55c   : > { %v9883_v47 = vpop.eup %9882  ;;  %v5886_v4 = vpop.f32.mrb[92].mxu0  ;;  %v6187_v24 = vadd.f32 1.0, %v9881_v58  ;;  %9894 = verf.f32 %v6066_v28 }
 0x55d   : > { %v13070_v26 = vadd.f32 %v5886_v4, %v12947_v40  ;;  %v5888_v36 = vpop.f32.mrb[93].mxu0  ;;  %v9885_v35 = vpop.eup %9884  ;;  %v6188_v44 = vadd.f32 1.0, %v9883_v47  ;;  %6526 = vmatprep.mubr.bf16.mxu1 %v6304_v41 }
 0x55e   : > { %v13074_v49 = vadd.f32 %v5888_v36, %v12951_v0  ;;  %v5890_v12 = vpop.f32.mrb[94].mxu0  ;;  %v9887_v1 = vpop.eup %9886  ;;  %v6189_v9 = vadd.f32 1.0, %v9885_v35  ;;  %6527 = vmatmul.mubr.bf16.gmra.mrb[80].mxu1 %v6303_v51  ;;  %v6251_v30 = vmul.f32 %v6187_v24, %v5995_v60 }
 0x55f   : > { %v6067_v16 = vmul.f32 0.70710677, %v13070_v26  ;;  %v5892_v21 = vpop.f32.mrb[95].mxu0  ;;  %v6190_v61 = vadd.f32 1.0, %v9887_v1  ;;  %v13082_v5 = vadd.f32 %v5890_v12, %v12947_v40  ;;  %v6252_v52 = vmul.f32 %v6188_v44, %v5996_v39 }
 0x560   : > { %v6068_v13 = vmul.f32 0.70710677, %v13074_v49  ;;  %v6253_v53 = vmul.f32 %v6189_v9, %v5997_v25  ;;  %v13085_v29 = vadd.f32 %v5892_v21, %v12951_v0  ;;  %v6003_v44 = vmul.f32 0.5, %v13070_v26 }
 0x561   : > { %9896 = verf.f32 %v6067_v16  ;;  %v6254_v45 = vmul.f32 %v6190_v61, %v5998_v46  ;;  %v6069_v11 = vmul.f32 0.70710677, %v13082_v5  ;;  %v6004_v9 = vmul.f32 0.5, %v13074_v49 }
 0x562   : > { %9898 = verf.f32 %v6068_v13  ;;  %v6070_v2 = vmul.f32 0.70710677, %v13085_v29  ;;  %v6305_v15 = vpack.c.bf16 %v6253_v53, %v6251_v30  ;;  %v6005_v16 = vmul.f32 0.5, %v13082_v5 }
 0x563   : > { %v9889_v7 = vpop.eup %9888  ;;  %9900 = verf.f32 %v6069_v11  ;;  %v6306_v54 = vpack.c.bf16 %v6254_v45, %v6252_v52  ;;  %v6006_v13 = vmul.f32 0.5, %v13085_v29 }
 0x564   : > { %v9891_v48 = vpop.eup %9890  ;;  %v5896_v37 = vpop.f32.mrb[96].mxu0  ;;  %v6191_v43 = vadd.f32 1.0, %v9889_v7  ;;  %9902 = verf.f32 %v6070_v2 }
 0x565   : > { %v13090_v10 = vadd.f32 %v5896_v37, %v12947_v40  ;;  %v5898_v34 = vpop.f32.mrb[97].mxu0  ;;  %v9893_v63 = vpop.eup %9892  ;;  %v6192_v20 = vadd.f32 1.0, %v9891_v48  ;;  %6534 = vmatprep.mubr.bf16.mxu1 %v6306_v54 }
 0x566   : > { %v13094_v17 = vadd.f32 %v5898_v34, %v12951_v0  ;;  %v5900_v55 = vpop.f32.mrb[98].mxu0  ;;  %v9895_v33 = vpop.eup %9894  ;;  %v6193_v19 = vadd.f32 1.0, %v9893_v63  ;;  %6535 = vmatmul.mubr.bf16.gmra.mrb[84].mxu1 %v6305_v15  ;;  %v6255_v14 = vmul.f32 %v6191_v43, %v5999_v8 }
 0x567   : > { %v6071_v32 = vmul.f32 0.70710677, %v13090_v10  ;;  %v5902_v27 = vpop.f32.mrb[99].mxu0  ;;  %v6194_v18 = vadd.f32 1.0, %v9895_v33  ;;  %v13102_v59 = vadd.f32 %v5900_v55, %v12947_v40  ;;  %v6256_v31 = vmul.f32 %v6192_v20, %v6000_v38 }
 0x568   : > { %v6072_v22 = vmul.f32 0.70710677, %v13094_v17  ;;  %v6257_v23 = vmul.f32 %v6193_v19, %v6001_v57  ;;  %v13105_v3 = vadd.f32 %v5902_v27, %v12951_v0  ;;  %v6007_v20 = vmul.f32 0.5, %v13090_v10 }
 0x569   : > { %9904 = verf.f32 %v6071_v32  ;;  %v6258_v6 = vmul.f32 %v6194_v18, %v6002_v42  ;;  %v6073_v58 = vmul.f32 0.70710677, %v13102_v59  ;;  %v6008_v19 = vmul.f32 0.5, %v13094_v17 }
 0x56a   : > { %9906 = verf.f32 %v6072_v22  ;;  %v6074_v50 = vmul.f32 0.70710677, %v13105_v3  ;;  %v6307_v51 = vpack.c.bf16 %v6257_v23, %v6255_v14  ;;  %v6009_v32 = vmul.f32 0.5, %v13102_v59 }
 0x56b   : > { %v9897_v28 = vpop.eup %9896  ;;  %9908 = verf.f32 %v6073_v58  ;;  %v6308_v41 = vpack.c.bf16 %v6258_v6, %v6256_v31  ;;  %v6010_v22 = vmul.f32 0.5, %v13105_v3 }
 0x56c   : > { %v9899_v47 = vpop.eup %9898  ;;  %v5906_v4 = vpop.f32.mrb[100].mxu0  ;;  %v6195_v24 = vadd.f32 1.0, %v9897_v28  ;;  %9910 = verf.f32 %v6074_v50 }
 0x56d   : > { %v13110_v36 = vadd.f32 %v5906_v4, %v12947_v40  ;;  %v5908_v35 = vpop.f32.mrb[101].mxu0  ;;  %v9901_v60 = vpop.eup %9900  ;;  %v6196_v12 = vadd.f32 1.0, %v9899_v47  ;;  %6542 = vmatprep.mubr.bf16.mxu1 %v6308_v41 }
 0x56e   : > { %v13114_v1 = vadd.f32 %v5908_v35, %v12951_v0  ;;  %v5910_v39 = vpop.f32.mrb[102].mxu0  ;;  %v9903_v25 = vpop.eup %9902  ;;  %v6197_v21 = vadd.f32 1.0, %v9901_v60  ;;  %6543 = vmatmul.mubr.bf16.gmra.mrb[88].mxu1 %v6307_v51  ;;  %v6259_v52 = vmul.f32 %v6195_v24, %v6003_v44 }
 0x56f   : > { %v6075_v46 = vmul.f32 0.70710677, %v13110_v36  ;;  %v5912_v61 = vpop.f32.mrb[103].mxu0  ;;  %v6198_v30 = vadd.f32 1.0, %v9903_v25  ;;  %v13122_v53 = vadd.f32 %v5910_v39, %v12947_v40  ;;  %v6260_v5 = vmul.f32 %v6196_v12, %v6004_v9 }
 0x570   : > { %v6076_v26 = vmul.f32 0.70710677, %v13114_v1  ;;  %v6261_v45 = vmul.f32 %v6197_v21, %v6005_v16  ;;  %v13125_v49 = vadd.f32 %v5912_v61, %v12951_v0  ;;  %v6011_v12 = vmul.f32 0.5, %v13110_v36 }
 0x571   : > { %9912 = verf.f32 %v6075_v46  ;;  %v6262_v11 = vmul.f32 %v6198_v30, %v6006_v13  ;;  %v6077_v7 = vmul.f32 0.70710677, %v13122_v53  ;;  %v6012_v21 = vmul.f32 0.5, %v13114_v1 }
 0x572   : > { %9914 = verf.f32 %v6076_v26  ;;  %v6078_v29 = vmul.f32 0.70710677, %v13125_v49  ;;  %v6309_v15 = vpack.c.bf16 %v6261_v45, %v6259_v52  ;;  %v6013_v46 = vmul.f32 0.5, %v13122_v53 }
 0x573   : > { %v9905_v2 = vpop.eup %9904  ;;  %9916 = verf.f32 %v6077_v7  ;;  %v6310_v54 = vpack.c.bf16 %v6262_v11, %v6260_v5  ;;  %v6014_v26 = vmul.f32 0.5, %v13125_v49 }
 0x574   : > { %v9907_v48 = vpop.eup %9906  ;;  %v5916_v37 = vpop.f32.mrb[104].mxu0  ;;  %v6199_v43 = vadd.f32 1.0, %v9905_v2  ;;  %9918 = verf.f32 %v6078_v29 }
 0x575   : > { %v13130_v34 = vadd.f32 %v5916_v37, %v12947_v40  ;;  %v5918_v63 = vpop.f32.mrb[105].mxu0  ;;  %v9909_v8 = vpop.eup %9908  ;;  %v6200_v55 = vadd.f32 1.0, %v9907_v48  ;;  %6550 = vmatprep.mubr.bf16.mxu1 %v6310_v54 }
 0x576   : > { %v13134_v33 = vadd.f32 %v5918_v63, %v12951_v0  ;;  %v5920_v38 = vpop.f32.mrb[106].mxu0  ;;  %v9911_v57 = vpop.eup %9910  ;;  %v6201_v27 = vadd.f32 1.0, %v9909_v8  ;;  %6551 = vmatmul.mubr.bf16.gmra.mrb[92].mxu1 %v6309_v15  ;;  %v6263_v31 = vmul.f32 %v6199_v43, %v6007_v20 }
 0x577   : > { %v6079_v42 = vmul.f32 0.70710677, %v13130_v34  ;;  %v5922_v18 = vpop.f32.mrb[107].mxu0  ;;  %v6202_v14 = vadd.f32 1.0, %v9911_v57  ;;  %v13142_v23 = vadd.f32 %v5920_v38, %v12947_v40  ;;  %v6264_v59 = vmul.f32 %v6200_v55, %v6008_v19 }
 0x578   : > { %v6080_v10 = vmul.f32 0.70710677, %v13134_v33  ;;  %v6265_v6 = vmul.f32 %v6201_v27, %v6009_v32  ;;  %v13145_v17 = vadd.f32 %v5922_v18, %v12951_v0  ;;  %v6015_v55 = vmul.f32 0.5, %v13130_v34 }
 0x579   : > { %9920 = verf.f32 %v6079_v42  ;;  %v6266_v58 = vmul.f32 %v6202_v14, %v6010_v22  ;;  %v6081_v28 = vmul.f32 0.70710677, %v13142_v23  ;;  %v6016_v27 = vmul.f32 0.5, %v13134_v33 }
 0x57a   : > { %9922 = verf.f32 %v6080_v10  ;;  %v6082_v3 = vmul.f32 0.70710677, %v13145_v17  ;;  %v6311_v51 = vpack.c.bf16 %v6265_v6, %v6263_v31  ;;  %v6017_v42 = vmul.f32 0.5, %v13142_v23 }
 0x57b   : > { %v9913_v50 = vpop.eup %9912  ;;  %9924 = verf.f32 %v6081_v28  ;;  %v6312_v41 = vpack.c.bf16 %v6266_v58, %v6264_v59  ;;  %v6018_v10 = vmul.f32 0.5, %v13145_v17 }
 0x57c   : > { %v9915_v47 = vpop.eup %9914  ;;  %v5926_v4 = vpop.f32.mrb[108].mxu0  ;;  %v6203_v24 = vadd.f32 1.0, %v9913_v50  ;;  %9926 = verf.f32 %v6082_v3 }
 0x57d   : > { %v13150_v35 = vadd.f32 %v5926_v4, %v12947_v40  ;;  %v5928_v60 = vpop.f32.mrb[109].mxu0  ;;  %v9917_v44 = vpop.eup %9916  ;;  %v6204_v39 = vadd.f32 1.0, %v9915_v47  ;;  %6558 = vmatprep.mubr.bf16.mxu1 %v6312_v41 }
 0x57e   : > { %v13154_v25 = vadd.f32 %v5928_v60, %v12951_v0  ;;  %v5930_v9 = vpop.f32.mrb[110].mxu0  ;;  %v9919_v16 = vpop.eup %9918  ;;  %v6205_v61 = vadd.f32 1.0, %v9917_v44  ;;  %6559 = vmatmul.mubr.bf16.gmra.mrb[96].mxu1 %v6311_v51  ;;  %v6267_v5 = vmul.f32 %v6203_v24, %v6011_v12 }
 0x57f   : > { %v6083_v13 = vmul.f32 0.70710677, %v13150_v35  ;;  %v5932_v30 = vpop.f32.mrb[111].mxu0  ;;  %v6206_v52 = vadd.f32 1.0, %v9919_v16  ;;  %v13162_v45 = vadd.f32 %v5930_v9, %v12947_v40  ;;  %v6268_v53 = vmul.f32 %v6204_v39, %v6012_v21 }
 0x580   : > { %v6084_v36 = vmul.f32 0.70710677, %v13154_v25  ;;  %v6269_v11 = vmul.f32 %v6205_v61, %v6013_v46  ;;  %v13165_v1 = vadd.f32 %v5932_v30, %v12951_v0  ;;  %v6019_v39 = vmul.f32 0.5, %v13150_v35 }
 0x581   : > { %9928 = verf.f32 %v6083_v13  ;;  %v6270_v7 = vmul.f32 %v6206_v52, %v6014_v26  ;;  %v6085_v2 = vmul.f32 0.70710677, %v13162_v45  ;;  %v6020_v61 = vmul.f32 0.5, %v13154_v25 }
 0x582   : > { %9930 = verf.f32 %v6084_v36  ;;  %v6086_v49 = vmul.f32 0.70710677, %v13165_v1  ;;  %v6313_v15 = vpack.c.bf16 %v6269_v11, %v6267_v5  ;;  %v6021_v13 = vmul.f32 0.5, %v13162_v45 }
 0x583   : > { %v9921_v29 = vpop.eup %9920  ;;  %9932 = verf.f32 %v6085_v2  ;;  %v6314_v54 = vpack.c.bf16 %v6270_v7, %v6268_v53  ;;  %v6022_v36 = vmul.f32 0.5, %v13165_v1 }
 0x584   : > { %v9923_v48 = vpop.eup %9922  ;;  %v5936_v37 = vpop.f32.mrb[112].mxu0  ;;  %v6207_v43 = vadd.f32 1.0, %v9921_v29  ;;  %9934 = verf.f32 %v6086_v49 }
 0x585   : > { %v13170_v63 = vadd.f32 %v5936_v37, %v12947_v40  ;;  %v5938_v8 = vpop.f32.mrb[113].mxu0  ;;  %v9925_v20 = vpop.eup %9924  ;;  %v6208_v38 = vadd.f32 1.0, %v9923_v48  ;;  %6566 = vmatprep.mubr.bf16.mxu1 %v6314_v54 }
 0x586   : > { %v13174_v57 = vadd.f32 %v5938_v8, %v12951_v0  ;;  %v5940_v19 = vpop.f32.mrb[114].mxu0  ;;  %v9927_v32 = vpop.eup %9926  ;;  %v6209_v18 = vadd.f32 1.0, %v9925_v20  ;;  %6567 = vmatmul.mubr.bf16.gmra.mrb[100].mxu1 %v6313_v15  ;;  %v6271_v59 = vmul.f32 %v6207_v43, %v6015_v55 }
 0x587   : > { %v6087_v22 = vmul.f32 0.70710677, %v13170_v63  ;;  %v5942_v14 = vpop.f32.mrb[115].mxu0  ;;  %v6210_v31 = vadd.f32 1.0, %v9927_v32  ;;  %v13182_v6 = vadd.f32 %v5940_v19, %v12947_v40  ;;  %v6272_v23 = vmul.f32 %v6208_v38, %v6016_v27 }
 0x588   : > { %v6088_v34 = vmul.f32 0.70710677, %v13174_v57  ;;  %v6273_v58 = vmul.f32 %v6209_v18, %v6017_v42  ;;  %v13185_v33 = vadd.f32 %v5942_v14, %v12951_v0  ;;  %v6023_v38 = vmul.f32 0.5, %v13170_v63 }
 0x589   : > { %9936 = verf.f32 %v6087_v22  ;;  %v6274_v28 = vmul.f32 %v6210_v31, %v6018_v10  ;;  %v6089_v50 = vmul.f32 0.70710677, %v13182_v6  ;;  %v6024_v18 = vmul.f32 0.5, %v13174_v57 }
 0x58a   : > { %9938 = verf.f32 %v6088_v34  ;;  %v6090_v17 = vmul.f32 0.70710677, %v13185_v33  ;;  %v6315_v51 = vpack.c.bf16 %v6273_v58, %v6271_v59  ;;  %v6025_v22 = vmul.f32 0.5, %v13182_v6 }
 0x58b   : > { %v9929_v3 = vpop.eup %9928  ;;  %9940 = verf.f32 %v6089_v50  ;;  %v6316_v41 = vpack.c.bf16 %v6274_v28, %v6272_v23  ;;  %v6026_v34 = vmul.f32 0.5, %v13185_v33 }
 0x58c   : > { %v9931_v47 = vpop.eup %9930  ;;  %v5946_v4 = vpop.f32.mrb[116].mxu0  ;;  %v6211_v24 = vadd.f32 1.0, %v9929_v3  ;;  %9942 = verf.f32 %v6090_v17 }
 0x58d   : > { %v13190_v60 = vadd.f32 %v5946_v4, %v12947_v40  ;;  %v5948_v44 = vpop.f32.mrb[117].mxu0  ;;  %v9933_v12 = vpop.eup %9932  ;;  %v6212_v9 = vadd.f32 1.0, %v9931_v47  ;;  %6574 = vmatprep.mubr.bf16.mxu1 %v6316_v41 }
 0x58e   : > { %v13194_v16 = vadd.f32 %v5948_v44, %v12951_v0  ;;  %v5950_v21 = vpop.f32.mrb[118].mxu0  ;;  %v9935_v46 = vpop.eup %9934  ;;  %v6213_v30 = vadd.f32 1.0, %v9933_v12  ;;  %6575 = vmatmul.mubr.bf16.gmra.mrb[104].mxu1 %v6315_v51  ;;  %v6275_v53 = vmul.f32 %v6211_v24, %v6019_v39 }
 0x58f   : > { %v6091_v26 = vmul.f32 0.70710677, %v13190_v60  ;;  %v5952_v52 = vpop.f32.mrb[119].mxu0  ;;  %v6214_v5 = vadd.f32 1.0, %v9935_v46  ;;  %v13202_v11 = vadd.f32 %v5950_v21, %v12947_v40  ;;  %v6276_v45 = vmul.f32 %v6212_v9, %v6020_v61 }
 0x590   : > { %v6092_v35 = vmul.f32 0.70710677, %v13194_v16  ;;  %v6277_v7 = vmul.f32 %v6213_v30, %v6021_v13  ;;  %v13205_v25 = vadd.f32 %v5952_v52, %v12951_v0  ;;  %v6027_v9 = vmul.f32 0.5, %v13190_v60 }
 0x591   : > { %9944 = verf.f32 %v6091_v26  ;;  %v6278_v2 = vmul.f32 %v6214_v5, %v6022_v36  ;;  %v6093_v29 = vmul.f32 0.70710677, %v13202_v11  ;;  %v6028_v30 = vmul.f32 0.5, %v13194_v16 }
 0x592   : > { %9946 = verf.f32 %v6092_v35  ;;  %v6094_v1 = vmul.f32 0.70710677, %v13205_v25  ;;  %v6317_v15 = vpack.c.bf16 %v6277_v7, %v6275_v53  ;;  %v6029_v26 = vmul.f32 0.5, %v13202_v11 }
 0x593   : > { %v9937_v49 = vpop.eup %9936  ;;  %9948 = verf.f32 %v6093_v29  ;;  %v6318_v54 = vpack.c.bf16 %v6278_v2, %v6276_v45  ;;  %v6030_v35 = vmul.f32 0.5, %v13205_v25  ;;  %v9576_v25 = vld [vmem:[%s13404_s9 + $0x20] sm:$0xff]  }
 0x594   : > { %v9939_v48 = vpop.eup %9938  ;;  %v5956_v37 = vpop.f32.mrb[120].mxu0  ;;  %v6215_v43 = vadd.f32 1.0, %v9937_v49  ;;  %9950 = verf.f32 %v6094_v1  ;;  %8426 = vmatprep.subr.bf16.mxu1 %v9576_v25 }
 0x595   : > { %v13210_v8 = vadd.f32 %v5956_v37, %v12947_v40  ;;  %v5958_v20 = vpop.f32.mrb[121].mxu0  ;;  %v9941_v55 = vpop.eup %9940  ;;  %v6216_v19 = vadd.f32 1.0, %v9939_v48  ;;  %6582 = vmatprep.mubr.bf16.mxu1 %v6318_v54  ;;  %8427 = vmatpush3.bf16.msra.mxu1 %v9576_v25 }
 0x596   : > { %v13214_v32 = vadd.f32 %v5958_v20, %v12951_v0  ;;  %v5960_v27 = vpop.f32.mrb[122].mxu0  ;;  %v9943_v42 = vpop.eup %9942  ;;  %v6217_v14 = vadd.f32 1.0, %v9941_v55  ;;  %6583 = vmatmul.mubr.bf16.gmra.mrb[108].mxu1 %v6317_v15  ;;  %v6279_v23 = vmul.f32 %v6215_v43, %v6023_v38 }
 0x597   : > { %v6095_v10 = vmul.f32 0.70710677, %v13210_v8  ;;  %v5962_v31 = vpop.f32.mrb[123].mxu0  ;;  %v6218_v59 = vadd.f32 1.0, %v9943_v42  ;;  %v8564_v58 = vadd.f32 %v5960_v27, %v12947_v40  ;;  %v6280_v57 = vmul.f32 %v6216_v19, %v6024_v18 }
 0x598   : > { %v6096_v63 = vmul.f32 0.70710677, %v13214_v32  ;;  %v6281_v28 = vmul.f32 %v6217_v14, %v6025_v22  ;;  %v8565_v50 = vadd.f32 %v5962_v31, %v12951_v0  ;;  %v6031_v55 = vmul.f32 0.5, %v13210_v8 }
 0x599   : > { %9952 = verf.f32 %v6095_v10  ;;  %v6282_v3 = vmul.f32 %v6218_v59, %v6026_v34  ;;  %v6097_v6 = vmul.f32 0.70710677, %v8564_v58  ;;  %v6033_v38 = vmul.f32 0.5, %v8564_v58 }
 0x59a   : > { %9954 = verf.f32 %v6096_v63  ;;  %v6098_v51 = vmul.f32 0.70710677, %v8565_v50  ;;  %v6319_v47 = vpack.c.bf16 %v6281_v28, %v6279_v23  ;;  %v6032_v27 = vmul.f32 0.5, %v13214_v32 }
 0x59b   : > { %v9945_v17 = vpop.eup %9944  ;;  %9956 = verf.f32 %v6097_v6  ;;  %v6320_v41 = vpack.c.bf16 %v6282_v3, %v6280_v57  ;;  %v6034_v42 = vmul.f32 0.5, %v8565_v50 }
 0x59c   : > { %v9947_v4 = vpop.eup %9946  ;;  %v5966_v33 = vpop.f32.mrb[124].mxu0  ;;  %v6219_v24 = vadd.f32 1.0, %v9945_v17  ;;  %9958 = verf.f32 %v6098_v51 }
 0x59d   : > { %v8566_v44 = vadd.f32 %v5966_v33, %v12947_v40  ;;  %v5968_v12 = vpop.f32.mrb[125].mxu0  ;;  %v9949_v39 = vpop.eup %9948  ;;  %v6220_v21 = vadd.f32 1.0, %v9947_v4  ;;  %6590 = vmatprep.mubr.bf16.mxu1 %v6320_v41 }
 0x59e   : > { %v8567_v46 = vadd.f32 %v5968_v12, %v12951_v0  ;;  %v5970_v61 = vpop.f32.mrb[126].mxu0  ;;  %v9951_v13 = vpop.eup %9950  ;;  %v6221_v52 = vadd.f32 1.0, %v9949_v39  ;;  %6591 = vmatmul.mubr.bf16.gmra.mrb[112].mxu1 %v6319_v47  ;;  %v6283_v45 = vmul.f32 %v6219_v24, %v6027_v9  ;;  %v9577_v39 = vld [vmem:[%s13404_s9 + $0x28] sm:$0xff]   ;;  %v9579_v9 = vld [vmem:[%s13404_s9 + $0x38] sm:$0xff]  }
 0x59f   : > { %v6099_v36 = vmul.f32 0.70710677, %v8566_v44  ;;  %v5972_v5 = vpop.f32.mrb[127].mxu0  ;;  %v6222_v53 = vadd.f32 1.0, %v9951_v13  ;;  %v8568_v60 = vadd.f32 %v5970_v61, %v12947_v40  ;;  %v6284_v49 = vmul.f32 %v6220_v21, %v6028_v30  ;;  %8428 = vmatprep.subr.bf16.mxu1 %v9577_v39 }
 0x5a0   : > { %v6100_v7 = vmul.f32 0.70710677, %v8567_v46  ;;  %v6285_v2 = vmul.f32 %v6221_v52, %v6029_v26  ;;  %v8569_v29 = vadd.f32 %v5972_v5, %v12951_v0  ;;  %v6035_v58 = vmul.f32 0.5, %v8566_v44  ;;  %8429 = vmatpush3.bf16.msra.mxu1 %v9577_v39  ;;  %v9578_v44 = vld [vmem:[%s13404_s9 + $0x30] sm:$0xff]  }
 0x5a1   : > { %9960 = verf.f32 %v6099_v36  ;;  %v6286_v1 = vmul.f32 %v6222_v53, %v6030_v35  ;;  %v6101_v16 = vmul.f32 0.70710677, %v8568_v60  ;;  %v6037_v6 = vmul.f32 0.5, %v8568_v60  ;;  %8430 = vmatprep.subr.bf16.mxu1 %v9578_v44 }
 0x5a2   : > { %9962 = verf.f32 %v6100_v7  ;;  %v6102_v15 = vmul.f32 0.70710677, %v8569_v29  ;;  %v6321_v48 = vpack.c.bf16 %v6285_v2, %v6283_v45  ;;  %v6036_v32 = vmul.f32 0.5, %v8567_v46  ;;  %v13248_v46 = vld [vmem:[%s13403_s8] ss:$0 sm:$0xff] }
 0x5a3   : > { %v9953_v11 = vpop.eup %9952  ;;  %9964 = verf.f32 %v6101_v16  ;;  %v6322_v54 = vpack.c.bf16 %v6286_v1, %v6284_v49  ;;  %v6038_v50 = vmul.f32 0.5, %v8569_v29 }
 0x5a4   : > { %v9955_v37 = vpop.eup %9954  ;;  %v6223_v40 = vadd.f32 1.0, %v9953_v11  ;;  %9966 = verf.f32 %v6102_v15  ;;  %8431 = vmatpush3.bf16.msra.mxu1 %v9578_v44 }
 0x5a5   : > { %v9957_v43 = vpop.eup %9956  ;;  %v6224_v20 = vadd.f32 1.0, %v9955_v37  ;;  %6598 = vmatprep.mubr.bf16.mxu1 %v6322_v54  ;;  %8432 = vmatprep.subr.bf16.mxu1 %v9579_v9 }
 0x5a6   : > { %v9959_v0 = vpop.eup %9958  ;;  %v6225_v19 = vadd.f32 1.0, %v9957_v43  ;;  %6599 = vmatmul.mubr.bf16.gmra.mrb[116].mxu1 %v6321_v48  ;;  %v6287_v22 = vmul.f32 %v6223_v40, %v6031_v55 }
 0x5a7   : > { %v6226_v18 = vadd.f32 1.0, %v9959_v0  ;;  %v6288_v10 = vmul.f32 %v6224_v20, %v6032_v27 }
 0x5a8   : > { %v6289_v14 = vmul.f32 %v6225_v19, %v6033_v38  ;;  %8433 = vmatpush3.bf16.msra.mxu1 %v9579_v9  ;;  %v9580_v38 = vld [vmem:[%s13406_s11] sm:$0xff]  }
 0x5a9   : > { %v6290_v31 = vmul.f32 %v6226_v18, %v6034_v42  ;;  %8466 = vmatprep.subr.bf16.mxu1 %v9580_v38 }
 0x5aa   : > { %v6323_v59 = vpack.c.bf16 %v6289_v14, %v6287_v22 }
 0x5ab   : > { %v9961_v34 = vpop.eup %9960  ;;  %v6324_v23 = vpack.c.bf16 %v6290_v31, %v6288_v10 }
 0x5ac   : > { %v9963_v63 = vpop.eup %9962  ;;  %v6227_v28 = vadd.f32 1.0, %v9961_v34 }
 0x5ad   : > { %v9965_v57 = vpop.eup %9964  ;;  %v6228_v3 = vadd.f32 1.0, %v9963_v63  ;;  %6606 = vmatprep.mubr.bf16.mxu1 %v6324_v23 }
 0x5ae   : > { %v9967_v8 = vpop.eup %9966  ;;  %v6229_v17 = vadd.f32 1.0, %v9965_v57  ;;  %6607 = vmatmul.mubr.bf16.gmra.mrb[120].mxu1 %v6323_v59  ;;  %v6291_v47 = vmul.f32 %v6227_v28, %v6035_v58 }
 0x5af   : > { %v6230_v51 = vadd.f32 1.0, %v9967_v8  ;;  %v6292_v33 = vmul.f32 %v6228_v3, %v6036_v32 }
 0x5b0   : > { %v6293_v4 = vmul.f32 %v6229_v17, %v6037_v6 }
 0x5b1   : > { %v6294_v41 = vmul.f32 %v6230_v51, %v6038_v50 }
 0x5b2   : > { %v6325_v24 = vpack.c.bf16 %v6293_v4, %v6291_v47 }
 0x5b3   : > { %v6326_v12 = vpack.c.bf16 %v6294_v41, %v6292_v33 }
 0x5b5   : > { %6614 = vmatprep.mubr.bf16.mxu1 %v6326_v12 }
 0x5b6   : > { %6615 = vmatmul.mubr.bf16.gmra.mrb[124].mxu1 %v6325_v24 }
 0x611   : > { %v8278_v21 = vpop.f32.mrb[64].mxu1 }
 0x612   : > { %v8279_v61 = vpop.f32.mrb[65].mxu1 }
 0x613   : > { %v8280_v13 = vadd.f32 %v8279_v61, %v8278_v21  ;;  %v8281_v30 = vpop.f32.mrb[66].mxu1 }
 0x614   : > { %v8282_v26 = vpop.f32.mrb[67].mxu1 }
 0x615   : > { %v6497_v52 = vadd.f32 %v8280_v13, %v13248_v46  ;;  %v8283_v36 = vadd.f32 %v8282_v26, %v8281_v30 }
 0x617   : > { %v6655_v5 = vmul.f32 0.70710677, %v6497_v52  ;;  %v6500_v35 = vadd.f32 %v8283_v36, %v13248_v46  ;;  %v6623_v0 = vmul.f32 0.5, %v6497_v52 }
 0x619   : > { %9968 = verf.f32 %v6655_v5  ;;  %v6656_v53 = vmul.f32 0.70710677, %v6500_v35  ;;  %v8284_v7 = vpop.f32.mrb[68].mxu1  ;;  %v6624_v19 = vmul.f32 0.5, %v6500_v35 }
 0x61a   : > { %v8285_v60 = vpop.f32.mrb[69].mxu1 }
 0x61b   : > { %9970 = verf.f32 %v6656_v53  ;;  %v8286_v45 = vadd.f32 %v8285_v60, %v8284_v7  ;;  %v8287_v2 = vpop.f32.mrb[70].mxu1 }
 0x61c   : > { %v8288_v29 = vpop.f32.mrb[71].mxu1 }
 0x61d   : > { %v6505_v49 = vadd.f32 %v8286_v45, %v13248_v46  ;;  %v8289_v1 = vadd.f32 %v8288_v29, %v8287_v2 }
 0x61f   : > { %v6657_v16 = vmul.f32 0.70710677, %v6505_v49  ;;  %v6508_v11 = vadd.f32 %v8289_v1, %v13248_v46  ;;  %v6625_v6 = vmul.f32 0.5, %v6505_v49 }
 0x621   : > { %9972 = verf.f32 %v6657_v16  ;;  %v6658_v15 = vmul.f32 0.70710677, %v6508_v11  ;;  %v8290_v48 = vpop.f32.mrb[72].mxu1  ;;  %v6626_v32 = vmul.f32 0.5, %v6508_v11 }
 0x622   : > { %v8291_v54 = vpop.f32.mrb[73].mxu1 }
 0x623   : > { %v9969_v37 = vpop.eup %9968  ;;  %9974 = verf.f32 %v6658_v15  ;;  %v8292_v40 = vadd.f32 %v8291_v54, %v8290_v48  ;;  %v8293_v43 = vpop.f32.mrb[74].mxu1 }
 0x624   : > { %v6719_v25 = vadd.f32 1.0, %v9969_v37  ;;  %v8294_v55 = vpop.f32.mrb[75].mxu1 }
 0x625   : > { %v9971_v20 = vpop.eup %9970  ;;  %v6513_v42 = vadd.f32 %v8292_v40, %v13248_v46  ;;  %v8295_v18 = vadd.f32 %v8294_v55, %v8293_v43 }
 0x626   : > { %v6720_v27 = vadd.f32 1.0, %v9971_v20  ;;  %v6751_v10 = vmul.f32 %v6719_v25, %v6623_v0 }
 0x627   : > { %v6659_v22 = vmul.f32 0.70710677, %v6513_v42  ;;  %v6516_v14 = vadd.f32 %v8295_v18, %v13248_v46  ;;  %v6627_v35 = vmul.f32 0.5, %v6513_v42 }
 0x628   : > { %v6752_v31 = vmul.f32 %v6720_v27, %v6624_v19 }
 0x629   : > { %9976 = verf.f32 %v6659_v22  ;;  %v6660_v34 = vmul.f32 0.70710677, %v6516_v14  ;;  %v8296_v59 = vpop.f32.mrb[76].mxu1  ;;  %v6628_v53 = vmul.f32 0.5, %v6516_v14 }
 0x62a   : > { %v6783_v63 = vpack.c.bf16 %v6752_v31, %v6751_v10  ;;  %v8297_v28 = vpop.f32.mrb[77].mxu1 }
 0x62b   : > { %v9973_v23 = vpop.eup %9972  ;;  %9978 = verf.f32 %v6660_v34  ;;  %v8298_v3 = vadd.f32 %v8297_v28, %v8296_v59  ;;  %v8299_v8 = vpop.f32.mrb[78].mxu1 }
 0x62c   : > { %v6721_v57 = vadd.f32 1.0, %v9973_v23  ;;  %8434 = vmatprep.mubr.bf16.mxu1 %v6783_v63  ;;  %v8300_v17 = vpop.f32.mrb[79].mxu1 }
 0x62d   : > { %v9975_v58 = vpop.eup %9974  ;;  %v6521_v51 = vadd.f32 %v8298_v3, %v13248_v46  ;;  %v8301_v47 = vadd.f32 %v8300_v17, %v8299_v8 }
 0x62e   : > { %v6722_v50 = vadd.f32 1.0, %v9975_v58  ;;  %v6753_v4 = vmul.f32 %v6721_v57, %v6625_v6 }
 0x62f   : > { %v6661_v41 = vmul.f32 0.70710677, %v6521_v51  ;;  %v6524_v24 = vadd.f32 %v8301_v47, %v13248_v46  ;;  %v6629_v0 = vmul.f32 0.5, %v6521_v51 }
 0x630   : > { %v6754_v33 = vmul.f32 %v6722_v50, %v6626_v32 }
 0x631   : > { %9980 = verf.f32 %v6661_v41  ;;  %v6662_v39 = vmul.f32 0.70710677, %v6524_v24  ;;  %v8302_v44 = vpop.f32.mrb[80].mxu1  ;;  %v6630_v55 = vmul.f32 0.5, %v6524_v24 }
 0x632   : > { %v6784_v12 = vpack.c.bf16 %v6754_v33, %v6753_v4  ;;  %v8303_v9 = vpop.f32.mrb[81].mxu1 }
 0x633   : > { %v9977_v21 = vpop.eup %9976  ;;  %9982 = verf.f32 %v6662_v39  ;;  %v8304_v61 = vadd.f32 %v8303_v9, %v8302_v44  ;;  %v8305_v13 = vpop.f32.mrb[82].mxu1 }
 0x634   : > { %8435 = vmatmul.mubr.bf16.vlgmr.msra.gmra.mrb[128].mxu1 %v6784_v12  ;;  %v6723_v30 = vadd.f32 1.0, %v9977_v21  ;;  %v8306_v26 = vpop.f32.mrb[83].mxu1 }
 0x635   : > { %8467 = vmatpush3.bf16.msra.mxu1 %v9580_v38  ;;  %v9979_v52 = vpop.eup %9978  ;;  %v6529_v36 = vadd.f32 %v8304_v61, %v13248_v46  ;;  %v8307_v5 = vadd.f32 %v8306_v26, %v8305_v13 }
 0x636   : > { %v6724_v7 = vadd.f32 1.0, %v9979_v52  ;;  %v6755_v2 = vmul.f32 %v6723_v30, %v6627_v35 }
 0x637   : > { %v6663_v60 = vmul.f32 0.70710677, %v6529_v36  ;;  %v6532_v45 = vadd.f32 %v8307_v5, %v13248_v46  ;;  %v6631_v58 = vmul.f32 0.5, %v6529_v36 }
 0x638   : > { %v6756_v29 = vmul.f32 %v6724_v7, %v6628_v53 }
 0x639   : > { %9984 = verf.f32 %v6663_v60  ;;  %v6664_v49 = vmul.f32 0.70710677, %v6532_v45  ;;  %v8308_v1 = vpop.f32.mrb[84].mxu1  ;;  %v6632_v6 = vmul.f32 0.5, %v6532_v45 }
 0x63a   : > { %v8309_v16 = vpop.f32.mrb[85].mxu1  ;;  %v6785_v11 = vpack.c.bf16 %v6756_v29, %v6755_v2 }
 0x63b   : > { %v9981_v15 = vpop.eup %9980  ;;  %9986 = verf.f32 %v6664_v49  ;;  %v8310_v48 = vadd.f32 %v8309_v16, %v8308_v1  ;;  %v8311_v37 = vpop.f32.mrb[86].mxu1 }
 0x63c   : > { %v6725_v54 = vadd.f32 1.0, %v9981_v15  ;;  %v8312_v25 = vpop.f32.mrb[87].mxu1  ;;  %8438 = vmatprep.mubr.bf16.mxu1 %v6785_v11 }
 0x63d   : > { %v9983_v40 = vpop.eup %9982  ;;  %v6537_v43 = vadd.f32 %v8310_v48, %v13248_v46  ;;  %v8313_v20 = vadd.f32 %v8312_v25, %v8311_v37 }
 0x63e   : > { %v6726_v38 = vadd.f32 1.0, %v9983_v40  ;;  %v6757_v42 = vmul.f32 %v6725_v54, %v6629_v0 }
 0x63f   : > { %v6665_v19 = vmul.f32 0.70710677, %v6537_v43  ;;  %v6540_v27 = vadd.f32 %v8313_v20, %v13248_v46  ;;  %v6633_v26 = vmul.f32 0.5, %v6537_v43 }
 0x640   : > { %v6758_v18 = vmul.f32 %v6726_v38, %v6630_v55 }
 0x641   : > { %9988 = verf.f32 %v6665_v19  ;;  %v6666_v22 = vmul.f32 0.70710677, %v6540_v27  ;;  %v8314_v14 = vpop.f32.mrb[88].mxu1  ;;  %v6634_v52 = vmul.f32 0.5, %v6540_v27 }
 0x642   : > { %v8315_v10 = vpop.f32.mrb[89].mxu1  ;;  %v6786_v31 = vpack.c.bf16 %v6758_v18, %v6757_v42 }
 0x643   : > { %v9985_v34 = vpop.eup %9984  ;;  %9990 = verf.f32 %v6666_v22  ;;  %v8316_v59 = vadd.f32 %v8315_v10, %v8314_v14  ;;  %v8317_v63 = vpop.f32.mrb[90].mxu1 }
 0x644   : > { %v6727_v23 = vadd.f32 1.0, %v9985_v34  ;;  %v8318_v28 = vpop.f32.mrb[91].mxu1  ;;  %8439 = vmatmul.mubr.bf16.gmra.mrb[132].mxu1 %v6786_v31 }
 0x645   : > { %v9987_v57 = vpop.eup %9986  ;;  %v6545_v3 = vadd.f32 %v8316_v59, %v13248_v46  ;;  %v8319_v8 = vadd.f32 %v8318_v28, %v8317_v63 }
 0x646   : > { %v6728_v17 = vadd.f32 1.0, %v9987_v57  ;;  %v6759_v51 = vmul.f32 %v6727_v23, %v6631_v58 }
 0x647   : > { %v6667_v32 = vmul.f32 0.70710677, %v6545_v3  ;;  %v6548_v50 = vadd.f32 %v8319_v8, %v13248_v46  ;;  %v6635_v25 = vmul.f32 0.5, %v6545_v3 }
 0x648   : > { %v6760_v47 = vmul.f32 %v6728_v17, %v6632_v6 }
 0x649   : > { %9992 = verf.f32 %v6667_v32  ;;  %v6668_v4 = vmul.f32 0.70710677, %v6548_v50  ;;  %v8320_v33 = vpop.f32.mrb[92].mxu1  ;;  %v6636_v40 = vmul.f32 0.5, %v6548_v50 }
 0x64a   : > { %v8321_v41 = vpop.f32.mrb[93].mxu1  ;;  %v6787_v24 = vpack.c.bf16 %v6760_v47, %v6759_v51 }
 0x64b   : > { %v9989_v12 = vpop.eup %9988  ;;  %9994 = verf.f32 %v6668_v4  ;;  %v8322_v39 = vadd.f32 %v8321_v41, %v8320_v33  ;;  %v8323_v44 = vpop.f32.mrb[94].mxu1 }
 0x64c   : > { %v6729_v9 = vadd.f32 1.0, %v9989_v12  ;;  %v8324_v21 = vpop.f32.mrb[95].mxu1  ;;  %8442 = vmatprep.mubr.bf16.mxu1 %v6787_v24 }
 0x64d   : > { %v9991_v61 = vpop.eup %9990  ;;  %v6553_v13 = vadd.f32 %v8322_v39, %v13248_v46  ;;  %v8325_v30 = vadd.f32 %v8324_v21, %v8323_v44 }
 0x64e   : > { %v6730_v36 = vadd.f32 1.0, %v9991_v61  ;;  %v6761_v53 = vmul.f32 %v6729_v9, %v6633_v26 }
 0x64f   : > { %v6669_v5 = vmul.f32 0.70710677, %v6553_v13  ;;  %v6556_v35 = vadd.f32 %v8325_v30, %v13248_v46  ;;  %v6637_v28 = vmul.f32 0.5, %v6553_v13 }
 0x650   : > { %v6762_v7 = vmul.f32 %v6730_v36, %v6634_v52 }
 0x651   : > { %9996 = verf.f32 %v6669_v5  ;;  %v6670_v60 = vmul.f32 0.70710677, %v6556_v35  ;;  %v8326_v45 = vpop.f32.mrb[96].mxu1  ;;  %v6638_v57 = vmul.f32 0.5, %v6556_v35 }
 0x652   : > { %v8327_v2 = vpop.f32.mrb[97].mxu1  ;;  %v6788_v29 = vpack.c.bf16 %v6762_v7, %v6761_v53 }
 0x653   : > { %v9993_v49 = vpop.eup %9992  ;;  %9998 = verf.f32 %v6670_v60  ;;  %v8328_v1 = vadd.f32 %v8327_v2, %v8326_v45  ;;  %v8329_v16 = vpop.f32.mrb[98].mxu1 }
 0x654   : > { %v6731_v11 = vadd.f32 1.0, %v9993_v49  ;;  %v8330_v15 = vpop.f32.mrb[99].mxu1  ;;  %8443 = vmatmul.mubr.bf16.gmra.mrb[136].mxu1 %v6788_v29 }
 0x655   : > { %v9995_v48 = vpop.eup %9994  ;;  %v6561_v37 = vadd.f32 %v8328_v1, %v13248_v46  ;;  %v8331_v54 = vadd.f32 %v8330_v15, %v8329_v16 }
 0x656   : > { %v6732_v43 = vadd.f32 1.0, %v9995_v48  ;;  %v6763_v55 = vmul.f32 %v6731_v11, %v6635_v25 }
 0x657   : > { %v6671_v20 = vmul.f32 0.70710677, %v6561_v37  ;;  %v6564_v0 = vadd.f32 %v8331_v54, %v13248_v46  ;;  %v6639_v21 = vmul.f32 0.5, %v6561_v37 }
 0x658   : > { %v6764_v38 = vmul.f32 %v6732_v43, %v6636_v40 }
 0x659   : > { %10000 = verf.f32 %v6671_v20  ;;  %v6672_v19 = vmul.f32 0.70710677, %v6564_v0  ;;  %v8332_v27 = vpop.f32.mrb[100].mxu1  ;;  %v6640_v61 = vmul.f32 0.5, %v6564_v0 }
 0x65a   : > { %v8333_v42 = vpop.f32.mrb[101].mxu1  ;;  %v6789_v18 = vpack.c.bf16 %v6764_v38, %v6763_v55 }
 0x65b   : > { %v9997_v22 = vpop.eup %9996  ;;  %10002 = verf.f32 %v6672_v19  ;;  %v8334_v14 = vadd.f32 %v8333_v42, %v8332_v27  ;;  %v8335_v10 = vpop.f32.mrb[102].mxu1 }
 0x65c   : > { %v6733_v31 = vadd.f32 1.0, %v9997_v22  ;;  %v8336_v34 = vpop.f32.mrb[103].mxu1  ;;  %8446 = vmatprep.mubr.bf16.mxu1 %v6789_v18 }
 0x65d   : > { %v9999_v59 = vpop.eup %9998  ;;  %v6569_v63 = vadd.f32 %v8334_v14, %v13248_v46  ;;  %v8337_v23 = vadd.f32 %v8336_v34, %v8335_v10 }
 0x65e   : > { %v6734_v3 = vadd.f32 1.0, %v9999_v59  ;;  %v6765_v6 = vmul.f32 %v6733_v31, %v6637_v28 }
 0x65f   : > { %v6673_v8 = vmul.f32 0.70710677, %v6569_v63  ;;  %v6572_v58 = vadd.f32 %v8337_v23, %v13248_v46  ;;  %v6641_v15 = vmul.f32 0.5, %v6569_v63 }
 0x660   : > { %v6766_v17 = vmul.f32 %v6734_v3, %v6638_v57 }
 0x661   : > { %10004 = verf.f32 %v6673_v8  ;;  %v6674_v32 = vmul.f32 0.70710677, %v6572_v58  ;;  %v8338_v50 = vpop.f32.mrb[104].mxu1  ;;  %v6642_v48 = vmul.f32 0.5, %v6572_v58 }
 0x662   : > { %v8339_v51 = vpop.f32.mrb[105].mxu1  ;;  %v6790_v47 = vpack.c.bf16 %v6766_v17, %v6765_v6 }
 0x663   : > { %v10001_v4 = vpop.eup %10000  ;;  %10006 = verf.f32 %v6674_v32  ;;  %v8340_v33 = vadd.f32 %v8339_v51, %v8338_v50  ;;  %v8341_v41 = vpop.f32.mrb[106].mxu1 }
 0x664   : > { %v6735_v24 = vadd.f32 1.0, %v10001_v4  ;;  %v8342_v12 = vpop.f32.mrb[107].mxu1  ;;  %8447 = vmatmul.mubr.bf16.gmra.mrb[140].mxu1 %v6790_v47 }
 0x665   : > { %v10003_v39 = vpop.eup %10002  ;;  %v6577_v44 = vadd.f32 %v8340_v33, %v13248_v46  ;;  %v8343_v9 = vadd.f32 %v8342_v12, %v8341_v41 }
 0x666   : > { %v6736_v13 = vadd.f32 1.0, %v10003_v39  ;;  %v6767_v52 = vmul.f32 %v6735_v24, %v6639_v21 }
 0x667   : > { %v6675_v30 = vmul.f32 0.70710677, %v6577_v44  ;;  %v6580_v26 = vadd.f32 %v8343_v9, %v13248_v46  ;;  %v6643_v34 = vmul.f32 0.5, %v6577_v44 }
 0x668   : > { %v6768_v36 = vmul.f32 %v6736_v13, %v6640_v61 }
 0x669   : > { %10008 = verf.f32 %v6675_v30  ;;  %v6676_v5 = vmul.f32 0.70710677, %v6580_v26  ;;  %v8344_v35 = vpop.f32.mrb[108].mxu1  ;;  %v6644_v59 = vmul.f32 0.5, %v6580_v26 }
 0x66a   : > { %v8345_v53 = vpop.f32.mrb[109].mxu1  ;;  %v6791_v7 = vpack.c.bf16 %v6768_v36, %v6767_v52 }
 0x66b   : > { %v10005_v60 = vpop.eup %10004  ;;  %10010 = verf.f32 %v6676_v5  ;;  %v8346_v45 = vadd.f32 %v8345_v53, %v8344_v35  ;;  %v8347_v2 = vpop.f32.mrb[110].mxu1 }
 0x66c   : > { %v6737_v29 = vadd.f32 1.0, %v10005_v60  ;;  %v8348_v49 = vpop.f32.mrb[111].mxu1  ;;  %8450 = vmatprep.mubr.bf16.mxu1 %v6791_v7 }
 0x66d   : > { %v10007_v1 = vpop.eup %10006  ;;  %v6585_v16 = vadd.f32 %v8346_v45, %v13248_v46  ;;  %v8349_v11 = vadd.f32 %v8348_v49, %v8347_v2 }
 0x66e   : > { %v6738_v37 = vadd.f32 1.0, %v10007_v1  ;;  %v6769_v40 = vmul.f32 %v6737_v29, %v6641_v15 }
 0x66f   : > { %v6677_v54 = vmul.f32 0.70710677, %v6585_v16  ;;  %v6588_v25 = vadd.f32 %v8349_v11, %v13248_v46  ;;  %v6645_v12 = vmul.f32 0.5, %v6585_v16 }
 0x670   : > { %v6770_v43 = vmul.f32 %v6738_v37, %v6642_v48 }
 0x671   : > { %10012 = verf.f32 %v6677_v54  ;;  %v6678_v20 = vmul.f32 0.70710677, %v6588_v25  ;;  %v8350_v0 = vpop.f32.mrb[112].mxu1  ;;  %v6646_v39 = vmul.f32 0.5, %v6588_v25 }
 0x672   : > { %v8351_v55 = vpop.f32.mrb[113].mxu1  ;;  %v6792_v38 = vpack.c.bf16 %v6770_v43, %v6769_v40 }
 0x673   : > { %v10009_v19 = vpop.eup %10008  ;;  %10014 = verf.f32 %v6678_v20  ;;  %v8352_v27 = vadd.f32 %v8351_v55, %v8350_v0  ;;  %v8353_v42 = vpop.f32.mrb[114].mxu1 }
 0x674   : > { %v6739_v18 = vadd.f32 1.0, %v10009_v19  ;;  %v8354_v22 = vpop.f32.mrb[115].mxu1  ;;  %8451 = vmatmul.mubr.bf16.gmra.mrb[144].mxu1 %v6792_v38 }
 0x675   : > { %v10011_v14 = vpop.eup %10010  ;;  %v6593_v10 = vadd.f32 %v8352_v27, %v13248_v46  ;;  %v8355_v31 = vadd.f32 %v8354_v22, %v8353_v42 }
 0x676   : > { %v6740_v63 = vadd.f32 1.0, %v10011_v14  ;;  %v6771_v57 = vmul.f32 %v6739_v18, %v6643_v34 }
 0x677   : > { %v6679_v23 = vmul.f32 0.70710677, %v6593_v10  ;;  %v6596_v28 = vadd.f32 %v8355_v31, %v13248_v46  ;;  %v6647_v49 = vmul.f32 0.5, %v6593_v10 }
 0x678   : > { %v6772_v3 = vmul.f32 %v6740_v63, %v6644_v59 }
 0x679   : > { %10016 = verf.f32 %v6679_v23  ;;  %v6680_v8 = vmul.f32 0.70710677, %v6596_v28  ;;  %v8356_v58 = vpop.f32.mrb[116].mxu1  ;;  %v6648_v1 = vmul.f32 0.5, %v6596_v28 }
 0x67a   : > { %v8357_v6 = vpop.f32.mrb[117].mxu1  ;;  %v6793_v17 = vpack.c.bf16 %v6772_v3, %v6771_v57 }
 0x67b   : > { %v10013_v32 = vpop.eup %10012  ;;  %10018 = verf.f32 %v6680_v8  ;;  %v8358_v50 = vadd.f32 %v8357_v6, %v8356_v58  ;;  %v8359_v51 = vpop.f32.mrb[118].mxu1 }
 0x67c   : > { %v6741_v47 = vadd.f32 1.0, %v10013_v32  ;;  %v8360_v4 = vpop.f32.mrb[119].mxu1  ;;  %8454 = vmatprep.mubr.bf16.mxu1 %v6793_v17 }
 0x67d   : > { %v10015_v33 = vpop.eup %10014  ;;  %v6601_v41 = vadd.f32 %v8358_v50, %v13248_v46  ;;  %v8361_v24 = vadd.f32 %v8360_v4, %v8359_v51 }
 0x67e   : > { %v6742_v44 = vadd.f32 1.0, %v10015_v33  ;;  %v6773_v61 = vmul.f32 %v6741_v47, %v6645_v12  ;;  %v9581_v33 = vld [vmem:[%s13406_s11 + $0x8] sm:$0xff]  }
 0x67f   : > { %v6681_v9 = vmul.f32 0.70710677, %v6601_v41  ;;  %v6604_v21 = vadd.f32 %v8361_v24, %v13248_v46  ;;  %v6649_v22 = vmul.f32 0.5, %v6601_v41  ;;  %8468 = vmatprep.subr.bf16.mxu1 %v9581_v33 }
 0x680   : > { %v6774_v13 = vmul.f32 %v6742_v44, %v6646_v39  ;;  %8469 = vmatpush3.bf16.msra.mxu1 %v9581_v33 }
 0x681   : > { %10020 = verf.f32 %v6681_v9  ;;  %v6682_v30 = vmul.f32 0.70710677, %v6604_v21  ;;  %v8362_v26 = vpop.f32.mrb[120].mxu1  ;;  %v6650_v14 = vmul.f32 0.5, %v6604_v21  ;;  %v9582_v21 = vld [vmem:[%s13406_s11 + $0x10] sm:$0xff]  }
 0x682   : > { %v8363_v52 = vpop.f32.mrb[121].mxu1  ;;  %v6794_v36 = vpack.c.bf16 %v6774_v13, %v6773_v61  ;;  %v9583_v61 = vld [vmem:[%s13406_s11 + $0x18] sm:$0xff]   ;;  %8470 = vmatprep.subr.bf16.mxu1 %v9582_v21  ;;  %v13297_v13 = vld [vmem:[%s13405_s10] ss:$0 sm:$0xff] }
 0x683   : > { %v10017_v5 = vpop.eup %10016  ;;  %10022 = verf.f32 %v6682_v30  ;;  %v8364_v35 = vadd.f32 %v8363_v52, %v8362_v26  ;;  %v8365_v53 = vpop.f32.mrb[122].mxu1 }
 0x684   : > { %v6743_v7 = vadd.f32 1.0, %v10017_v5  ;;  %v8366_v60 = vpop.f32.mrb[123].mxu1  ;;  %8455 = vmatmul.mubr.bf16.gmra.mrb[148].mxu1 %v6794_v36 }
 0x685   : > { %v10019_v45 = vpop.eup %10018  ;;  %v6609_v2 = vadd.f32 %v8364_v35, %v13248_v46  ;;  %v8367_v29 = vadd.f32 %v8366_v60, %v8365_v53  ;;  %8471 = vmatpush3.bf16.msra.mxu1 %v9582_v21 }
 0x686   : > { %v6744_v16 = vadd.f32 1.0, %v10019_v45  ;;  %v6775_v48 = vmul.f32 %v6743_v7, %v6647_v49  ;;  %8472 = vmatprep.subr.bf16.mxu1 %v9583_v61 }
 0x687   : > { %v6683_v11 = vmul.f32 0.70710677, %v6609_v2  ;;  %v6612_v15 = vadd.f32 %v8367_v29, %v13248_v46  ;;  %v6651_v58 = vmul.f32 0.5, %v6609_v2 }
 0x688   : > { %v6776_v37 = vmul.f32 %v6744_v16, %v6648_v1 }
 0x689   : > { %10024 = verf.f32 %v6683_v11  ;;  %v6684_v54 = vmul.f32 0.70710677, %v6612_v15  ;;  %v8368_v25 = vpop.f32.mrb[124].mxu1  ;;  %v6652_v6 = vmul.f32 0.5, %v6612_v15  ;;  %8473 = vmatpush3.bf16.msra.mxu1 %v9583_v61 }
 0x68a   : > { %v8369_v40 = vpop.f32.mrb[125].mxu1  ;;  %v6795_v43 = vpack.c.bf16 %v6776_v37, %v6775_v48 }
 0x68b   : > { %v10021_v20 = vpop.eup %10020  ;;  %10026 = verf.f32 %v6684_v54  ;;  %v8370_v0 = vadd.f32 %v8369_v40, %v8368_v25  ;;  %v8371_v55 = vpop.f32.mrb[126].mxu1 }
 0x68c   : > { %v6745_v38 = vadd.f32 1.0, %v10021_v20  ;;  %v8372_v19 = vpop.f32.mrb[127].mxu1  ;;  %8458 = vmatprep.mubr.bf16.mxu1 %v6795_v43 }
 0x68d   : > { %v10023_v27 = vpop.eup %10022  ;;  %v6617_v42 = vadd.f32 %v8370_v0, %v13248_v46  ;;  %v8373_v18 = vadd.f32 %v8372_v19, %v8371_v55 }
 0x68e   : > { %v6746_v10 = vadd.f32 1.0, %v10023_v27  ;;  %v6777_v59 = vmul.f32 %v6745_v38, %v6649_v22 }
 0x68f   : > { %v6685_v31 = vmul.f32 0.70710677, %v6617_v42  ;;  %v6620_v34 = vadd.f32 %v8373_v18, %v13248_v46  ;;  %v6653_v41 = vmul.f32 0.5, %v6617_v42 }
 0x690   : > { %v6778_v63 = vmul.f32 %v6746_v10, %v6650_v14 }
 0x691   : > { %10028 = verf.f32 %v6685_v31  ;;  %v6686_v23 = vmul.f32 0.70710677, %v6620_v34  ;;  %v6654_v24 = vmul.f32 0.5, %v6620_v34 }
 0x692   : > { %v6796_v28 = vpack.c.bf16 %v6778_v63, %v6777_v59 }
 0x693   : > { %v10025_v57 = vpop.eup %10024  ;;  %10030 = verf.f32 %v6686_v23 }
 0x694   : > { %v6747_v3 = vadd.f32 1.0, %v10025_v57  ;;  %8459 = vmatmul.mubr.bf16.gmra.mrb[152].mxu1 %v6796_v28 }
 0x695   : > { %v10027_v8 = vpop.eup %10026 }
 0x696   : > { %v6748_v17 = vadd.f32 1.0, %v10027_v8  ;;  %v6779_v32 = vmul.f32 %v6747_v3, %v6651_v58 }
 0x698   : > { %v6780_v50 = vmul.f32 %v6748_v17, %v6652_v6 }
 0x69a   : > { %v6797_v51 = vpack.c.bf16 %v6780_v50, %v6779_v32 }
 0x69b   : > { %v10029_v47 = vpop.eup %10028 }
 0x69c   : > { %v6749_v4 = vadd.f32 1.0, %v10029_v47  ;;  %8462 = vmatprep.mubr.bf16.mxu1 %v6797_v51 }
 0x69d   : > { %v10031_v46 = vpop.eup %10030 }
 0x69e   : > { %v6750_v12 = vadd.f32 1.0, %v10031_v46  ;;  %v6781_v39 = vmul.f32 %v6749_v4, %v6653_v41 }
 0x6a0   : > { %v6782_v44 = vmul.f32 %v6750_v12, %v6654_v24 }
 0x6a2   : > { %v6798_v9 = vpack.c.bf16 %v6782_v44, %v6781_v39 }
 0x6a4   : > { %8463 = vmatmul.mubr.bf16.gmra.mrb[156].mxu1 %v6798_v9 }
 0x707   : > { %v8436_v30 = vpop.f32.mrb[128].mxu1 }
 0x708   : > { %v6913_v26 = vadd.f32 %v8436_v30, %v13297_v13  ;;  %v6904_v52 = vpop.f32.mrb[129].mxu1 }
 0x709   : > { %v6905_v36 = vadd.f32 %v13297_v13, %v6904_v52  ;;  %v8437_v5 = vpop.f32.mrb[130].mxu1 }
 0x70a   : > { %v7065_v35 = vmul.f32 0.70710677, %v6913_v26  ;;  %v6916_v53 = vadd.f32 %v8437_v5, %v13297_v13  ;;  %v6907_v7 = vpop.f32.mrb[131].mxu1  ;;  %v7033_v54 = vmul.f32 0.5, %v6913_v26 }
 0x70b   : > { %v7063_v60 = vmul.f32 0.70710677, %v6905_v36  ;;  %v6908_v45 = vadd.f32 %v13297_v13, %v6907_v7  ;;  %v7031_v0 = vmul.f32 0.5, %v6905_v36 }
 0x70c   : > { %10032 = verf.f32 %v7065_v35  ;;  %v7066_v2 = vmul.f32 0.70710677, %v6916_v53  ;;  %v7034_v25 = vmul.f32 0.5, %v6916_v53 }
 0x70d   : > { %10034 = verf.f32 %v7063_v60  ;;  %v7064_v29 = vmul.f32 0.70710677, %v6908_v45  ;;  %v7032_v55 = vmul.f32 0.5, %v6908_v45 }
 0x70e   : > { %10036 = verf.f32 %v7066_v2 }
 0x70f   : > { %10038 = verf.f32 %v7064_v29 }
 0x716   : > { %v10033_v49 = vpop.eup %10032 }
 0x717   : > { %v10035_v1 = vpop.eup %10034  ;;  %v7129_v16 = vadd.f32 1.0, %v10033_v49  ;;  %v8440_v48 = vpop.f32.mrb[132].mxu1 }
 0x718   : > { %v10037_v11 = vpop.eup %10036  ;;  %v7127_v15 = vadd.f32 1.0, %v10035_v1  ;;  %v6929_v43 = vadd.f32 %v8440_v48, %v13297_v13  ;;  %v6920_v20 = vpop.f32.mrb[133].mxu1 }
 0x719   : > { %v10039_v37 = vpop.eup %10038  ;;  %v7130_v40 = vadd.f32 1.0, %v10037_v11  ;;  %v6921_v19 = vadd.f32 %v13297_v13, %v6920_v20  ;;  %v8441_v27 = vpop.f32.mrb[134].mxu1  ;;  %v7161_v42 = vmul.f32 %v7129_v16, %v7033_v54 }
 0x71a   : > { %v7128_v38 = vadd.f32 1.0, %v10039_v37  ;;  %v7069_v22 = vmul.f32 0.70710677, %v6929_v43  ;;  %v6932_v14 = vadd.f32 %v8441_v27, %v13297_v13  ;;  %v6923_v10 = vpop.f32.mrb[135].mxu1  ;;  %v7159_v31 = vmul.f32 %v7127_v15, %v7031_v0 }
 0x71b   : > { %v7162_v18 = vmul.f32 %v7130_v40, %v7034_v25  ;;  %v7067_v59 = vmul.f32 0.70710677, %v6921_v19  ;;  %v6924_v63 = vadd.f32 %v13297_v13, %v6923_v10  ;;  %v7037_v46 = vmul.f32 0.5, %v6929_v43 }
 0x71c   : > { %v7160_v34 = vmul.f32 %v7128_v38, %v7032_v55  ;;  %10040 = verf.f32 %v7069_v22  ;;  %v7070_v28 = vmul.f32 0.70710677, %v6932_v14  ;;  %v7038_v33 = vmul.f32 0.5, %v6932_v14 }
 0x71d   : > { %v7192_v23 = vpack.c.bf16 %v7162_v18, %v7161_v42  ;;  %10042 = verf.f32 %v7067_v59  ;;  %v7068_v3 = vmul.f32 0.70710677, %v6924_v63  ;;  %v7035_v39 = vmul.f32 0.5, %v6921_v19 }
 0x71e   : > { %v7191_v57 = vpack.c.bf16 %v7160_v34, %v7159_v31  ;;  %10044 = verf.f32 %v7070_v28  ;;  %v7036_v44 = vmul.f32 0.5, %v6924_v63 }
 0x71f   : > { %10046 = verf.f32 %v7068_v3 }
 0x720   : > { %8474 = vmatprep.mubr.msk.bf16.mxu1 %vm7246_vm4, %v7191_v57 }
 0x721   : > { %8475 = vmatmul.mubr.msk.bf16.vlgmr.msra.gmra.mrb[160].mxu1 %vm7246_vm4, %v7192_v23 }
 0x726   : > { %v10041_v8 = vpop.eup %10040 }
 0x727   : > { %v10043_v58 = vpop.eup %10042  ;;  %v7133_v6 = vadd.f32 1.0, %v10041_v8  ;;  %v8444_v17 = vpop.f32.mrb[136].mxu1 }
 0x728   : > { %v10045_v32 = vpop.eup %10044  ;;  %v7131_v50 = vadd.f32 1.0, %v10043_v58  ;;  %v6945_v51 = vadd.f32 %v8444_v17, %v13297_v13  ;;  %v6936_v47 = vpop.f32.mrb[137].mxu1 }
 0x729   : > { %v10047_v4 = vpop.eup %10046  ;;  %v7134_v41 = vadd.f32 1.0, %v10045_v32  ;;  %v6937_v24 = vadd.f32 %v13297_v13, %v6936_v47  ;;  %v8445_v12 = vpop.f32.mrb[138].mxu1  ;;  %v7165_v30 = vmul.f32 %v7133_v6, %v7037_v46 }
 0x72a   : > { %v7132_v9 = vadd.f32 1.0, %v10047_v4  ;;  %v7073_v21 = vmul.f32 0.70710677, %v6945_v51  ;;  %v6939_v61 = vpop.f32.mrb[139].mxu1  ;;  %v6948_v36 = vadd.f32 %v8445_v12, %v13297_v13  ;;  %v7163_v5 = vmul.f32 %v7131_v50, %v7035_v39 }
 0x72b   : > { %v7166_v26 = vmul.f32 %v7134_v41, %v7038_v33  ;;  %v7071_v52 = vmul.f32 0.70710677, %v6937_v24  ;;  %v6940_v53 = vadd.f32 %v13297_v13, %v6939_v61  ;;  %v7041_v37 = vmul.f32 0.5, %v6945_v51 }
 0x72c   : > { %v7164_v35 = vmul.f32 %v7132_v9, %v7036_v44  ;;  %10048 = verf.f32 %v7073_v21  ;;  %v7074_v60 = vmul.f32 0.70710677, %v6948_v36  ;;  %v7039_v20 = vmul.f32 0.5, %v6937_v24 }
 0x72d   : > { %v7194_v7 = vpack.c.bf16 %v7166_v26, %v7165_v30  ;;  %10050 = verf.f32 %v7071_v52  ;;  %v7072_v2 = vmul.f32 0.70710677, %v6940_v53  ;;  %v7042_v0 = vmul.f32 0.5, %v6948_v36 }
 0x72e   : > { %v7193_v45 = vpack.c.bf16 %v7164_v35, %v7163_v5  ;;  %10052 = verf.f32 %v7074_v60  ;;  %v7040_v27 = vmul.f32 0.5, %v6940_v53 }
 0x72f   : > { %10054 = verf.f32 %v7072_v2 }
 0x730   : > { %8478 = vmatprep.mubr.msk.bf16.mxu1 %vm7246_vm4, %v7193_v45 }
 0x731   : > { %8479 = vmatmul.mubr.msk.bf16.gmra.mrb[164].mxu1 %vm7246_vm4, %v7194_v7 }
 0x736   : > { %v10049_v29 = vpop.eup %10048 }
 0x737   : > { %v10051_v49 = vpop.eup %10050  ;;  %v8448_v1 = vpop.f32.mrb[140].mxu1  ;;  %v7137_v16 = vadd.f32 1.0, %v10049_v29 }
 0x738   : > { %v6961_v11 = vadd.f32 %v8448_v1, %v13297_v13  ;;  %v6952_v15 = vpop.f32.mrb[141].mxu1  ;;  %v10053_v48 = vpop.eup %10052  ;;  %v7135_v54 = vadd.f32 1.0, %v10051_v49 }
 0x739   : > { %v6953_v25 = vadd.f32 %v13297_v13, %v6952_v15  ;;  %v8449_v40 = vpop.f32.mrb[142].mxu1  ;;  %v10055_v43 = vpop.eup %10054  ;;  %v7138_v55 = vadd.f32 1.0, %v10053_v48  ;;  %v7169_v14 = vmul.f32 %v7137_v16, %v7041_v37 }
 0x73a   : > { %v7077_v38 = vmul.f32 0.70710677, %v6961_v11  ;;  %v6955_v19 = vpop.f32.mrb[143].mxu1  ;;  %v7136_v42 = vadd.f32 1.0, %v10055_v43  ;;  %v6964_v22 = vadd.f32 %v8449_v40, %v13297_v13  ;;  %v7167_v34 = vmul.f32 %v7135_v54, %v7039_v20 }
 0x73b   : > { %v7075_v18 = vmul.f32 0.70710677, %v6953_v25  ;;  %v7170_v10 = vmul.f32 %v7138_v55, %v7042_v0  ;;  %v6956_v31 = vadd.f32 %v13297_v13, %v6955_v19  ;;  %v7045_v51 = vmul.f32 0.5, %v6961_v11 }
 0x73c   : > { %10056 = verf.f32 %v7077_v38  ;;  %v7168_v59 = vmul.f32 %v7136_v42, %v7040_v27  ;;  %v7078_v63 = vmul.f32 0.70710677, %v6964_v22  ;;  %v7043_v41 = vmul.f32 0.5, %v6953_v25 }
 0x73d   : > { %10058 = verf.f32 %v7075_v18  ;;  %v7196_v23 = vpack.c.bf16 %v7170_v10, %v7169_v14  ;;  %v7076_v28 = vmul.f32 0.70710677, %v6956_v31  ;;  %v7046_v24 = vmul.f32 0.5, %v6964_v22 }
 0x73e   : > { %v7195_v57 = vpack.c.bf16 %v7168_v59, %v7167_v34  ;;  %10060 = verf.f32 %v7078_v63  ;;  %v7044_v9 = vmul.f32 0.5, %v6956_v31 }
 0x73f   : > { %10062 = verf.f32 %v7076_v28 }
 0x740   : > { %8482 = vmatprep.mubr.msk.bf16.mxu1 %vm7246_vm4, %v7195_v57 }
 0x741   : > { %8483 = vmatmul.mubr.msk.bf16.gmra.mrb[168].mxu1 %vm7246_vm4, %v7196_v23 }
 0x746   : > { %v10057_v3 = vpop.eup %10056 }
 0x747   : > { %v10059_v8 = vpop.eup %10058  ;;  %v8452_v58 = vpop.f32.mrb[144].mxu1  ;;  %v7141_v6 = vadd.f32 1.0, %v10057_v3 }
 0x748   : > { %v6977_v17 = vadd.f32 %v8452_v58, %v13297_v13  ;;  %v6968_v32 = vpop.f32.mrb[145].mxu1  ;;  %v10061_v50 = vpop.eup %10060  ;;  %v7139_v47 = vadd.f32 1.0, %v10059_v8 }
 0x749   : > { %v6969_v4 = vadd.f32 %v13297_v13, %v6968_v32  ;;  %v8453_v46 = vpop.f32.mrb[146].mxu1  ;;  %v10063_v33 = vpop.eup %10062  ;;  %v7142_v12 = vadd.f32 1.0, %v10061_v50  ;;  %v7173_v26 = vmul.f32 %v7141_v6, %v7045_v51 }
 0x74a   : > { %v7081_v39 = vmul.f32 0.70710677, %v6977_v17  ;;  %v6971_v44 = vpop.f32.mrb[147].mxu1  ;;  %v7140_v21 = vadd.f32 1.0, %v10063_v33  ;;  %v6980_v30 = vadd.f32 %v8453_v46, %v13297_v13  ;;  %v7171_v5 = vmul.f32 %v7139_v47, %v7043_v41 }
 0x74b   : > { %v7079_v61 = vmul.f32 0.70710677, %v6969_v4  ;;  %v7174_v52 = vmul.f32 %v7142_v12, %v7046_v24  ;;  %v6972_v36 = vadd.f32 %v13297_v13, %v6971_v44  ;;  %v7049_v48 = vmul.f32 0.5, %v6977_v17 }
 0x74c   : > { %10064 = verf.f32 %v7081_v39  ;;  %v7172_v35 = vmul.f32 %v7140_v21, %v7044_v9  ;;  %v7082_v53 = vmul.f32 0.70710677, %v6980_v30  ;;  %v7047_v43 = vmul.f32 0.5, %v6969_v4 }
 0x74d   : > { %10066 = verf.f32 %v7079_v61  ;;  %v7198_v7 = vpack.c.bf16 %v7174_v52, %v7173_v26  ;;  %v7080_v60 = vmul.f32 0.70710677, %v6972_v36  ;;  %v7050_v20 = vmul.f32 0.5, %v6980_v30 }
 0x74e   : > { %v7197_v45 = vpack.c.bf16 %v7172_v35, %v7171_v5  ;;  %10068 = verf.f32 %v7082_v53  ;;  %v7048_v19 = vmul.f32 0.5, %v6972_v36 }
 0x74f   : > { %10070 = verf.f32 %v7080_v60 }
 0x750   : > { %8486 = vmatprep.mubr.msk.bf16.mxu1 %vm7246_vm4, %v7197_v45 }
 0x751   : > { %8487 = vmatmul.mubr.msk.bf16.gmra.mrb[172].mxu1 %vm7246_vm4, %v7198_v7 }
 0x756   : > { %v10065_v2 = vpop.eup %10064 }
 0x757   : > { %v10067_v29 = vpop.eup %10066  ;;  %v8456_v49 = vpop.f32.mrb[148].mxu1  ;;  %v7145_v1 = vadd.f32 1.0, %v10065_v2 }
 0x758   : > { %v6993_v16 = vadd.f32 %v8456_v49, %v13297_v13  ;;  %v6984_v11 = vpop.f32.mrb[149].mxu1  ;;  %v10069_v15 = vpop.eup %10068  ;;  %v7143_v37 = vadd.f32 1.0, %v10067_v29 }
 0x759   : > { %v6985_v54 = vadd.f32 %v13297_v13, %v6984_v11  ;;  %v8457_v25 = vpop.f32.mrb[150].mxu1  ;;  %v10071_v40 = vpop.eup %10070  ;;  %v7146_v0 = vadd.f32 1.0, %v10069_v15  ;;  %v7177_v22 = vmul.f32 %v7145_v1, %v7049_v48 }
 0x75a   : > { %v7085_v55 = vmul.f32 0.70710677, %v6993_v16  ;;  %v6987_v38 = vpop.f32.mrb[151].mxu1  ;;  %v7144_v27 = vadd.f32 1.0, %v10071_v40  ;;  %v6996_v18 = vadd.f32 %v8457_v25, %v13297_v13  ;;  %v7175_v31 = vmul.f32 %v7143_v37, %v7047_v43 }
 0x75b   : > { %v7083_v42 = vmul.f32 0.70710677, %v6985_v54  ;;  %v7178_v14 = vmul.f32 %v7146_v0, %v7050_v20  ;;  %v6988_v10 = vadd.f32 %v13297_v13, %v6987_v38  ;;  %v7053_v50 = vmul.f32 0.5, %v6993_v16 }
 0x75c   : > { %10072 = verf.f32 %v7085_v55  ;;  %v7176_v34 = vmul.f32 %v7144_v27, %v7048_v19  ;;  %v7086_v59 = vmul.f32 0.70710677, %v6996_v18  ;;  %v7051_v33 = vmul.f32 0.5, %v6985_v54 }
 0x75d   : > { %10074 = verf.f32 %v7083_v42  ;;  %v7200_v63 = vpack.c.bf16 %v7178_v14, %v7177_v22  ;;  %v7084_v23 = vmul.f32 0.70710677, %v6988_v10  ;;  %v7054_v41 = vmul.f32 0.5, %v6996_v18 }
 0x75e   : > { %v7199_v28 = vpack.c.bf16 %v7176_v34, %v7175_v31  ;;  %10076 = verf.f32 %v7086_v59  ;;  %v7052_v44 = vmul.f32 0.5, %v6988_v10 }
 0x75f   : > { %10078 = verf.f32 %v7084_v23 }
 0x760   : > { %8490 = vmatprep.mubr.msk.bf16.mxu1 %vm7246_vm4, %v7199_v28 }
 0x761   : > { %8491 = vmatmul.mubr.msk.bf16.gmra.mrb[176].mxu1 %vm7246_vm4, %v7200_v63 }
 0x766   : > { %v10073_v57 = vpop.eup %10072 }
 0x767   : > { %v10075_v3 = vpop.eup %10074  ;;  %v8460_v8 = vpop.f32.mrb[152].mxu1  ;;  %v7149_v58 = vadd.f32 1.0, %v10073_v57 }
 0x768   : > { %v7009_v6 = vadd.f32 %v8460_v8, %v13297_v13  ;;  %v7000_v17 = vpop.f32.mrb[153].mxu1  ;;  %v10077_v32 = vpop.eup %10076  ;;  %v7147_v51 = vadd.f32 1.0, %v10075_v3 }
 0x769   : > { %v7001_v47 = vadd.f32 %v13297_v13, %v7000_v17  ;;  %v8461_v4 = vpop.f32.mrb[154].mxu1  ;;  %v10079_v46 = vpop.eup %10078  ;;  %v7150_v24 = vadd.f32 1.0, %v10077_v32  ;;  %v7181_v30 = vmul.f32 %v7149_v58, %v7053_v50 }
 0x76a   : > { %v7089_v12 = vmul.f32 0.70710677, %v7009_v6  ;;  %v7003_v39 = vpop.f32.mrb[155].mxu1  ;;  %v7148_v9 = vadd.f32 1.0, %v10079_v46  ;;  %v7012_v61 = vadd.f32 %v8461_v4, %v13297_v13  ;;  %v7179_v36 = vmul.f32 %v7147_v51, %v7051_v33 }
 0x76b   : > { %v7087_v21 = vmul.f32 0.70710677, %v7001_v47  ;;  %v7182_v26 = vmul.f32 %v7150_v24, %v7054_v41  ;;  %v7004_v52 = vadd.f32 %v13297_v13, %v7003_v39  ;;  %v7057_v15 = vmul.f32 0.5, %v7009_v6  ;;  %v13350_v39 = vld [vmem:[%s13407_s12] ss:$0 sm:$0xff] }
 0x76c   : > { %10080 = verf.f32 %v7089_v12  ;;  %v7180_v5 = vmul.f32 %v7148_v9, %v7052_v44  ;;  %v7090_v35 = vmul.f32 0.70710677, %v7012_v61  ;;  %v7055_v40 = vmul.f32 0.5, %v7001_v47 }
 0x76d   : > { %10082 = verf.f32 %v7087_v21  ;;  %v7202_v53 = vpack.c.bf16 %v7182_v26, %v7181_v30  ;;  %v7088_v7 = vmul.f32 0.70710677, %v7004_v52  ;;  %v7058_v43 = vmul.f32 0.5, %v7012_v61 }
 0x76e   : > { %v7201_v60 = vpack.c.bf16 %v7180_v5, %v7179_v36  ;;  %10084 = verf.f32 %v7090_v35  ;;  %v7056_v38 = vmul.f32 0.5, %v7004_v52 }
 0x76f   : > { %10086 = verf.f32 %v7088_v7 }
 0x770   : > { %8494 = vmatprep.mubr.msk.bf16.mxu1 %vm7246_vm4, %v7201_v60 }
 0x771   : > { %8495 = vmatmul.mubr.msk.bf16.gmra.mrb[180].mxu1 %vm7246_vm4, %v7202_v53 }
 0x776   : > { %v10081_v45 = vpop.eup %10080 }
 0x777   : > { %v10083_v2 = vpop.eup %10082  ;;  %v8464_v29 = vpop.f32.mrb[156].mxu1  ;;  %v7153_v49 = vadd.f32 1.0, %v10081_v45 }
 0x778   : > { %v7025_v1 = vadd.f32 %v8464_v29, %v13297_v13  ;;  %v7016_v16 = vpop.f32.mrb[157].mxu1  ;;  %v10085_v11 = vpop.eup %10084  ;;  %v7151_v48 = vadd.f32 1.0, %v10083_v2 }
 0x779   : > { %v7017_v37 = vadd.f32 %v13297_v13, %v7016_v16  ;;  %v8465_v54 = vpop.f32.mrb[158].mxu1  ;;  %v10087_v25 = vpop.eup %10086  ;;  %v7154_v20 = vadd.f32 1.0, %v10085_v11  ;;  %v7185_v18 = vmul.f32 %v7153_v49, %v7057_v15 }
 0x77a   : > { %v7093_v0 = vmul.f32 0.70710677, %v7025_v1  ;;  %v7019_v55 = vpop.f32.mrb[159].mxu1  ;;  %v7152_v19 = vadd.f32 1.0, %v10087_v25  ;;  %v7028_v42 = vadd.f32 %v8465_v54, %v13297_v13  ;;  %v7183_v10 = vmul.f32 %v7151_v48, %v7055_v40 }
 0x77b   : > { %v7091_v27 = vmul.f32 0.70710677, %v7017_v37  ;;  %v7186_v22 = vmul.f32 %v7154_v20, %v7058_v43  ;;  %v7020_v14 = vadd.f32 %v13297_v13, %v7019_v55  ;;  %v7061_v13 = vmul.f32 0.5, %v7025_v1 }
 0x77c   : > { %10088 = verf.f32 %v7093_v0  ;;  %v7184_v31 = vmul.f32 %v7152_v19, %v7056_v38  ;;  %v7094_v34 = vmul.f32 0.70710677, %v7028_v42  ;;  %v7062_v17 = vmul.f32 0.5, %v7028_v42 }
 0x77d   : > { %10090 = verf.f32 %v7091_v27  ;;  %v7204_v59 = vpack.c.bf16 %v7186_v22, %v7185_v18  ;;  %v7092_v63 = vmul.f32 0.70710677, %v7020_v14  ;;  %v7059_v50 = vmul.f32 0.5, %v7017_v37 }
 0x77e   : > { %v7203_v23 = vpack.c.bf16 %v7184_v31, %v7183_v10  ;;  %10092 = verf.f32 %v7094_v34  ;;  %v7060_v51 = vmul.f32 0.5, %v7020_v14 }
 0x77f   : > { %10094 = verf.f32 %v7092_v63 }
 0x780   : > { %8498 = vmatprep.mubr.msk.bf16.mxu1 %vm7246_vm4, %v7203_v23 }
 0x781   : > { %8499 = vmatmul.mubr.msk.bf16.gmra.mrb[184].mxu1 %vm7246_vm4, %v7204_v59 }
 0x786   : > { %v10089_v28 = vpop.eup %10088 }
 0x787   : > { %v10091_v57 = vpop.eup %10090  ;;  %v7157_v3 = vadd.f32 1.0, %v10089_v28 }
 0x788   : > { %v10093_v8 = vpop.eup %10092  ;;  %v7155_v58 = vadd.f32 1.0, %v10091_v57 }
 0x789   : > { %v10095_v6 = vpop.eup %10094  ;;  %v7158_v32 = vadd.f32 1.0, %v10093_v8  ;;  %v7189_v4 = vmul.f32 %v7157_v3, %v7061_v13 }
 0x78a   : > { %v7156_v47 = vadd.f32 1.0, %v10095_v6  ;;  %v7187_v33 = vmul.f32 %v7155_v58, %v7059_v50 }
 0x78b   : > { %v7190_v46 = vmul.f32 %v7158_v32, %v7062_v17 }
 0x78c   : > { %v7188_v41 = vmul.f32 %v7156_v47, %v7060_v51 }
 0x78d   : > { %v7206_v24 = vpack.c.bf16 %v7190_v46, %v7189_v4 }
 0x78e   : > { %v7205_v12 = vpack.c.bf16 %v7188_v41, %v7187_v33 }
 0x790   : > { %8502 = vmatprep.mubr.msk.bf16.mxu1 %vm7246_vm4, %v7205_v12 }
 0x791   : > { %8503 = vmatmul.mubr.msk.bf16.gmra.mrb[188].mxu1 %vm7246_vm4, %v7206_v24 }
 0x7f4   : > { %v8476_v44 = vpop.f32.mrb[160].mxu1 }
 0x7f5   : > { %v7338_v9 = vadd.f32 %v8476_v44, %v13350_v39  ;;  %v7329_v21 = vpop.f32.mrb[161].mxu1 }
 0x7f6   : > { %v7330_v61 = vadd.f32 %v13350_v39, %v7329_v21  ;;  %v8477_v30 = vpop.f32.mrb[162].mxu1 }
 0x7f7   : > { %v7332_v26 = vpop.f32.mrb[163].mxu1  ;;  %v7490_v5 = vmul.f32 0.70710677, %v7338_v9  ;;  %v7341_v35 = vadd.f32 %v8477_v30, %v13350_v39  ;;  %v7458_v18 = vmul.f32 0.5, %v7338_v9 }
 0x7f8   : > { %v7488_v52 = vmul.f32 0.70710677, %v7330_v61  ;;  %v7333_v36 = vadd.f32 %v13350_v39, %v7332_v26  ;;  %v7456_v45 = vmul.f32 0.5, %v7330_v61 }
 0x7f9   : > { %v7491_v7 = vmul.f32 0.70710677, %v7341_v35  ;;  %v7459_v31 = vmul.f32 0.5, %v7341_v35 }
 0x7fa   : > { %10096 = verf.f32 %v7488_v52  ;;  %v7489_v53 = vmul.f32 0.70710677, %v7333_v36  ;;  %v7457_v40 = vmul.f32 0.5, %v7333_v36 }
 0x7fc   : > { %10098 = verf.f32 %v7489_v53 }
 0x7fd   : > { %10100 = verf.f32 %v7490_v5 }
 0x7fe   : > { %10102 = verf.f32 %v7491_v7 }
 0x804   : > { %v10097_v60 = vpop.eup %10096  ;;  %v8480_v29 = vpop.f32.mrb[164].mxu1 }
 0x805   : > { %v7552_v2 = vadd.f32 1.0, %v10097_v60  ;;  %v7354_v1 = vadd.f32 %v8480_v29, %v13350_v39  ;;  %v7345_v16 = vpop.f32.mrb[165].mxu1 }
 0x806   : > { %v10099_v49 = vpop.eup %10098  ;;  %v7346_v48 = vadd.f32 %v13350_v39, %v7345_v16  ;;  %v8481_v37 = vpop.f32.mrb[166].mxu1 }
 0x807   : > { %v10101_v11 = vpop.eup %10100  ;;  %v7553_v15 = vadd.f32 1.0, %v10099_v49  ;;  %v7584_v54 = vmul.f32 %v7552_v2, %v7456_v45  ;;  %v7348_v25 = vpop.f32.mrb[167].mxu1  ;;  %v7494_v55 = vmul.f32 0.70710677, %v7354_v1  ;;  %v7357_v19 = vadd.f32 %v8481_v37, %v13350_v39 }
 0x808   : > { %v7492_v43 = vmul.f32 0.70710677, %v7346_v48  ;;  %v7349_v20 = vadd.f32 %v13350_v39, %v7348_v25  ;;  %v7554_v0 = vadd.f32 1.0, %v10101_v11  ;;  %v10103_v42 = vpop.eup %10102  ;;  %v7460_v63 = vmul.f32 0.5, %v7346_v48 }
 0x809   : > { %7616 = vxpose.xlu1.b32.start [1/16] (narrow) %v7584_v54, 32  ;;  %v7585_v38 = vmul.f32 %v7553_v15, %v7457_v40  ;;  %v7555_v14 = vadd.f32 1.0, %v10103_v42  ;;  %v7495_v10 = vmul.f32 0.70710677, %v7357_v19  ;;  %v7462_v9 = vmul.f32 0.5, %v7354_v1 }
 0x80a   : > { %10104 = verf.f32 %v7492_v43  ;;  %v7493_v27 = vmul.f32 0.70710677, %v7349_v20  ;;  %v7586_v22 = vmul.f32 %v7554_v0, %v7458_v18  ;;  %v7461_v51 = vmul.f32 0.5, %v7349_v20 }
 0x80b   : > { %v7587_v34 = vmul.f32 %v7555_v14, %v7459_v31  ;;  %v7463_v26 = vmul.f32 0.5, %v7357_v19 }
 0x80c   : > { %10106 = verf.f32 %v7493_v27 }
 0x80d   : > { %7617 = vxpose.xlu1.b32.cont [2/16] (narrow) %v7585_v38, 32  ;;  %10108 = verf.f32 %v7494_v55 }
 0x80e   : > { %10110 = verf.f32 %v7495_v10 }
 0x811   : > { %7618 = vxpose.xlu1.b32.cont [3/16] (narrow) %v7586_v22, 32 }
 0x814   : > { %v10105_v59 = vpop.eup %10104  ;;  %v8484_v28 = vpop.f32.mrb[168].mxu1 }
 0x815   : > { %7619 = vxpose.xlu1.b32.cont [4/16] (narrow) %v7587_v34, 32  ;;  %v7556_v23 = vadd.f32 1.0, %v10105_v59  ;;  %v7370_v3 = vadd.f32 %v8484_v28, %v13350_v39  ;;  %v7361_v8 = vpop.f32.mrb[169].mxu1 }
 0x816   : > { %v10107_v57 = vpop.eup %10106  ;;  %v7362_v17 = vadd.f32 %v13350_v39, %v7361_v8  ;;  %v8485_v32 = vpop.f32.mrb[170].mxu1 }
 0x817   : > { %v10109_v58 = vpop.eup %10108  ;;  %v7588_v6 = vmul.f32 %v7556_v23, %v7460_v63  ;;  %v7557_v13 = vadd.f32 1.0, %v10107_v57  ;;  %v7364_v50 = vpop.f32.mrb[171].mxu1  ;;  %v7498_v33 = vmul.f32 0.70710677, %v7370_v3  ;;  %v7373_v24 = vadd.f32 %v8485_v32, %v13350_v39 }
 0x818   : > { %v7496_v47 = vmul.f32 0.70710677, %v7362_v17  ;;  %v7365_v4 = vadd.f32 %v13350_v39, %v7364_v50  ;;  %v7558_v46 = vadd.f32 1.0, %v10109_v58  ;;  %v10111_v44 = vpop.eup %10110  ;;  %v7464_v35 = vmul.f32 0.5, %v7362_v17 }
 0x819   : > { %7620 = vxpose.xlu1.b32.cont [5/16] (narrow) %v7588_v6, 32  ;;  %v7589_v41 = vmul.f32 %v7557_v13, %v7461_v51  ;;  %v7559_v61 = vadd.f32 1.0, %v10111_v44  ;;  %v7499_v30 = vmul.f32 0.70710677, %v7373_v24  ;;  %v7466_v55 = vmul.f32 0.5, %v7370_v3 }
 0x81a   : > { %10112 = verf.f32 %v7496_v47  ;;  %v7497_v12 = vmul.f32 0.70710677, %v7365_v4  ;;  %v7590_v21 = vmul.f32 %v7558_v46, %v7462_v9  ;;  %v7465_v48 = vmul.f32 0.5, %v7365_v4 }
 0x81b   : > { %v7591_v52 = vmul.f32 %v7559_v61, %v7463_v26  ;;  %v7467_v42 = vmul.f32 0.5, %v7373_v24 }
 0x81c   : > { %10114 = verf.f32 %v7497_v12 }
 0x81d   : > { %7621 = vxpose.xlu1.b32.cont [6/16] (narrow) %v7589_v41, 32  ;;  %10116 = verf.f32 %v7498_v33 }
 0x81e   : > { %10118 = verf.f32 %v7499_v30 }
 0x821   : > { %7622 = vxpose.xlu1.b32.cont [7/16] (narrow) %v7590_v21, 32 }
 0x824   : > { %v10113_v36 = vpop.eup %10112  ;;  %v8488_v5 = vpop.f32.mrb[172].mxu1 }
 0x825   : > { %7623 = vxpose.xlu1.b32.cont [8/16] (narrow) %v7591_v52, 32  ;;  %v7560_v53 = vadd.f32 1.0, %v10113_v36  ;;  %v7377_v7 = vpop.f32.mrb[173].mxu1  ;;  %v7386_v45 = vadd.f32 %v8488_v5, %v13350_v39 }
 0x826   : > { %v10115_v60 = vpop.eup %10114  ;;  %v7378_v2 = vadd.f32 %v13350_v39, %v7377_v7  ;;  %v8489_v29 = vpop.f32.mrb[174].mxu1 }
 0x827   : > { %v7592_v49 = vmul.f32 %v7560_v53, %v7464_v35  ;;  %v7561_v1 = vadd.f32 1.0, %v10115_v60  ;;  %v7380_v16 = vpop.f32.mrb[175].mxu1  ;;  %v10117_v11 = vpop.eup %10116  ;;  %v7502_v54 = vmul.f32 0.70710677, %v7386_v45  ;;  %v7389_v25 = vadd.f32 %v8489_v29, %v13350_v39 }
 0x828   : > { %v7500_v15 = vmul.f32 0.70710677, %v7378_v2  ;;  %v7381_v37 = vadd.f32 %v13350_v39, %v7380_v16  ;;  %v7562_v40 = vadd.f32 1.0, %v10117_v11  ;;  %v10119_v0 = vpop.eup %10118  ;;  %v7468_v10 = vmul.f32 0.5, %v7378_v2 }
 0x829   : > { %7624 = vxpose.xlu1.b32.cont [9/16] (narrow) %v7592_v49, 32  ;;  %v7593_v43 = vmul.f32 %v7561_v1, %v7465_v48  ;;  %v7503_v38 = vmul.f32 0.70710677, %v7389_v25  ;;  %v7563_v27 = vadd.f32 1.0, %v10119_v0  ;;  %v7470_v4 = vmul.f32 0.5, %v7386_v45 }
 0x82a   : > { %10120 = verf.f32 %v7500_v15  ;;  %v7501_v20 = vmul.f32 0.70710677, %v7381_v37  ;;  %v7594_v19 = vmul.f32 %v7562_v40, %v7466_v55  ;;  %v7469_v6 = vmul.f32 0.5, %v7381_v37 }
 0x82b   : > { %v7595_v18 = vmul.f32 %v7563_v27, %v7467_v42  ;;  %v7471_v12 = vmul.f32 0.5, %v7389_v25 }
 0x82c   : > { %10122 = verf.f32 %v7501_v20 }
 0x82d   : > { %7625 = vxpose.xlu1.b32.cont [10/16] (narrow) %v7593_v43, 32  ;;  %10124 = verf.f32 %v7502_v54 }
 0x82e   : > { %10126 = verf.f32 %v7503_v38 }
 0x831   : > { %7626 = vxpose.xlu1.b32.cont [11/16] (narrow) %v7594_v19, 32 }
 0x834   : > { %v10121_v22 = vpop.eup %10120  ;;  %v8492_v14 = vpop.f32.mrb[176].mxu1 }
 0x835   : > { %v7564_v31 = vadd.f32 1.0, %v10121_v22  ;;  %v7393_v34 = vpop.f32.mrb[177].mxu1  ;;  %7627 = vxpose.xlu1.b32.cont [12/16] (narrow) %v7595_v18, 32  ;;  %v7402_v17 = vadd.f32 %v8492_v14, %v13350_v39 }
 0x836   : > { %v7394_v59 = vadd.f32 %v13350_v39, %v7393_v34  ;;  %v8493_v63 = vpop.f32.mrb[178].mxu1  ;;  %v10123_v23 = vpop.eup %10122 }
 0x837   : > { %v7596_v28 = vmul.f32 %v7564_v31, %v7468_v10  ;;  %v7396_v57 = vpop.f32.mrb[179].mxu1  ;;  %v10125_v3 = vpop.eup %10124  ;;  %v7565_v8 = vadd.f32 1.0, %v10123_v23  ;;  %v7506_v46 = vmul.f32 0.70710677, %v7402_v17  ;;  %v7405_v33 = vadd.f32 %v8493_v63, %v13350_v39 }
 0x838   : > { %v7504_v58 = vmul.f32 0.70710677, %v7394_v59  ;;  %v7397_v13 = vadd.f32 %v13350_v39, %v7396_v57  ;;  %v7566_v32 = vadd.f32 1.0, %v10125_v3  ;;  %v10127_v47 = vpop.eup %10126  ;;  %v7472_v60 = vmul.f32 0.5, %v7394_v59 }
 0x839   : > { %7628 = vxpose.xlu1.b32.cont [13/16] (narrow) %v7596_v28, 32  ;;  %v7597_v50 = vmul.f32 %v7565_v8, %v7469_v6  ;;  %v7567_v24 = vadd.f32 1.0, %v10127_v47  ;;  %v7507_v44 = vmul.f32 0.70710677, %v7405_v33  ;;  %v7474_v25 = vmul.f32 0.5, %v7402_v17 }
 0x83a   : > { %10128 = verf.f32 %v7504_v58  ;;  %v7505_v51 = vmul.f32 0.70710677, %v7397_v13  ;;  %v7598_v41 = vmul.f32 %v7566_v32, %v7470_v4  ;;  %v7473_v16 = vmul.f32 0.5, %v7397_v13 }
 0x83b   : > { %v7599_v9 = vmul.f32 %v7567_v24, %v7471_v12  ;;  %v7475_v38 = vmul.f32 0.5, %v7405_v33 }
 0x83c   : > { %10130 = verf.f32 %v7505_v51 }
 0x83d   : > { %7629 = vxpose.xlu1.b32.cont [14/16] (narrow) %v7597_v50, 32  ;;  %10132 = verf.f32 %v7506_v46 }
 0x83e   : > { %10134 = verf.f32 %v7507_v44 }
 0x841   : > { %7630 = vxpose.xlu1.b32.cont [15/16] (narrow) %v7598_v41, 32 }
 0x844   : > { %v10129_v21 = vpop.eup %10128  ;;  %v8496_v61 = vpop.f32.mrb[180].mxu1 }
 0x845   : > { %v7409_v30 = vpop.f32.mrb[181].mxu1  ;;  %7631 = vxpose.xlu1.b32.end [16/16] (narrow) %v7599_v9, 32  ;;  %v7568_v36 = vadd.f32 1.0, %v10129_v21  ;;  %v7418_v45 = vadd.f32 %v8496_v61, %v13350_v39 }
 0x846   : > { %v7410_v26 = vadd.f32 %v13350_v39, %v7409_v30  ;;  %v8497_v52 = vpop.f32.mrb[182].mxu1  ;;  %v10131_v35 = vpop.eup %10130 }
 0x847   : > { %v7412_v5 = vpop.f32.mrb[183].mxu1  ;;  %v7569_v29 = vadd.f32 1.0, %v10131_v35  ;;  %v7600_v49 = vmul.f32 %v7568_v36, %v7472_v60  ;;  %v10133_v1 = vpop.eup %10132  ;;  %v7510_v11 = vmul.f32 0.70710677, %v7418_v45  ;;  %v7421_v15 = vadd.f32 %v8497_v52, %v13350_v39 }
 0x848   : > { %v7508_v53 = vmul.f32 0.70710677, %v7410_v26  ;;  %v7413_v7 = vadd.f32 %v13350_v39, %v7412_v5  ;;  %v7570_v48 = vadd.f32 1.0, %v10133_v1  ;;  %v10135_v54 = vpop.eup %10134  ;;  %v7476_v14 = vmul.f32 0.5, %v7410_v26 }
 0x849   : > { %7648 = vxpose.xlu0.b32.start [1/16] (narrow) %v7600_v49, 32  ;;  %v7601_v37 = vmul.f32 %v7569_v29, %v7473_v16  ;;  %v7511_v40 = vmul.f32 0.70710677, %v7421_v15  ;;  %v7571_v20 = vadd.f32 1.0, %v10135_v54  ;;  %v7478_v50 = vmul.f32 0.5, %v7418_v45 }
 0x84a   : > { %10136 = verf.f32 %v7508_v53  ;;  %v7509_v2 = vmul.f32 0.70710677, %v7413_v7  ;;  %v7602_v43 = vmul.f32 %v7570_v48, %v7474_v25  ;;  %v7477_v8 = vmul.f32 0.5, %v7413_v7 }
 0x84b   : > { %v7603_v22 = vmul.f32 %v7571_v20, %v7475_v38  ;;  %v7479_v41 = vmul.f32 0.5, %v7421_v15 }
 0x84c   : > { %10138 = verf.f32 %v7509_v2 }
 0x84d   : > { %7649 = vxpose.xlu0.b32.cont [2/16] (narrow) %v7601_v37, 32  ;;  %10140 = verf.f32 %v7510_v11 }
 0x84e   : > { %10142 = verf.f32 %v7511_v40 }
 0x851   : > { %7650 = vxpose.xlu0.b32.cont [3/16] (narrow) %v7602_v43, 32 }
 0x854   : > { %v10137_v0 = vpop.eup %10136  ;;  %v8500_v55 = vpop.f32.mrb[184].mxu1 }
 0x855   : > { %v7572_v19 = vadd.f32 1.0, %v10137_v0  ;;  %v7425_v27 = vpop.f32.mrb[185].mxu1  ;;  %7651 = vxpose.xlu0.b32.cont [4/16] (narrow) %v7603_v22, 32  ;;  %v7434_v23 = vadd.f32 %v8500_v55, %v13350_v39 }
 0x856   : > { %v7426_v42 = vadd.f32 %v13350_v39, %v7425_v27  ;;  %v8501_v18 = vpop.f32.mrb[186].mxu1  ;;  %v10139_v31 = vpop.eup %10138 }
 0x857   : > { %v7428_v10 = vpop.f32.mrb[187].mxu1  ;;  %v7604_v59 = vmul.f32 %v7572_v19, %v7476_v14  ;;  %v7573_v28 = vadd.f32 1.0, %v10139_v31  ;;  %v10141_v3 = vpop.eup %10140  ;;  %v7514_v58 = vmul.f32 0.70710677, %v7434_v23  ;;  %v7437_v6 = vadd.f32 %v8501_v18, %v13350_v39 }
 0x858   : > { %v7512_v34 = vmul.f32 0.70710677, %v7426_v42  ;;  %v7429_v63 = vadd.f32 %v13350_v39, %v7428_v10  ;;  %v7574_v13 = vadd.f32 1.0, %v10141_v3  ;;  %v10143_v32 = vpop.eup %10142  ;;  %v7480_v61 = vmul.f32 0.5, %v7426_v42 }
 0x859   : > { %7652 = vxpose.xlu0.b32.cont [5/16] (narrow) %v7604_v59, 32  ;;  %v7605_v17 = vmul.f32 %v7573_v28, %v7477_v8  ;;  %v7515_v51 = vmul.f32 0.70710677, %v7437_v6  ;;  %v7575_v4 = vadd.f32 1.0, %v10143_v32  ;;  %v7482_v11 = vmul.f32 0.5, %v7434_v23  ;;  %v7692_v59 = vpop.permute.xlu1 %7691 }
 0x85a   : > { %10144 = verf.f32 %v7512_v34  ;;  %v7513_v57 = vmul.f32 0.70710677, %v7429_v63  ;;  %v7606_v47 = vmul.f32 %v7574_v13, %v7478_v50  ;;  %v7481_v45 = vmul.f32 0.5, %v7429_v63 }
 0x85b   : > { %v7607_v21 = vmul.f32 %v7575_v4, %v7479_v41  ;;  %v7483_v25 = vmul.f32 0.5, %v7437_v6 }
 0x85c   : > { %10146 = verf.f32 %v7513_v57  ;;  %v7687_v57 = vpop.permute.xlu0 %7686 }
 0x85d   : > { %7653 = vxpose.xlu0.b32.cont [6/16] (narrow) %v7605_v17, 32  ;;  %10148 = verf.f32 %v7514_v58  ;;  %v7702_v63 = vpop.permute.xlu1 %7701 }
 0x85e   : > { %10150 = verf.f32 %v7515_v51 }
 0x860   : > { %v7697_v58 = vpop.permute.xlu0 %7696 }
 0x861   : > { %7654 = vxpose.xlu0.b32.cont [7/16] (narrow) %v7606_v47, 32 }
 0x864   : > { %v10145_v46 = vpop.eup %10144  ;;  %v8504_v33 = vpop.f32.mrb[188].mxu1 }
 0x865   : > { %v7576_v24 = vadd.f32 1.0, %v10145_v46  ;;  %v7441_v12 = vpop.f32.mrb[189].mxu1  ;;  %7655 = vxpose.xlu0.b32.cont [8/16] (narrow) %v7607_v21, 32  ;;  %v7450_v35 = vadd.f32 %v8504_v33, %v13350_v39  ;;  %v7734_v4 = vpop.permute.xlu0 %7733 }
 0x866   : > { %v7442_v44 = vadd.f32 %v13350_v39, %v7441_v12  ;;  %v8505_v9 = vpop.f32.mrb[190].mxu1  ;;  %v10147_v26 = vpop.eup %10146 }
 0x867   : > { %v7444_v30 = vpop.f32.mrb[191].mxu1  ;;  %v7608_v36 = vmul.f32 %v7576_v24, %v7480_v61  ;;  %v7577_v53 = vadd.f32 1.0, %v10147_v26  ;;  %v10149_v60 = vpop.eup %10148  ;;  %v7518_v2 = vmul.f32 0.70710677, %v7450_v35  ;;  %v7453_v29 = vadd.f32 %v8505_v9, %v13350_v39 }
 0x868   : > { %v7516_v52 = vmul.f32 0.70710677, %v7442_v44  ;;  %v7445_v5 = vadd.f32 %v13350_v39, %v7444_v30  ;;  %v7578_v49 = vadd.f32 1.0, %v10149_v60  ;;  %v10151_v16 = vpop.eup %10150  ;;  %v7484_v20 = vmul.f32 0.5, %v7442_v44 }
 0x869   : > { %7656 = vxpose.xlu0.b32.cont [9/16] (narrow) %v7608_v36, 32  ;;  %v7609_v1 = vmul.f32 %v7577_v53, %v7481_v45  ;;  %v7519_v15 = vmul.f32 0.70710677, %v7453_v29  ;;  %v7579_v37 = vadd.f32 1.0, %v10151_v16  ;;  %v7486_v22 = vmul.f32 0.5, %v7450_v35 }
 0x86a   : > { %10152 = verf.f32 %v7516_v52  ;;  %v7517_v7 = vmul.f32 0.70710677, %v7445_v5  ;;  %v7610_v48 = vmul.f32 %v7578_v49, %v7482_v11  ;;  %v7485_v19 = vmul.f32 0.5, %v7445_v5 }
 0x86b   : > { %v7611_v43 = vmul.f32 %v7579_v37, %v7483_v25  ;;  %v7487_v31 = vmul.f32 0.5, %v7453_v29  ;;  %v7739_v45 = vrot.slane %v7734_v4, %v13626_v56 }
 0x86c   : > { %10154 = verf.f32 %v7517_v7 }
 0x86d   : > { %7657 = vxpose.xlu0.b32.cont [10/16] (narrow) %v7609_v1, 32  ;;  %10156 = verf.f32 %v7518_v2 }
 0x86e   : > { %10158 = verf.f32 %v7519_v15 }
 0x871   : > { %7658 = vxpose.xlu0.b32.cont [11/16] (narrow) %v7610_v48, 32 }
 0x874   : > { %v10153_v54 = vpop.eup %10152 }
 0x875   : > { %v7580_v40 = vadd.f32 1.0, %v10153_v54  ;;  %7659 = vxpose.xlu0.b32.cont [12/16] (narrow) %v7611_v43, 32 }
 0x876   : > { %v10155_v0 = vpop.eup %10154 }
 0x877   : > { %v7612_v55 = vmul.f32 %v7580_v40, %v7484_v20  ;;  %v7581_v39 = vadd.f32 1.0, %v10155_v0  ;;  %v10157_v38 = vpop.eup %10156  ;;  %v10178_v20 = vmov 1966171168  }
 0x878   : > { %v7582_v27 = vadd.f32 1.0, %v10157_v38  ;;  %v10159_v18 = vpop.eup %10158  ;;  %v7758_v56 = vunpack.c.l.s4 %v10178_v20 }
 0x879   : > { %7660 = vxpose.xlu0.b32.cont [13/16] (narrow) %v7612_v55, 32  ;;  %v7613_v42 = vmul.f32 %v7581_v39, %v7485_v19  ;;  %v7583_v10 = vadd.f32 1.0, %v10159_v18 }
 0x87a   : > { %v7614_v14 = vmul.f32 %v7582_v27, %v7486_v22  ;;  %v7759_v0 = vunpack.c.0.s8 %v7758_v56 }
 0x87b   : > { %v7615_v34 = vmul.f32 %v7583_v10, %v7487_v31 }
 0x87c   : > { %v7762_v39 = vsub.s32 %v7759_v0, %v13627_v62 }
 0x87d   : > { %7661 = vxpose.xlu0.b32.cont [14/16] (narrow) %v7613_v42, 32  ;;  %v13629_v42 = vlaneseq }
 0x87f   : > { %vm7774_vm5 = vcmp.lt.s32.totalorder %v13629_v42, 256 }
 0x881   : > { %7662 = vxpose.xlu0.b32.cont [15/16] (narrow) %v7614_v14, 32 }
 0x885   : > { %7663 = vxpose.xlu0.b32.end [16/16] (narrow) %v7615_v34, 32 }
 0x889   : > { %v7632_v23 = vpop.trf.xlu1 }
 0x88a   : > { %v7704_v13 = vmul.f32 %v7687_v57, %v7632_v23 }
 0x88d   : > { %v7633_v28 = vpop.trf.xlu1 }
 0x88e   : > { %v7706_v8 = vmul.f32 %v7692_v59, %v7633_v28 }
 0x890   : > { %v7712_v32 = vadd.f32 %v7706_v8, %v7704_v13 }
 0x891   : > { %v7634_v3 = vpop.trf.xlu1 }
 0x892   : > { %v7708_v17 = vmul.f32 %v7697_v58, %v7634_v3 }
 0x894   : > { %v7713_v51 = vadd.f32 %v7712_v32, %v7708_v17 }
 0x895   : > { %v7635_v6 = vpop.trf.xlu1 }
 0x896   : > { %v7710_v50 = vmul.f32 %v7702_v63, %v7635_v6 }
 0x898   : > { %v7714_v47 = vadd.f32 %v7713_v51, %v7710_v50 }
 0x89a   : > { %v7715_v46 = vrot.slane %v7714_v47, 4 }
 0x89c   : > { %v7716_v33 = vadd.f32 %v7715_v46, %v7714_v47 }
 0x89e   : > { %v7717_v24 = vrot.slane %v7716_v33, 2 }
 0x8a0   : > { %v7718_v9 = vadd.f32 %v7717_v24, %v7716_v33 }
 0x8a2   : > { %v7719_v52 = vrot.slane %v7718_v9, 1 }
 0x8a4   : > { %v7720_v7 = vadd.f32 %v7719_v52, %v7718_v9 }
 0x8a6   : > { %v7740_v29 = vadd.f32 %v7739_v45, %v7720_v7 }
 0x8a8   : > { %v8258_v16 = vmul.f32 -1.442695, %v7740_v29 }
 0x8aa   : > { %10160 = vpow2.f32 %v8258_v16 }
 0x8b4   : > { %v10161_v54 = vpop.eup %10160 }
 0x8b5   : > { %v7748_v25 = vadd.f32 1.0, %v10161_v54 }
 0x8c9   : > { %v7664_v41 = vpop.trf.xlu0 }
 0x8ca   : > { %v7705_v61 = vmul.f32 %v7687_v57, %v7664_v41 }
 0x8cd   : > { %v7665_v12 = vpop.trf.xlu0 }
 0x8ce   : > { %v7707_v44 = vmul.f32 %v7692_v59, %v7665_v12 }
 0x8d0   : > { %v7721_v26 = vadd.f32 %v7707_v44, %v7705_v61 }
 0x8d1   : > { %v7666_v21 = vpop.trf.xlu0 }
 0x8d2   : > { %v7709_v30 = vmul.f32 %v7697_v58, %v7666_v21 }
 0x8d4   : > { %v7722_v5 = vadd.f32 %v7721_v26, %v7709_v30 }
 0x8d5   : > { %v7667_v36 = vpop.trf.xlu0 }
 0x8d6   : > { %v7711_v35 = vmul.f32 %v7702_v63, %v7667_v36 }
 0x8d8   : > { %v7723_v53 = vadd.f32 %v7722_v5, %v7711_v35 }
 0x8da   : > { %v7724_v60 = vrot.slane %v7723_v53, 4 }
 0x8dc   : > { %v7725_v2 = vadd.f32 %v7724_v60, %v7723_v53 }
 0x8de   : > { %v7726_v49 = vrot.slane %v7725_v2, 2 }
 0x8e0   : > { %v7727_v1 = vadd.f32 %v7726_v49, %v7725_v2 }
 0x8e2   : > { %v7728_v11 = vrot.slane %v7727_v1, 1 }
 0x8e4   : > { %v7729_v15 = vadd.f32 %v7728_v11, %v7727_v1 }
 0x8e6   : > { %v7741_v48 = vadd.f32 %v7739_v45, %v7729_v15 }
 0x8e8   : > { %v8259_v37 = vmul.f32 -1.442695, %v7741_v48 }
 0x8ea   : > { %10162 = vpow2.f32 %v8259_v37 }
 0x8eb   : > { %10164 = vrcp.f32 %v7748_v25 }
 0x8f4   : > { %v10163_v40 = vpop.eup %10162 }
 0x8f5   : > { %v7749_v43 = vadd.f32 1.0, %v10163_v40  ;;  %v10165_v55 = vpop.eup %10164 }
 0x8f7   : > { %10166 = vrcp.f32 %v7749_v43 }
 0x901   : > { %v10167_v38 = vpop.eup %10166 }
 0x902   : > { %v7756_v19 = vcombine.low %v10165_v55, %v10167_v38 }
 0x904   : > { %v7763_v27 = vrot.slane %v7756_v19, %v7762_v39 }
 0x906   : > { %v7770_v18 = vrot.slane %v7763_v27, %v7762_v39 }
 0x908   : > { %7776 = vst.msk [vmem:[%s521_s27] sm:$0x3] %vm7774_vm5, %v7770_v18 }
 0x909 PF: > { %s27_s20 = sadd.s32 1, %s10174_s20  }
 0x90a   : > { %p24_p5 = scmp.ge.s32.totalorder %s27_s20, 4  }
 0x90c   :  { %26 = sbr.rel (!%p24_p5) target bundleno = 3 (0x3), region = 113 }

</bundles_post_ra>
